<compile_context>
chip_gen: v6e
topology: v6e:2x2x1
jax: 0.10.0
libtpu: 0.0.40
codegen_flags: <defaults>
</compile_context>

<pallas_src>
import jax
import jax.numpy as jnp
from jax import lax
from jax.experimental import pallas as pl
from jax.experimental.pallas import tpu as pltpu


# --------------------------------- helpers --------------------------------- #

def _round_up(x, m):
    return (x + m - 1) // m * m


# ------------------------------ Pallas kernels ------------------------------ #

def _gemm_bn_relu_kernel(a_ref, b_ref, o_ref):
    """[M, K] @ [K, Cpad] GEMM fused with training-mode BatchNorm + ReLU."""
    y = jnp.dot(a_ref[...], b_ref[...], preferred_element_type=jnp.float32)
    mean = jnp.mean(y, axis=0, keepdims=True)
    d = y - mean
    var = jnp.mean(d * d, axis=0, keepdims=True)        # biased batch variance
    o_ref[...] = jnp.maximum(d * lax.rsqrt(var + 1e-5), 0.0).astype(o_ref.dtype)


def _subpixel_gemm_bn_relu_kernel(a_ref, b_ref, o_ref):
    """Parity-batched GEMM [P,M,K] @ [P,K,Cpad] with BN stats over (P, M) + ReLU."""
    y = jnp.einsum("pmk,pkn->pmn", a_ref[...], b_ref[...],
                   preferred_element_type=jnp.float32)
    mean = jnp.mean(jnp.mean(y, axis=1, keepdims=True), axis=0, keepdims=True)
    d = y - mean
    var = jnp.mean(jnp.mean(d * d, axis=1, keepdims=True), axis=0, keepdims=True)
    o_ref[...] = jnp.maximum(d * lax.rsqrt(var + 1e-5), 0.0).astype(o_ref.dtype)


def _gemm_tanh_kernel(a_ref, b_ref, o_ref):
    """[M, K] @ [K, Cpad] GEMM fused with tanh (final layer, no BN)."""
    y = jnp.dot(a_ref[...], b_ref[...], preferred_element_type=jnp.float32)
    o_ref[...] = jnp.tanh(y)


# ------------------------------ pallas_call wrappers ------------------------ #

def fused_gemm_bn_relu_groups(a, b):
    """a: [G, M, K] bf16, b: [K, Cpad] bf16 -> [G, M, Cpad] bf16.

    One grid step per group (independent BN stats per group) -> parallel axis."""
    G, M, K = a.shape
    _, C = b.shape
    return pl.pallas_call(
        _gemm_bn_relu_kernel,
        out_shape=jax.ShapeDtypeStruct((G, M, C), jnp.bfloat16),
        grid=(G,),
        in_specs=[
            pl.BlockSpec((None, M, K), lambda i: (i, 0, 0)),
            pl.BlockSpec((K, C), lambda i: (0, 0)),
        ],
        out_specs=pl.BlockSpec((None, M, C), lambda i: (i, 0, 0)),
        compiler_params=pltpu.CompilerParams(dimension_semantics=("parallel",)),
    )(a, b)


def fused_subpixel_bn_relu(a, b):
    """a: [4, M, K] bf16, b: [4, K, Cpad] bf16 -> [4, M, Cpad] bf16.

    Single block: BN statistics couple all 4 parity classes, and the whole layer
    fits comfortably in VMEM at these sizes."""
    P, M, K = a.shape
    _, _, C = b.shape
    return pl.pallas_call(
        _subpixel_gemm_bn_relu_kernel,
        out_shape=jax.ShapeDtypeStruct((P, M, C), jnp.bfloat16),
        grid=(1,),
        in_specs=[
            pl.BlockSpec((P, M, K), lambda i: (0, 0, 0)),
            pl.BlockSpec((P, K, C), lambda i: (0, 0, 0)),
        ],
        out_specs=pl.BlockSpec((P, M, C), lambda i: (0, 0, 0)),
    )(a, b)


def fused_subpixel_tanh(a, b):
    """a: [4, M, K] bf16, b: [4, K, Cpad] bf16 -> [4, M, Cpad] f32 (tanh fused)."""
    P, M, K = a.shape
    _, _, C = b.shape
    return pl.pallas_call(
        _gemm_tanh_kernel,
        out_shape=jax.ShapeDtypeStruct((P, M, C), jnp.float32),
        grid=(P,),
        in_specs=[
            pl.BlockSpec((None, M, K), lambda i: (i, 0, 0)),
            pl.BlockSpec((None, K, C), lambda i: (i, 0, 0)),
        ],
        out_specs=pl.BlockSpec((None, M, C), lambda i: (i, 0, 0)),
        compiler_params=pltpu.CompilerParams(dimension_semantics=("parallel",)),
    )(a, b)


# ----------------------- ConvTranspose2d lowering glue ---------------------- #

def _stride1_patches(x_nhwc, ksize, padding):
    """Stride-1 conv-transpose im2col. x: [N,H,W,C] -> [N*Ho*Wo, k*k*C]."""
    N, H, W, C = x_nhwc.shape
    p = ksize - 1 - padding
    xp = jnp.pad(x_nhwc, ((0, 0), (p, p), (p, p), (0, 0)))
    Ho = H + 2 * p - ksize + 1
    Wo = W + 2 * p - ksize + 1
    taps = []
    for jy in range(ksize):
        for jx in range(ksize):
            taps.append(xp[:, jy:jy + Ho, jx:jx + Wo, :])
    pat = jnp.stack(taps, axis=3)                        # [N, Ho, Wo, k*k, C]
    return pat.reshape(N * Ho * Wo, ksize * ksize * C), (N, Ho, Wo)


def _stride1_weight_mat(w, cpad):
    """w: (Cin, Cout, K, K) ConvTranspose2d layout -> [K*K*Cin, cpad]."""
    Cin, Cout, K, _ = w.shape
    w_flip = w[:, :, ::-1, ::-1]                         # rotate kernel 180
    w_mat = jnp.transpose(w_flip, (2, 3, 0, 1)).reshape(K * K * Cin, Cout)
    return jnp.pad(w_mat, ((0, 0), (0, cpad - Cout)))


# Sub-pixel decomposition of ConvTranspose2d(k=4, stride=2, padding=1):
# output parity (ey, ex) is a stride-1 2x2 conv over the 1-padded input with
# kernel taps ky = _KTAP[ey][jy], kx = _KTAP[ex][jx].
_KTAP = ((3, 1), (2, 0))


def _subpixel_patches(x_nhwc):
    """x: [N,H,W,C] -> [4, N*H*W, 4*C] (parity-class 2x2 patches)."""
    N, H, W, C = x_nhwc.shape
    xp = jnp.pad(x_nhwc, ((0, 0), (1, 1), (1, 1), (0, 0)))
    classes = []
    for ey in range(2):
        for ex in range(2):
            taps = []
            for jy in range(2):
                for jx in range(2):
                    taps.append(xp[:, ey + jy:ey + jy + H, ex + jx:ex + jx + W, :])
            p = jnp.stack(taps, axis=3)                  # [N, H, W, 4, C]
            classes.append(p.reshape(N * H * W, 4 * C))
    return jnp.stack(classes, axis=0)                    # [4, N*H*W, 4*C]


def _subpixel_weight_mats(w, cpad):
    """w: (Cin, Cout, 4, 4) -> [4, 4*Cin, cpad] parity-class sub-kernel matrices."""
    Cin, Cout, K, _ = w.shape
    mats = []
    for ey in range(2):
        for ex in range(2):
            sub = w[:, :, list(_KTAP[ey]), :][:, :, :, list(_KTAP[ex])]   # (Cin,Cout,2,2)
            m = jnp.transpose(sub, (2, 3, 0, 1)).reshape(4 * Cin, Cout)
            mats.append(jnp.pad(m, ((0, 0), (0, cpad - Cout))))
    return jnp.stack(mats, axis=0)


def _assemble_subpixel(y, N, H, W, Cout):
    """y: [4, N*H*W, cpad] -> NHWC [N, 2H, 2W, Cout] (interleave parity classes)."""
    y = y[:, :, :Cout].reshape(2, 2, N, H, W, Cout)
    y = jnp.transpose(y, (2, 3, 0, 4, 1, 5))             # [N, H, ey, W, ex, C]
    return y.reshape(N, 2 * H, 2 * W, Cout)


def _subpixel_bn_relu_layer(h_nhwc, w):
    N, H, W, _ = h_nhwc.shape
    Cout = w.shape[1]
    cpad = _round_up(Cout, 128)
    a = _subpixel_patches(h_nhwc).astype(jnp.bfloat16)
    b = _subpixel_weight_mats(w, cpad).astype(jnp.bfloat16)
    y = fused_subpixel_bn_relu(a, b)
    return _assemble_subpixel(y, N, H, W, Cout)


def _subpixel_tanh_layer(h_nhwc, w):
    N, H, W, _ = h_nhwc.shape
    Cout = w.shape[1]
    cpad = _round_up(Cout, 128)
    a = _subpixel_patches(h_nhwc).astype(jnp.bfloat16)
    b = _subpixel_weight_mats(w, cpad).astype(jnp.bfloat16)
    y = fused_subpixel_tanh(a, b)                        # f32
    return _assemble_subpixel(y, N, H, W, Cout)


# --------------------------------- Generator -------------------------------- #

def init_generator_params(key, num_in, num_labels, ngf, num_out):
    ks = jax.random.split(key, 6)

    def w(k, cin, cout):
        return 0.02 * jax.random.normal(k, (cin, cout, 4, 4), jnp.float32)

    return {
        "layer1": w(ks[0], num_in, ngf * 4),
        "layer1Label": w(ks[1], num_labels, ngf * 4),    # defined in __init__, unused in forward
        "layer2": w(ks[2], ngf * 8, ngf * 4),
        "layer3": w(ks[3], ngf * 4, ngf * 2),
        "layer4": w(ks[4], ngf * 2, ngf),
        "layer5": w(ks[5], ngf, num_out),
    }


@jax.jit
def generator_forward(params, x, c):
    # TODO(synk): `c` is undefined in the PyTorch forward; treated as a 2nd input
    # and (as literally written) fed through layer1's weights.
    N = x.shape[0]
    w1 = params["layer1"]
    C1 = w1.shape[1]                                     # ngf*4
    cpad1 = _round_up(C1, 128)

    x_nhwc = jnp.transpose(x, (0, 2, 3, 1))
    c_nhwc = jnp.transpose(c, (0, 2, 3, 1))

    # layer1 (stride 1, pad 0) on x and c, merged into one 2-step parallel call.
    px, (_, Ho, Wo) = _stride1_patches(x_nhwc, 4, 0)
    pc, _ = _stride1_patches(c_nhwc, 4, 0)
    a1 = jnp.stack([px, pc], axis=0).astype(jnp.bfloat16)        # [2, N*Ho*Wo, 16*Cin]
    b1 = _stride1_weight_mat(w1, cpad1).astype(jnp.bfloat16)     # [16*Cin, cpad1]
    o1 = fused_gemm_bn_relu_groups(a1, b1)                       # [2, N*Ho*Wo, cpad1] bf16
    xh = o1[0, :, :C1].reshape(N, Ho, Wo, C1)
    ch = o1[1, :, :C1].reshape(N, Ho, Wo, C1)
    h = jnp.concatenate([xh, ch], axis=-1)                       # NHWC, ngf*8 channels

    # layers 2..4 (stride 2, pad 1): sub-pixel conv-transpose GEMM + BN + ReLU.
    h = _subpixel_bn_relu_layer(h, params["layer2"])             # 4 -> 8
    h = _subpixel_bn_relu_layer(h, params["layer3"])             # 8 -> 16
    # TODO(synk): layer4_BN channel-count mismatch in the reference module; BN is
    # applied over the actual numGenFilter output channels.
    h = _subpixel_bn_relu_layer(h, params["layer4"])             # 16 -> 32

    # layer5 (stride 2, pad 1) + tanh.
    out_nhwc = _subpixel_tanh_layer(h, params["layer5"])         # 32 -> 64, f32
    return jnp.transpose(out_nhwc, (0, 3, 1, 2))                 # NCHW


# ------------------------------ pure-JAX reference --------------------------- #

def _ref_convT(x, w, stride, padding):
    w_conv = jnp.transpose(w[:, :, ::-1, ::-1], (1, 0, 2, 3))    # OIHW
    p = w.shape[2] - 1 - padding
    return lax.conv_general_dilated(
        x, w_conv, window_strides=(1, 1), padding=[(p, p), (p, p)],
        lhs_dilation=(stride, stride),
        dimension_numbers=("NCHW", "OIHW", "NCHW"))


def _ref_bn_relu(x):
    mean = jnp.mean(x, axis=(0, 2, 3), keepdims=True)
    var = jnp.mean((x - mean) ** 2, axis=(0, 2, 3), keepdims=True)
    return jnp.maximum((x - mean) * lax.rsqrt(var + 1e-5), 0.0)


@jax.jit
def generator_forward_ref(params, x, c):
    xh = _ref_bn_relu(_ref_convT(x, params["layer1"], 1, 0))
    ch = _ref_bn_relu(_ref_convT(c, params["layer1"], 1, 0))
    h = jnp.concatenate([xh, ch], axis=1)
    h = _ref_bn_relu(_ref_convT(h, params["layer2"], 2, 1))
    h = _ref_bn_relu(_ref_convT(h, params["layer3"], 2, 1))
    h = _ref_bn_relu(_ref_convT(h, params["layer4"], 2, 1))
    return jnp.tanh(_ref_convT(h, params["layer5"], 2, 1))


# ----------------------------------- main ------------------------------------ #

if __name__ == "__main__":
    num_in, num_labels, ngf, num_out = 16, 10, 8, 3
    batch = 2

    key = jax.random.PRNGKey(0)
    kp, kx, kc = jax.random.split(key, 3)
    params = init_generator_params(kp, num_in, num_labels, ngf, num_out)
    x = jax.random.normal(kx, (batch, num_in, 1, 1), jnp.float32)
    c = jax.random.normal(kc, (batch, num_in, 1, 1), jnp.float32)

    out = jax.block_until_ready(generator_forward(params, x, c))
    ref = jax.block_until_ready(generator_forward_ref(params, x, c))

    assert out.shape == (batch, num_out, 64, 64), out.shape
    assert bool(jnp.all(jnp.isfinite(out)))
    max_diff = float(jnp.max(jnp.abs(out - ref)))
    assert max_diff < 0.15, max_diff                     # bf16 GEMM vs f32 reference
    print("KERNEL_OK")
</pallas_src>

<mosaic_0001>
module attributes {stable_mosaic.version = 11 : i64} {
  func.func @_gemm_bn_relu_kernel(%arg0: i32, %arg1: memref<1x32x256xbf16, #tpu.memory_space<vmem>>, %arg2: memref<256x128xbf16, #tpu.memory_space<vmem>>, %arg3: memref<1x32x128xbf16, #tpu.memory_space<vmem>>) attributes {dimension_semantics = [#tpu.dimension_semantics<parallel>], iteration_bounds = array<i64: 2>, scalar_prefetch = 0 : i64, scratch_operands = 0 : i64, tpu.core_type = #tpu.core_type<tc>, window_params = [{transform_indices = @transform_0, window_bounds = array<i64: 1, 32, 256>}, {pipeline_mode = #tpu.pipeline_mode<synchronous>, transform_indices = @transform_1, window_bounds = array<i64: 256, 128>}, {transform_indices = @transform_2, window_bounds = array<i64: 1, 32, 128>}]} {
    %c0 = arith.constant 0 : index
    %c0_0 = arith.constant 0 : index
    %c0_1 = arith.constant 0 : index
    %0 = vector.load %arg1[%c0, %c0_0, %c0_1] : memref<1x32x256xbf16, #tpu.memory_space<vmem>>, vector<1x32x256xbf16>
    %1 = vector.shape_cast %0 : vector<1x32x256xbf16> to vector<32x256xbf16>
    %c0_2 = arith.constant 0 : index
    %c0_3 = arith.constant 0 : index
    %2 = vector.load %arg2[%c0_2, %c0_3] : memref<256x128xbf16, #tpu.memory_space<vmem>>, vector<256x128xbf16>
    %cst = arith.constant dense<0.000000e+00> : vector<32x128xf32>
    %3 = tpu.matmul %1, %2, %cst {dimension_numbers = #tpu.dot_dimension_numbers<[1], [0], [0], [1], [0, 0, 1, 1], [], []>} : vector<32x256xbf16>, vector<256x128xbf16>, vector<32x128xf32> -> vector<32x128xf32>
    %cst_4 = arith.constant dense<0.000000e+00> : vector<128xf32>
    %4 = vector.multi_reduction <add>, %3, %cst_4 [0] : vector<32x128xf32> to vector<128xf32>
    %5 = vector.shape_cast %4 : vector<128xf32> to vector<1x128xf32>
    %cst_5 = arith.constant 3.200000e+01 : f32
    %6 = vector.broadcast %cst_5 : f32 to vector<1x128xf32>
    %7 = arith.divf %5, %6 : vector<1x128xf32>
    %8 = vector.broadcast %7 : vector<1x128xf32> to vector<32x128xf32>
    %9 = arith.subf %3, %8 : vector<32x128xf32>
    %10 = arith.mulf %9, %9 : vector<32x128xf32>
    %cst_6 = arith.constant dense<0.000000e+00> : vector<128xf32>
    %11 = vector.multi_reduction <add>, %10, %cst_6 [0] : vector<32x128xf32> to vector<128xf32>
    %12 = vector.shape_cast %11 : vector<128xf32> to vector<1x128xf32>
    %cst_7 = arith.constant 3.200000e+01 : f32
    %13 = vector.broadcast %cst_7 : f32 to vector<1x128xf32>
    %14 = arith.divf %12, %13 : vector<1x128xf32>
    %cst_8 = arith.constant 9.99999974E-6 : f32
    %15 = vector.broadcast %cst_8 : f32 to vector<1x128xf32>
    %16 = arith.addf %14, %15 : vector<1x128xf32>
    %17 = math.rsqrt %16 : vector<1x128xf32>
    %18 = vector.broadcast %17 : vector<1x128xf32> to vector<32x128xf32>
    %19 = arith.mulf %9, %18 : vector<32x128xf32>
    %cst_9 = arith.constant 0.000000e+00 : f32
    %20 = vector.broadcast %cst_9 : f32 to vector<32x128xf32>
    %21 = arith.maximumf %19, %20 : vector<32x128xf32>
    %22 = arith.truncf %21 : vector<32x128xf32> to vector<32x128xbf16>
    %c0_10 = arith.constant 0 : index
    %c0_11 = arith.constant 0 : index
    %c0_12 = arith.constant 0 : index
    %23 = vector.load %arg3[%c0_10, %c0_11, %c0_12] : memref<1x32x128xbf16, #tpu.memory_space<vmem>>, vector<1x32x128xbf16>
    %24 = vector.shape_cast %23 : vector<1x32x128xbf16> to vector<32x128xbf16>
    %25 = vector.shape_cast %22 : vector<32x128xbf16> to vector<1x32x128xbf16>
    tpu.vector_store %arg3[%c0_10, %c0_11, %c0_12], %25 {strides = array<i32>} : memref<1x32x128xbf16, #tpu.memory_space<vmem>>, vector<1x32x128xbf16>,
    return
  }
  func.func @transform_0(%arg0: i32) -> (i32, i32, i32) {
    %c0_i32 = arith.constant 0 : i32
    %c0_i32_0 = arith.constant 0 : i32
    %c0_i32_1 = arith.constant 0 : i32
    return %arg0, %c0_i32, %c0_i32_0 : i32, i32, i32
  }
  func.func @transform_1(%arg0: i32) -> (i32, i32) {
    %c0_i32 = arith.constant 0 : i32
    %c0_i32_0 = arith.constant 0 : i32
    %c0_i32_1 = arith.constant 0 : i32
    return %c0_i32, %c0_i32_0 : i32, i32
  }
  func.func @transform_2(%arg0: i32) -> (i32, i32, i32) {
    %c0_i32 = arith.constant 0 : i32
    %c0_i32_0 = arith.constant 0 : i32
    %c0_i32_1 = arith.constant 0 : i32
    return %arg0, %c0_i32, %c0_i32_0 : i32, i32, i32
  }
}

module attributes {stable_mosaic.version = 11 : i64} {
  func.func @_subpixel_gemm_bn_relu_kernel(%arg0: i32, %arg1: memref<4x32x256xbf16, #tpu.memory_space<vmem>>, %arg2: memref<4x256x128xbf16, #tpu.memory_space<vmem>>, %arg3: memref<4x32x128xbf16, #tpu.memory_space<vmem>>) attributes {dimension_semantics = [#tpu.dimension_semantics<arbitrary>], iteration_bounds = array<i64: 1>, scalar_prefetch = 0 : i64, scratch_operands = 0 : i64, tpu.core_type = #tpu.core_type<tc>, window_params = [{pipeline_mode = #tpu.pipeline_mode<synchronous>, transform_indices = @transform_0, window_bounds = array<i64: 4, 32, 256>}, {pipeline_mode = #tpu.pipeline_mode<synchronous>, transform_indices = @transform_1, window_bounds = array<i64: 4, 256, 128>}, {pipeline_mode = #tpu.pipeline_mode<synchronous>, transform_indices = @transform_2, window_bounds = array<i64: 4, 32, 128>}]} {
    %c0 = arith.constant 0 : index
    %c0_0 = arith.constant 0 : index
    %c0_1 = arith.constant 0 : index
    %0 = vector.load %arg1[%c0, %c0_0, %c0_1] : memref<4x32x256xbf16, #tpu.memory_space<vmem>>, vector<4x32x256xbf16>
    %c0_2 = arith.constant 0 : index
    %c0_3 = arith.constant 0 : index
    %c0_4 = arith.constant 0 : index
    %1 = vector.load %arg2[%c0_2, %c0_3, %c0_4] : memref<4x256x128xbf16, #tpu.memory_space<vmem>>, vector<4x256x128xbf16>
    "tpu.trace_start"() <{level = 10 : i32, message = "pmk,pkn->pmn"}> : () -> ()
    %cst = arith.constant dense<0.000000e+00> : vector<4x32x128xf32>
    %2 = tpu.matmul %0, %1, %cst {dimension_numbers = #tpu.dot_dimension_numbers<[2], [1], [1], [2], [0, 0, 0, 1, 1, 2], [0], [0]>} : vector<4x32x256xbf16>, vector<4x256x128xbf16>, vector<4x32x128xf32> -> vector<4x32x128xf32>
    "tpu.trace_stop"() : () -> ()
    %cst_5 = arith.constant dense<0.000000e+00> : vector<4x128xf32>
    %3 = vector.multi_reduction <add>, %2, %cst_5 [1] : vector<4x32x128xf32> to vector<4x128xf32>
    %4 = vector.shape_cast %3 : vector<4x128xf32> to vector<4x1x128xf32>
    %cst_6 = arith.constant 3.200000e+01 : f32
    %5 = vector.broadcast %cst_6 : f32 to vector<4x1x128xf32>
    %6 = arith.divf %4, %5 : vector<4x1x128xf32>
    %cst_7 = arith.constant dense<0.000000e+00> : vector<1x128xf32>
    %7 = vector.multi_reduction <add>, %6, %cst_7 [0] : vector<4x1x128xf32> to vector<1x128xf32>
    %8 = vector.shape_cast %7 : vector<1x128xf32> to vector<1x1x128xf32>
    %cst_8 = arith.constant 4.000000e+00 : f32
    %9 = vector.broadcast %cst_8 : f32 to vector<1x1x128xf32>
    %10 = arith.divf %8, %9 : vector<1x1x128xf32>
    %11 = vector.broadcast %10 : vector<1x1x128xf32> to vector<4x32x128xf32>
    %12 = arith.subf %2, %11 : vector<4x32x128xf32>
    %13 = arith.mulf %12, %12 : vector<4x32x128xf32>
    %cst_9 = arith.constant dense<0.000000e+00> : vector<4x128xf32>
    %14 = vector.multi_reduction <add>, %13, %cst_9 [1] : vector<4x32x128xf32> to vector<4x128xf32>
    %15 = vector.shape_cast %14 : vector<4x128xf32> to vector<4x1x128xf32>
    %cst_10 = arith.constant 3.200000e+01 : f32
    %16 = vector.broadcast %cst_10 : f32 to vector<4x1x128xf32>
    %17 = arith.divf %15, %16 : vector<4x1x128xf32>
    %cst_11 = arith.constant dense<0.000000e+00> : vector<1x128xf32>
    %18 = vector.multi_reduction <add>, %17, %cst_11 [0] : vector<4x1x128xf32> to vector<1x128xf32>
    %19 = vector.shape_cast %18 : vector<1x128xf32> to vector<1x1x128xf32>
    %cst_12 = arith.constant 4.000000e+00 : f32
    %20 = vector.broadcast %cst_12 : f32 to vector<1x1x128xf32>
    %21 = arith.divf %19, %20 : vector<1x1x128xf32>
    %cst_13 = arith.constant 9.99999974E-6 : f32
    %22 = vector.broadcast %cst_13 : f32 to vector<1x1x128xf32>
    %23 = arith.addf %21, %22 : vector<1x1x128xf32>
    %24 = math.rsqrt %23 : vector<1x1x128xf32>
    %25 = vector.broadcast %24 : vector<1x1x128xf32> to vector<4x32x128xf32>
    %26 = arith.mulf %12, %25 : vector<4x32x128xf32>
    %cst_14 = arith.constant 0.000000e+00 : f32
    %27 = vector.broadcast %cst_14 : f32 to vector<4x32x128xf32>
    %28 = arith.maximumf %26, %27 : vector<4x32x128xf32>
    %29 = arith.truncf %28 : vector<4x32x128xf32> to vector<4x32x128xbf16>
    %c0_15 = arith.constant 0 : index
    %c0_16 = arith.constant 0 : index
    %c0_17 = arith.constant 0 : index
    %30 = vector.load %arg3[%c0_15, %c0_16, %c0_17] : memref<4x32x128xbf16, #tpu.memory_space<vmem>>, vector<4x32x128xbf16>
    tpu.vector_store %arg3[%c0_15, %c0_16, %c0_17], %29 {strides = array<i32>} : memref<4x32x128xbf16, #tpu.memory_space<vmem>>, vector<4x32x128xbf16>,
    return
  }
  func.func @transform_0(%arg0: i32) -> (i32, i32, i32) {
    %c0_i32 = arith.constant 0 : i32
    %c0_i32_0 = arith.constant 0 : i32
    %c0_i32_1 = arith.constant 0 : i32
    %c0_i32_2 = arith.constant 0 : i32
    return %c0_i32, %c0_i32_0, %c0_i32_1 : i32, i32, i32
  }
  func.func @transform_1(%arg0: i32) -> (i32, i32, i32) {
    %c0_i32 = arith.constant 0 : i32
    %c0_i32_0 = arith.constant 0 : i32
    %c0_i32_1 = arith.constant 0 : i32
    %c0_i32_2 = arith.constant 0 : i32
    return %c0_i32, %c0_i32_0, %c0_i32_1 : i32, i32, i32
  }
  func.func @transform_2(%arg0: i32) -> (i32, i32, i32) {
    %c0_i32 = arith.constant 0 : i32
    %c0_i32_0 = arith.constant 0 : i32
    %c0_i32_1 = arith.constant 0 : i32
    %c0_i32_2 = arith.constant 0 : i32
    return %c0_i32, %c0_i32_0, %c0_i32_1 : i32, i32, i32
  }
}

module attributes {stable_mosaic.version = 11 : i64} {
  func.func @_subpixel_gemm_bn_relu_kernel(%arg0: i32, %arg1: memref<4x128x128xbf16, #tpu.memory_space<vmem>>, %arg2: memref<4x128x128xbf16, #tpu.memory_space<vmem>>, %arg3: memref<4x128x128xbf16, #tpu.memory_space<vmem>>) attributes {dimension_semantics = [#tpu.dimension_semantics<arbitrary>], iteration_bounds = array<i64: 1>, scalar_prefetch = 0 : i64, scratch_operands = 0 : i64, tpu.core_type = #tpu.core_type<tc>, window_params = [{pipeline_mode = #tpu.pipeline_mode<synchronous>, transform_indices = @transform_0, window_bounds = array<i64: 4, 128, 128>}, {pipeline_mode = #tpu.pipeline_mode<synchronous>, transform_indices = @transform_1, window_bounds = array<i64: 4, 128, 128>}, {pipeline_mode = #tpu.pipeline_mode<synchronous>, transform_indices = @transform_2, window_bounds = array<i64: 4, 128, 128>}]} {
    %c0 = arith.constant 0 : index
    %c0_0 = arith.constant 0 : index
    %c0_1 = arith.constant 0 : index
    %0 = vector.load %arg1[%c0, %c0_0, %c0_1] : memref<4x128x128xbf16, #tpu.memory_space<vmem>>, vector<4x128x128xbf16>
    %c0_2 = arith.constant 0 : index
    %c0_3 = arith.constant 0 : index
    %c0_4 = arith.constant 0 : index
    %1 = vector.load %arg2[%c0_2, %c0_3, %c0_4] : memref<4x128x128xbf16, #tpu.memory_space<vmem>>, vector<4x128x128xbf16>
    "tpu.trace_start"() <{level = 10 : i32, message = "pmk,pkn->pmn"}> : () -> ()
    %cst = arith.constant dense<0.000000e+00> : vector<4x128x128xf32>
    %2 = tpu.matmul %0, %1, %cst {dimension_numbers = #tpu.dot_dimension_numbers<[2], [1], [1], [2], [0, 0, 0, 1, 1, 2], [0], [0]>} : vector<4x128x128xbf16>, vector<4x128x128xbf16>, vector<4x128x128xf32> -> vector<4x128x128xf32>
    "tpu.trace_stop"() : () -> ()
    %cst_5 = arith.constant dense<0.000000e+00> : vector<4x128xf32>
    %3 = vector.multi_reduction <add>, %2, %cst_5 [1] : vector<4x128x128xf32> to vector<4x128xf32>
    %4 = vector.shape_cast %3 : vector<4x128xf32> to vector<4x1x128xf32>
    %cst_6 = arith.constant 1.280000e+02 : f32
    %5 = vector.broadcast %cst_6 : f32 to vector<4x1x128xf32>
    %6 = arith.divf %4, %5 : vector<4x1x128xf32>
    %cst_7 = arith.constant dense<0.000000e+00> : vector<1x128xf32>
    %7 = vector.multi_reduction <add>, %6, %cst_7 [0] : vector<4x1x128xf32> to vector<1x128xf32>
    %8 = vector.shape_cast %7 : vector<1x128xf32> to vector<1x1x128xf32>
    %cst_8 = arith.constant 4.000000e+00 : f32
    %9 = vector.broadcast %cst_8 : f32 to vector<1x1x128xf32>
    %10 = arith.divf %8, %9 : vector<1x1x128xf32>
    %11 = vector.broadcast %10 : vector<1x1x128xf32> to vector<4x128x128xf32>
    %12 = arith.subf %2, %11 : vector<4x128x128xf32>
    %13 = arith.mulf %12, %12 : vector<4x128x128xf32>
    %cst_9 = arith.constant dense<0.000000e+00> : vector<4x128xf32>
    %14 = vector.multi_reduction <add>, %13, %cst_9 [1] : vector<4x128x128xf32> to vector<4x128xf32>
    %15 = vector.shape_cast %14 : vector<4x128xf32> to vector<4x1x128xf32>
    %cst_10 = arith.constant 1.280000e+02 : f32
    %16 = vector.broadcast %cst_10 : f32 to vector<4x1x128xf32>
    %17 = arith.divf %15, %16 : vector<4x1x128xf32>
    %cst_11 = arith.constant dense<0.000000e+00> : vector<1x128xf32>
    %18 = vector.multi_reduction <add>, %17, %cst_11 [0] : vector<4x1x128xf32> to vector<1x128xf32>
    %19 = vector.shape_cast %18 : vector<1x128xf32> to vector<1x1x128xf32>
    %cst_12 = arith.constant 4.000000e+00 : f32
    %20 = vector.broadcast %cst_12 : f32 to vector<1x1x128xf32>
    %21 = arith.divf %19, %20 : vector<1x1x128xf32>
    %cst_13 = arith.constant 9.99999974E-6 : f32
    %22 = vector.broadcast %cst_13 : f32 to vector<1x1x128xf32>
    %23 = arith.addf %21, %22 : vector<1x1x128xf32>
    %24 = math.rsqrt %23 : vector<1x1x128xf32>
    %25 = vector.broadcast %24 : vector<1x1x128xf32> to vector<4x128x128xf32>
    %26 = arith.mulf %12, %25 : vector<4x128x128xf32>
    %cst_14 = arith.constant 0.000000e+00 : f32
    %27 = vector.broadcast %cst_14 : f32 to vector<4x128x128xf32>
    %28 = arith.maximumf %26, %27 : vector<4x128x128xf32>
    %29 = arith.truncf %28 : vector<4x128x128xf32> to vector<4x128x128xbf16>
    %c0_15 = arith.constant 0 : index
    %c0_16 = arith.constant 0 : index
    %c0_17 = arith.constant 0 : index
    %30 = vector.load %arg3[%c0_15, %c0_16, %c0_17] : memref<4x128x128xbf16, #tpu.memory_space<vmem>>, vector<4x128x128xbf16>
    tpu.vector_store %arg3[%c0_15, %c0_16, %c0_17], %29 {strides = array<i32>} : memref<4x128x128xbf16, #tpu.memory_space<vmem>>, vector<4x128x128xbf16>,
    return
  }
  func.func @transform_0(%arg0: i32) -> (i32, i32, i32) {
    %c0_i32 = arith.constant 0 : i32
    %c0_i32_0 = arith.constant 0 : i32
    %c0_i32_1 = arith.constant 0 : i32
    %c0_i32_2 = arith.constant 0 : i32
    return %c0_i32, %c0_i32_0, %c0_i32_1 : i32, i32, i32
  }
  func.func @transform_1(%arg0: i32) -> (i32, i32, i32) {
    %c0_i32 = arith.constant 0 : i32
    %c0_i32_0 = arith.constant 0 : i32
    %c0_i32_1 = arith.constant 0 : i32
    %c0_i32_2 = arith.constant 0 : i32
    return %c0_i32, %c0_i32_0, %c0_i32_1 : i32, i32, i32
  }
  func.func @transform_2(%arg0: i32) -> (i32, i32, i32) {
    %c0_i32 = arith.constant 0 : i32
    %c0_i32_0 = arith.constant 0 : i32
    %c0_i32_1 = arith.constant 0 : i32
    %c0_i32_2 = arith.constant 0 : i32
    return %c0_i32, %c0_i32_0, %c0_i32_1 : i32, i32, i32
  }
}

module attributes {stable_mosaic.version = 11 : i64} {
  func.func @_subpixel_gemm_bn_relu_kernel(%arg0: i32, %arg1: memref<4x512x64xbf16, #tpu.memory_space<vmem>>, %arg2: memref<4x64x128xbf16, #tpu.memory_space<vmem>>, %arg3: memref<4x512x128xbf16, #tpu.memory_space<vmem>>) attributes {dimension_semantics = [#tpu.dimension_semantics<arbitrary>], iteration_bounds = array<i64: 1>, scalar_prefetch = 0 : i64, scratch_operands = 0 : i64, tpu.core_type = #tpu.core_type<tc>, window_params = [{pipeline_mode = #tpu.pipeline_mode<synchronous>, transform_indices = @transform_0, window_bounds = array<i64: 4, 512, 64>}, {pipeline_mode = #tpu.pipeline_mode<synchronous>, transform_indices = @transform_1, window_bounds = array<i64: 4, 64, 128>}, {pipeline_mode = #tpu.pipeline_mode<synchronous>, transform_indices = @transform_2, window_bounds = array<i64: 4, 512, 128>}]} {
    %c0 = arith.constant 0 : index
    %c0_0 = arith.constant 0 : index
    %c0_1 = arith.constant 0 : index
    %0 = vector.load %arg1[%c0, %c0_0, %c0_1] : memref<4x512x64xbf16, #tpu.memory_space<vmem>>, vector<4x512x64xbf16>
    %c0_2 = arith.constant 0 : index
    %c0_3 = arith.constant 0 : index
    %c0_4 = arith.constant 0 : index
    %1 = vector.load %arg2[%c0_2, %c0_3, %c0_4] : memref<4x64x128xbf16, #tpu.memory_space<vmem>>, vector<4x64x128xbf16>
    "tpu.trace_start"() <{level = 10 : i32, message = "pmk,pkn->pmn"}> : () -> ()
    %cst = arith.constant dense<0.000000e+00> : vector<4x512x128xf32>
    %2 = tpu.matmul %0, %1, %cst {dimension_numbers = #tpu.dot_dimension_numbers<[2], [1], [1], [2], [0, 0, 0, 1, 1, 2], [0], [0]>} : vector<4x512x64xbf16>, vector<4x64x128xbf16>, vector<4x512x128xf32> -> vector<4x512x128xf32>
    "tpu.trace_stop"() : () -> ()
    %cst_5 = arith.constant dense<0.000000e+00> : vector<4x128xf32>
    %3 = vector.multi_reduction <add>, %2, %cst_5 [1] : vector<4x512x128xf32> to vector<4x128xf32>
    %4 = vector.shape_cast %3 : vector<4x128xf32> to vector<4x1x128xf32>
    %cst_6 = arith.constant 5.120000e+02 : f32
    %5 = vector.broadcast %cst_6 : f32 to vector<4x1x128xf32>
    %6 = arith.divf %4, %5 : vector<4x1x128xf32>
    %cst_7 = arith.constant dense<0.000000e+00> : vector<1x128xf32>
    %7 = vector.multi_reduction <add>, %6, %cst_7 [0] : vector<4x1x128xf32> to vector<1x128xf32>
    %8 = vector.shape_cast %7 : vector<1x128xf32> to vector<1x1x128xf32>
    %cst_8 = arith.constant 4.000000e+00 : f32
    %9 = vector.broadcast %cst_8 : f32 to vector<1x1x128xf32>
    %10 = arith.divf %8, %9 : vector<1x1x128xf32>
    %11 = vector.broadcast %10 : vector<1x1x128xf32> to vector<4x512x128xf32>
    %12 = arith.subf %2, %11 : vector<4x512x128xf32>
    %13 = arith.mulf %12, %12 : vector<4x512x128xf32>
    %cst_9 = arith.constant dense<0.000000e+00> : vector<4x128xf32>
    %14 = vector.multi_reduction <add>, %13, %cst_9 [1] : vector<4x512x128xf32> to vector<4x128xf32>
    %15 = vector.shape_cast %14 : vector<4x128xf32> to vector<4x1x128xf32>
    %cst_10 = arith.constant 5.120000e+02 : f32
    %16 = vector.broadcast %cst_10 : f32 to vector<4x1x128xf32>
    %17 = arith.divf %15, %16 : vector<4x1x128xf32>
    %cst_11 = arith.constant dense<0.000000e+00> : vector<1x128xf32>
    %18 = vector.multi_reduction <add>, %17, %cst_11 [0] : vector<4x1x128xf32> to vector<1x128xf32>
    %19 = vector.shape_cast %18 : vector<1x128xf32> to vector<1x1x128xf32>
    %cst_12 = arith.constant 4.000000e+00 : f32
    %20 = vector.broadcast %cst_12 : f32 to vector<1x1x128xf32>
    %21 = arith.divf %19, %20 : vector<1x1x128xf32>
    %cst_13 = arith.constant 9.99999974E-6 : f32
    %22 = vector.broadcast %cst_13 : f32 to vector<1x1x128xf32>
    %23 = arith.addf %21, %22 : vector<1x1x128xf32>
    %24 = math.rsqrt %23 : vector<1x1x128xf32>
    %25 = vector.broadcast %24 : vector<1x1x128xf32> to vector<4x512x128xf32>
    %26 = arith.mulf %12, %25 : vector<4x512x128xf32>
    %cst_14 = arith.constant 0.000000e+00 : f32
    %27 = vector.broadcast %cst_14 : f32 to vector<4x512x128xf32>
    %28 = arith.maximumf %26, %27 : vector<4x512x128xf32>
    %29 = arith.truncf %28 : vector<4x512x128xf32> to vector<4x512x128xbf16>
    %c0_15 = arith.constant 0 : index
    %c0_16 = arith.constant 0 : index
    %c0_17 = arith.constant 0 : index
    %30 = vector.load %arg3[%c0_15, %c0_16, %c0_17] : memref<4x512x128xbf16, #tpu.memory_space<vmem>>, vector<4x512x128xbf16>
    tpu.vector_store %arg3[%c0_15, %c0_16, %c0_17], %29 {strides = array<i32>} : memref<4x512x128xbf16, #tpu.memory_space<vmem>>, vector<4x512x128xbf16>,
    return
  }
  func.func @transform_0(%arg0: i32) -> (i32, i32, i32) {
    %c0_i32 = arith.constant 0 : i32
    %c0_i32_0 = arith.constant 0 : i32
    %c0_i32_1 = arith.constant 0 : i32
    %c0_i32_2 = arith.constant 0 : i32
    return %c0_i32, %c0_i32_0, %c0_i32_1 : i32, i32, i32
  }
  func.func @transform_1(%arg0: i32) -> (i32, i32, i32) {
    %c0_i32 = arith.constant 0 : i32
    %c0_i32_0 = arith.constant 0 : i32
    %c0_i32_1 = arith.constant 0 : i32
    %c0_i32_2 = arith.constant 0 : i32
    return %c0_i32, %c0_i32_0, %c0_i32_1 : i32, i32, i32
  }
  func.func @transform_2(%arg0: i32) -> (i32, i32, i32) {
    %c0_i32 = arith.constant 0 : i32
    %c0_i32_0 = arith.constant 0 : i32
    %c0_i32_1 = arith.constant 0 : i32
    %c0_i32_2 = arith.constant 0 : i32
    return %c0_i32, %c0_i32_0, %c0_i32_1 : i32, i32, i32
  }
}

module attributes {stable_mosaic.version = 11 : i64} {
  func.func @_gemm_tanh_kernel(%arg0: i32, %arg1: memref<1x2048x32xbf16, #tpu.memory_space<vmem>>, %arg2: memref<1x32x128xbf16, #tpu.memory_space<vmem>>, %arg3: memref<1x2048x128xf32, #tpu.memory_space<vmem>>) attributes {dimension_semantics = [#tpu.dimension_semantics<parallel>], iteration_bounds = array<i64: 4>, scalar_prefetch = 0 : i64, scratch_operands = 0 : i64, tpu.core_type = #tpu.core_type<tc>, window_params = [{transform_indices = @transform_0, window_bounds = array<i64: 1, 2048, 32>}, {transform_indices = @transform_1, window_bounds = array<i64: 1, 32, 128>}, {transform_indices = @transform_2, window_bounds = array<i64: 1, 2048, 128>}]} {
    %c0 = arith.constant 0 : index
    %c0_0 = arith.constant 0 : index
    %c0_1 = arith.constant 0 : index
    %0 = vector.load %arg1[%c0, %c0_0, %c0_1] : memref<1x2048x32xbf16, #tpu.memory_space<vmem>>, vector<1x2048x32xbf16>
    %1 = vector.shape_cast %0 : vector<1x2048x32xbf16> to vector<2048x32xbf16>
    %c0_2 = arith.constant 0 : index
    %c0_3 = arith.constant 0 : index
    %c0_4 = arith.constant 0 : index
    %2 = vector.load %arg2[%c0_2, %c0_3, %c0_4] : memref<1x32x128xbf16, #tpu.memory_space<vmem>>, vector<1x32x128xbf16>
    %3 = vector.shape_cast %2 : vector<1x32x128xbf16> to vector<32x128xbf16>
    %cst = arith.constant dense<0.000000e+00> : vector<2048x128xf32>
    %4 = tpu.matmul %1, %3, %cst {dimension_numbers = #tpu.dot_dimension_numbers<[1], [0], [0], [1], [0, 0, 1, 1], [], []>} : vector<2048x32xbf16>, vector<32x128xbf16>, vector<2048x128xf32> -> vector<2048x128xf32>
    %5 = math.tanh %4 : vector<2048x128xf32>
    %c0_5 = arith.constant 0 : index
    %c0_6 = arith.constant 0 : index
    %c0_7 = arith.constant 0 : index
    %6 = vector.load %arg3[%c0_5, %c0_6, %c0_7] : memref<1x2048x128xf32, #tpu.memory_space<vmem>>, vector<1x2048x128xf32>
    %7 = vector.shape_cast %6 : vector<1x2048x128xf32> to vector<2048x128xf32>
    %8 = vector.shape_cast %5 : vector<2048x128xf32> to vector<1x2048x128xf32>
    tpu.vector_store %arg3[%c0_5, %c0_6, %c0_7], %8 {strides = array<i32>} : memref<1x2048x128xf32, #tpu.memory_space<vmem>>, vector<1x2048x128xf32>,
    return
  }
  func.func @transform_0(%arg0: i32) -> (i32, i32, i32) {
    %c0_i32 = arith.constant 0 : i32
    %c0_i32_0 = arith.constant 0 : i32
    %c0_i32_1 = arith.constant 0 : i32
    return %arg0, %c0_i32, %c0_i32_0 : i32, i32, i32
  }
  func.func @transform_1(%arg0: i32) -> (i32, i32, i32) {
    %c0_i32 = arith.constant 0 : i32
    %c0_i32_0 = arith.constant 0 : i32
    %c0_i32_1 = arith.constant 0 : i32
    return %arg0, %c0_i32, %c0_i32_0 : i32, i32, i32
  }
  func.func @transform_2(%arg0: i32) -> (i32, i32, i32) {
    %c0_i32 = arith.constant 0 : i32
    %c0_i32_0 = arith.constant 0 : i32
    %c0_i32_1 = arith.constant 0 : i32
    return %arg0, %c0_i32, %c0_i32_0 : i32, i32, i32
  }
}

</mosaic_0001>

<bundles_post_ra>
// kernel: generator_forward.5
= control target key start
LH: loop header
LB: loop body
LE: loop exit
PB: predicated region body
PF: predicated region fallthrough
CT: control target
= control target key end

     0   :  { %s611_s9 = smov 0   ;;  %s680_s0 = inlined_call_operand.vmem [shape: bf16[2,32,256], index: 0, kind: input, shape index: {}]   ;;  %s681_s1 = inlined_call_operand.vmem [shape: bf16[256,128], index: 1, kind: input, shape index: {}]   ;;  %s682_s2 = inlined_call_operand.vmem [shape: bf16[2,32,128], index: 2, kind: output, shape index: {}]  }
   0x1 LB: > { %s460_s10 = sadd.s32 4294967295, %s594_s9   ;;  %p464_p0 = scmp.ge.s32.totalorder %s594_s9, 1  ;;  %s594_s9 = sphi %s611_s9, %s12_s9  }
   0x2   : > { %p112_p1 = scmp.lt.s32.totalorder %s594_s9, 3 }
   0x4   : > { %p113_p2 = pnand %p464_p0, %p112_p1 }
   0x5   : > { %p134_p3 = scmp.lt.s32.totalorder (!%p113_p2), %s460_s10, 1 }
   0x6   : > { %116 = sbr.rel (%p113_p2) target bundleno = 312 (0x138), region = 28 }
   0xb   : > { %v564_v0 = vld [vmem:[%s681_s1 + $0x78] sm:$0xff]   ;;  %v566_v2 = vld [vmem:[%s681_s1 + $0x70] sm:$0xff]   ;;  %v568_v4 = vld [vmem:[%s681_s1 + $0x68] sm:$0xff]   ;;  %s684_s10 = smov (!%p134_p3, %s460_s10), 1 }
   0xc   : > { %v565_v1 = vld [vmem:[%s681_s1 + $0x38] sm:$0xff]   ;;  %512 = vmatprep.subr.bf16.mxu0 %v564_v0  ;;  %540 = vmatprep.subr.bf16.mxu1 %v564_v0  ;;  %v567_v3 = vld [vmem:[%s681_s1 + $0x30] sm:$0xff]   ;;  %v569_v5 = vld [vmem:[%s681_s1 + $0x28] sm:$0xff]   ;;  %s495_s27 = sshll.u32 %s684_s10, 5  ;;  %s496_s21 = sshll.u32 %s684_s10, 4 }
   0xd   : > { %513 = vmatpush3.bf16.msra.mxu0 %v565_v1  ;;  %548 = vmatpush3.bf16.msra.mxu1 %v565_v1  ;;  %v570_v6 = vld [vmem:[%s681_s1 + $0x60] sm:$0xff]   ;;  %v572_v8 = vld [vmem:[%s681_s1 + $0x58] sm:$0xff]   ;;  %s138_s4 = scalar_lea.vmem %s680_s0, %s495_s27  ;;  %v574_v10 = vld [vmem:[%s681_s1 + $0x50] sm:$0xff]   ;;  %s143_s24 = scalar_lea.vmem %s682_s2, %s496_s21 }
   0xe   : > { %514 = vmatprep.subr.bf16.mxu0 %v566_v2  ;;  %541 = vmatprep.subr.bf16.mxu1 %v566_v2  ;;  %v571_v7 = vld [vmem:[%s681_s1 + $0x20] sm:$0xff]   ;;  %v573_v9 = vld [vmem:[%s681_s1 + $0x18] sm:$0xff]   ;;  %v575_v13 = vld [vmem:[%s681_s1 + $0x10] sm:$0xff]  }
   0xf   : > { %v582_v11 = vld [vmem:[%s138_s4 + $0x4] ss:$8 sps:$4 sm:$0xff]   ;;  %v585_v12 = vld [vmem:[%s138_s4 + $0x14] ss:$8 sps:$4 sm:$0xff]   ;;  %v580_v18 = vld [vmem:[%s138_s4] ss:$8 sps:$4 sm:$0xff]  }
  0x10   : > { %v576_v14 = vld [vmem:[%s681_s1 + $0x48] sm:$0xff]   ;;  %329 = vmatprep.mubr.bf16.mxu0 %v582_v11  ;;  %337 = vmatprep.mubr.bf16.mxu1 %v585_v12  ;;  %v578_v16 = vld [vmem:[%s681_s1 + $0x40] sm:$0xff]   ;;  %v583_v19 = vld [vmem:[%s138_s4 + $0x10] ss:$8 sps:$4 sm:$0xff]  }
  0x11   : > { %515 = vmatpush3.bf16.msra.mxu0 %v567_v3  ;;  %549 = vmatpush3.bf16.msra.mxu1 %v567_v3  ;;  %v577_v15 = vld [vmem:[%s681_s1 + $0x8] sm:$0xff]   ;;  %v579_v17 = vld [vmem:[%s681_s1] sm:$0xff]  }
  0x12   : > { %516 = vmatprep.subr.bf16.mxu0 %v568_v4  ;;  %542 = vmatprep.subr.bf16.mxu1 %v568_v4 }
  0x15   : > { %517 = vmatpush3.bf16.msra.mxu0 %v569_v5  ;;  %550 = vmatpush3.bf16.msra.mxu1 %v569_v5 }
  0x16   : > { %518 = vmatprep.subr.bf16.mxu0 %v570_v6  ;;  %543 = vmatprep.subr.bf16.mxu1 %v570_v6 }
  0x19   : > { %519 = vmatpush3.bf16.msra.mxu0 %v571_v7  ;;  %551 = vmatpush3.bf16.msra.mxu1 %v571_v7 }
  0x1a   : > { %520 = vmatprep.subr.bf16.mxu0 %v572_v8  ;;  %544 = vmatprep.subr.bf16.mxu1 %v572_v8 }
  0x1d   : > { %521 = vmatpush3.bf16.msra.mxu0 %v573_v9  ;;  %552 = vmatpush3.bf16.msra.mxu1 %v573_v9 }
  0x1e   : > { %522 = vmatprep.subr.bf16.mxu0 %v574_v10  ;;  %545 = vmatprep.subr.bf16.mxu1 %v574_v10 }
  0x21   : > { %523 = vmatpush3.bf16.msra.mxu0 %v575_v13  ;;  %553 = vmatpush3.bf16.msra.mxu1 %v575_v13 }
  0x22   : > { %524 = vmatprep.subr.bf16.mxu0 %v576_v14  ;;  %546 = vmatprep.subr.bf16.mxu1 %v576_v14 }
  0x25   : > { %525 = vmatpush3.bf16.msra.mxu0 %v577_v15  ;;  %554 = vmatpush3.bf16.msra.mxu1 %v577_v15 }
  0x26   : > { %526 = vmatprep.subr.bf16.mxu0 %v578_v16  ;;  %547 = vmatprep.subr.bf16.mxu1 %v578_v16 }
  0x29   : > { %527 = vmatpush3.bf16.msra.mxu0 %v579_v17  ;;  %555 = vmatpush3.bf16.msra.mxu1 %v579_v17 }
  0x2c   : > { %330 = vmatmul.mubr.bf16.vlgmr.msra.gmra.mxu0 %v580_v18  ;;  %338 = vmatmul.mubr.bf16.vlgmr.msra.gmra.mxu1 %v583_v19 }
  0xec   : > { %v528_v20 = vpop.f32.mrf.mxu0  ;;  %v534_v21 = vpop.f32.mrf.mxu1 }
  0xee   : > { %v529_v22 = vpop.f32.mrf.mxu0  ;;  %v535_v23 = vpop.f32.mrf.mxu1 }
  0xef   : > { %v530_v27 = vadd.f32 %v529_v22, %v528_v20  ;;  %v536_v30 = vadd.f32 %v535_v23, %v534_v21 }
  0xf0   : > { %v531_v24 = vpop.f32.mrf.mxu0  ;;  %v537_v25 = vpop.f32.mrf.mxu1 }
  0xf2   : > { %v532_v26 = vpop.f32.mrf.mxu0  ;;  %v538_v29 = vpop.f32.mrf.mxu1 }
  0xf3   : > { %v533_v28 = vadd.f32 %v532_v26, %v531_v24  ;;  %v539_v32 = vadd.f32 %v538_v29, %v537_v25 }
  0xf5   : > { %v346_v31 = vadd.f32 %v533_v28, %v530_v27 }
  0xf7   : > { %v347_v33 = vadd.f32 %v536_v30, %v346_v31 }
  0xf9   : > { %v348_v34 = vadd.f32 %v539_v32, %v347_v33 }
  0xfb   : > { %v349_v35 = vrot.slane %v348_v34, 4 }
  0xfd   : > { %v350_v36 = vadd.f32 %v349_v35, %v348_v34 }
  0xff   : > { %v351_v37 = vrot.slane %v350_v36, 2 }
 0x101   : > { %v352_v38 = vadd.f32 %v351_v37, %v350_v36 }
 0x103   : > { %v353_v39 = vrot.slane %v352_v38, 1 }
 0x105   : > { %v354_v40 = vadd.f32 %v353_v39, %v352_v38 }
 0x107   : > { %v356_v41 = vmul.f32 0.03125, %v354_v40 }
 0x109   : > { %v357_v42 = vsub.f32 %v530_v27, %v356_v41  ;;  %v358_v43 = vsub.f32 %v533_v28, %v356_v41  ;;  %v359_v44 = vsub.f32 %v536_v30, %v356_v41  ;;  %v360_v45 = vsub.f32 %v539_v32, %v356_v41 }
 0x10b   : > { %v361_v46 = vmul.f32 %v357_v42, %v357_v42  ;;  %v362_v47 = vmul.f32 %v358_v43, %v358_v43  ;;  %v363_v48 = vmul.f32 %v359_v44, %v359_v44  ;;  %v364_v50 = vmul.f32 %v360_v45, %v360_v45 }
 0x10d   : > { %v365_v49 = vadd.f32 %v362_v47, %v361_v46 }
 0x10f   : > { %v366_v51 = vadd.f32 %v365_v49, %v363_v48 }
 0x111   : > { %v367_v52 = vadd.f32 %v366_v51, %v364_v50 }
 0x113   : > { %v368_v53 = vrot.slane %v367_v52, 4 }
 0x115   : > { %v369_v54 = vadd.f32 %v368_v53, %v367_v52 }
 0x117   : > { %v370_v55 = vrot.slane %v369_v54, 2 }
 0x119   : > { %v371_v56 = vadd.f32 %v370_v55, %v369_v54 }
 0x11b   : > { %v372_v57 = vrot.slane %v371_v56, 1 }
 0x11d   : > { %v373_v58 = vadd.f32 %v372_v57, %v371_v56 }
 0x11f   : > { %v374_v59 = vmul.f32 0.03125, %v373_v58 }
 0x121   : > { %v375_v60 = vadd.f32 1e-05, %v374_v59 }
 0x123   : > { %586 = vrsqrt.f32 %v375_v60 }
 0x130   : > { %v587_v61 = vpop.eup %586 }
 0x131   : > { %v377_v62 = vmul.f32 %v587_v61, %v357_v42  ;;  %v378_v63 = vmul.f32 %v587_v61, %v358_v43  ;;  %v379_v0 = vmul.f32 %v587_v61, %v359_v44  ;;  %v380_v1 = vmul.f32 %v587_v61, %v360_v45 }
 0x133   : > { %v381_v2 = vmax.f32 %v377_v62, 0.0  ;;  %v382_v3 = vmax.f32 %v378_v63, 0.0  ;;  %v383_v4 = vmax.f32 %v379_v0, 0.0  ;;  %v384_v5 = vmax.f32 %v380_v1, 0.0 }
 0x135   : > { %v504_v6 = vpack.c.bf16 %v382_v3, %v381_v2  ;;  %v509_v7 = vpack.c.bf16 %v384_v5, %v383_v4 }
 0x137   : > { %505 = vst [vmem:[%s143_s24] sm:$0xff] %v504_v6   ;;  %511 = vst [vmem:[%s143_s24 + $0x8] sm:$0xff] %v509_v7  }
 0x138 PF: > { %s12_s9 = sadd.s32 1, %s594_s9  }
 0x139   : > { %p9_p4 = scmp.ge.s32.totalorder %s12_s9, 4  }
 0x13b   :  { %11 = sbr.rel (!%p9_p4) target bundleno = 1 (0x1), region = 58 }

// kernel: generator_forward.6
= control target key start
LH: loop header
LB: loop body
LE: loop exit
PB: predicated region body
PF: predicated region fallthrough
CT: control target
= control target key end

     0   :  { %s1808_s1 = inlined_call_operand.vmem [shape: bf16[4,256,128], index: 1, kind: input, shape index: {}]   ;;  %s1809_s0 = inlined_call_operand.vmem [shape: bf16[4,32,256], index: 0, kind: input, shape index: {}]   ;;  %s1810_s2 = inlined_call_operand.vmem [shape: bf16[4,32,128], index: 2, kind: output, shape index: {}]  }
   0x1   :  { %v1327_v0 = vld [vmem:[%s1808_s1 + $0x78] sm:$0xff]   ;;  %v1331_v4 = vld [vmem:[%s1808_s1 + $0x70] sm:$0xff]   ;;  %v1335_v8 = vld [vmem:[%s1808_s1 + $0x68] sm:$0xff]  }
   0x2   :  { %v1328_v1 = vld [vmem:[%s1808_s1 + $0xf8] sm:$0xff]   ;;  %1215 = vmatprep.subr.bf16.mxu0 %v1327_v0  ;;  %v1332_v5 = vld [vmem:[%s1808_s1 + $0xf0] sm:$0xff]   ;;  %v1336_v9 = vld [vmem:[%s1808_s1 + $0xe8] sm:$0xff]  }
   0x3   :  { %v1329_v2 = vld [vmem:[%s1808_s1 + $0x38] sm:$0xff]   ;;  %1243 = vmatprep.subr.bf16.mxu1 %v1328_v1  ;;  %v1333_v6 = vld [vmem:[%s1808_s1 + $0x30] sm:$0xff]   ;;  %v1337_v10 = vld [vmem:[%s1808_s1 + $0x28] sm:$0xff]  }
   0x4   :  { %v1330_v3 = vld [vmem:[%s1808_s1 + $0xb8] sm:$0xff]   ;;  %1216 = vmatpush3.bf16.msra.mxu0 %v1329_v2  ;;  %v1334_v7 = vld [vmem:[%s1808_s1 + $0xb0] sm:$0xff]   ;;  %v1338_v11 = vld [vmem:[%s1808_s1 + $0xa8] sm:$0xff]  }
   0x5   :  { %1244 = vmatpush3.bf16.msra.mxu1 %v1330_v3  ;;  %1217 = vmatprep.subr.bf16.mxu0 %v1331_v4  ;;  %v1339_v12 = vld [vmem:[%s1808_s1 + $0x60] sm:$0xff]   ;;  %v1343_v16 = vld [vmem:[%s1808_s1 + $0x58] sm:$0xff]   ;;  %v1347_v20 = vld [vmem:[%s1808_s1 + $0x50] sm:$0xff]  }
   0x6   :  { %1245 = vmatprep.subr.bf16.mxu1 %v1332_v5  ;;  %v1340_v13 = vld [vmem:[%s1808_s1 + $0xe0] sm:$0xff]   ;;  %v1344_v17 = vld [vmem:[%s1808_s1 + $0xd8] sm:$0xff]   ;;  %v1348_v21 = vld [vmem:[%s1808_s1 + $0xd0] sm:$0xff]  }
   0x7   :  { %v1341_v14 = vld [vmem:[%s1808_s1 + $0x20] sm:$0xff]   ;;  %v1345_v18 = vld [vmem:[%s1808_s1 + $0x18] sm:$0xff]   ;;  %v1349_v22 = vld [vmem:[%s1808_s1 + $0x10] sm:$0xff]  }
   0x8   :  { %1218 = vmatpush3.bf16.msra.mxu0 %v1333_v6  ;;  %v1342_v15 = vld [vmem:[%s1808_s1 + $0xa0] sm:$0xff]   ;;  %v1346_v19 = vld [vmem:[%s1808_s1 + $0x98] sm:$0xff]   ;;  %v1350_v23 = vld [vmem:[%s1808_s1 + $0x90] sm:$0xff]  }
   0x9   :  { %1246 = vmatpush3.bf16.msra.mxu1 %v1334_v7  ;;  %1219 = vmatprep.subr.bf16.mxu0 %v1335_v8  ;;  %v1351_v24 = vld [vmem:[%s1808_s1 + $0x48] sm:$0xff]   ;;  %v1355_v28 = vld [vmem:[%s1808_s1 + $0x40] sm:$0xff]   ;;  %v1365_v36 = vld [vmem:[%s1808_s1 + $0x178] sm:$0xff]  }
   0xa   :  { %1247 = vmatprep.subr.bf16.mxu1 %v1336_v9  ;;  %v1352_v25 = vld [vmem:[%s1808_s1 + $0xc8] sm:$0xff]   ;;  %v1356_v29 = vld [vmem:[%s1808_s1 + $0xc0] sm:$0xff]   ;;  %v1366_v37 = vld [vmem:[%s1808_s1 + $0x1f8] sm:$0xff]  }
   0xb   :  { %v1353_v26 = vld [vmem:[%s1808_s1 + $0x8] sm:$0xff]   ;;  %v1357_v30 = vld [vmem:[%s1808_s1] sm:$0xff]   ;;  %v1367_v38 = vld [vmem:[%s1808_s1 + $0x138] sm:$0xff]  }
   0xc   :  { %1220 = vmatpush3.bf16.msra.mxu0 %v1337_v10  ;;  %v1354_v27 = vld [vmem:[%s1808_s1 + $0x88] sm:$0xff]   ;;  %v1358_v31 = vld [vmem:[%s1808_s1 + $0x80] sm:$0xff]   ;;  %v1368_v39 = vld [vmem:[%s1808_s1 + $0x1b8] sm:$0xff]  }
   0xd   :  { %1248 = vmatpush3.bf16.msra.mxu1 %v1338_v11  ;;  %1221 = vmatprep.subr.bf16.mxu0 %v1339_v12  ;;  %v1359_v32 = vld [vmem:[%s1809_s0] ss:$8 sps:$4 sm:$0xff]   ;;  %v1361_v33 = vld [vmem:[%s1809_s0 + $0x4] ss:$8 sps:$4 sm:$0xff]   ;;  %v1369_v40 = vld [vmem:[%s1808_s1 + $0x170] sm:$0xff]  }
   0xe   :  { %1249 = vmatprep.subr.bf16.mxu1 %v1340_v13  ;;  %v1362_v34 = vld [vmem:[%s1809_s0 + $0x20] ss:$8 sps:$4 sm:$0xff]   ;;  %v1364_v35 = vld [vmem:[%s1809_s0 + $0x24] ss:$8 sps:$4 sm:$0xff]   ;;  %304 = vmatprep.mubr.bf16.mxu0 %v1361_v33  ;;  %v1370_v41 = vld [vmem:[%s1808_s1 + $0x1f0] sm:$0xff]  }
   0xf   :  { %469 = vmatprep.mubr.bf16.mxu1 %v1364_v35  ;;  %v1371_v42 = vld [vmem:[%s1808_s1 + $0x130] sm:$0xff]   ;;  %v1379_v48 = vld [vmem:[%s1808_s1 + $0x168] sm:$0xff]   ;;  %v1383_v52 = vld [vmem:[%s1808_s1 + $0x160] sm:$0xff]  }
  0x10   :  { %1222 = vmatpush3.bf16.msra.mxu0 %v1341_v14  ;;  %v1372_v43 = vld [vmem:[%s1808_s1 + $0x1b0] sm:$0xff]   ;;  %v1380_v49 = vld [vmem:[%s1808_s1 + $0x1e8] sm:$0xff]   ;;  %v1384_v53 = vld [vmem:[%s1808_s1 + $0x1e0] sm:$0xff]  }
  0x11   :  { %1250 = vmatpush3.bf16.msra.mxu1 %v1342_v15  ;;  %1223 = vmatprep.subr.bf16.mxu0 %v1343_v16  ;;  %v1373_v44 = vld [vmem:[%s1809_s0 + $0x14] ss:$8 sps:$4 sm:$0xff]   ;;  %v1377_v46 = vld [vmem:[%s1809_s0 + $0x10] ss:$8 sps:$4 sm:$0xff]   ;;  %v1381_v50 = vld [vmem:[%s1808_s1 + $0x128] sm:$0xff]  }
  0x12   :  { %1251 = vmatprep.subr.bf16.mxu1 %v1344_v17  ;;  %v1375_v45 = vld [vmem:[%s1809_s0 + $0x34] ss:$8 sps:$4 sm:$0xff]   ;;  %v1378_v47 = vld [vmem:[%s1809_s0 + $0x30] ss:$8 sps:$4 sm:$0xff]   ;;  %v1382_v51 = vld [vmem:[%s1808_s1 + $0x1a8] sm:$0xff]  }
  0x13   :  { %v1385_v54 = vld [vmem:[%s1808_s1 + $0x120] sm:$0xff]   ;;  %v1387_v56 = vld [vmem:[%s1808_s1 + $0x158] sm:$0xff]   ;;  %v1391_v60 = vld [vmem:[%s1808_s1 + $0x150] sm:$0xff]  }
  0x14   :  { %1224 = vmatpush3.bf16.msra.mxu0 %v1345_v18  ;;  %v1386_v55 = vld [vmem:[%s1808_s1 + $0x1a0] sm:$0xff]   ;;  %v1388_v57 = vld [vmem:[%s1808_s1 + $0x1d8] sm:$0xff]   ;;  %v1392_v61 = vld [vmem:[%s1808_s1 + $0x1d0] sm:$0xff]  }
  0x15   :  { %1252 = vmatpush3.bf16.msra.mxu1 %v1346_v19  ;;  %1225 = vmatprep.subr.bf16.mxu0 %v1347_v20  ;;  %v1389_v58 = vld [vmem:[%s1808_s1 + $0x118] sm:$0xff]   ;;  %v1393_v62 = vld [vmem:[%s1808_s1 + $0x110] sm:$0xff]   ;;  %v1395_v0 = vld [vmem:[%s1808_s1 + $0x148] sm:$0xff]  }
  0x16   :  { %1253 = vmatprep.subr.bf16.mxu1 %v1348_v21  ;;  %v1390_v59 = vld [vmem:[%s1808_s1 + $0x198] sm:$0xff]   ;;  %v1394_v63 = vld [vmem:[%s1808_s1 + $0x190] sm:$0xff]   ;;  %v1396_v1 = vld [vmem:[%s1808_s1 + $0x1c8] sm:$0xff]  }
  0x17   :  { %v1397_v2 = vld [vmem:[%s1808_s1 + $0x108] sm:$0xff]   ;;  %v1399_v4 = vld [vmem:[%s1808_s1 + $0x140] sm:$0xff]   ;;  %v1409_v12 = vld [vmem:[%s1809_s0 + $0x54] ss:$8 sps:$4 sm:$0xff]  }
  0x18   :  { %1226 = vmatpush3.bf16.msra.mxu0 %v1349_v22  ;;  %v1398_v3 = vld [vmem:[%s1808_s1 + $0x188] sm:$0xff]   ;;  %v1400_v5 = vld [vmem:[%s1808_s1 + $0x1c0] sm:$0xff]   ;;  %v1411_v13 = vld [vmem:[%s1809_s0 + $0x74] ss:$8 sps:$4 sm:$0xff]  }
  0x19   :  { %1254 = vmatpush3.bf16.msra.mxu1 %v1350_v23  ;;  %1227 = vmatprep.subr.bf16.mxu0 %v1351_v24  ;;  %v1401_v6 = vld [vmem:[%s1808_s1 + $0x100] sm:$0xff]   ;;  %v1413_v14 = vld [vmem:[%s1809_s0 + $0x50] ss:$8 sps:$4 sm:$0xff]  }
  0x1a   :  { %1255 = vmatprep.subr.bf16.mxu1 %v1352_v25  ;;  %v1402_v7 = vld [vmem:[%s1808_s1 + $0x180] sm:$0xff]   ;;  %v1414_v15 = vld [vmem:[%s1809_s0 + $0x70] ss:$8 sps:$4 sm:$0xff]  }
  0x1b   :  { %v1403_v8 = vld [vmem:[%s1809_s0 + $0x40] ss:$8 sps:$4 sm:$0xff]   ;;  %v1405_v9 = vld [vmem:[%s1809_s0 + $0x44] ss:$8 sps:$4 sm:$0xff]  }
  0x1c   :  { %1228 = vmatpush3.bf16.msra.mxu0 %v1353_v26  ;;  %v1406_v10 = vld [vmem:[%s1809_s0 + $0x60] ss:$8 sps:$4 sm:$0xff]   ;;  %v1408_v11 = vld [vmem:[%s1809_s0 + $0x64] ss:$8 sps:$4 sm:$0xff]  }
  0x1d   :  { %1256 = vmatpush3.bf16.msra.mxu1 %v1354_v27  ;;  %1229 = vmatprep.subr.bf16.mxu0 %v1355_v28 }
  0x1e   :  { %1257 = vmatprep.subr.bf16.mxu1 %v1356_v29 }
  0x20   :  { %1230 = vmatpush3.bf16.msra.mxu0 %v1357_v30 }
  0x21   :  { %1258 = vmatpush3.bf16.msra.mxu1 %v1358_v31  ;;  %1271 = vmatprep.subr.bf16.mxu0 %v1365_v36 }
  0x22   :  { %1299 = vmatprep.subr.bf16.mxu1 %v1366_v37 }
  0x23   :  { %305 = vmatmul.mubr.bf16.vlgmr.msra.gmra.mxu0 %v1359_v32 }
  0x24   :  { %470 = vmatmul.mubr.bf16.vlgmr.msra.gmra.mxu1 %v1362_v34  ;;  %1272 = vmatpush3.bf16.msra.mxu0 %v1367_v38 }
  0x25   :  { %1300 = vmatpush3.bf16.msra.mxu1 %v1368_v39  ;;  %1273 = vmatprep.subr.bf16.mxu0 %v1369_v40 }
  0x26   :  { %1301 = vmatprep.subr.bf16.mxu1 %v1370_v41  ;;  %312 = vmatprep.mubr.bf16.mxu0 %v1373_v44 }
  0x27   :  { %477 = vmatprep.mubr.bf16.mxu1 %v1375_v45 }
  0x28   :  { %1274 = vmatpush3.bf16.msra.mxu0 %v1371_v42 }
  0x29   :  { %1302 = vmatpush3.bf16.msra.mxu1 %v1372_v43  ;;  %1275 = vmatprep.subr.bf16.mxu0 %v1379_v48 }
  0x2a   :  { %1303 = vmatprep.subr.bf16.mxu1 %v1380_v49 }
  0x2b   :  { %313 = vmatmul.mubr.bf16.gmra.mxu0 %v1377_v46 }
  0x2c   :  { %478 = vmatmul.mubr.bf16.gmra.mxu1 %v1378_v47  ;;  %1276 = vmatpush3.bf16.msra.mxu0 %v1381_v50 }
  0x2d   :  { %1304 = vmatpush3.bf16.msra.mxu1 %v1382_v51  ;;  %1277 = vmatprep.subr.bf16.mxu0 %v1383_v52 }
  0x2e   :  { %1305 = vmatprep.subr.bf16.mxu1 %v1384_v53  ;;  %634 = vmatprep.mubr.bf16.mxu0 %v1405_v9 }
  0x2f   :  { %799 = vmatprep.mubr.bf16.mxu1 %v1408_v11 }
  0x30   :  { %1278 = vmatpush3.bf16.msra.mxu0 %v1385_v54 }
  0x31   :  { %1306 = vmatpush3.bf16.msra.mxu1 %v1386_v55  ;;  %1279 = vmatprep.subr.bf16.mxu0 %v1387_v56 }
  0x32   :  { %1307 = vmatprep.subr.bf16.mxu1 %v1388_v57 }
  0x34   :  { %1280 = vmatpush3.bf16.msra.mxu0 %v1389_v58 }
  0x35   :  { %1308 = vmatpush3.bf16.msra.mxu1 %v1390_v59  ;;  %1281 = vmatprep.subr.bf16.mxu0 %v1391_v60 }
  0x36   :  { %1309 = vmatprep.subr.bf16.mxu1 %v1392_v61 }
  0x38   :  { %1282 = vmatpush3.bf16.msra.mxu0 %v1393_v62 }
  0x39   :  { %1310 = vmatpush3.bf16.msra.mxu1 %v1394_v63  ;;  %1283 = vmatprep.subr.bf16.mxu0 %v1395_v0 }
  0x3a   :  { %1311 = vmatprep.subr.bf16.mxu1 %v1396_v1 }
  0x3c   :  { %1284 = vmatpush3.bf16.msra.mxu0 %v1397_v2 }
  0x3d   :  { %1312 = vmatpush3.bf16.msra.mxu1 %v1398_v3  ;;  %1285 = vmatprep.subr.bf16.mxu0 %v1399_v4 }
  0x3e   :  { %1313 = vmatprep.subr.bf16.mxu1 %v1400_v5 }
  0x40   :  { %1286 = vmatpush3.bf16.msra.mxu0 %v1401_v6 }
  0x41   :  { %1314 = vmatpush3.bf16.msra.mxu1 %v1402_v7 }
  0x43   :  { %635 = vmatmul.mubr.bf16.vlgmr.msra.gmra.mxu0 %v1403_v8 }
  0x44   :  { %800 = vmatmul.mubr.bf16.vlgmr.msra.gmra.mxu1 %v1406_v10  ;;  %642 = vmatprep.mubr.bf16.mxu0 %v1409_v12 }
  0x45   :  { %807 = vmatprep.mubr.bf16.mxu1 %v1411_v13 }
  0x4b   :  { %643 = vmatmul.mubr.bf16.gmra.mxu0 %v1413_v14 }
  0x4c   :  { %808 = vmatmul.mubr.bf16.gmra.mxu1 %v1414_v15 }
  0xe3   :  { %v1231_v16 = vpop.f32.mrf.mxu0 }
  0xe4   :  { %v1259_v17 = vpop.f32.mrf.mxu1 }
  0xe5   :  { %v1232_v18 = vpop.f32.mrf.mxu0 }
  0xe6   :  { %v1260_v19 = vpop.f32.mrf.mxu1  ;;  %v1676_v34 = vadd.f32 %v1232_v18, %v1231_v16 }
  0xe7   :  { %v1234_v20 = vpop.f32.mrf.mxu0  ;;  %v1678_v35 = vadd.f32 %v1260_v19, %v1259_v17 }
  0xe8   :  { %v1262_v21 = vpop.f32.mrf.mxu1 }
  0xe9   :  { %v1235_v22 = vpop.f32.mrf.mxu0 }
  0xea   :  { %v1263_v23 = vpop.f32.mrf.mxu1  ;;  %v1672_v30 = vadd.f32 %v1235_v22, %v1234_v20 }
  0xeb   :  { %v1237_v24 = vpop.f32.mrf.mxu0  ;;  %v1674_v31 = vadd.f32 %v1263_v23, %v1262_v21 }
  0xec   :  { %v1265_v25 = vpop.f32.mrf.mxu1  ;;  %v816_v38 = vadd.f32 %v1672_v30, %v1676_v34 }
  0xed   :  { %v1238_v26 = vpop.f32.mrf.mxu0  ;;  %v825_v39 = vadd.f32 %v1674_v31, %v1678_v35 }
  0xee   :  { %v1266_v27 = vpop.f32.mrf.mxu1  ;;  %v1680_v36 = vadd.f32 %v1238_v26, %v1237_v24 }
  0xef   :  { %v1240_v28 = vpop.f32.mrf.mxu0  ;;  %v1682_v37 = vadd.f32 %v1266_v27, %v1265_v25 }
  0xf0   :  { %v1268_v29 = vpop.f32.mrf.mxu1  ;;  %v817_v42 = vadd.f32 %v1680_v36, %v816_v38 }
  0xf1   :  { %v1241_v32 = vpop.f32.mrf.mxu0  ;;  %v826_v43 = vadd.f32 %v1682_v37, %v825_v39 }
  0xf2   :  { %v1269_v33 = vpop.f32.mrf.mxu1  ;;  %v1688_v40 = vadd.f32 %v1241_v32, %v1240_v28 }
  0xf3   :  { %v1690_v41 = vadd.f32 %v1269_v33, %v1268_v29 }
  0xf4   :  { %v818_v44 = vadd.f32 %v1688_v40, %v817_v42 }
  0xf5   :  { %v827_v45 = vadd.f32 %v1690_v41, %v826_v43 }
  0xf6   :  { %v819_v49 = vrot.slane %v818_v44, 4 }
  0xf7   :  { %v828_v50 = vrot.slane %v827_v45, 4 }
  0xf8   :  { %v820_v55 = vadd.f32 %v819_v49, %v818_v44 }
  0xf9   :  { %v829_v56 = vadd.f32 %v828_v50, %v827_v45 }
  0xfa   :  { %v821_v63 = vrot.slane %v820_v55, 2 }
  0xfb   :  { %v830_v0 = vrot.slane %v829_v56, 2 }
  0xfc   :  { %v822_v11 = vadd.f32 %v821_v63, %v820_v55 }
  0xfd   :  { %v831_v12 = vadd.f32 %v830_v0, %v829_v56 }
  0xfe   :  { %v823_v20 = vrot.slane %v822_v11, 1 }
  0xff   :  { %v832_v21 = vrot.slane %v831_v12, 1 }
 0x100   :  { %v824_v26 = vadd.f32 %v823_v20, %v822_v11 }
 0x101   :  { %v833_v27 = vadd.f32 %v832_v21, %v831_v12 }
 0x102   :  { %v853_v38 = vmul.f32 0.03125, %v824_v26 }
 0x103   :  { %v1287_v46 = vpop.f32.mrf.mxu0  ;;  %v854_v39 = vmul.f32 0.03125, %v833_v27 }
 0x104   :  { %v1315_v47 = vpop.f32.mrf.mxu1 }
 0x105   :  { %v1288_v48 = vpop.f32.mrf.mxu0 }
 0x106   :  { %v1316_v51 = vpop.f32.mrf.mxu1  ;;  %v1289_v1 = vadd.f32 %v1288_v48, %v1287_v46  ;;  %v857_v46 = vadd.f32 %v854_v39, %v853_v38 }
 0x107   :  { %v1290_v52 = vpop.f32.mrf.mxu0  ;;  %v1317_v4 = vadd.f32 %v1316_v51, %v1315_v47 }
 0x108   :  { %v1318_v53 = vpop.f32.mrf.mxu1 }
 0x109   :  { %v1291_v54 = vpop.f32.mrf.mxu0 }
 0x10a   :  { %v1319_v57 = vpop.f32.mrf.mxu1  ;;  %v1292_v59 = vadd.f32 %v1291_v54, %v1290_v52 }
 0x10b   :  { %v1293_v58 = vpop.f32.mrf.mxu0  ;;  %v1320_v61 = vadd.f32 %v1319_v57, %v1318_v53 }
 0x10c   :  { %v1321_v60 = vpop.f32.mrf.mxu1  ;;  %v834_v7 = vadd.f32 %v1292_v59, %v1289_v1 }
 0x10d   :  { %v1294_v62 = vpop.f32.mrf.mxu0  ;;  %v843_v9 = vadd.f32 %v1320_v61, %v1317_v4 }
 0x10e   :  { %v1295_v2 = vadd.f32 %v1294_v62, %v1293_v58  ;;  %v1322_v3 = vpop.f32.mrf.mxu1 }
 0x10f   :  { %v1323_v5 = vadd.f32 %v1322_v3, %v1321_v60  ;;  %v1296_v6 = vpop.f32.mrf.mxu0 }
 0x110   :  { %v1324_v8 = vpop.f32.mrf.mxu1  ;;  %v835_v13 = vadd.f32 %v1295_v2, %v834_v7 }
 0x111   :  { %v1297_v10 = vpop.f32.mrf.mxu0  ;;  %v844_v16 = vadd.f32 %v1323_v5, %v843_v9 }
 0x112   :  { %v1298_v14 = vadd.f32 %v1297_v10, %v1296_v6  ;;  %v1325_v15 = vpop.f32.mrf.mxu1 }
 0x113   :  { %v1326_v17 = vadd.f32 %v1325_v15, %v1324_v8 }
 0x114   :  { %v836_v18 = vadd.f32 %v1298_v14, %v835_v13 }
 0x115   :  { %v845_v19 = vadd.f32 %v1326_v17, %v844_v16 }
 0x116   :  { %v837_v22 = vrot.slane %v836_v18, 4 }
 0x117   :  { %v846_v23 = vrot.slane %v845_v19, 4 }
 0x118   :  { %v838_v24 = vadd.f32 %v837_v22, %v836_v18 }
 0x119   :  { %v847_v25 = vadd.f32 %v846_v23, %v845_v19 }
 0x11a   :  { %v839_v28 = vrot.slane %v838_v24, 2 }
 0x11b   :  { %v848_v29 = vrot.slane %v847_v25, 2 }
 0x11c   :  { %v840_v32 = vadd.f32 %v839_v28, %v838_v24 }
 0x11d   :  { %v849_v33 = vadd.f32 %v848_v29, %v847_v25 }
 0x11e   :  { %v841_v42 = vrot.slane %v840_v32, 1 }
 0x11f   :  { %v850_v43 = vrot.slane %v849_v33, 1 }
 0x120   :  { %v842_v44 = vadd.f32 %v841_v42, %v840_v32 }
 0x121   :  { %v851_v45 = vadd.f32 %v850_v43, %v849_v33 }
 0x122   :  { %v855_v47 = vmul.f32 0.03125, %v842_v44 }
 0x123   :  { %v856_v49 = vmul.f32 0.03125, %v851_v45 }
 0x124   :  { %v858_v48 = vadd.f32 %v857_v46, %v855_v47 }
 0x126   :  { %v859_v50 = vadd.f32 %v858_v48, %v856_v49 }
 0x128   :  { %v861_v51 = vmul.f32 0.25, %v859_v50 }
 0x12a   :  { %v1697_v52 = vsub.f32 %v1676_v34, %v861_v51  ;;  %v1700_v53 = vsub.f32 %v1672_v30, %v861_v51  ;;  %v1703_v54 = vsub.f32 %v1678_v35, %v861_v51  ;;  %v1706_v55 = vsub.f32 %v1674_v31, %v861_v51 }
 0x12b   :  { %v1708_v56 = vsub.f32 %v1289_v1, %v861_v51  ;;  %v1710_v57 = vsub.f32 %v1292_v59, %v861_v51  ;;  %v1713_v58 = vsub.f32 %v1680_v36, %v861_v51  ;;  %v1716_v60 = vsub.f32 %v1682_v37, %v861_v51 }
 0x12c   :  { %v1718_v34 = vsub.f32 %v1317_v4, %v861_v51  ;;  %v1720_v30 = vsub.f32 %v1320_v61, %v861_v51  ;;  %v1723_v35 = vsub.f32 %v1688_v40, %v861_v51  ;;  %v1725_v62 = vsub.f32 %v1295_v2, %v861_v51 }
 0x12d   :  { %v878_v31 = vmul.f32 %v1697_v52, %v1697_v52  ;;  %v879_v59 = vmul.f32 %v1700_v53, %v1700_v53  ;;  %v1732_v36 = vsub.f32 %v1690_v41, %v861_v51  ;;  %v1734_v37 = vsub.f32 %v1323_v5, %v861_v51 }
 0x12e   :  { %v882_v61 = vmul.f32 %v1703_v54, %v1703_v54  ;;  %v883_v40 = vmul.f32 %v1706_v55, %v1706_v55  ;;  %v1740_v63 = vsub.f32 %v1298_v14, %v861_v51  ;;  %v1742_v0 = vsub.f32 %v1326_v17, %v861_v51 }
 0x12f   :  { %v886_v1 = vmul.f32 %v1708_v56, %v1708_v56  ;;  %v887_v2 = vmul.f32 %v1710_v57, %v1710_v57  ;;  %v880_v41 = vmul.f32 %v1713_v58, %v1713_v58  ;;  %v884_v3 = vmul.f32 %v1716_v60, %v1716_v60 }
 0x130   :  { %v890_v4 = vmul.f32 %v1718_v34, %v1718_v34  ;;  %v891_v5 = vmul.f32 %v1720_v30, %v1720_v30  ;;  %v888_v6 = vmul.f32 %v1725_v62, %v1725_v62  ;;  %v894_v7 = vadd.f32 %v879_v59, %v878_v31 }
 0x131   :  { %v903_v8 = vadd.f32 %v883_v40, %v882_v61  ;;  %v912_v9 = vadd.f32 %v887_v2, %v886_v1  ;;  %v881_v10 = vmul.f32 %v1723_v35, %v1723_v35  ;;  %v885_v11 = vmul.f32 %v1732_v36, %v1732_v36 }
 0x132   :  { %v892_v12 = vmul.f32 %v1734_v37, %v1734_v37  ;;  %v921_v13 = vadd.f32 %v891_v5, %v890_v4  ;;  %v889_v14 = vmul.f32 %v1740_v63, %v1740_v63  ;;  %v895_v15 = vadd.f32 %v894_v7, %v880_v41 }
 0x133   :  { %v904_v16 = vadd.f32 %v903_v8, %v884_v3  ;;  %v913_v17 = vadd.f32 %v912_v9, %v888_v6  ;;  %v893_v18 = vmul.f32 %v1742_v0, %v1742_v0 }
 0x134   :  { %v922_v19 = vadd.f32 %v921_v13, %v892_v12  ;;  %v896_v20 = vadd.f32 %v895_v15, %v881_v10 }
 0x135   :  { %v905_v21 = vadd.f32 %v904_v16, %v885_v11  ;;  %v914_v22 = vadd.f32 %v913_v17, %v889_v14 }
 0x136   :  { %v923_v23 = vadd.f32 %v922_v19, %v893_v18  ;;  %v897_v24 = vrot.slane %v896_v20, 4 }
 0x137   :  { %v906_v25 = vrot.slane %v905_v21, 4  ;;  %v915_v26 = vrot.slane %v914_v22, 4 }
 0x138   :  { %v924_v27 = vrot.slane %v923_v23, 4  ;;  %v898_v28 = vadd.f32 %v897_v24, %v896_v20 }
 0x139   :  { %v907_v29 = vadd.f32 %v906_v25, %v905_v21  ;;  %v916_v32 = vadd.f32 %v915_v26, %v914_v22 }
 0x13a   :  { %v925_v33 = vadd.f32 %v924_v27, %v923_v23  ;;  %v899_v38 = vrot.slane %v898_v28, 2 }
 0x13b   :  { %v908_v39 = vrot.slane %v907_v29, 2  ;;  %v917_v42 = vrot.slane %v916_v32, 2 }
 0x13c   :  { %v926_v43 = vrot.slane %v925_v33, 2  ;;  %v900_v44 = vadd.f32 %v899_v38, %v898_v28 }
 0x13d   :  { %v909_v45 = vadd.f32 %v908_v39, %v907_v29  ;;  %v918_v46 = vadd.f32 %v917_v42, %v916_v32 }
 0x13e   :  { %v927_v47 = vadd.f32 %v926_v43, %v925_v33  ;;  %v901_v48 = vrot.slane %v900_v44, 1 }
 0x13f   :  { %v910_v49 = vrot.slane %v909_v45, 1  ;;  %v919_v50 = vrot.slane %v918_v46, 1 }
 0x140   :  { %v928_v51 = vrot.slane %v927_v47, 1  ;;  %v902_v31 = vadd.f32 %v901_v48, %v900_v44 }
 0x141   :  { %v911_v59 = vadd.f32 %v910_v49, %v909_v45  ;;  %v920_v61 = vadd.f32 %v919_v50, %v918_v46 }
 0x142   :  { %v929_v40 = vadd.f32 %v928_v51, %v927_v47  ;;  %v930_v1 = vmul.f32 0.03125, %v902_v31 }
 0x143   :  { %v931_v2 = vmul.f32 0.03125, %v911_v59  ;;  %v932_v41 = vmul.f32 0.03125, %v920_v61 }
 0x144   :  { %v933_v4 = vmul.f32 0.03125, %v929_v40 }
 0x145   :  { %v934_v3 = vadd.f32 %v931_v2, %v930_v1 }
 0x147   :  { %v935_v5 = vadd.f32 %v934_v3, %v932_v41 }
 0x149   :  { %v936_v6 = vadd.f32 %v935_v5, %v933_v4 }
 0x14b   :  { %v937_v7 = vmul.f32 0.25, %v936_v6 }
 0x14d   :  { %v938_v8 = vadd.f32 1e-05, %v937_v7 }
 0x14f   :  { %1415 = vrsqrt.f32 %v938_v8 }
 0x15c   :  { %v1416_v9 = vpop.eup %1415 }
 0x15d   :  { %v940_v10 = vmul.f32 %v1416_v9, %v1697_v52  ;;  %v941_v11 = vmul.f32 %v1416_v9, %v1700_v53  ;;  %v942_v12 = vmul.f32 %v1416_v9, %v1713_v58  ;;  %v943_v13 = vmul.f32 %v1416_v9, %v1723_v35 }
 0x15e   :  { %v944_v14 = vmul.f32 %v1416_v9, %v1703_v54  ;;  %v945_v15 = vmul.f32 %v1416_v9, %v1706_v55  ;;  %v946_v16 = vmul.f32 %v1416_v9, %v1716_v60  ;;  %v947_v17 = vmul.f32 %v1416_v9, %v1732_v36 }
 0x15f   :  { %v948_v18 = vmul.f32 %v1416_v9, %v1708_v56  ;;  %v949_v19 = vmul.f32 %v1416_v9, %v1710_v57  ;;  %v950_v52 = vmul.f32 %v1416_v9, %v1725_v62  ;;  %v951_v53 = vmul.f32 %v1416_v9, %v1740_v63 }
 0x160   :  { %v952_v58 = vmul.f32 %v1416_v9, %v1718_v34  ;;  %v953_v35 = vmul.f32 %v1416_v9, %v1720_v30  ;;  %v954_v54 = vmul.f32 %v1416_v9, %v1734_v37  ;;  %v955_v55 = vmul.f32 %v1416_v9, %v1742_v0 }
 0x161   :  { %v956_v20 = vmax.f32 %v940_v10, 0.0  ;;  %v957_v60 = vmax.f32 %v941_v11, 0.0  ;;  %v958_v21 = vmax.f32 %v942_v12, 0.0  ;;  %v959_v36 = vmax.f32 %v943_v13, 0.0 }
 0x162   :  { %v960_v22 = vmax.f32 %v944_v14, 0.0  ;;  %v961_v56 = vmax.f32 %v945_v15, 0.0  ;;  %v962_v23 = vmax.f32 %v946_v16, 0.0  ;;  %v963_v57 = vmax.f32 %v947_v17, 0.0 }
 0x163   :  { %v964_v24 = vmax.f32 %v948_v18, 0.0  ;;  %v965_v62 = vmax.f32 %v949_v19, 0.0  ;;  %v966_v25 = vmax.f32 %v950_v52, 0.0  ;;  %v967_v63 = vmax.f32 %v951_v53, 0.0 }
 0x164   :  { %v968_v26 = vmax.f32 %v952_v58, 0.0  ;;  %v969_v34 = vmax.f32 %v953_v35, 0.0  ;;  %v970_v27 = vmax.f32 %v954_v54, 0.0  ;;  %v971_v30 = vmax.f32 %v955_v55, 0.0 }
 0x165   :  { %v1171_v28 = vpack.c.bf16 %v957_v60, %v956_v20  ;;  %v1176_v37 = vpack.c.bf16 %v959_v36, %v958_v21  ;;  %v1181_v29 = vpack.c.bf16 %v961_v56, %v960_v22  ;;  %v1186_v0 = vpack.c.bf16 %v963_v57, %v962_v23 }
 0x166   :  { %v1191_v32 = vpack.c.bf16 %v965_v62, %v964_v24  ;;  %v1196_v33 = vpack.c.bf16 %v967_v63, %v966_v25  ;;  %v1201_v38 = vpack.c.bf16 %v969_v34, %v968_v26  ;;  %v1206_v39 = vpack.c.bf16 %v971_v30, %v970_v27 }
 0x167   :  { %1172 = vst [vmem:[%s1810_s2] sm:$0xff] %v1171_v28   ;;  %1208 = vst [vmem:[%s1810_s2 + $0x8] sm:$0xff] %v1176_v37  }
 0x168   :  { %1209 = vst [vmem:[%s1810_s2 + $0x10] sm:$0xff] %v1181_v29   ;;  %1210 = vst [vmem:[%s1810_s2 + $0x18] sm:$0xff] %v1186_v0  }
 0x169   :  { %1211 = vst [vmem:[%s1810_s2 + $0x20] sm:$0xff] %v1191_v32   ;;  %1212 = vst [vmem:[%s1810_s2 + $0x28] sm:$0xff] %v1196_v33  }
 0x16a   :  { %1213 = vst [vmem:[%s1810_s2 + $0x30] sm:$0xff] %v1201_v38   ;;  %1214 = vst [vmem:[%s1810_s2 + $0x38] sm:$0xff] %v1206_v39  }

// kernel: generator_forward.7
= control target key start
LH: loop header
LB: loop body
LE: loop exit
PB: predicated region body
PF: predicated region fallthrough
CT: control target
= control target key end

     0   :  { %s3534_s1 = inlined_call_operand.vmem [shape: bf16[4,128,128], index: 1, kind: input, shape index: {}]   ;;  %s3535_s0 = inlined_call_operand.vmem [shape: bf16[4,128,128], index: 0, kind: input, shape index: {}]   ;;  %s3536_s2 = inlined_call_operand.vmem [shape: bf16[4,128,128], index: 2, kind: output, shape index: {}]  }
   0x1   :  { %v2255_v0 = vld [vmem:[%s3534_s1 + $0x38] sm:$0xff]   ;;  %v2257_v2 = vld [vmem:[%s3534_s1 + $0x30] sm:$0xff]   ;;  %v2259_v4 = vld [vmem:[%s3534_s1 + $0x28] sm:$0xff]  }
   0x2   :  { %v2256_v1 = vld [vmem:[%s3534_s1 + $0x78] sm:$0xff]   ;;  %2127 = vmatprep.subr.bf16.mxu0 %v2255_v0  ;;  %v2258_v3 = vld [vmem:[%s3534_s1 + $0x70] sm:$0xff]   ;;  %v2260_v5 = vld [vmem:[%s3534_s1 + $0x68] sm:$0xff]  }
   0x3   :  { %2159 = vmatprep.subr.bf16.mxu1 %v2256_v1  ;;  %2128 = vmatpush3.bf16.msra.mxu0 %v2255_v0  ;;  %v2261_v6 = vld [vmem:[%s3534_s1 + $0x20] sm:$0xff]   ;;  %v2263_v8 = vld [vmem:[%s3534_s1 + $0x18] sm:$0xff]   ;;  %v2265_v10 = vld [vmem:[%s3534_s1 + $0x10] sm:$0xff]  }
   0x4   :  { %2160 = vmatpush3.bf16.msra.mxu1 %v2256_v1  ;;  %2129 = vmatprep.subr.bf16.mxu0 %v2257_v2  ;;  %v2262_v7 = vld [vmem:[%s3534_s1 + $0x60] sm:$0xff]   ;;  %v2264_v9 = vld [vmem:[%s3534_s1 + $0x58] sm:$0xff]   ;;  %v2266_v11 = vld [vmem:[%s3534_s1 + $0x50] sm:$0xff]  }
   0x5   :  { %2161 = vmatprep.subr.bf16.mxu1 %v2258_v3  ;;  %v2271_v12 = vld [vmem:[%s3535_s0] sm:$0xff]   ;;  %v2267_v14 = vld [vmem:[%s3534_s1 + $0x8] sm:$0xff]   ;;  %v2275_v19 = vld [vmem:[%s3534_s1 + $0xb8] sm:$0xff]  }
   0x6   :  { %v2272_v13 = vld [vmem:[%s3535_s0 + $0x40] sm:$0xff]   ;;  %2143 = vmatprep.mubr.bf16.mxu0 %v2271_v12  ;;  %v2268_v15 = vld [vmem:[%s3534_s1 + $0x48] sm:$0xff]   ;;  %v2276_v20 = vld [vmem:[%s3534_s1 + $0xf8] sm:$0xff]  }
   0x7   :  { %2130 = vmatpush3.bf16.msra.mxu0 %v2257_v2  ;;  %2175 = vmatprep.mubr.bf16.mxu1 %v2272_v13  ;;  %v2269_v16 = vld [vmem:[%s3534_s1] sm:$0xff]   ;;  %v2273_v18 = vld [vmem:[%s3535_s0 + $0x8] sm:$0xff]   ;;  %v2277_v22 = vld [vmem:[%s3534_s1 + $0xb0] sm:$0xff]  }
   0x8   :  { %2162 = vmatpush3.bf16.msra.mxu1 %v2258_v3  ;;  %2131 = vmatprep.subr.bf16.mxu0 %v2259_v4  ;;  %v2270_v17 = vld [vmem:[%s3534_s1 + $0x40] sm:$0xff]   ;;  %v2274_v21 = vld [vmem:[%s3535_s0 + $0x48] sm:$0xff]   ;;  %v2278_v23 = vld [vmem:[%s3534_s1 + $0xf0] sm:$0xff]  }
   0x9   :  { %2163 = vmatprep.subr.bf16.mxu1 %v2260_v5  ;;  %v2279_v24 = vld [vmem:[%s3535_s0 + $0x10] sm:$0xff]   ;;  %v2281_v26 = vld [vmem:[%s3535_s0 + $0x18] sm:$0xff]   ;;  %v2283_v27 = vld [vmem:[%s3534_s1 + $0xa8] sm:$0xff]  }
   0xa   :  { %v2280_v25 = vld [vmem:[%s3535_s0 + $0x50] sm:$0xff]   ;;  %v2284_v28 = vld [vmem:[%s3534_s1 + $0xe8] sm:$0xff]   ;;  %v2282_v29 = vld [vmem:[%s3535_s0 + $0x58] sm:$0xff]  }
   0xb   :  { %2132 = vmatpush3.bf16.msra.mxu0 %v2259_v4  ;;  %v2285_v30 = vld [vmem:[%s3534_s1 + $0xa0] sm:$0xff]   ;;  %v2289_v34 = vld [vmem:[%s3535_s0 + $0x28] sm:$0xff]   ;;  %v2291_v35 = vld [vmem:[%s3534_s1 + $0x98] sm:$0xff]  }
   0xc   :  { %2164 = vmatpush3.bf16.msra.mxu1 %v2260_v5  ;;  %2133 = vmatprep.subr.bf16.mxu0 %v2261_v6  ;;  %v2286_v31 = vld [vmem:[%s3534_s1 + $0xe0] sm:$0xff]   ;;  %v2292_v36 = vld [vmem:[%s3534_s1 + $0xd8] sm:$0xff]   ;;  %v2290_v37 = vld [vmem:[%s3535_s0 + $0x68] sm:$0xff]  }
   0xd   :  { %2165 = vmatprep.subr.bf16.mxu1 %v2262_v7  ;;  %v2287_v32 = vld [vmem:[%s3535_s0 + $0x20] sm:$0xff]   ;;  %v2293_v38 = vld [vmem:[%s3534_s1 + $0x90] sm:$0xff]   ;;  %v2297_v42 = vld [vmem:[%s3535_s0 + $0x38] sm:$0xff]  }
   0xe   :  { %v2288_v33 = vld [vmem:[%s3535_s0 + $0x60] sm:$0xff]   ;;  %v2294_v39 = vld [vmem:[%s3534_s1 + $0xd0] sm:$0xff]   ;;  %v2299_v43 = vld [vmem:[%s3534_s1 + $0x88] sm:$0xff]  }
   0xf   :  { %2134 = vmatpush3.bf16.msra.mxu0 %v2261_v6  ;;  %v2295_v40 = vld [vmem:[%s3535_s0 + $0x30] sm:$0xff]   ;;  %v2300_v44 = vld [vmem:[%s3534_s1 + $0xc8] sm:$0xff]   ;;  %v2298_v45 = vld [vmem:[%s3535_s0 + $0x78] sm:$0xff]  }
  0x10   :  { %2166 = vmatpush3.bf16.msra.mxu1 %v2262_v7  ;;  %2135 = vmatprep.subr.bf16.mxu0 %v2263_v8  ;;  %v2296_v41 = vld [vmem:[%s3535_s0 + $0x70] sm:$0xff]   ;;  %v2301_v46 = vld [vmem:[%s3534_s1 + $0x80] sm:$0xff]   ;;  %v2305_v50 = vld [vmem:[%s3535_s0 + $0x88] sm:$0xff]  }
  0x11   :  { %2167 = vmatprep.subr.bf16.mxu1 %v2264_v9  ;;  %v2302_v47 = vld [vmem:[%s3534_s1 + $0xc0] sm:$0xff]   ;;  %v2306_v51 = vld [vmem:[%s3535_s0 + $0xc8] sm:$0xff]   ;;  %v2307_v52 = vld [vmem:[%s3535_s0 + $0x90] sm:$0xff]  }
  0x12   :  { %v2303_v48 = vld [vmem:[%s3535_s0 + $0x80] sm:$0xff]   ;;  %v2308_v53 = vld [vmem:[%s3535_s0 + $0xd0] sm:$0xff]   ;;  %v2309_v54 = vld [vmem:[%s3535_s0 + $0x98] sm:$0xff]  }
  0x13   :  { %2136 = vmatpush3.bf16.msra.mxu0 %v2263_v8  ;;  %v2304_v49 = vld [vmem:[%s3535_s0 + $0xc0] sm:$0xff]   ;;  %v2310_v55 = vld [vmem:[%s3535_s0 + $0xd8] sm:$0xff]   ;;  %v2313_v58 = vld [vmem:[%s3535_s0 + $0xa8] sm:$0xff]  }
  0x14   :  { %2168 = vmatpush3.bf16.msra.mxu1 %v2264_v9  ;;  %2137 = vmatprep.subr.bf16.mxu0 %v2265_v10  ;;  %v2311_v56 = vld [vmem:[%s3535_s0 + $0xa0] sm:$0xff]   ;;  %v2314_v59 = vld [vmem:[%s3535_s0 + $0xe8] sm:$0xff]   ;;  %v2315_v60 = vld [vmem:[%s3535_s0 + $0xb0] sm:$0xff]  }
  0x15   :  { %2169 = vmatprep.subr.bf16.mxu1 %v2266_v11  ;;  %v2312_v57 = vld [vmem:[%s3535_s0 + $0xe0] sm:$0xff]   ;;  %v2316_v61 = vld [vmem:[%s3535_s0 + $0xf0] sm:$0xff]   ;;  %v2317_v62 = vld [vmem:[%s3535_s0 + $0xb8] sm:$0xff]  }
  0x16   :  { %v2318_v63 = vld [vmem:[%s3535_s0 + $0xf8] sm:$0xff]  }
  0x17   :  { %2138 = vmatpush3.bf16.msra.mxu0 %v2265_v10 }
  0x18   :  { %2170 = vmatpush3.bf16.msra.mxu1 %v2266_v11  ;;  %2139 = vmatprep.subr.bf16.mxu0 %v2267_v14 }
  0x19   :  { %2171 = vmatprep.subr.bf16.mxu1 %v2268_v15 }
  0x1b   :  { %2140 = vmatpush3.bf16.msra.mxu0 %v2267_v14 }
  0x1c   :  { %2172 = vmatpush3.bf16.msra.mxu1 %v2268_v15  ;;  %2141 = vmatprep.subr.bf16.mxu0 %v2269_v16 }
  0x1d   :  { %2173 = vmatprep.subr.bf16.mxu1 %v2270_v17 }
  0x1f   :  { %2142 = vmatpush3.bf16.msra.mxu0 %v2269_v16 }
  0x20   :  { %2174 = vmatpush3.bf16.msra.mxu1 %v2270_v17  ;;  %2191 = vmatprep.subr.bf16.mxu0 %v2275_v19 }
  0x21   :  { %2223 = vmatprep.subr.bf16.mxu1 %v2276_v20 }
  0x22   :  { %2144 = vmatmul.mubr.bf16.vlgmr.msra.gmra.mxu0 %v2273_v18 }
  0x23   :  { %2176 = vmatmul.mubr.bf16.vlgmr.msra.gmra.mxu1 %v2274_v21  ;;  %2192 = vmatpush3.bf16.msra.mxu0 %v2275_v19 }
  0x24   :  { %2224 = vmatpush3.bf16.msra.mxu1 %v2276_v20  ;;  %2193 = vmatprep.subr.bf16.mxu0 %v2277_v22 }
  0x25   :  { %2225 = vmatprep.subr.bf16.mxu1 %v2278_v23  ;;  %2147 = vmatprep.mubr.bf16.mxu0 %v2279_v24 }
  0x26   :  { %2179 = vmatprep.mubr.bf16.mxu1 %v2280_v25 }
  0x27   :  { %2194 = vmatpush3.bf16.msra.mxu0 %v2277_v22 }
  0x28   :  { %2226 = vmatpush3.bf16.msra.mxu1 %v2278_v23  ;;  %2195 = vmatprep.subr.bf16.mxu0 %v2283_v27 }
  0x29   :  { %2227 = vmatprep.subr.bf16.mxu1 %v2284_v28 }
  0x2a   :  { %2148 = vmatmul.mubr.bf16.gmra.mxu0 %v2281_v26 }
  0x2b   :  { %2180 = vmatmul.mubr.bf16.gmra.mxu1 %v2282_v29  ;;  %2196 = vmatpush3.bf16.msra.mxu0 %v2283_v27 }
  0x2c   :  { %2228 = vmatpush3.bf16.msra.mxu1 %v2284_v28  ;;  %2197 = vmatprep.subr.bf16.mxu0 %v2285_v30 }
  0x2d   :  { %2229 = vmatprep.subr.bf16.mxu1 %v2286_v31  ;;  %2151 = vmatprep.mubr.bf16.mxu0 %v2287_v32 }
  0x2e   :  { %2183 = vmatprep.mubr.bf16.mxu1 %v2288_v33 }
  0x2f   :  { %2198 = vmatpush3.bf16.msra.mxu0 %v2285_v30 }
  0x30   :  { %2230 = vmatpush3.bf16.msra.mxu1 %v2286_v31  ;;  %2199 = vmatprep.subr.bf16.mxu0 %v2291_v35 }
  0x31   :  { %2231 = vmatprep.subr.bf16.mxu1 %v2292_v36 }
  0x32   :  { %2152 = vmatmul.mubr.bf16.gmra.mxu0 %v2289_v34 }
  0x33   :  { %2184 = vmatmul.mubr.bf16.gmra.mxu1 %v2290_v37  ;;  %2200 = vmatpush3.bf16.msra.mxu0 %v2291_v35 }
  0x34   :  { %2232 = vmatpush3.bf16.msra.mxu1 %v2292_v36  ;;  %2201 = vmatprep.subr.bf16.mxu0 %v2293_v38 }
  0x35   :  { %2233 = vmatprep.subr.bf16.mxu1 %v2294_v39  ;;  %2155 = vmatprep.mubr.bf16.mxu0 %v2295_v40 }
  0x36   :  { %2187 = vmatprep.mubr.bf16.mxu1 %v2296_v41 }
  0x37   :  { %2202 = vmatpush3.bf16.msra.mxu0 %v2293_v38 }
  0x38   :  { %2234 = vmatpush3.bf16.msra.mxu1 %v2294_v39  ;;  %2203 = vmatprep.subr.bf16.mxu0 %v2299_v43 }
  0x39   :  { %2235 = vmatprep.subr.bf16.mxu1 %v2300_v44 }
  0x3a   :  { %2156 = vmatmul.mubr.bf16.gmra.mxu0 %v2297_v42 }
  0x3b   :  { %2188 = vmatmul.mubr.bf16.gmra.mxu1 %v2298_v45  ;;  %2204 = vmatpush3.bf16.msra.mxu0 %v2299_v43 }
  0x3c   :  { %2236 = vmatpush3.bf16.msra.mxu1 %v2300_v44  ;;  %2205 = vmatprep.subr.bf16.mxu0 %v2301_v46 }
  0x3d   :  { %2237 = vmatprep.subr.bf16.mxu1 %v2302_v47  ;;  %2207 = vmatprep.mubr.bf16.mxu0 %v2303_v48 }
  0x3e   :  { %2239 = vmatprep.mubr.bf16.mxu1 %v2304_v49 }
  0x3f   :  { %2206 = vmatpush3.bf16.msra.mxu0 %v2301_v46 }
  0x40   :  { %2238 = vmatpush3.bf16.msra.mxu1 %v2302_v47 }
  0x42   :  { %2208 = vmatmul.mubr.bf16.vlgmr.msra.gmra.mxu0 %v2305_v50 }
  0x43   :  { %2240 = vmatmul.mubr.bf16.vlgmr.msra.gmra.mxu1 %v2306_v51  ;;  %2211 = vmatprep.mubr.bf16.mxu0 %v2307_v52 }
  0x44   :  { %2243 = vmatprep.mubr.bf16.mxu1 %v2308_v53 }
  0x4a   :  { %2212 = vmatmul.mubr.bf16.gmra.mxu0 %v2309_v54 }
  0x4b   :  { %2244 = vmatmul.mubr.bf16.gmra.mxu1 %v2310_v55  ;;  %2215 = vmatprep.mubr.bf16.mxu0 %v2311_v56 }
  0x4c   :  { %2247 = vmatprep.mubr.bf16.mxu1 %v2312_v57 }
  0x52   :  { %2216 = vmatmul.mubr.bf16.gmra.mxu0 %v2313_v58 }
  0x53   :  { %2248 = vmatmul.mubr.bf16.gmra.mxu1 %v2314_v59  ;;  %2219 = vmatprep.mubr.bf16.mxu0 %v2315_v60 }
  0x54   :  { %2251 = vmatprep.mubr.bf16.mxu1 %v2316_v61 }
  0x5a   :  { %2220 = vmatmul.mubr.bf16.gmra.mxu0 %v2317_v62 }
  0x5b   :  { %2252 = vmatmul.mubr.bf16.gmra.mxu1 %v2318_v63 }
  0xe2   :  { %v2528_v0 = vpop.f32.mrf.mxu0 }
  0xe3   :  { %v2530_v1 = vpop.f32.mrf.mxu1 }
  0xe4   :  { %v2532_v2 = vpop.f32.mrf.mxu0 }
  0xe5   :  { %v2534_v3 = vpop.f32.mrf.mxu1 }
  0xe6   :  { %v2536_v4 = vpop.f32.mrf.mxu0 }
  0xe7   :  { %v2538_v5 = vpop.f32.mrf.mxu1 }
  0xe8   :  { %v2540_v6 = vpop.f32.mrf.mxu0 }
  0xe9   :  { %v912_v7 = vadd.f32 %v2540_v6, %v2532_v2  ;;  %v2544_v8 = vpop.f32.mrf.mxu1 }
  0xea   :  { %v933_v9 = vadd.f32 %v2544_v8, %v2534_v3  ;;  %v2548_v10 = vpop.f32.mrf.mxu0 }
  0xeb   :  { %v913_v11 = vadd.f32 %v2528_v0, %v912_v7  ;;  %v2551_v12 = vpop.f32.mrf.mxu1 }
  0xec   :  { %v934_v13 = vadd.f32 %v2530_v1, %v933_v9  ;;  %v2554_v14 = vpop.f32.mrf.mxu0 }
  0xed   :  { %v914_v15 = vadd.f32 %v2536_v4, %v913_v11  ;;  %v2557_v16 = vpop.f32.mrf.mxu1 }
  0xee   :  { %v935_v17 = vadd.f32 %v2538_v5, %v934_v13  ;;  %v2560_v18 = vpop.f32.mrf.mxu0 }
  0xef   :  { %v915_v19 = vadd.f32 %v914_v15, %v2554_v14  ;;  %v2563_v20 = vpop.f32.mrf.mxu1 }
  0xf0   :  { %v936_v21 = vadd.f32 %v935_v17, %v2557_v16  ;;  %v2566_v22 = vpop.f32.mrf.mxu0 }
  0xf1   :  { %v2568_v23 = vpop.f32.mrf.mxu1  ;;  %v916_v24 = vadd.f32 %v915_v19, %v2566_v22 }
  0xf2   :  { %v937_v25 = vadd.f32 %v936_v21, %v2568_v23  ;;  %v2572_v26 = vpop.f32.mrf.mxu0 }
  0xf3   :  { %v2574_v27 = vpop.f32.mrf.mxu1  ;;  %v917_v30 = vadd.f32 %v2548_v10, %v916_v24 }
  0xf4   :  { %v2576_v28 = vpop.f32.mrf.mxu0  ;;  %v938_v31 = vadd.f32 %v2551_v12, %v937_v25 }
  0xf5   :  { %v2578_v29 = vpop.f32.mrf.mxu1  ;;  %v918_v36 = vadd.f32 %v2560_v18, %v917_v30 }
  0xf6   :  { %v2582_v32 = vpop.f32.mrf.mxu0  ;;  %v939_v37 = vadd.f32 %v2563_v20, %v938_v31 }
  0xf7   :  { %v2584_v33 = vpop.f32.mrf.mxu1  ;;  %v919_v42 = vadd.f32 %v918_v36, %v2576_v28 }
  0xf8   :  { %v2586_v34 = vpop.f32.mrf.mxu0  ;;  %v940_v43 = vadd.f32 %v939_v37, %v2578_v29 }
  0xf9   :  { %v2588_v35 = vpop.f32.mrf.mxu1  ;;  %v920_v48 = vadd.f32 %v919_v42, %v2586_v34 }
  0xfa   :  { %v2592_v38 = vpop.f32.mrf.mxu0  ;;  %v941_v49 = vadd.f32 %v940_v43, %v2588_v35 }
  0xfb   :  { %v2594_v39 = vpop.f32.mrf.mxu1  ;;  %v921_v54 = vadd.f32 %v2572_v26, %v920_v48 }
  0xfc   :  { %v2596_v40 = vpop.f32.mrf.mxu0  ;;  %v942_v55 = vadd.f32 %v2574_v27, %v941_v49 }
  0xfd   :  { %v2598_v41 = vpop.f32.mrf.mxu1  ;;  %v922_v61 = vadd.f32 %v2582_v32, %v921_v54 }
  0xfe   :  { %v2602_v44 = vpop.f32.mrf.mxu0  ;;  %v943_v62 = vadd.f32 %v2584_v33, %v942_v55 }
  0xff   :  { %v2604_v45 = vpop.f32.mrf.mxu1  ;;  %v923_v21 = vadd.f32 %v922_v61, %v2596_v40 }
 0x100   :  { %v2606_v46 = vpop.f32.mrf.mxu0  ;;  %v944_v24 = vadd.f32 %v943_v62, %v2598_v41 }
 0x101   :  { %v2608_v47 = vpop.f32.mrf.mxu1  ;;  %v924_v49 = vadd.f32 %v923_v21, %v2606_v46 }
 0x102   :  { %v2612_v50 = vpop.f32.mrf.mxu0  ;;  %v945_v54 = vadd.f32 %v944_v24, %v2608_v47 }
 0x103   :  { %v2614_v51 = vpop.f32.mrf.mxu1  ;;  %v925_v21 = vadd.f32 %v2592_v38, %v924_v49 }
 0x104   :  { %3608 = vst [vmem:[#allocation2_spill] sm:$0xff] %v2614_v51  ;;  %v2616_v52 = vpop.f32.mrf.mxu0  ;;  %v946_v24 = vadd.f32 %v2594_v39, %v945_v54 }
 0x105   :  { %v2618_v53 = vpop.f32.mrf.mxu1  ;;  %v926_v49 = vadd.f32 %v2602_v44, %v925_v21 }
 0x106   :  { %3609 = vst [vmem:[#allocation3_spill] sm:$0xff] %v2618_v53  ;;  %v2622_v56 = vpop.f32.mrf.mxu0  ;;  %v947_v54 = vadd.f32 %v2604_v45, %v946_v24 }
 0x107   :  { %v2624_v57 = vpop.f32.mrf.mxu1 }
 0x108   :  { %3610 = vst [vmem:[#allocation4_spill] sm:$0xff] %v2624_v57  ;;  %v2626_v58 = vpop.f32.mrf.mxu0  ;;  %v948_v21 = vrot.slane %v947_v54, 4 }
 0x109   :  { %v954_v59 = vadd.f32 %v2626_v58, %v2616_v52  ;;  %v2630_v60 = vpop.f32.mrf.mxu1 }
 0x10a   :  { %3611 = vst [vmem:[#allocation5_spill] sm:$0xff] %v2630_v60  ;;  %v975_v63 = vadd.f32 %v2630_v60, %v2618_v53  ;;  %v2636_v7 = vpop.f32.mrf.mxu0 }
 0x10b   :  { %3612 = vst [vmem:[#allocation6_spill] sm:$0xff] %v2636_v7  ;;  %v955_v9 = vadd.f32 %v2612_v50, %v954_v59  ;;  %v2639_v11 = vpop.f32.mrf.mxu1 }
 0x10c   :  { %3613 = vst [vmem:[#allocation7_spill] sm:$0xff] %v2639_v11  ;;  %v976_v13 = vadd.f32 %v2614_v51, %v975_v63  ;;  %v2642_v15 = vpop.f32.mrf.mxu0  ;;  %v927_v51 = vrot.slane %v926_v49, 4 }
 0x10d   :  { %3614 = vst [vmem:[#allocation8_spill] sm:$0xff] %v2642_v15  ;;  %v956_v17 = vadd.f32 %v2622_v56, %v955_v9  ;;  %v2645_v19 = vpop.f32.mrf.mxu1 }
 0x10e   :  { %3615 = vst [vmem:[#allocation9_spill] sm:$0xff] %v2645_v19  ;;  %v977_v25 = vadd.f32 %v2624_v57, %v976_v13  ;;  %v2650_v30 = vpop.f32.mrf.mxu0 }
 0x10f   :  { %3616 = vst [vmem:[#allocation10_spill] sm:$0xff] %v2650_v30  ;;  %v957_v31 = vadd.f32 %v956_v17, %v2642_v15  ;;  %v2653_v36 = vpop.f32.mrf.mxu1 }
 0x110   :  { %3617 = vst [vmem:[#allocation11_spill] sm:$0xff] %v2653_v36  ;;  %v978_v37 = vadd.f32 %v977_v25, %v2645_v19  ;;  %v2656_v42 = vpop.f32.mrf.mxu0 }
 0x111   :  { %3618 = vst [vmem:[#allocation12_spill] sm:$0xff] %v2656_v42  ;;  %v958_v43 = vadd.f32 %v957_v31, %v2656_v42  ;;  %v2659_v48 = vpop.f32.mrf.mxu1 }
 0x112   :  { %3619 = vst [vmem:[#allocation13_spill] sm:$0xff] %v2659_v48  ;;  %v979_v55 = vadd.f32 %v978_v37, %v2659_v48  ;;  %v2664_v59 = vpop.f32.mrf.mxu0 }
 0x113   :  { %3620 = vst [vmem:[#allocation14_spill] sm:$0xff] %v2664_v59  ;;  %v959_v61 = vadd.f32 %v2636_v7, %v958_v43  ;;  %v2667_v62 = vpop.f32.mrf.mxu1 }
 0x114   :  { %3621 = vst [vmem:[#allocation15_spill] sm:$0xff] %v2667_v62  ;;  %v980_v63 = vadd.f32 %v2639_v11, %v979_v55  ;;  %v2670_v9 = vpop.f32.mrf.mxu0 }
 0x115   :  { %3622 = vst [vmem:[#allocation16_spill] sm:$0xff] %v2670_v9  ;;  %v960_v13 = vadd.f32 %v2650_v30, %v959_v61  ;;  %v2673_v17 = vpop.f32.mrf.mxu1 }
 0x116   :  { %3623 = vst [vmem:[#allocation17_spill] sm:$0xff] %v2673_v17  ;;  %v981_v25 = vadd.f32 %v2653_v36, %v980_v63  ;;  %v2678_v31 = vpop.f32.mrf.mxu0 }
 0x117   :  { %3624 = vst [vmem:[#allocation18_spill] sm:$0xff] %v2678_v31  ;;  %v961_v37 = vadd.f32 %v960_v13, %v2670_v9  ;;  %v2681_v43 = vpop.f32.mrf.mxu1 }
 0x118   :  { %3625 = vst [vmem:[#allocation19_spill] sm:$0xff] %v2681_v43  ;;  %v982_v55 = vadd.f32 %v981_v25, %v2673_v17  ;;  %v2684_v11 = vpop.f32.mrf.mxu0 }
 0x119   :  { %3626 = vst [vmem:[#allocation20_spill] sm:$0xff] %v2684_v11  ;;  %v962_v61 = vadd.f32 %v961_v37, %v2684_v11  ;;  %v2687_v48 = vpop.f32.mrf.mxu1 }
 0x11a   :  { %3627 = vst [vmem:[#allocation21_spill] sm:$0xff] %v2687_v48  ;;  %v983_v63 = vadd.f32 %v982_v55, %v2687_v48  ;;  %v2692_v36 = vpop.f32.mrf.mxu0 }
 0x11b   :  { %3628 = vst [vmem:[#allocation22_spill] sm:$0xff] %v2692_v36  ;;  %v963_v13 = vadd.f32 %v2664_v59, %v962_v61  ;;  %v2695_v19 = vpop.f32.mrf.mxu1 }
 0x11c   :  { %3629 = vst [vmem:[#allocation23_spill] sm:$0xff] %v2695_v19  ;;  %v984_v25 = vadd.f32 %v2667_v62, %v983_v63  ;;  %v2698_v17 = vpop.f32.mrf.mxu0 }
 0x11d   :  { %3630 = vst [vmem:[#allocation24_spill] sm:$0xff] %v2698_v17  ;;  %v964_v37 = vadd.f32 %v2678_v31, %v963_v13  ;;  %v2701_v57 = vpop.f32.mrf.mxu1  ;;  %v928_v13 = vadd.f32 %v927_v51, %v926_v49  ;;  %v949_v31 = vadd.f32 %v948_v21, %v947_v54 }
 0x11e   :  { %3631 = vst [vmem:[#allocation25_spill] sm:$0xff] %v2701_v57  ;;  %v985_v24 = vadd.f32 %v2681_v43, %v984_v25  ;;  %v2704_v60 = vpop.f32.mrf.mxu0 }
 0x11f   :  { %3632 = vst [vmem:[#allocation26_spill] sm:$0xff] %v2704_v60  ;;  %v965_v55 = vadd.f32 %v964_v37, %v2698_v17  ;;  %v2707_v48 = vpop.f32.mrf.mxu1  ;;  %v929_v17 = vrot.slane %v928_v13, 2  ;;  %v950_v11 = vrot.slane %v949_v31, 2 }
 0x120   :  { %3633 = vst [vmem:[#allocation27_spill] sm:$0xff] %v2707_v48  ;;  %v986_v61 = vadd.f32 %v985_v24, %v2701_v57  ;;  %v2710_v53 = vpop.f32.mrf.mxu0 }
 0x121   :  { %3634 = vst [vmem:[#allocation28_spill] sm:$0xff] %v2710_v53  ;;  %v966_v63 = vadd.f32 %v965_v55, %v2710_v53  ;;  %v2713_v62 = vpop.f32.mrf.mxu1  ;;  %v930_v55 = vadd.f32 %v929_v17, %v928_v13  ;;  %v951_v53 = vadd.f32 %v950_v11, %v949_v31  ;;  %v3656_v31 = vld [vmem:[#allocation20_spill] sm:$0xff] }
 0x122   :  { %3635 = vst [vmem:[#allocation29_spill] sm:$0xff] %v2713_v62  ;;  %v987_v59 = vadd.f32 %v986_v61, %v2713_v62 }
 0x123   :  { %v967_v25 = vadd.f32 %v2692_v36, %v966_v63  ;;  %v931_v54 = vrot.slane %v930_v55, 1  ;;  %v952_v21 = vrot.slane %v951_v53, 1 }
 0x124   :  { %v988_v43 = vadd.f32 %v2695_v19, %v987_v59 }
 0x125   :  { %v968_v37 = vadd.f32 %v2704_v60, %v967_v25  ;;  %v932_v62 = vadd.f32 %v931_v54, %v930_v55  ;;  %v953_v59 = vadd.f32 %v952_v21, %v951_v53  ;;  %v3660_v55 = vld [vmem:[#allocation18_spill] sm:$0xff] }
 0x126   :  { %v989_v24 = vadd.f32 %v2707_v48, %v988_v43 }
 0x127   :  { %v969_v57 = vrot.slane %v968_v37, 4  ;;  %v997_v60 = vmul.f32 0.0078125, %v932_v62  ;;  %v998_v36 = vmul.f32 0.0078125, %v953_v59  ;;  %v3655_v62 = vld [vmem:[#allocation16_spill] sm:$0xff] }
 0x128   :  { %v990_v9 = vrot.slane %v989_v24, 4  ;;  %v3664_v21 = vld [vmem:[#allocation28_spill] sm:$0xff] }
 0x129   :  { %v970_v30 = vadd.f32 %v969_v57, %v968_v37  ;;  %v1001_v48 = vadd.f32 %v998_v36, %v997_v60  ;;  %v3652_v36 = vld [vmem:[#allocation12_spill] sm:$0xff]  ;;  %v3658_v37 = vld [vmem:[#allocation14_spill] sm:$0xff] }
 0x12a   :  { %v991_v7 = vadd.f32 %v990_v9, %v989_v24 }
 0x12b   :  { %v971_v51 = vrot.slane %v970_v30, 2 }
 0x12c   :  { %v992_v61 = vrot.slane %v991_v7, 2 }
 0x12d   :  { %v972_v49 = vadd.f32 %v971_v51, %v970_v30 }
 0x12e   :  { %v993_v19 = vadd.f32 %v992_v61, %v991_v7 }
 0x12f   :  { %v973_v63 = vrot.slane %v972_v49, 1 }
 0x130   :  { %v994_v42 = vrot.slane %v993_v19, 1 }
 0x131   :  { %v974_v25 = vadd.f32 %v973_v63, %v972_v49  ;;  %v3662_v49 = vld [vmem:[#allocation24_spill] sm:$0xff]  ;;  %v3666_v63 = vld [vmem:[#allocation3_spill] sm:$0xff] }
 0x132   :  { %v995_v15 = vadd.f32 %v994_v42, %v993_v19  ;;  %v3651_v19 = vld [vmem:[#allocation8_spill] sm:$0xff]  ;;  %v3653_v42 = vld [vmem:[#allocation6_spill] sm:$0xff] }
 0x133   :  { %v999_v43 = vmul.f32 0.0078125, %v974_v25  ;;  %v3668_v25 = vld [vmem:[#allocation5_spill] sm:$0xff] }
 0x134   :  { %v1000_v17 = vmul.f32 0.0078125, %v995_v15 }
 0x135   :  { %v1002_v57 = vadd.f32 %v1001_v48, %v999_v43  ;;  %v3654_v48 = vld [vmem:[#allocation10_spill] sm:$0xff] }
 0x137   :  { %v1003_v11 = vadd.f32 %v1002_v57, %v1000_v17  ;;  %v3670_v57 = vld [vmem:[#allocation22_spill] sm:$0xff] }
 0x139   :  { %v2720_v9 = vmul.f32 0.25, %v1003_v11  ;;  %v3672_v11 = vld [vmem:[#allocation26_spill] sm:$0xff] }
 0x13b   :  { %v2724_v30 = vsub.f32 %v2532_v2, %v2720_v9  ;;  %v2728_v53 = vsub.f32 %v2540_v6, %v2720_v9  ;;  %v2732_v7 = vsub.f32 %v2528_v0, %v2720_v9  ;;  %v2736_v60 = vsub.f32 %v2536_v4, %v2720_v9 }
 0x13c   :  { %v2740_v15 = vsub.f32 %v2554_v14, %v2720_v9  ;;  %v2744_v2 = vsub.f32 %v2566_v22, %v2720_v9  ;;  %v2748_v6 = vsub.f32 %v2548_v10, %v2720_v9  ;;  %v2752_v0 = vsub.f32 %v2560_v18, %v2720_v9 }
 0x13d   :  { %3636 = vst [vmem:[#allocation30_spill] sm:$0xff] %v2724_v30  ;;  %3637 = vst [vmem:[#allocation31_spill] sm:$0xff] %v2728_v53  ;;  %v2756_v4 = vsub.f32 %v2576_v28, %v2720_v9  ;;  %v2760_v14 = vsub.f32 %v2586_v34, %v2720_v9  ;;  %v2764_v22 = vsub.f32 %v2572_v26, %v2720_v9 }
 0x13e   :  { %3638 = vst [vmem:[#allocation32_spill] sm:$0xff] %v2732_v7  ;;  %v2768_v10 = vsub.f32 %v2582_v32, %v2720_v9  ;;  %v2772_v18 = vsub.f32 %v2596_v40, %v2720_v9  ;;  %v2776_v28 = vsub.f32 %v2606_v46, %v2720_v9  ;;  %v2780_v34 = vsub.f32 %v2592_v38, %v2720_v9 }
 0x13f   :  { %v2784_v26 = vsub.f32 %v2602_v44, %v2720_v9  ;;  %v2788_v32 = vsub.f32 %v2534_v3, %v2720_v9  ;;  %v2792_v40 = vsub.f32 %v2544_v8, %v2720_v9  ;;  %v2796_v46 = vsub.f32 %v2530_v1, %v2720_v9 }
 0x140   :  { %3639 = vst [vmem:[#allocation33_spill] sm:$0xff] %v2776_v28  ;;  %3640 = vst [vmem:[#allocation34_spill] sm:$0xff] %v2780_v34  ;;  %v2800_v38 = vsub.f32 %v2538_v5, %v2720_v9  ;;  %v2804_v44 = vsub.f32 %v2557_v16, %v2720_v9  ;;  %v2808_v3 = vsub.f32 %v2568_v23, %v2720_v9  ;;  %v3700_v34 = vld [vmem:[#allocation27_spill] sm:$0xff] }
 0x141   :  { %3641 = vst [vmem:[#allocation35_spill] sm:$0xff] %v2784_v26  ;;  %3642 = vst [vmem:[#allocation36_spill] sm:$0xff] %v2788_v32  ;;  %v2812_v8 = vsub.f32 %v2551_v12, %v2720_v9  ;;  %v2816_v1 = vsub.f32 %v2563_v20, %v2720_v9  ;;  %v2820_v5 = vsub.f32 %v2578_v29, %v2720_v9 }
 0x142   :  { %3643 = vst [vmem:[#allocation37_spill] sm:$0xff] %v2792_v40  ;;  %3644 = vst [vmem:[#allocation38_spill] sm:$0xff] %v2796_v46  ;;  %v2824_v16 = vsub.f32 %v2588_v35, %v2720_v9  ;;  %v2828_v23 = vsub.f32 %v2574_v27, %v2720_v9  ;;  %v2832_v12 = vsub.f32 %v2584_v33, %v2720_v9 }
 0x143   :  { %v2836_v20 = vsub.f32 %v2598_v41, %v2720_v9  ;;  %v2840_v29 = vsub.f32 %v2608_v47, %v2720_v9  ;;  %v2844_v35 = vsub.f32 %v2594_v39, %v2720_v9  ;;  %v2848_v27 = vsub.f32 %v2604_v45, %v2720_v9 }
 0x144   :  { %v2852_v33 = vsub.f32 %v2616_v52, %v2720_v9  ;;  %v2856_v41 = vsub.f32 %v2626_v58, %v2720_v9  ;;  %v2860_v47 = vsub.f32 %v2612_v50, %v2720_v9  ;;  %v2864_v39 = vsub.f32 %v2622_v56, %v2720_v9 }
 0x145   :  { %3645 = vst [vmem:[#allocation39_spill] sm:$0xff] %v2840_v29  ;;  %3646 = vst [vmem:[#allocation40_spill] sm:$0xff] %v2844_v35  ;;  %v2868_v45 = vsub.f32 %v3651_v19, %v2720_v9  ;;  %v2872_v52 = vsub.f32 %v3652_v36, %v2720_v9  ;;  %v2876_v58 = vsub.f32 %v3653_v42, %v2720_v9  ;;  %v3674_v36 = vld [vmem:[#allocation2_spill] sm:$0xff]  ;;  %v3698_v35 = vld [vmem:[#allocation23_spill] sm:$0xff] }
 0x146   :  { %3647 = vst [vmem:[#allocation41_spill] sm:$0xff] %v2848_v27  ;;  %3648 = vst [vmem:[#allocation42_spill] sm:$0xff] %v2852_v33  ;;  %v2880_v50 = vsub.f32 %v3654_v48, %v2720_v9  ;;  %v2884_v56 = vsub.f32 %v3655_v62, %v2720_v9  ;;  %v2888_v13 = vsub.f32 %v3656_v31, %v2720_v9  ;;  %v3676_v48 = vld [vmem:[#allocation4_spill] sm:$0xff]  ;;  %v3678_v31 = vld [vmem:[#allocation9_spill] sm:$0xff] }
 0x147   :  { %3649 = vst [vmem:[#allocation43_spill] sm:$0xff] %v2856_v41  ;;  %3650 = vst [vmem:[#allocation44_spill] sm:$0xff] %v2860_v47  ;;  %v2892_v24 = vsub.f32 %v3658_v37, %v2720_v9  ;;  %v2896_v51 = vsub.f32 %v3660_v55, %v2720_v9  ;;  %v2900_v54 = vsub.f32 %v3662_v49, %v2720_v9  ;;  %v3680_v55 = vld [vmem:[#allocation13_spill] sm:$0xff] }
 0x148   :  { %3657 = vst [vmem:[#allocation8_spill] sm:$0xff] %v2888_v13  ;;  %v2904_v61 = vsub.f32 %v3664_v21, %v2720_v9  ;;  %v2908_v59 = vsub.f32 %v3666_v63, %v2720_v9  ;;  %v2912_v43 = vsub.f32 %v3668_v25, %v2720_v9  ;;  %v2916_v17 = vsub.f32 %v3670_v57, %v2720_v9  ;;  %v3682_v21 = vld [vmem:[#allocation7_spill] sm:$0xff] }
 0x149   :  { %3659 = vst [vmem:[#allocation12_spill] sm:$0xff] %v2892_v24  ;;  %3661 = vst [vmem:[#allocation6_spill] sm:$0xff] %v2896_v51  ;;  %v2920_v19 = vsub.f32 %v3672_v11, %v2720_v9  ;;  %v2924_v42 = vsub.f32 %v3674_v36, %v2720_v9  ;;  %v2928_v62 = vsub.f32 %v3676_v48, %v2720_v9  ;;  %v3684_v25 = vld [vmem:[#allocation11_spill] sm:$0xff] }
 0x14a   :  { %3663 = vst [vmem:[#allocation10_spill] sm:$0xff] %v2900_v54  ;;  %3665 = vst [vmem:[#allocation16_spill] sm:$0xff] %v2904_v61  ;;  %v2932_v37 = vsub.f32 %v3678_v31, %v2720_v9  ;;  %v2936_v49 = vsub.f32 %v3680_v55, %v2720_v9  ;;  %v2940_v63 = vsub.f32 %v3682_v21, %v2720_v9 }
 0x14b   :  { %3667 = vst [vmem:[#allocation20_spill] sm:$0xff] %v2908_v59  ;;  %3669 = vst [vmem:[#allocation14_spill] sm:$0xff] %v2912_v43  ;;  %v2944_v57 = vsub.f32 %v3684_v25, %v2720_v9  ;;  %v1070_v11 = vmul.f32 %v2724_v30, %v2724_v30  ;;  %v1071_v36 = vmul.f32 %v2728_v53, %v2728_v53  ;;  %v3686_v53 = vld [vmem:[#allocation17_spill] sm:$0xff] }
 0x14c   :  { %3671 = vst [vmem:[#allocation18_spill] sm:$0xff] %v2916_v17  ;;  %3673 = vst [vmem:[#allocation24_spill] sm:$0xff] %v2920_v19  ;;  %v1086_v48 = vmul.f32 %v2788_v32, %v2788_v32  ;;  %v1087_v31 = vmul.f32 %v2792_v40, %v2792_v40  ;;  %v1102_v55 = vmul.f32 %v2852_v33, %v2852_v33  ;;  %v3688_v32 = vld [vmem:[#allocation21_spill] sm:$0xff]  ;;  %v3690_v40 = vld [vmem:[#allocation15_spill] sm:$0xff] }
 0x14d   :  { %3675 = vst [vmem:[#allocation28_spill] sm:$0xff] %v2924_v42  ;;  %3677 = vst [vmem:[#allocation3_spill] sm:$0xff] %v2928_v62  ;;  %v1103_v21 = vmul.f32 %v2856_v41, %v2856_v41  ;;  %v1118_v25 = vmul.f32 %v2908_v59, %v2908_v59  ;;  %v1119_v30 = vmul.f32 %v2912_v43, %v2912_v43  ;;  %v3692_v41 = vld [vmem:[#allocation19_spill] sm:$0xff]  ;;  %v3694_v59 = vld [vmem:[#allocation25_spill] sm:$0xff] }
 0x14e   :  { %3679 = vst [vmem:[#allocation5_spill] sm:$0xff] %v2932_v37  ;;  %3681 = vst [vmem:[#allocation22_spill] sm:$0xff] %v2936_v49  ;;  %v2964_v19 = vsub.f32 %v3686_v53, %v2720_v9  ;;  %v2968_v27 = vsub.f32 %v3688_v32, %v2720_v9  ;;  %v2972_v33 = vsub.f32 %v3690_v40, %v2720_v9  ;;  %v3696_v43 = vld [vmem:[#allocation29_spill] sm:$0xff] }
 0x14f   :  { %3683 = vst [vmem:[#allocation26_spill] sm:$0xff] %v2940_v63  ;;  %3685 = vst [vmem:[#allocation2_spill] sm:$0xff] %v2944_v57  ;;  %v2976_v26 = vsub.f32 %v3692_v41, %v2720_v9  ;;  %v2980_v17 = vsub.f32 %v3694_v59, %v2720_v9  ;;  %v2984_v53 = vsub.f32 %v3696_v43, %v2720_v9 }
 0x150   :  { %3687 = vst [vmem:[#allocation4_spill] sm:$0xff] %v2964_v19  ;;  %3689 = vst [vmem:[#allocation9_spill] sm:$0xff] %v2968_v27  ;;  %v2988_v32 = vsub.f32 %v3698_v35, %v2720_v9  ;;  %v2992_v40 = vsub.f32 %v3700_v34, %v2720_v9  ;;  %v1072_v41 = vmul.f32 %v2732_v7, %v2732_v7 }
 0x151   :  { %3691 = vst [vmem:[#allocation13_spill] sm:$0xff] %v2972_v33  ;;  %3693 = vst [vmem:[#allocation7_spill] sm:$0xff] %v2976_v26  ;;  %v1088_v61 = vmul.f32 %v2796_v46, %v2796_v46  ;;  %v1104_v59 = vmul.f32 %v2860_v47, %v2860_v47  ;;  %v1120_v43 = vmul.f32 %v2924_v42, %v2924_v42 }
 0x152   :  { %3695 = vst [vmem:[#allocation11_spill] sm:$0xff] %v2980_v17  ;;  %3697 = vst [vmem:[#allocation17_spill] sm:$0xff] %v2984_v53  ;;  %v1134_v53 = vadd.f32 %v1071_v36, %v1070_v11  ;;  %v1155_v29 = vadd.f32 %v1087_v31, %v1086_v48  ;;  %v1176_v35 = vadd.f32 %v1103_v21, %v1102_v55 }
 0x153   :  { %3699 = vst [vmem:[#allocation21_spill] sm:$0xff] %v2988_v32  ;;  %3701 = vst [vmem:[#allocation15_spill] sm:$0xff] %v2992_v40  ;;  %v1197_v32 = vadd.f32 %v1119_v30, %v1118_v25  ;;  %v1073_v9 = vmul.f32 %v2736_v60, %v2736_v60  ;;  %v1089_v34 = vmul.f32 %v2800_v38, %v2800_v38 }
 0x154   :  { %v1105_v7 = vmul.f32 %v2864_v39, %v2864_v39  ;;  %v1121_v46 = vmul.f32 %v2928_v62, %v2928_v62  ;;  %v1135_v47 = vadd.f32 %v1134_v53, %v1072_v41  ;;  %v1156_v40 = vadd.f32 %v1155_v29, %v1088_v61 }
 0x155   :  { %v1177_v28 = vadd.f32 %v1176_v35, %v1104_v59  ;;  %v1198_v42 = vadd.f32 %v1197_v32, %v1120_v43  ;;  %v1074_v11 = vmul.f32 %v2740_v15, %v2740_v15  ;;  %v1090_v30 = vmul.f32 %v2804_v44, %v2804_v44 }
 0x156   :  { %v1106_v36 = vmul.f32 %v2868_v45, %v2868_v45  ;;  %v1122_v48 = vmul.f32 %v2932_v37, %v2932_v37  ;;  %v1136_v31 = vadd.f32 %v1135_v47, %v1073_v9  ;;  %v1157_v55 = vadd.f32 %v1156_v40, %v1089_v34 }
 0x157   :  { %v1178_v21 = vadd.f32 %v1177_v28, %v1105_v7  ;;  %v1199_v25 = vadd.f32 %v1198_v42, %v1121_v46  ;;  %v1075_v29 = vmul.f32 %v2744_v2, %v2744_v2  ;;  %v1091_v61 = vmul.f32 %v2808_v3, %v2808_v3 }
 0x158   :  { %v1107_v53 = vmul.f32 %v2872_v52, %v2872_v52  ;;  %v1123_v32 = vmul.f32 %v2936_v49, %v2936_v49  ;;  %v1137_v41 = vadd.f32 %v1136_v31, %v1074_v11  ;;  %v1158_v59 = vadd.f32 %v1157_v55, %v1090_v30 }
 0x159   :  { %v1179_v43 = vadd.f32 %v1178_v21, %v1106_v36  ;;  %v1200_v35 = vadd.f32 %v1199_v25, %v1122_v48  ;;  %v1076_v7 = vmul.f32 %v2748_v6, %v2748_v6  ;;  %v1092_v28 = vmul.f32 %v2812_v8, %v2812_v8 }
 0x15a   :  { %v1108_v46 = vmul.f32 %v2876_v58, %v2876_v58  ;;  %v1124_v47 = vmul.f32 %v2940_v63, %v2940_v63  ;;  %v1138_v42 = vadd.f32 %v1137_v41, %v1075_v29  ;;  %v1159_v40 = vadd.f32 %v1158_v59, %v1091_v61 }
 0x15b   :  { %v1180_v9 = vadd.f32 %v1179_v43, %v1107_v53  ;;  %v1201_v34 = vadd.f32 %v1200_v35, %v1123_v32  ;;  %v1077_v11 = vmul.f32 %v2752_v0, %v2752_v0  ;;  %v1093_v30 = vmul.f32 %v2816_v1, %v2816_v1 }
 0x15c   :  { %v1109_v36 = vmul.f32 %v2880_v50, %v2880_v50  ;;  %v1125_v48 = vmul.f32 %v2944_v57, %v2944_v57  ;;  %v1139_v31 = vadd.f32 %v1138_v42, %v1076_v7  ;;  %v1160_v55 = vadd.f32 %v1159_v40, %v1092_v28 }
 0x15d   :  { %v1181_v21 = vadd.f32 %v1180_v9, %v1108_v46  ;;  %v1202_v25 = vadd.f32 %v1201_v34, %v1124_v47  ;;  %v1078_v29 = vmul.f32 %v2756_v4, %v2756_v4  ;;  %v1094_v61 = vmul.f32 %v2820_v5, %v2820_v5 }
 0x15e   :  { %v1110_v53 = vmul.f32 %v2884_v56, %v2884_v56  ;;  %v1126_v32 = vmul.f32 %v2964_v19, %v2964_v19  ;;  %v1140_v41 = vadd.f32 %v1139_v31, %v1077_v11  ;;  %v1161_v59 = vadd.f32 %v1160_v55, %v1093_v30 }
 0x15f   :  { %v1182_v43 = vadd.f32 %v1181_v21, %v1109_v36  ;;  %v1203_v35 = vadd.f32 %v1202_v25, %v1125_v48  ;;  %v1079_v7 = vmul.f32 %v2760_v14, %v2760_v14  ;;  %v1095_v28 = vmul.f32 %v2824_v16, %v2824_v16 }
 0x160   :  { %v1111_v46 = vmul.f32 %v2888_v13, %v2888_v13  ;;  %v1127_v47 = vmul.f32 %v2968_v27, %v2968_v27  ;;  %v1141_v42 = vadd.f32 %v1140_v41, %v1078_v29  ;;  %v1162_v40 = vadd.f32 %v1161_v59, %v1094_v61 }
 0x161   :  { %v1183_v9 = vadd.f32 %v1182_v43, %v1110_v53  ;;  %v1204_v34 = vadd.f32 %v1203_v35, %v1126_v32  ;;  %v1080_v11 = vmul.f32 %v2764_v22, %v2764_v22  ;;  %v1096_v30 = vmul.f32 %v2828_v23, %v2828_v23 }
 0x162   :  { %v1112_v36 = vmul.f32 %v2892_v24, %v2892_v24  ;;  %v1128_v48 = vmul.f32 %v2972_v33, %v2972_v33  ;;  %v1142_v31 = vadd.f32 %v1141_v42, %v1079_v7  ;;  %v1163_v55 = vadd.f32 %v1162_v40, %v1095_v28 }
 0x163   :  { %v1184_v21 = vadd.f32 %v1183_v9, %v1111_v46  ;;  %v1205_v25 = vadd.f32 %v1204_v34, %v1127_v47  ;;  %v1081_v29 = vmul.f32 %v2768_v10, %v2768_v10  ;;  %v1097_v61 = vmul.f32 %v2832_v12, %v2832_v12 }
 0x164   :  { %v1113_v53 = vmul.f32 %v2896_v51, %v2896_v51  ;;  %v1129_v32 = vmul.f32 %v2976_v26, %v2976_v26  ;;  %v1143_v41 = vadd.f32 %v1142_v31, %v1080_v11  ;;  %v1164_v59 = vadd.f32 %v1163_v55, %v1096_v30  ;;  %v3702_v11 = vld [vmem:[#allocation33_spill] sm:$0xff]  ;;  %v3704_v31 = vld [vmem:[#allocation16_spill] sm:$0xff] }
 0x165   :  { %v1185_v43 = vadd.f32 %v1184_v21, %v1112_v36  ;;  %v1206_v35 = vadd.f32 %v1205_v25, %v1128_v48  ;;  %v1082_v7 = vmul.f32 %v2772_v18, %v2772_v18  ;;  %v1098_v28 = vmul.f32 %v2836_v20, %v2836_v20  ;;  %v3703_v36 = vld [vmem:[#allocation39_spill] sm:$0xff]  ;;  %v3705_v21 = vld [vmem:[#allocation17_spill] sm:$0xff] }
 0x166   :  { %v1114_v46 = vmul.f32 %v2900_v54, %v2900_v54  ;;  %v1130_v47 = vmul.f32 %v2980_v17, %v2980_v17  ;;  %v1144_v42 = vadd.f32 %v1143_v41, %v1081_v29  ;;  %v1165_v40 = vadd.f32 %v1164_v59, %v1097_v61  ;;  %v3706_v29 = vld [vmem:[#allocation34_spill] sm:$0xff] }
 0x167   :  { %v1186_v9 = vadd.f32 %v1185_v43, %v1113_v53  ;;  %v1207_v34 = vadd.f32 %v1206_v35, %v1129_v32  ;;  %v1083_v30 = vmul.f32 %v3702_v11, %v3702_v11  ;;  %v1099_v48 = vmul.f32 %v3703_v36, %v3703_v36  ;;  %v3707_v53 = vld [vmem:[#allocation40_spill] sm:$0xff]  ;;  %v3708_v41 = vld [vmem:[#allocation18_spill] sm:$0xff]  ;;  %v3709_v43 = vld [vmem:[#allocation21_spill] sm:$0xff] }
 0x168   :  { %v1115_v55 = vmul.f32 %v3704_v31, %v3704_v31  ;;  %v1131_v25 = vmul.f32 %v3705_v21, %v3705_v21  ;;  %v1145_v26 = vadd.f32 %v1144_v42, %v1082_v7  ;;  %v1166_v33 = vadd.f32 %v1165_v40, %v1098_v28  ;;  %v3710_v7 = vld [vmem:[#allocation35_spill] sm:$0xff]  ;;  %v3712_v42 = vld [vmem:[#allocation24_spill] sm:$0xff] }
 0x169   :  { %v1187_v27 = vadd.f32 %v1186_v9, %v1114_v46  ;;  %v1208_v17 = vadd.f32 %v1207_v34, %v1130_v47  ;;  %v1084_v61 = vmul.f32 %v3706_v29, %v3706_v29  ;;  %v1100_v32 = vmul.f32 %v3707_v53, %v3707_v53  ;;  %v3711_v46 = vld [vmem:[#allocation41_spill] sm:$0xff]  ;;  %v3713_v9 = vld [vmem:[#allocation15_spill] sm:$0xff] }
 0x16a   :  { %v1116_v59 = vmul.f32 %v3708_v41, %v3708_v41  ;;  %v1132_v35 = vmul.f32 %v3709_v43, %v3709_v43  ;;  %v1146_v19 = vadd.f32 %v1145_v26, %v1083_v30  ;;  %v1167_v57 = vadd.f32 %v1166_v33, %v1099_v48 }
 0x16b   :  { %v1188_v63 = vadd.f32 %v1187_v27, %v1115_v55  ;;  %v1209_v21 = vadd.f32 %v1208_v17, %v1131_v25  ;;  %v1085_v28 = vmul.f32 %v3710_v7, %v3710_v7  ;;  %v1101_v47 = vmul.f32 %v3711_v46, %v3711_v46 }
 0x16c   :  { %v1117_v40 = vmul.f32 %v3712_v42, %v3712_v42  ;;  %v1133_v34 = vmul.f32 %v3713_v9, %v3713_v9  ;;  %v1147_v49 = vadd.f32 %v1146_v19, %v1084_v61  ;;  %v1168_v37 = vadd.f32 %v1167_v57, %v1100_v32 }
 0x16d   :  { %v1189_v62 = vadd.f32 %v1188_v63, %v1116_v59  ;;  %v1210_v43 = vadd.f32 %v1209_v21, %v1132_v35 }
 0x16e   :  { %v1148_v26 = vadd.f32 %v1147_v49, %v1085_v28  ;;  %v1169_v33 = vadd.f32 %v1168_v37, %v1101_v47 }
 0x16f   :  { %v1190_v27 = vadd.f32 %v1189_v62, %v1117_v40  ;;  %v1211_v17 = vadd.f32 %v1210_v43, %v1133_v34 }
 0x170   :  { %v1149_v30 = vrot.slane %v1148_v26, 4  ;;  %v1170_v48 = vrot.slane %v1169_v33, 4 }
 0x171   :  { %v1191_v55 = vrot.slane %v1190_v27, 4  ;;  %v1212_v25 = vrot.slane %v1211_v17, 4 }
 0x172   :  { %v1150_v41 = vadd.f32 %v1149_v30, %v1148_v26  ;;  %v1171_v31 = vadd.f32 %v1170_v48, %v1169_v33 }
 0x173   :  { %v1192_v54 = vadd.f32 %v1191_v55, %v1190_v27  ;;  %v1213_v51 = vadd.f32 %v1212_v25, %v1211_v17 }
 0x174   :  { %v1151_v42 = vrot.slane %v1150_v41, 2  ;;  %v1172_v24 = vrot.slane %v1171_v31, 2 }
 0x175   :  { %v1193_v13 = vrot.slane %v1192_v54, 2  ;;  %v1214_v9 = vrot.slane %v1213_v51, 2 }
 0x176   :  { %v1152_v19 = vadd.f32 %v1151_v42, %v1150_v41  ;;  %v1173_v57 = vadd.f32 %v1172_v24, %v1171_v31  ;;  %v3714_v24 = vld [vmem:[#allocation30_spill] sm:$0xff]  ;;  %v3718_v42 = vld [vmem:[#allocation32_spill] sm:$0xff] }
 0x177   :  { %v1194_v63 = vadd.f32 %v1193_v13, %v1192_v54  ;;  %v1215_v21 = vadd.f32 %v1214_v9, %v1213_v51  ;;  %v3716_v54 = vld [vmem:[#allocation31_spill] sm:$0xff] }
 0x178   :  { %v1153_v49 = vrot.slane %v1152_v19, 1  ;;  %v1174_v37 = vrot.slane %v1173_v57, 1 }
 0x179   :  { %v1195_v62 = vrot.slane %v1194_v63, 1  ;;  %v1216_v61 = vrot.slane %v1215_v21, 1 }
 0x17a   :  { %v1154_v32 = vadd.f32 %v1153_v49, %v1152_v19  ;;  %v1175_v59 = vadd.f32 %v1174_v37, %v1173_v57  ;;  %v3722_v57 = vld [vmem:[#allocation36_spill] sm:$0xff] }
 0x17b   :  { %v1196_v43 = vadd.f32 %v1195_v62, %v1194_v63  ;;  %v1217_v35 = vadd.f32 %v1216_v61, %v1215_v21  ;;  %v3723_v63 = vld [vmem:[#allocation37_spill] sm:$0xff]  ;;  %v3724_v21 = vld [vmem:[#allocation38_spill] sm:$0xff] }
 0x17c   :  { %v1218_v28 = vmul.f32 0.0078125, %v1154_v32  ;;  %v1219_v47 = vmul.f32 0.0078125, %v1175_v59  ;;  %v3725_v61 = vld [vmem:[#allocation42_spill] sm:$0xff]  ;;  %v3726_v32 = vld [vmem:[#allocation43_spill] sm:$0xff]  ;;  %v3727_v59 = vld [vmem:[#allocation44_spill] sm:$0xff] }
 0x17d   :  { %v1220_v40 = vmul.f32 0.0078125, %v1196_v43  ;;  %v1221_v26 = vmul.f32 0.0078125, %v1217_v35 }
 0x17e   :  { %v1222_v34 = vadd.f32 %v1219_v47, %v1218_v28  ;;  %v3728_v47 = vld [vmem:[#allocation8_spill] sm:$0xff] }
 0x180   :  { %v1223_v33 = vadd.f32 %v1222_v34, %v1220_v40  ;;  %v3729_v40 = vld [vmem:[#allocation12_spill] sm:$0xff]  ;;  %v3730_v34 = vld [vmem:[#allocation6_spill] sm:$0xff] }
 0x182   :  { %v1224_v27 = vadd.f32 %v1223_v33, %v1221_v26  ;;  %v3731_v26 = vld [vmem:[#allocation10_spill] sm:$0xff]  ;;  %v3732_v33 = vld [vmem:[#allocation16_spill] sm:$0xff] }
 0x184   :  { %v1225_v17 = vmul.f32 0.25, %v1224_v27  ;;  %v3733_v27 = vld [vmem:[#allocation18_spill] sm:$0xff] }
 0x186   :  { %v1226_v41 = vadd.f32 1e-05, %v1225_v17 }
 0x188   :  { %2319 = vrsqrt.f32 %v1226_v41  ;;  %v3734_v41 = vld [vmem:[#allocation24_spill] sm:$0xff] }
 0x195   :  { %v3106_v13 = vpop.eup %2319 }
 0x196   :  { %v3110_v51 = vmul.f32 %v3106_v13, %v3714_v24  ;;  %v3114_v31 = vmul.f32 %v3106_v13, %v3716_v54  ;;  %v3118_v9 = vmul.f32 %v3106_v13, %v3718_v42  ;;  %v3122_v30 = vmul.f32 %v3106_v13, %v2736_v60  ;;  %v3735_v54 = vld [vmem:[#allocation20_spill] sm:$0xff] }
 0x197   :  { %v3126_v48 = vmul.f32 %v3106_v13, %v2740_v15  ;;  %v3130_v55 = vmul.f32 %v3106_v13, %v2744_v2  ;;  %v3134_v25 = vmul.f32 %v3106_v13, %v2748_v6  ;;  %v3138_v19 = vmul.f32 %v3106_v13, %v2752_v0 }
 0x198   :  { %3715 = vst [vmem:[#allocation19_spill] sm:$0xff] %v3110_v51  ;;  %3717 = vst [vmem:[#allocation25_spill] sm:$0xff] %v3114_v31  ;;  %v3142_v60 = vmul.f32 %v3106_v13, %v2756_v4  ;;  %v3146_v15 = vmul.f32 %v3106_v13, %v2760_v14  ;;  %v3150_v2 = vmul.f32 %v3106_v13, %v2764_v22 }
 0x199   :  { %3719 = vst [vmem:[#allocation29_spill] sm:$0xff] %v3118_v9  ;;  %3720 = vst [vmem:[#allocation23_spill] sm:$0xff] %v3122_v30  ;;  %v3154_v6 = vmul.f32 %v3106_v13, %v2768_v10  ;;  %v3158_v0 = vmul.f32 %v3106_v13, %v2772_v18  ;;  %v3162_v4 = vmul.f32 %v3106_v13, %v3702_v11 }
 0x19a   :  { %3721 = vst [vmem:[#allocation27_spill] sm:$0xff] %v3126_v48  ;;  %v3166_v14 = vmul.f32 %v3106_v13, %v3706_v29  ;;  %v3170_v22 = vmul.f32 %v3106_v13, %v3710_v7  ;;  %v3174_v10 = vmul.f32 %v3106_v13, %v3722_v57  ;;  %v3178_v18 = vmul.f32 %v3106_v13, %v3723_v63  ;;  %v3736_v57 = vld [vmem:[#allocation14_spill] sm:$0xff] }
 0x19b   :  { %v3182_v11 = vmul.f32 %v3106_v13, %v3724_v21  ;;  %v3186_v29 = vmul.f32 %v3106_v13, %v2800_v38  ;;  %v3190_v7 = vmul.f32 %v3106_v13, %v2804_v44  ;;  %v3194_v49 = vmul.f32 %v3106_v13, %v2808_v3  ;;  %v3737_v21 = vld [vmem:[#allocation28_spill] sm:$0xff] }
 0x19c   :  { %v3198_v37 = vmul.f32 %v3106_v13, %v2812_v8  ;;  %v3202_v62 = vmul.f32 %v3106_v13, %v2816_v1  ;;  %v3206_v38 = vmul.f32 %v3106_v13, %v2820_v5  ;;  %v3210_v44 = vmul.f32 %v3106_v13, %v2824_v16 }
 0x19d   :  { %v3214_v3 = vmul.f32 %v3106_v13, %v2828_v23  ;;  %v3218_v8 = vmul.f32 %v3106_v13, %v2832_v12  ;;  %v3222_v1 = vmul.f32 %v3106_v13, %v2836_v20  ;;  %v3226_v5 = vmul.f32 %v3106_v13, %v3703_v36 }
 0x19e   :  { %v3230_v16 = vmul.f32 %v3106_v13, %v3707_v53  ;;  %v3234_v23 = vmul.f32 %v3106_v13, %v3711_v46  ;;  %v3238_v12 = vmul.f32 %v3106_v13, %v3725_v61  ;;  %v3242_v20 = vmul.f32 %v3106_v13, %v3726_v32  ;;  %v3738_v32 = vld [vmem:[#allocation3_spill] sm:$0xff] }
 0x19f   :  { %v3246_v36 = vmul.f32 %v3106_v13, %v3727_v59  ;;  %v3250_v53 = vmul.f32 %v3106_v13, %v2864_v39  ;;  %v3254_v46 = vmul.f32 %v3106_v13, %v2868_v45  ;;  %v3258_v43 = vmul.f32 %v3106_v13, %v2872_v52 }
 0x1a0   :  { %v3262_v35 = vmul.f32 %v3106_v13, %v2876_v58  ;;  %v3266_v28 = vmul.f32 %v3106_v13, %v2880_v50  ;;  %v3270_v39 = vmul.f32 %v3106_v13, %v2884_v56  ;;  %v3274_v45 = vmul.f32 %v3106_v13, %v3728_v47  ;;  %v3739_v47 = vld [vmem:[#allocation5_spill] sm:$0xff] }
 0x1a1   :  { %v3278_v52 = vmul.f32 %v3106_v13, %v3729_v40  ;;  %v3282_v58 = vmul.f32 %v3106_v13, %v3730_v34  ;;  %v3286_v50 = vmul.f32 %v3106_v13, %v3731_v26  ;;  %v3290_v56 = vmul.f32 %v3106_v13, %v3732_v33  ;;  %v3741_v34 = vld [vmem:[#allocation22_spill] sm:$0xff] }
 0x1a2   :  { %v3294_v17 = vmul.f32 %v3106_v13, %v3733_v27  ;;  %v3298_v24 = vmul.f32 %v3106_v13, %v3734_v41  ;;  %v3302_v42 = vmul.f32 %v3106_v13, %v3735_v54  ;;  %v3306_v63 = vmul.f32 %v3106_v13, %v3736_v57  ;;  %v3743_v33 = vld [vmem:[#allocation26_spill] sm:$0xff]  ;;  %v3747_v57 = vld [vmem:[#allocation4_spill] sm:$0xff] }
 0x1a3   :  { %v3310_v61 = vmul.f32 %v3106_v13, %v3737_v21  ;;  %v3314_v59 = vmul.f32 %v3106_v13, %v3738_v32  ;;  %v3318_v40 = vmul.f32 %v3106_v13, %v3739_v47  ;;  %v3322_v26 = vmul.f32 %v3106_v13, %v3741_v34  ;;  %v3745_v41 = vld [vmem:[#allocation2_spill] sm:$0xff]  ;;  %v3749_v32 = vld [vmem:[#allocation9_spill] sm:$0xff] }
 0x1a4   :  { %v3326_v27 = vmul.f32 %v3106_v13, %v3743_v33  ;;  %v3330_v54 = vmul.f32 %v3106_v13, %v3745_v41  ;;  %v3334_v21 = vmul.f32 %v3106_v13, %v3747_v57  ;;  %v3338_v47 = vmul.f32 %v3106_v13, %v3749_v32 }
 0x1a5   :  { %3740 = vst [vmem:[#allocation33_spill] sm:$0xff] %v3318_v40  ;;  %3742 = vst [vmem:[#allocation39_spill] sm:$0xff] %v3322_v26  ;;  %v3751_v40 = vld [vmem:[#allocation13_spill] sm:$0xff]  ;;  %v3753_v26 = vld [vmem:[#allocation7_spill] sm:$0xff] }
 0x1a6   :  { %3744 = vst [vmem:[#allocation34_spill] sm:$0xff] %v3326_v27  ;;  %3746 = vst [vmem:[#allocation40_spill] sm:$0xff] %v3330_v54  ;;  %v3342_v34 = vmul.f32 %v3106_v13, %v3751_v40  ;;  %v3346_v33 = vmul.f32 %v3106_v13, %v3753_v26  ;;  %v3755_v27 = vld [vmem:[#allocation11_spill] sm:$0xff]  ;;  %v3757_v54 = vld [vmem:[#allocation17_spill] sm:$0xff]  ;;  %v1303_v26 = vmax.f32 %v3154_v6, 0.0  ;;  %v1313_v6 = vmax.f32 %v3194_v49, 0.0 }
 0x1a7   :  { %3748 = vst [vmem:[#allocation35_spill] sm:$0xff] %v3334_v21  ;;  %3750 = vst [vmem:[#allocation41_spill] sm:$0xff] %v3338_v47  ;;  %v3350_v41 = vmul.f32 %v3106_v13, %v3755_v27  ;;  %v3354_v57 = vmul.f32 %v3106_v13, %v3757_v54  ;;  %v3759_v21 = vld [vmem:[#allocation21_spill] sm:$0xff]  ;;  %v3761_v47 = vld [vmem:[#allocation15_spill] sm:$0xff]  ;;  %v1297_v54 = vmax.f32 %v3130_v55, 0.0  ;;  %v1305_v27 = vmax.f32 %v3162_v4, 0.0 }
 0x1a8   :  { %3752 = vst [vmem:[#allocation30_spill] sm:$0xff] %v3342_v34  ;;  %3754 = vst [vmem:[#allocation31_spill] sm:$0xff] %v3346_v33  ;;  %v3358_v32 = vmul.f32 %v3106_v13, %v3759_v21  ;;  %v3362_v40 = vmul.f32 %v3106_v13, %v3761_v47  ;;  %v1299_v21 = vmax.f32 %v3138_v19, 0.0  ;;  %v1301_v13 = vmax.f32 %v3146_v15, 0.0 }
 0x1a9   :  { %3756 = vst [vmem:[#allocation32_spill] sm:$0xff] %v3350_v41  ;;  %3758 = vst [vmem:[#allocation36_spill] sm:$0xff] %v3354_v57  ;;  %v1298_v57 = vmax.f32 %v3134_v25, 0.0  ;;  %v1302_v47 = vmax.f32 %v3150_v2, 0.0  ;;  %v1304_v33 = vmax.f32 %v3158_v0, 0.0  ;;  %v1306_v41 = vmax.f32 %v3166_v14, 0.0 }
 0x1aa   :  { %3760 = vst [vmem:[#allocation37_spill] sm:$0xff] %v3358_v32  ;;  %3762 = vst [vmem:[#allocation38_spill] sm:$0xff] %v3362_v40  ;;  %v1300_v32 = vmax.f32 %v3142_v60, 0.0  ;;  %v1307_v55 = vmax.f32 %v3170_v22, 0.0  ;;  %v1308_v25 = vmax.f32 %v3174_v10, 0.0  ;;  %v1309_v19 = vmax.f32 %v3178_v18, 0.0 }
 0x1ab   :  { %v1310_v60 = vmax.f32 %v3182_v11, 0.0  ;;  %v1311_v15 = vmax.f32 %v3186_v29, 0.0  ;;  %v1312_v2 = vmax.f32 %v3190_v7, 0.0  ;;  %v1314_v0 = vmax.f32 %v3198_v37, 0.0 }
 0x1ac   :  { %v1315_v4 = vmax.f32 %v3202_v62, 0.0  ;;  %v1316_v14 = vmax.f32 %v3206_v38, 0.0  ;;  %v1317_v22 = vmax.f32 %v3210_v44, 0.0  ;;  %v1318_v10 = vmax.f32 %v3214_v3, 0.0  ;;  %v3763_v34 = vld [vmem:[#allocation33_spill] sm:$0xff]  ;;  %v3764_v48 = vld [vmem:[#allocation39_spill] sm:$0xff] }
 0x1ad   :  { %v1319_v18 = vmax.f32 %v3218_v8, 0.0  ;;  %v1320_v11 = vmax.f32 %v3222_v1, 0.0  ;;  %v1321_v29 = vmax.f32 %v3226_v5, 0.0  ;;  %v1322_v7 = vmax.f32 %v3230_v16, 0.0  ;;  %v3765_v30 = vld [vmem:[#allocation34_spill] sm:$0xff]  ;;  %v3766_v9 = vld [vmem:[#allocation40_spill] sm:$0xff] }
 0x1ae   :  { %v1323_v49 = vmax.f32 %v3234_v23, 0.0  ;;  %v1324_v37 = vmax.f32 %v3238_v12, 0.0  ;;  %v1325_v62 = vmax.f32 %v3242_v20, 0.0  ;;  %v1326_v38 = vmax.f32 %v3246_v36, 0.0  ;;  %v3767_v31 = vld [vmem:[#allocation35_spill] sm:$0xff]  ;;  %v3768_v51 = vld [vmem:[#allocation41_spill] sm:$0xff] }
 0x1af   :  { %v1327_v44 = vmax.f32 %v3250_v53, 0.0  ;;  %v1328_v3 = vmax.f32 %v3254_v46, 0.0  ;;  %v1329_v8 = vmax.f32 %v3258_v43, 0.0  ;;  %v1330_v1 = vmax.f32 %v3262_v35, 0.0  ;;  %v3769_v40 = vld [vmem:[#allocation30_spill] sm:$0xff] }
 0x1b0   :  { %v1331_v5 = vmax.f32 %v3266_v28, 0.0  ;;  %v1332_v16 = vmax.f32 %v3270_v39, 0.0  ;;  %v1333_v23 = vmax.f32 %v3274_v45, 0.0  ;;  %v1334_v12 = vmax.f32 %v3278_v52, 0.0 }
 0x1b1   :  { %v1335_v20 = vmax.f32 %v3282_v58, 0.0  ;;  %v1336_v36 = vmax.f32 %v3286_v50, 0.0  ;;  %v1337_v53 = vmax.f32 %v3290_v56, 0.0  ;;  %v1338_v46 = vmax.f32 %v3294_v17, 0.0 }
 0x1b2   :  { %v1339_v43 = vmax.f32 %v3298_v24, 0.0  ;;  %v1340_v35 = vmax.f32 %v3302_v42, 0.0  ;;  %v1341_v28 = vmax.f32 %v3306_v63, 0.0  ;;  %v1342_v39 = vmax.f32 %v3310_v61, 0.0  ;;  %v3770_v63 = vld [vmem:[#allocation31_spill] sm:$0xff] }
 0x1b3   :  { %v1343_v45 = vmax.f32 %v3314_v59, 0.0  ;;  %v1344_v52 = vmax.f32 %v3763_v34, 0.0  ;;  %v1345_v58 = vmax.f32 %v3764_v48, 0.0  ;;  %v1346_v50 = vmax.f32 %v3765_v30, 0.0  ;;  %v3771_v59 = vld [vmem:[#allocation32_spill] sm:$0xff] }
 0x1b4   :  { %v1347_v56 = vmax.f32 %v3766_v9, 0.0  ;;  %v1348_v17 = vmax.f32 %v3767_v31, 0.0  ;;  %v1349_v24 = vmax.f32 %v3768_v51, 0.0  ;;  %v1350_v42 = vmax.f32 %v3769_v40, 0.0  ;;  %v3772_v48 = vld [vmem:[#allocation36_spill] sm:$0xff]  ;;  %v3773_v9 = vld [vmem:[#allocation37_spill] sm:$0xff] }
 0x1b5   :  { %v1351_v61 = vmax.f32 %v3770_v63, 0.0  ;;  %v1352_v34 = vmax.f32 %v3771_v59, 0.0  ;;  %v1353_v30 = vmax.f32 %v3772_v48, 0.0  ;;  %v1354_v31 = vmax.f32 %v3773_v9, 0.0  ;;  %v3774_v51 = vld [vmem:[#allocation38_spill] sm:$0xff]  ;;  %v3775_v63 = vld [vmem:[#allocation19_spill] sm:$0xff] }
 0x1b6   :  { %v1355_v40 = vmax.f32 %v3774_v51, 0.0  ;;  %v3776_v59 = vmax.f32 %v3775_v63, 0.0  ;;  %v3777_v48 = vld [vmem:[#allocation25_spill] sm:$0xff] }
 0x1b7   :  { %v3778_v9 = vmax.f32 %v3777_v48, 0.0  ;;  %v3779_v63 = vld [vmem:[#allocation29_spill] sm:$0xff] }
 0x1b8   :  { %v3780_v48 = vmax.f32 %v3779_v63, 0.0 }
 0x1b9   :  { %v1875_v51 = vpack.c.bf16 %v3778_v9, %v3776_v59  ;;  %v3781_v9 = vld [vmem:[#allocation23_spill] sm:$0xff] }
 0x1ba   :  { %v3782_v59 = vmax.f32 %v3781_v9, 0.0  ;;  %v3783_v9 = vld [vmem:[#allocation27_spill] sm:$0xff] }
 0x1bb   :  { %1876 = vst [vmem:[%s3536_s2] sm:$0xff] %v1875_v51  }
 0x1bc   :  { %v1880_v63 = vpack.c.bf16 %v3782_v59, %v3780_v48  ;;  %v3784_v48 = vmax.f32 %v3783_v9, 0.0  ;;  %v1890_v9 = vpack.c.bf16 %v1299_v21, %v1298_v57  ;;  %v1905_v21 = vpack.c.bf16 %v1305_v27, %v1304_v33 }
 0x1bd   :  { %v1910_v57 = vpack.c.bf16 %v1307_v55, %v1306_v41  ;;  %v1925_v33 = vpack.c.bf16 %v1313_v6, %v1312_v2  ;;  %v1930_v41 = vpack.c.bf16 %v1315_v4, %v1314_v0  ;;  %v1935_v27 = vpack.c.bf16 %v1317_v22, %v1316_v14 }
 0x1be   :  { %v1885_v59 = vpack.c.bf16 %v1297_v54, %v3784_v48  ;;  %v1895_v48 = vpack.c.bf16 %v1301_v13, %v1300_v32  ;;  %v1900_v54 = vpack.c.bf16 %v1303_v26, %v1302_v47  ;;  %2032 = vst [vmem:[%s3536_s2 + $0x8] sm:$0xff] %v1880_v63   ;;  %2034 = vst [vmem:[%s3536_s2 + $0x18] sm:$0xff] %v1890_v9  }
 0x1bf   :  { %v1915_v32 = vpack.c.bf16 %v1309_v19, %v1308_v25  ;;  %v1920_v26 = vpack.c.bf16 %v1311_v15, %v1310_v60  ;;  %2037 = vst [vmem:[%s3536_s2 + $0x30] sm:$0xff] %v1905_v21   ;;  %2038 = vst [vmem:[%s3536_s2 + $0x38] sm:$0xff] %v1910_v57   ;;  %v1940_v13 = vpack.c.bf16 %v1319_v18, %v1318_v10 }
 0x1c0   :  { %2033 = vst [vmem:[%s3536_s2 + $0x10] sm:$0xff] %v1885_v59   ;;  %2035 = vst [vmem:[%s3536_s2 + $0x20] sm:$0xff] %v1895_v48   ;;  %v1945_v47 = vpack.c.bf16 %v1321_v29, %v1320_v11  ;;  %v1950_v55 = vpack.c.bf16 %v1323_v49, %v1322_v7  ;;  %v1955_v25 = vpack.c.bf16 %v1325_v62, %v1324_v37 }
 0x1c1   :  { %2036 = vst [vmem:[%s3536_s2 + $0x28] sm:$0xff] %v1900_v54   ;;  %2039 = vst [vmem:[%s3536_s2 + $0x40] sm:$0xff] %v1915_v32   ;;  %v1960_v19 = vpack.c.bf16 %v1327_v44, %v1326_v38  ;;  %v1965_v60 = vpack.c.bf16 %v1329_v8, %v1328_v3  ;;  %v1970_v15 = vpack.c.bf16 %v1331_v5, %v1330_v1 }
 0x1c2   :  { %2040 = vst [vmem:[%s3536_s2 + $0x48] sm:$0xff] %v1920_v26   ;;  %2041 = vst [vmem:[%s3536_s2 + $0x50] sm:$0xff] %v1925_v33   ;;  %v1975_v2 = vpack.c.bf16 %v1333_v23, %v1332_v16  ;;  %v1980_v6 = vpack.c.bf16 %v1335_v20, %v1334_v12  ;;  %v1985_v0 = vpack.c.bf16 %v1337_v53, %v1336_v36 }
 0x1c3   :  { %2042 = vst [vmem:[%s3536_s2 + $0x58] sm:$0xff] %v1930_v41   ;;  %2043 = vst [vmem:[%s3536_s2 + $0x60] sm:$0xff] %v1935_v27   ;;  %v1990_v4 = vpack.c.bf16 %v1339_v43, %v1338_v46  ;;  %v1995_v14 = vpack.c.bf16 %v1341_v28, %v1340_v35  ;;  %v2000_v22 = vpack.c.bf16 %v1343_v45, %v1342_v39 }
 0x1c4   :  { %2044 = vst [vmem:[%s3536_s2 + $0x68] sm:$0xff] %v1940_v13   ;;  %2045 = vst [vmem:[%s3536_s2 + $0x70] sm:$0xff] %v1945_v47   ;;  %v2005_v10 = vpack.c.bf16 %v1345_v58, %v1344_v52  ;;  %v2010_v18 = vpack.c.bf16 %v1347_v56, %v1346_v50  ;;  %v2015_v11 = vpack.c.bf16 %v1349_v24, %v1348_v17 }
 0x1c5   :  { %2046 = vst [vmem:[%s3536_s2 + $0x78] sm:$0xff] %v1950_v55   ;;  %2047 = vst [vmem:[%s3536_s2 + $0x80] sm:$0xff] %v1955_v25   ;;  %v2020_v29 = vpack.c.bf16 %v1351_v61, %v1350_v42  ;;  %v2025_v7 = vpack.c.bf16 %v1353_v30, %v1352_v34  ;;  %v2030_v49 = vpack.c.bf16 %v1355_v40, %v1354_v31 }
 0x1c6   :  { %2048 = vst [vmem:[%s3536_s2 + $0x88] sm:$0xff] %v1960_v19   ;;  %2049 = vst [vmem:[%s3536_s2 + $0x90] sm:$0xff] %v1965_v60  }
 0x1c7   :  { %2050 = vst [vmem:[%s3536_s2 + $0x98] sm:$0xff] %v1970_v15   ;;  %2051 = vst [vmem:[%s3536_s2 + $0xa0] sm:$0xff] %v1975_v2  }
 0x1c8   :  { %2052 = vst [vmem:[%s3536_s2 + $0xa8] sm:$0xff] %v1980_v6   ;;  %2053 = vst [vmem:[%s3536_s2 + $0xb0] sm:$0xff] %v1985_v0  }
 0x1c9   :  { %2054 = vst [vmem:[%s3536_s2 + $0xb8] sm:$0xff] %v1990_v4   ;;  %2055 = vst [vmem:[%s3536_s2 + $0xc0] sm:$0xff] %v1995_v14  }
 0x1ca   :  { %2056 = vst [vmem:[%s3536_s2 + $0xc8] sm:$0xff] %v2000_v22   ;;  %2057 = vst [vmem:[%s3536_s2 + $0xd0] sm:$0xff] %v2005_v10  }
 0x1cb   :  { %2058 = vst [vmem:[%s3536_s2 + $0xd8] sm:$0xff] %v2010_v18   ;;  %2059 = vst [vmem:[%s3536_s2 + $0xe0] sm:$0xff] %v2015_v11  }
 0x1cc   :  { %2060 = vst [vmem:[%s3536_s2 + $0xe8] sm:$0xff] %v2020_v29   ;;  %2061 = vst [vmem:[%s3536_s2 + $0xf0] sm:$0xff] %v2025_v7  }
 0x1cd   :  { %2062 = vst [vmem:[%s3536_s2 + $0xf8] sm:$0xff] %v2030_v49  }

// kernel: generator_forward.8
= control target key start
LH: loop header
LB: loop body
LE: loop exit
PB: predicated region body
PF: predicated region fallthrough
CT: control target
= control target key end

     0   :  { %vm484_vm0 = vcmask 523264   ;;  %s12645_s1 = inlined_call_operand.vmem [shape: bf16[4,64,128], index: 1, kind: input, shape index: {}]   ;;  %s12646_s0 = inlined_call_operand.vmem [shape: bf16[4,512,64], index: 0, kind: input, shape index: {}]   ;;  %s12647_s2 = inlined_call_operand.vmem [shape: bf16[4,512,128], index: 2, kind: output, shape index: {}]  }
   0x1   :  { %v7440_v0 = vld [vmem:[%s12645_s1 + $0x18] sm:$0xff]   ;;  %v7442_v2 = vld [vmem:[%s12645_s1 + $0x10] sm:$0xff]   ;;  %v7444_v4 = vld [vmem:[%s12645_s1 + $0x8] sm:$0xff]  }
   0x2   :  { %v7441_v1 = vld [vmem:[%s12645_s1 + $0x38] sm:$0xff]   ;;  %7152 = vmatprep.subr.bf16.mxu0 %v7440_v0  ;;  %v7443_v3 = vld [vmem:[%s12645_s1 + $0x30] sm:$0xff]   ;;  %v7445_v5 = vld [vmem:[%s12645_s1 + $0x28] sm:$0xff]  }
   0x3   :  { %7224 = vmatprep.subr.bf16.mxu1 %v7441_v1  ;;  %7153 = vmatpush3.bf16.msra.mxu0 %v7440_v0  ;;  %v7446_v6 = vld [vmem:[%s12645_s1] sm:$0xff]   ;;  %v7452_v10 = vld [vmem:[%s12645_s1 + $0x58] sm:$0xff]   ;;  %v7450_v12 = vld [vmem:[%s12646_s0 + $0x8] sm:$0xff]  }
   0x4   :  { %7225 = vmatpush3.bf16.msra.mxu1 %v7441_v1  ;;  %7154 = vmatprep.subr.bf16.mxu0 %v7442_v2  ;;  %v7447_v7 = vld [vmem:[%s12645_s1 + $0x20] sm:$0xff]   ;;  %v7453_v11 = vld [vmem:[%s12645_s1 + $0x78] sm:$0xff]   ;;  %v7451_v13 = vld [vmem:[%s12646_s0 + $0x108] sm:$0xff]  }
   0x5   :  { %7226 = vmatprep.subr.bf16.mxu1 %v7443_v3  ;;  %v7448_v8 = vld [vmem:[%s12646_s0] sm:$0xff]   ;;  %v7454_v14 = vld [vmem:[%s12646_s0 + $0x10] sm:$0xff]   ;;  %v7456_v16 = vld [vmem:[%s12646_s0 + $0x18] sm:$0xff]  }
   0x6   :  { %v7449_v9 = vld [vmem:[%s12646_s0 + $0x100] sm:$0xff]   ;;  %7160 = vmatprep.mubr.msk.bf16.mxu0 %vm484_vm0, %v7448_v8  ;;  %v7455_v15 = vld [vmem:[%s12646_s0 + $0x110] sm:$0xff]   ;;  %v7457_v17 = vld [vmem:[%s12646_s0 + $0x118] sm:$0xff]  }
   0x7   :  { %7155 = vmatpush3.bf16.msra.mxu0 %v7442_v2  ;;  %7232 = vmatprep.mubr.msk.bf16.mxu1 %vm484_vm0, %v7449_v9  ;;  %v7458_v18 = vld [vmem:[%s12646_s0 + $0x20] sm:$0xff]   ;;  %v7460_v20 = vld [vmem:[%s12646_s0 + $0x28] sm:$0xff]   ;;  %v7462_v22 = vld [vmem:[%s12646_s0 + $0x30] sm:$0xff]  }
   0x8   :  { %7227 = vmatpush3.bf16.msra.mxu1 %v7443_v3  ;;  %7156 = vmatprep.subr.bf16.mxu0 %v7444_v4  ;;  %v7459_v19 = vld [vmem:[%s12646_s0 + $0x120] sm:$0xff]   ;;  %v7461_v21 = vld [vmem:[%s12646_s0 + $0x128] sm:$0xff]   ;;  %v7470_v23 = vld [vmem:[%s12645_s1 + $0x50] sm:$0xff]  }
   0x9   :  { %7228 = vmatprep.subr.bf16.mxu1 %v7445_v5  ;;  %v7471_v24 = vld [vmem:[%s12645_s1 + $0x70] sm:$0xff]   ;;  %v7464_v26 = vld [vmem:[%s12646_s0 + $0x38] sm:$0xff]   ;;  %v7466_v28 = vld [vmem:[%s12646_s0 + $0x40] sm:$0xff]  }
   0xa   :  { %v7463_v25 = vld [vmem:[%s12646_s0 + $0x130] sm:$0xff]   ;;  %v7465_v27 = vld [vmem:[%s12646_s0 + $0x138] sm:$0xff]   ;;  %v7467_v29 = vld [vmem:[%s12646_s0 + $0x140] sm:$0xff]  }
   0xb   :  { %7157 = vmatpush3.bf16.msra.mxu0 %v7444_v4  ;;  %v7468_v30 = vld [vmem:[%s12646_s0 + $0x48] sm:$0xff]   ;;  %v7472_v32 = vld [vmem:[%s12646_s0 + $0x50] sm:$0xff]   ;;  %v7474_v36 = vld [vmem:[%s12646_s0 + $0x58] sm:$0xff]  }
   0xc   :  { %7229 = vmatpush3.bf16.msra.mxu1 %v7445_v5  ;;  %7158 = vmatprep.subr.bf16.mxu0 %v7446_v6  ;;  %v7469_v31 = vld [vmem:[%s12646_s0 + $0x148] sm:$0xff]   ;;  %v7473_v33 = vld [vmem:[%s12646_s0 + $0x150] sm:$0xff]   ;;  %v7475_v37 = vld [vmem:[%s12646_s0 + $0x158] sm:$0xff]  }
   0xd   :  { %7230 = vmatprep.subr.bf16.mxu1 %v7447_v7  ;;  %v7488_v34 = vld [vmem:[%s12645_s1 + $0x48] sm:$0xff]   ;;  %v7476_v38 = vld [vmem:[%s12646_s0 + $0x60] sm:$0xff]   ;;  %v7480_v42 = vld [vmem:[%s12646_s0 + $0x70] sm:$0xff]  }
   0xe   :  { %v7489_v35 = vld [vmem:[%s12645_s1 + $0x68] sm:$0xff]   ;;  %v7477_v39 = vld [vmem:[%s12646_s0 + $0x160] sm:$0xff]   ;;  %v7481_v43 = vld [vmem:[%s12646_s0 + $0x170] sm:$0xff]  }
   0xf   :  { %7159 = vmatpush3.bf16.msra.mxu0 %v7446_v6  ;;  %v7478_v40 = vld [vmem:[%s12646_s0 + $0x68] sm:$0xff]   ;;  %v7506_v44 = vld [vmem:[%s12645_s1 + $0x40] sm:$0xff]   ;;  %v7482_v46 = vld [vmem:[%s12646_s0 + $0x78] sm:$0xff]  }
  0x10   :  { %7231 = vmatpush3.bf16.msra.mxu1 %v7447_v7  ;;  %7296 = vmatprep.subr.bf16.mxu0 %v7452_v10  ;;  %v7479_v41 = vld [vmem:[%s12646_s0 + $0x168] sm:$0xff]   ;;  %v7507_v45 = vld [vmem:[%s12645_s1 + $0x60] sm:$0xff]   ;;  %v7483_v47 = vld [vmem:[%s12646_s0 + $0x178] sm:$0xff]  }
  0x11   :  { %7368 = vmatprep.subr.bf16.mxu1 %v7453_v11  ;;  %v7484_v48 = vld [vmem:[%s12646_s0 + $0x80] sm:$0xff]   ;;  %v7486_v50 = vld [vmem:[%s12646_s0 + $0x88] sm:$0xff]   ;;  %v7490_v52 = vld [vmem:[%s12646_s0 + $0x90] sm:$0xff]  }
  0x12   :  { %7161 = vmatmul.mubr.msk.bf16.vlgmr.msra.gmra.mxu0 %vm484_vm0, %v7450_v12  ;;  %v7485_v49 = vld [vmem:[%s12646_s0 + $0x180] sm:$0xff]   ;;  %v7487_v51 = vld [vmem:[%s12646_s0 + $0x188] sm:$0xff]   ;;  %v7491_v53 = vld [vmem:[%s12646_s0 + $0x190] sm:$0xff]  }
  0x13   :  { %7233 = vmatmul.mubr.msk.bf16.vlgmr.msra.gmra.mxu1 %vm484_vm0, %v7451_v13  ;;  %7297 = vmatpush3.bf16.msra.mxu0 %v7452_v10  ;;  %v7492_v54 = vld [vmem:[%s12646_s0 + $0x98] sm:$0xff]   ;;  %v7494_v56 = vld [vmem:[%s12646_s0 + $0xa0] sm:$0xff]   ;;  %v7496_v58 = vld [vmem:[%s12646_s0 + $0xa8] sm:$0xff]  }
  0x14   :  { %7369 = vmatpush3.bf16.msra.mxu1 %v7453_v11  ;;  %7164 = vmatprep.mubr.msk.bf16.mxu0 %vm484_vm0, %v7454_v14  ;;  %v7493_v55 = vld [vmem:[%s12646_s0 + $0x198] sm:$0xff]   ;;  %v7495_v57 = vld [vmem:[%s12646_s0 + $0x1a0] sm:$0xff]   ;;  %v7497_v59 = vld [vmem:[%s12646_s0 + $0x1a8] sm:$0xff]  }
  0x15   :  { %7236 = vmatprep.mubr.msk.bf16.mxu1 %vm484_vm0, %v7455_v15  ;;  %7298 = vmatprep.subr.bf16.mxu0 %v7470_v23  ;;  %v7498_v60 = vld [vmem:[%s12646_s0 + $0xb0] sm:$0xff]   ;;  %v7500_v62 = vld [vmem:[%s12646_s0 + $0xb8] sm:$0xff]   ;;  %v7502_v0 = vld [vmem:[%s12646_s0 + $0xc0] sm:$0xff]  }
  0x16   :  { %7370 = vmatprep.subr.bf16.mxu1 %v7471_v24  ;;  %v7499_v61 = vld [vmem:[%s12646_s0 + $0x1b0] sm:$0xff]   ;;  %v7501_v63 = vld [vmem:[%s12646_s0 + $0x1b8] sm:$0xff]   ;;  %v7503_v1 = vld [vmem:[%s12646_s0 + $0x1c0] sm:$0xff]  }
  0x17   :  { %7299 = vmatpush3.bf16.msra.mxu0 %v7470_v23  ;;  %v7504_v2 = vld [vmem:[%s12646_s0 + $0xc8] sm:$0xff]   ;;  %v7508_v4 = vld [vmem:[%s12646_s0 + $0xd0] sm:$0xff]   ;;  %v7510_v6 = vld [vmem:[%s12646_s0 + $0xd8] sm:$0xff]  }
  0x18   :  { %7371 = vmatpush3.bf16.msra.mxu1 %v7471_v24  ;;  %7300 = vmatprep.subr.bf16.mxu0 %v7488_v34  ;;  %v7505_v3 = vld [vmem:[%s12646_s0 + $0x1c8] sm:$0xff]   ;;  %v7509_v5 = vld [vmem:[%s12646_s0 + $0x1d0] sm:$0xff]   ;;  %v7511_v7 = vld [vmem:[%s12646_s0 + $0x1d8] sm:$0xff]  }
  0x19   :  { %7372 = vmatprep.subr.bf16.mxu1 %v7489_v35  ;;  %v7512_v8 = vld [vmem:[%s12646_s0 + $0xe0] sm:$0xff]   ;;  %v7514_v10 = vld [vmem:[%s12646_s0 + $0xe8] sm:$0xff]   ;;  %v7516_v12 = vld [vmem:[%s12646_s0 + $0xf0] sm:$0xff]  }
  0x1a   :  { %7165 = vmatmul.mubr.msk.bf16.gmra.mxu0 %vm484_vm0, %v7456_v16  ;;  %v7513_v9 = vld [vmem:[%s12646_s0 + $0x1e0] sm:$0xff]   ;;  %v7515_v11 = vld [vmem:[%s12646_s0 + $0x1e8] sm:$0xff]   ;;  %v7517_v13 = vld [vmem:[%s12646_s0 + $0x1f0] sm:$0xff]  }
  0x1b   :  { %7237 = vmatmul.mubr.msk.bf16.gmra.mxu1 %vm484_vm0, %v7457_v17  ;;  %7168 = vmatprep.mubr.msk.bf16.mxu0 %vm484_vm0, %v7458_v18  ;;  %v7518_v14 = vld [vmem:[%s12646_s0 + $0xf8] sm:$0xff]   ;;  %v7520_v16 = vld [vmem:[%s12646_s0 + $0x200] sm:$0xff]   ;;  %v7522_v18 = vld [vmem:[%s12646_s0 + $0x208] sm:$0xff]  }
  0x1c   :  { %7240 = vmatprep.mubr.msk.bf16.mxu1 %vm484_vm0, %v7459_v19  ;;  %7301 = vmatpush3.bf16.msra.mxu0 %v7488_v34  ;;  %v7519_v15 = vld [vmem:[%s12646_s0 + $0x1f8] sm:$0xff]   ;;  %v7521_v17 = vld [vmem:[%s12646_s0 + $0x300] sm:$0xff]   ;;  %v7523_v19 = vld [vmem:[%s12646_s0 + $0x308] sm:$0xff]  }
  0x1d   :  { %7373 = vmatpush3.bf16.msra.mxu1 %v7489_v35  ;;  %7302 = vmatprep.subr.bf16.mxu0 %v7506_v44  ;;  %v7527_v23 = vld [vmem:[%s12646_s0 + $0x318] sm:$0xff]   ;;  %v7528_v24 = vld [vmem:[%s12646_s0 + $0x220] sm:$0xff]   ;;  %v7538_v34 = vld [vmem:[%s12646_s0 + $0x248] sm:$0xff]  }
  0x1e   :  { %7374 = vmatprep.subr.bf16.mxu1 %v7507_v45  ;;  %v7539_v35 = vld [vmem:[%s12646_s0 + $0x348] sm:$0xff]  }
  0x20   :  { %7303 = vmatpush3.bf16.msra.mxu0 %v7506_v44  ;;  %v7548_v44 = vld [vmem:[%s12646_s0 + $0x270] sm:$0xff]  }
  0x21   :  { %7375 = vmatpush3.bf16.msra.mxu1 %v7507_v45  ;;  %v7549_v45 = vld [vmem:[%s12646_s0 + $0x370] sm:$0xff]  }
  0x22   :  { %7169 = vmatmul.mubr.msk.bf16.gmra.mxu0 %vm484_vm0, %v7460_v20  ;;  %v7524_v20 = vld [vmem:[%s12646_s0 + $0x210] sm:$0xff]  }
  0x23   :  { %7241 = vmatmul.mubr.msk.bf16.gmra.mxu1 %vm484_vm0, %v7461_v21  ;;  %7172 = vmatprep.mubr.msk.bf16.mxu0 %vm484_vm0, %v7462_v22  ;;  %v7525_v21 = vld [vmem:[%s12646_s0 + $0x310] sm:$0xff]   ;;  %v7526_v22 = vld [vmem:[%s12646_s0 + $0x218] sm:$0xff]  }
  0x24   :  { %7244 = vmatprep.mubr.msk.bf16.mxu1 %vm484_vm0, %v7463_v25  ;;  %v7529_v25 = vld [vmem:[%s12646_s0 + $0x320] sm:$0xff]  }
  0x2a   :  { %7173 = vmatmul.mubr.msk.bf16.gmra.mxu0 %vm484_vm0, %v7464_v26  ;;  %v7530_v26 = vld [vmem:[%s12646_s0 + $0x228] sm:$0xff]  }
  0x2b   :  { %7245 = vmatmul.mubr.msk.bf16.gmra.mxu1 %vm484_vm0, %v7465_v27  ;;  %7176 = vmatprep.mubr.msk.bf16.mxu0 %vm484_vm0, %v7466_v28  ;;  %v7531_v27 = vld [vmem:[%s12646_s0 + $0x328] sm:$0xff]   ;;  %v7532_v28 = vld [vmem:[%s12646_s0 + $0x230] sm:$0xff]  }
  0x2c   :  { %7248 = vmatprep.mubr.msk.bf16.mxu1 %vm484_vm0, %v7467_v29  ;;  %v7533_v29 = vld [vmem:[%s12646_s0 + $0x330] sm:$0xff]  }
  0x32   :  { %7177 = vmatmul.mubr.msk.bf16.gmra.mxu0 %vm484_vm0, %v7468_v30  ;;  %v7534_v30 = vld [vmem:[%s12646_s0 + $0x238] sm:$0xff]  }
  0x33   :  { %7249 = vmatmul.mubr.msk.bf16.gmra.mxu1 %vm484_vm0, %v7469_v31  ;;  %7180 = vmatprep.mubr.msk.bf16.mxu0 %vm484_vm0, %v7472_v32  ;;  %v7535_v31 = vld [vmem:[%s12646_s0 + $0x338] sm:$0xff]   ;;  %v7536_v32 = vld [vmem:[%s12646_s0 + $0x240] sm:$0xff]  }
  0x34   :  { %7252 = vmatprep.mubr.msk.bf16.mxu1 %vm484_vm0, %v7473_v33  ;;  %v7537_v33 = vld [vmem:[%s12646_s0 + $0x340] sm:$0xff]  }
  0x3a   :  { %7181 = vmatmul.mubr.msk.bf16.gmra.mxu0 %vm484_vm0, %v7474_v36  ;;  %v7540_v36 = vld [vmem:[%s12646_s0 + $0x250] sm:$0xff]  }
  0x3b   :  { %7253 = vmatmul.mubr.msk.bf16.gmra.mxu1 %vm484_vm0, %v7475_v37  ;;  %7184 = vmatprep.mubr.msk.bf16.mxu0 %vm484_vm0, %v7476_v38  ;;  %v7541_v37 = vld [vmem:[%s12646_s0 + $0x350] sm:$0xff]   ;;  %v7542_v38 = vld [vmem:[%s12646_s0 + $0x258] sm:$0xff]  }
  0x3c   :  { %7256 = vmatprep.mubr.msk.bf16.mxu1 %vm484_vm0, %v7477_v39  ;;  %v7543_v39 = vld [vmem:[%s12646_s0 + $0x358] sm:$0xff]  }
  0x42   :  { %7185 = vmatmul.mubr.msk.bf16.gmra.mxu0 %vm484_vm0, %v7478_v40  ;;  %v7544_v40 = vld [vmem:[%s12646_s0 + $0x260] sm:$0xff]  }
  0x43   :  { %7257 = vmatmul.mubr.msk.bf16.gmra.mxu1 %vm484_vm0, %v7479_v41  ;;  %7188 = vmatprep.mubr.msk.bf16.mxu0 %vm484_vm0, %v7480_v42  ;;  %v7545_v41 = vld [vmem:[%s12646_s0 + $0x360] sm:$0xff]   ;;  %v7546_v42 = vld [vmem:[%s12646_s0 + $0x268] sm:$0xff]  }
  0x44   :  { %7260 = vmatprep.mubr.msk.bf16.mxu1 %vm484_vm0, %v7481_v43  ;;  %v7547_v43 = vld [vmem:[%s12646_s0 + $0x368] sm:$0xff]  }
  0x4a   :  { %7189 = vmatmul.mubr.msk.bf16.gmra.mxu0 %vm484_vm0, %v7482_v46  ;;  %v7550_v46 = vld [vmem:[%s12646_s0 + $0x278] sm:$0xff]  }
  0x4b   :  { %7261 = vmatmul.mubr.msk.bf16.gmra.mxu1 %vm484_vm0, %v7483_v47  ;;  %7192 = vmatprep.mubr.msk.bf16.mxu0 %vm484_vm0, %v7484_v48  ;;  %v7551_v47 = vld [vmem:[%s12646_s0 + $0x378] sm:$0xff]   ;;  %v7552_v48 = vld [vmem:[%s12646_s0 + $0x280] sm:$0xff]  }
  0x4c   :  { %7264 = vmatprep.mubr.msk.bf16.mxu1 %vm484_vm0, %v7485_v49  ;;  %v7553_v49 = vld [vmem:[%s12646_s0 + $0x380] sm:$0xff]  }
  0x52   :  { %7193 = vmatmul.mubr.msk.bf16.gmra.mxu0 %vm484_vm0, %v7486_v50  ;;  %v7554_v50 = vld [vmem:[%s12646_s0 + $0x288] sm:$0xff]  }
  0x53   :  { %7265 = vmatmul.mubr.msk.bf16.gmra.mxu1 %vm484_vm0, %v7487_v51  ;;  %7196 = vmatprep.mubr.msk.bf16.mxu0 %vm484_vm0, %v7490_v52  ;;  %v7555_v51 = vld [vmem:[%s12646_s0 + $0x388] sm:$0xff]   ;;  %v7556_v52 = vld [vmem:[%s12646_s0 + $0x290] sm:$0xff]  }
  0x54   :  { %7268 = vmatprep.mubr.msk.bf16.mxu1 %vm484_vm0, %v7491_v53  ;;  %v7557_v53 = vld [vmem:[%s12646_s0 + $0x390] sm:$0xff]  }
  0x5a   :  { %7197 = vmatmul.mubr.msk.bf16.gmra.mxu0 %vm484_vm0, %v7492_v54 }
  0x5b   :  { %7269 = vmatmul.mubr.msk.bf16.gmra.mxu1 %vm484_vm0, %v7493_v55  ;;  %7200 = vmatprep.mubr.msk.bf16.mxu0 %vm484_vm0, %v7494_v56 }
  0x5c   :  { %7272 = vmatprep.mubr.msk.bf16.mxu1 %vm484_vm0, %v7495_v57 }
  0x62   :  { %7201 = vmatmul.mubr.msk.bf16.gmra.mxu0 %vm484_vm0, %v7496_v58 }
  0x63   :  { %7273 = vmatmul.mubr.msk.bf16.gmra.mxu1 %vm484_vm0, %v7497_v59  ;;  %7204 = vmatprep.mubr.msk.bf16.mxu0 %vm484_vm0, %v7498_v60  ;;  %v7558_v59 = vld [vmem:[%s12646_s0 + $0x298] sm:$0xff]  }
  0x64   :  { %7276 = vmatprep.mubr.msk.bf16.mxu1 %vm484_vm0, %v7499_v61  ;;  %v7559_v61 = vld [vmem:[%s12646_s0 + $0x398] sm:$0xff]  }
  0x6a   :  { %7205 = vmatmul.mubr.msk.bf16.gmra.mxu0 %vm484_vm0, %v7500_v62  ;;  %v7560_v62 = vld [vmem:[%s12646_s0 + $0x2a0] sm:$0xff]  }
  0x6b   :  { %7277 = vmatmul.mubr.msk.bf16.gmra.mxu1 %vm484_vm0, %v7501_v63  ;;  %7208 = vmatprep.mubr.msk.bf16.mxu0 %vm484_vm0, %v7502_v0  ;;  %v7561_v0 = vld [vmem:[%s12646_s0 + $0x3a0] sm:$0xff]  }
  0x6c   :  { %7280 = vmatprep.mubr.msk.bf16.mxu1 %vm484_vm0, %v7503_v1 }
  0x72   :  { %7209 = vmatmul.mubr.msk.bf16.gmra.mxu0 %vm484_vm0, %v7504_v2 }
  0x73   :  { %7281 = vmatmul.mubr.msk.bf16.gmra.mxu1 %vm484_vm0, %v7505_v3  ;;  %7212 = vmatprep.mubr.msk.bf16.mxu0 %vm484_vm0, %v7508_v4 }
  0x74   :  { %7284 = vmatprep.mubr.msk.bf16.mxu1 %vm484_vm0, %v7509_v5 }
  0x7a   :  { %7213 = vmatmul.mubr.msk.bf16.gmra.mxu0 %vm484_vm0, %v7510_v6 }
  0x7b   :  { %7285 = vmatmul.mubr.msk.bf16.gmra.mxu1 %vm484_vm0, %v7511_v7  ;;  %7216 = vmatprep.mubr.msk.bf16.mxu0 %vm484_vm0, %v7512_v8  ;;  %v7562_v7 = vld [vmem:[%s12646_s0 + $0x2a8] sm:$0xff]  }
  0x7c   :  { %7288 = vmatprep.mubr.msk.bf16.mxu1 %vm484_vm0, %v7513_v9  ;;  %v7563_v9 = vld [vmem:[%s12646_s0 + $0x3a8] sm:$0xff]  }
  0x82   :  { %7217 = vmatmul.mubr.msk.bf16.gmra.mxu0 %vm484_vm0, %v7514_v10  ;;  %v7564_v10 = vld [vmem:[%s12646_s0 + $0x2b0] sm:$0xff]  }
  0x83   :  { %7289 = vmatmul.mubr.msk.bf16.gmra.mxu1 %vm484_vm0, %v7515_v11  ;;  %7220 = vmatprep.mubr.msk.bf16.mxu0 %vm484_vm0, %v7516_v12  ;;  %v7565_v12 = vld [vmem:[%s12646_s0 + $0x3b0] sm:$0xff]  }
  0x84   :  { %7292 = vmatprep.mubr.msk.bf16.mxu1 %vm484_vm0, %v7517_v13 }
  0x8a   :  { %7221 = vmatmul.mubr.msk.bf16.gmra.mxu0 %vm484_vm0, %v7518_v14 }
  0x8b   :  { %7293 = vmatmul.mubr.msk.bf16.gmra.mxu1 %vm484_vm0, %v7519_v15  ;;  %7304 = vmatprep.mubr.msk.bf16.mxu0 %vm484_vm0, %v7520_v16 }
  0x8c   :  { %7376 = vmatprep.mubr.msk.bf16.mxu1 %vm484_vm0, %v7521_v17 }
  0x92   :  { %7305 = vmatmul.mubr.msk.bf16.vlgmr.msra.gmra.mxu0 %vm484_vm0, %v7522_v18 }
  0x93   :  { %7377 = vmatmul.mubr.msk.bf16.vlgmr.msra.gmra.mxu1 %vm484_vm0, %v7523_v19  ;;  %7308 = vmatprep.mubr.msk.bf16.mxu0 %vm484_vm0, %v7524_v20  ;;  %v7566_v19 = vld [vmem:[%s12646_s0 + $0x2b8] sm:$0xff]  }
  0x94   :  { %7380 = vmatprep.mubr.msk.bf16.mxu1 %vm484_vm0, %v7525_v21  ;;  %v7567_v21 = vld [vmem:[%s12646_s0 + $0x3b8] sm:$0xff]  }
  0x9a   :  { %7309 = vmatmul.mubr.msk.bf16.gmra.mxu0 %vm484_vm0, %v7526_v22  ;;  %v7568_v22 = vld [vmem:[%s12646_s0 + $0x2c0] sm:$0xff]  }
  0x9b   :  { %7381 = vmatmul.mubr.msk.bf16.gmra.mxu1 %vm484_vm0, %v7527_v23  ;;  %7312 = vmatprep.mubr.msk.bf16.mxu0 %vm484_vm0, %v7528_v24  ;;  %v7569_v24 = vld [vmem:[%s12646_s0 + $0x3c0] sm:$0xff]  }
  0x9c   :  { %7384 = vmatprep.mubr.msk.bf16.mxu1 %vm484_vm0, %v7529_v25 }
  0xa2   :  { %7313 = vmatmul.mubr.msk.bf16.gmra.mxu0 %vm484_vm0, %v7530_v26 }
  0xa3   :  { %7385 = vmatmul.mubr.msk.bf16.gmra.mxu1 %vm484_vm0, %v7531_v27  ;;  %7316 = vmatprep.mubr.msk.bf16.mxu0 %vm484_vm0, %v7532_v28 }
  0xa4   :  { %7388 = vmatprep.mubr.msk.bf16.mxu1 %vm484_vm0, %v7533_v29 }
  0xaa   :  { %7317 = vmatmul.mubr.msk.bf16.gmra.mxu0 %vm484_vm0, %v7534_v30 }
  0xab   :  { %7389 = vmatmul.mubr.msk.bf16.gmra.mxu1 %vm484_vm0, %v7535_v31  ;;  %7320 = vmatprep.mubr.msk.bf16.mxu0 %vm484_vm0, %v7536_v32  ;;  %v7570_v31 = vld [vmem:[%s12646_s0 + $0x2c8] sm:$0xff]  }
  0xac   :  { %7392 = vmatprep.mubr.msk.bf16.mxu1 %vm484_vm0, %v7537_v33  ;;  %v7571_v33 = vld [vmem:[%s12646_s0 + $0x3c8] sm:$0xff]  }
  0xb2   :  { %7321 = vmatmul.mubr.msk.bf16.gmra.mxu0 %vm484_vm0, %v7538_v34  ;;  %v7572_v34 = vld [vmem:[%s12646_s0 + $0x2d0] sm:$0xff]  }
  0xb3   :  { %7393 = vmatmul.mubr.msk.bf16.gmra.mxu1 %vm484_vm0, %v7539_v35  ;;  %7324 = vmatprep.mubr.msk.bf16.mxu0 %vm484_vm0, %v7540_v36  ;;  %v7573_v36 = vld [vmem:[%s12646_s0 + $0x3d0] sm:$0xff]  }
  0xb4   :  { %7396 = vmatprep.mubr.msk.bf16.mxu1 %vm484_vm0, %v7541_v37 }
  0xba   :  { %7325 = vmatmul.mubr.msk.bf16.gmra.mxu0 %vm484_vm0, %v7542_v38 }
  0xbb   :  { %7397 = vmatmul.mubr.msk.bf16.gmra.mxu1 %vm484_vm0, %v7543_v39  ;;  %7328 = vmatprep.mubr.msk.bf16.mxu0 %vm484_vm0, %v7544_v40 }
  0xbc   :  { %7400 = vmatprep.mubr.msk.bf16.mxu1 %vm484_vm0, %v7545_v41 }
  0xc2   :  { %7329 = vmatmul.mubr.msk.bf16.gmra.mxu0 %vm484_vm0, %v7546_v42 }
  0xc3   :  { %7401 = vmatmul.mubr.msk.bf16.gmra.mxu1 %vm484_vm0, %v7547_v43  ;;  %7332 = vmatprep.mubr.msk.bf16.mxu0 %vm484_vm0, %v7548_v44  ;;  %v7574_v43 = vld [vmem:[%s12646_s0 + $0x2d8] sm:$0xff]  }
  0xc4   :  { %7404 = vmatprep.mubr.msk.bf16.mxu1 %vm484_vm0, %v7549_v45  ;;  %v7575_v45 = vld [vmem:[%s12646_s0 + $0x3d8] sm:$0xff]  }
  0xca   :  { %7333 = vmatmul.mubr.msk.bf16.gmra.mxu0 %vm484_vm0, %v7550_v46  ;;  %v7576_v46 = vld [vmem:[%s12646_s0 + $0x2e0] sm:$0xff]  }
  0xcb   :  { %7405 = vmatmul.mubr.msk.bf16.gmra.mxu1 %vm484_vm0, %v7551_v47  ;;  %7336 = vmatprep.mubr.msk.bf16.mxu0 %vm484_vm0, %v7552_v48  ;;  %v7577_v48 = vld [vmem:[%s12646_s0 + $0x3e0] sm:$0xff]  }
  0xcc   :  { %7408 = vmatprep.mubr.msk.bf16.mxu1 %vm484_vm0, %v7553_v49 }
  0xd2   :  { %v8053_v54 = vpop.f32.mrf.mxu0  ;;  %7337 = vmatmul.mubr.msk.bf16.gmra.mxu0 %vm484_vm0, %v7554_v50 }
  0xd3   :  { %13341 = vst [vmem:[#allocation2_spill] sm:$0xff] %v8053_v54  ;;  %v8056_v55 = vpop.f32.mrf.mxu1  ;;  %7409 = vmatmul.mubr.msk.bf16.gmra.mxu1 %vm484_vm0, %v7555_v51  ;;  %7340 = vmatprep.mubr.msk.bf16.mxu0 %vm484_vm0, %v7556_v52 }
  0xd4   :  { %13342 = vst [vmem:[#allocation3_spill] sm:$0xff] %v8056_v55  ;;  %v8060_v56 = vpop.f32.mrf.mxu0  ;;  %7412 = vmatprep.mubr.msk.bf16.mxu1 %vm484_vm0, %v7557_v53 }
  0xd5   :  { %13343 = vst [vmem:[#allocation4_spill] sm:$0xff] %v8060_v56  ;;  %v8063_v57 = vpop.f32.mrf.mxu1 }
  0xd6   :  { %13344 = vst [vmem:[#allocation5_spill] sm:$0xff] %v8063_v57  ;;  %v8065_v58 = vpop.f32.mrf.mxu0 }
  0xd7   :  { %13345 = vst [vmem:[#allocation6_spill] sm:$0xff] %v8065_v58  ;;  %v8070_v60 = vpop.f32.mrf.mxu1 }
  0xd8   :  { %13346 = vst [vmem:[#allocation7_spill] sm:$0xff] %v8070_v60  ;;  %v8078_v63 = vpop.f32.mrf.mxu0 }
  0xd9   :  { %13347 = vst [vmem:[#allocation8_spill] sm:$0xff] %v8078_v63  ;;  %v8083_v1 = vpop.f32.mrf.mxu1 }
  0xda   :  { %13348 = vst [vmem:[#allocation9_spill] sm:$0xff] %v8083_v1  ;;  %v8085_v2 = vpop.f32.mrf.mxu0  ;;  %7341 = vmatmul.mubr.msk.bf16.gmra.mxu0 %vm484_vm0, %v7558_v59 }
  0xdb   :  { %13349 = vst [vmem:[#allocation10_spill] sm:$0xff] %v8085_v2  ;;  %v8088_v3 = vpop.f32.mrf.mxu1  ;;  %7413 = vmatmul.mubr.msk.bf16.gmra.mxu1 %vm484_vm0, %v7559_v61  ;;  %7344 = vmatprep.mubr.msk.bf16.mxu0 %vm484_vm0, %v7560_v62  ;;  %v7578_v61 = vld [vmem:[%s12646_s0 + $0x2e8] sm:$0xff]  }
  0xdc   :  { %13350 = vst [vmem:[#allocation11_spill] sm:$0xff] %v8088_v3  ;;  %v8092_v4 = vpop.f32.mrf.mxu0  ;;  %7416 = vmatprep.mubr.msk.bf16.mxu1 %vm484_vm0, %v7561_v0  ;;  %v7579_v0 = vld [vmem:[%s12646_s0 + $0x3e8] sm:$0xff]  }
  0xdd   :  { %13351 = vst [vmem:[#allocation12_spill] sm:$0xff] %v8092_v4  ;;  %v8095_v5 = vpop.f32.mrf.mxu1 }
  0xde   :  { %13352 = vst [vmem:[#allocation13_spill] sm:$0xff] %v8095_v5  ;;  %v8097_v6 = vpop.f32.mrf.mxu0 }
  0xdf   :  { %13353 = vst [vmem:[#allocation14_spill] sm:$0xff] %v8097_v6  ;;  %v8102_v8 = vpop.f32.mrf.mxu1 }
  0xe0   :  { %13354 = vst [vmem:[#allocation15_spill] sm:$0xff] %v8102_v8  ;;  %v8110_v11 = vpop.f32.mrf.mxu0 }
  0xe1   :  { %13355 = vst [vmem:[#allocation16_spill] sm:$0xff] %v8110_v11  ;;  %v8115_v13 = vpop.f32.mrf.mxu1 }
  0xe2   :  { %13356 = vst [vmem:[#allocation17_spill] sm:$0xff] %v8115_v13  ;;  %v8117_v14 = vpop.f32.mrf.mxu0  ;;  %7345 = vmatmul.mubr.msk.bf16.gmra.mxu0 %vm484_vm0, %v7562_v7  ;;  %v7580_v7 = vld [vmem:[%s12646_s0 + $0x2f0] sm:$0xff]  }
  0xe3   :  { %13357 = vst [vmem:[#allocation18_spill] sm:$0xff] %v8117_v14  ;;  %v8120_v15 = vpop.f32.mrf.mxu1  ;;  %7417 = vmatmul.mubr.msk.bf16.gmra.mxu1 %vm484_vm0, %v7563_v9  ;;  %7348 = vmatprep.mubr.msk.bf16.mxu0 %vm484_vm0, %v7564_v10  ;;  %v7581_v10 = vld [vmem:[%s12646_s0 + $0x3f0] sm:$0xff]  }
  0xe4   :  { %13358 = vst [vmem:[#allocation19_spill] sm:$0xff] %v8120_v15  ;;  %v8124_v16 = vpop.f32.mrf.mxu0  ;;  %7420 = vmatprep.mubr.msk.bf16.mxu1 %vm484_vm0, %v7565_v12 }
  0xe5   :  { %13359 = vst [vmem:[#allocation20_spill] sm:$0xff] %v8124_v16  ;;  %v8127_v17 = vpop.f32.mrf.mxu1 }
  0xe6   :  { %13360 = vst [vmem:[#allocation21_spill] sm:$0xff] %v8127_v17  ;;  %v8129_v18 = vpop.f32.mrf.mxu0 }
  0xe7   :  { %13361 = vst [vmem:[#allocation22_spill] sm:$0xff] %v8129_v18  ;;  %v8134_v20 = vpop.f32.mrf.mxu1 }
  0xe8   :  { %13362 = vst [vmem:[#allocation23_spill] sm:$0xff] %v8134_v20  ;;  %v8142_v23 = vpop.f32.mrf.mxu0 }
  0xe9   :  { %13363 = vst [vmem:[#allocation24_spill] sm:$0xff] %v8142_v23  ;;  %v8147_v25 = vpop.f32.mrf.mxu1 }
  0xea   :  { %13364 = vst [vmem:[#allocation25_spill] sm:$0xff] %v8147_v25  ;;  %v8149_v26 = vpop.f32.mrf.mxu0  ;;  %7349 = vmatmul.mubr.msk.bf16.gmra.mxu0 %vm484_vm0, %v7566_v19  ;;  %v2577_v19 = vadd.f32 %v8078_v63, %v8060_v56 }
  0xeb   :  { %13365 = vst [vmem:[#allocation26_spill] sm:$0xff] %v8149_v26  ;;  %v8152_v27 = vpop.f32.mrf.mxu1  ;;  %7421 = vmatmul.mubr.msk.bf16.gmra.mxu1 %vm484_vm0, %v7567_v21  ;;  %7352 = vmatprep.mubr.msk.bf16.mxu0 %vm484_vm0, %v7568_v22  ;;  %v2646_v21 = vadd.f32 %v8083_v1, %v8063_v57 }
  0xec   :  { %13366 = vst [vmem:[#allocation27_spill] sm:$0xff] %v8152_v27  ;;  %v8156_v28 = vpop.f32.mrf.mxu0  ;;  %7424 = vmatprep.mubr.msk.bf16.mxu1 %vm484_vm0, %v7569_v24 }
  0xed   :  { %13367 = vst [vmem:[#allocation28_spill] sm:$0xff] %v8156_v28  ;;  %v8159_v29 = vpop.f32.mrf.mxu1 }
  0xee   :  { %13368 = vst [vmem:[#allocation29_spill] sm:$0xff] %v8159_v29  ;;  %v8161_v30 = vpop.f32.mrf.mxu0 }
  0xef   :  { %13369 = vst [vmem:[#allocation30_spill] sm:$0xff] %v8161_v30  ;;  %v8166_v32 = vpop.f32.mrf.mxu1 }
  0xf0   :  { %13370 = vst [vmem:[#allocation31_spill] sm:$0xff] %v8166_v32  ;;  %v8174_v35 = vpop.f32.mrf.mxu0 }
  0xf1   :  { %13371 = vst [vmem:[#allocation32_spill] sm:$0xff] %v8174_v35  ;;  %v8179_v37 = vpop.f32.mrf.mxu1 }
  0xf2   :  { %13372 = vst [vmem:[#allocation33_spill] sm:$0xff] %v8179_v37  ;;  %v8181_v38 = vpop.f32.mrf.mxu0  ;;  %7353 = vmatmul.mubr.msk.bf16.gmra.mxu0 %vm484_vm0, %v7570_v31 }
  0xf3   :  { %13373 = vst [vmem:[#allocation34_spill] sm:$0xff] %v8181_v38  ;;  %v8184_v39 = vpop.f32.mrf.mxu1  ;;  %7425 = vmatmul.mubr.msk.bf16.gmra.mxu1 %vm484_vm0, %v7571_v33  ;;  %7356 = vmatprep.mubr.msk.bf16.mxu0 %vm484_vm0, %v7572_v34  ;;  %v2578_v34 = vadd.f32 %v8053_v54, %v2577_v19 }
  0xf4   :  { %13374 = vst [vmem:[#allocation35_spill] sm:$0xff] %v8184_v39  ;;  %v8188_v40 = vpop.f32.mrf.mxu0  ;;  %7428 = vmatprep.mubr.msk.bf16.mxu1 %vm484_vm0, %v7573_v36  ;;  %v2647_v36 = vadd.f32 %v8056_v55, %v2646_v21 }
  0xf5   :  { %13375 = vst [vmem:[#allocation36_spill] sm:$0xff] %v8188_v40  ;;  %v8191_v41 = vpop.f32.mrf.mxu1 }
  0xf6   :  { %13376 = vst [vmem:[#allocation37_spill] sm:$0xff] %v8191_v41  ;;  %v8193_v42 = vpop.f32.mrf.mxu0 }
  0xf7   :  { %13377 = vst [vmem:[#allocation38_spill] sm:$0xff] %v8193_v42  ;;  %v8198_v44 = vpop.f32.mrf.mxu1 }
  0xf8   :  { %13378 = vst [vmem:[#allocation39_spill] sm:$0xff] %v8198_v44  ;;  %v8206_v47 = vpop.f32.mrf.mxu0 }
  0xf9   :  { %13379 = vst [vmem:[#allocation40_spill] sm:$0xff] %v8206_v47  ;;  %v8211_v49 = vpop.f32.mrf.mxu1 }
  0xfa   :  { %13380 = vst [vmem:[#allocation41_spill] sm:$0xff] %v8211_v49  ;;  %v8213_v50 = vpop.f32.mrf.mxu0  ;;  %7357 = vmatmul.mubr.msk.bf16.gmra.mxu0 %vm484_vm0, %v7574_v43 }
  0xfb   :  { %13381 = vst [vmem:[#allocation42_spill] sm:$0xff] %v8213_v50  ;;  %v8216_v51 = vpop.f32.mrf.mxu1  ;;  %7429 = vmatmul.mubr.msk.bf16.gmra.mxu1 %vm484_vm0, %v7575_v45  ;;  %7360 = vmatprep.mubr.msk.bf16.mxu0 %vm484_vm0, %v7576_v46  ;;  %v7582_v45 = vld [vmem:[%s12646_s0 + $0x2f8] sm:$0xff]  }
  0xfc   :  { %13382 = vst [vmem:[#allocation43_spill] sm:$0xff] %v8216_v51  ;;  %v8220_v52 = vpop.f32.mrf.mxu0  ;;  %7432 = vmatprep.mubr.msk.bf16.mxu1 %vm484_vm0, %v7577_v48  ;;  %v7583_v48 = vld [vmem:[%s12646_s0 + $0x3f8] sm:$0xff]  }
  0xfd   :  { %13383 = vst [vmem:[#allocation44_spill] sm:$0xff] %v8220_v52  ;;  %v8223_v53 = vpop.f32.mrf.mxu1 }
  0xfe   :  { %13384 = vst [vmem:[#allocation45_spill] sm:$0xff] %v8223_v53  ;;  %v8225_v59 = vpop.f32.mrf.mxu0 }
  0xff   :  { %v8230_v62 = vpop.f32.mrf.mxu1 }
 0x100   :  { %13385 = vst [vmem:[#allocation46_spill] sm:$0xff] %v8230_v62  ;;  %v8238_v9 = vpop.f32.mrf.mxu0 }
 0x101   :  { %13386 = vst [vmem:[#allocation47_spill] sm:$0xff] %v8238_v9  ;;  %v8243_v12 = vpop.f32.mrf.mxu1 }
 0x102   :  { %13387 = vst [vmem:[#allocation48_spill] sm:$0xff] %v8243_v12  ;;  %v8249_v22 = vpop.f32.mrf.mxu0  ;;  %7361 = vmatmul.mubr.msk.bf16.gmra.mxu0 %vm484_vm0, %v7578_v61 }
 0x103   :  { %v8252_v24 = vpop.f32.mrf.mxu1  ;;  %7433 = vmatmul.mubr.msk.bf16.gmra.mxu1 %vm484_vm0, %v7579_v0  ;;  %7364 = vmatprep.mubr.msk.bf16.mxu0 %vm484_vm0, %v7580_v7  ;;  %v2579_v7 = vadd.f32 %v8065_v58, %v2578_v34 }
 0x104   :  { %13388 = vst [vmem:[#allocation49_spill] sm:$0xff] %v8252_v24  ;;  %v8256_v31 = vpop.f32.mrf.mxu0  ;;  %7436 = vmatprep.mubr.msk.bf16.mxu1 %vm484_vm0, %v7581_v10  ;;  %v2648_v10 = vadd.f32 %v8070_v60, %v2647_v36 }
 0x105   :  { %v8259_v33 = vpop.f32.mrf.mxu1  ;;  %v2580_v57 = vadd.f32 %v2579_v7, %v8092_v4 }
 0x106   :  { %13389 = vst [vmem:[#allocation50_spill] sm:$0xff] %v8259_v33  ;;  %v8263_v43 = vpop.f32.mrf.mxu0  ;;  %v2649_v54 = vadd.f32 %v2648_v10, %v8095_v5 }
 0x107   :  { %v8268_v46 = vpop.f32.mrf.mxu1 }
 0x108   :  { %13390 = vst [vmem:[#allocation51_spill] sm:$0xff] %v8268_v46  ;;  %v8273_v61 = vpop.f32.mrf.mxu0 }
 0x109   :  { %v8275_v0 = vpop.f32.mrf.mxu1 }
 0x10a   :  { %13391 = vst [vmem:[#allocation52_spill] sm:$0xff] %v8275_v0  ;;  %v8279_v19 = vpop.f32.mrf.mxu0  ;;  %7365 = vmatmul.mubr.msk.bf16.gmra.mxu0 %vm484_vm0, %v7582_v45  ;;  %v2581_v45 = vadd.f32 %v2580_v57, %v8110_v11 }
 0x10b   :  { %v8282_v21 = vpop.f32.mrf.mxu1  ;;  %7437 = vmatmul.mubr.msk.bf16.gmra.mxu1 %vm484_vm0, %v7583_v48  ;;  %v2650_v48 = vadd.f32 %v2649_v54, %v8115_v13 }
 0x10c   :  { %13392 = vst [vmem:[#allocation53_spill] sm:$0xff] %v8282_v21  ;;  %v8285_v55 = vpop.f32.mrf.mxu0  ;;  %v2582_v10 = vadd.f32 %v8085_v2, %v2581_v45 }
 0x10d   :  { %v8287_v1 = vpop.f32.mrf.mxu1  ;;  %v2651_v5 = vadd.f32 %v8088_v3, %v2650_v48 }
 0x10e   :  { %13393 = vst [vmem:[#allocation54_spill] sm:$0xff] %v8287_v1  ;;  %v8291_v63 = vpop.f32.mrf.mxu0  ;;  %v2583_v54 = vadd.f32 %v8097_v6, %v2582_v10 }
 0x10f   :  { %13394 = vst [vmem:[#allocation55_spill] sm:$0xff] %v8291_v63  ;;  %v8293_v34 = vpop.f32.mrf.mxu1  ;;  %v2652_v13 = vadd.f32 %v8102_v8, %v2651_v5 }
 0x110   :  { %13395 = vst [vmem:[#allocation56_spill] sm:$0xff] %v8293_v34  ;;  %v8295_v36 = vpop.f32.mrf.mxu0  ;;  %v2584_v48 = vadd.f32 %v2583_v54, %v8124_v16 }
 0x111   :  { %v8297_v60 = vpop.f32.mrf.mxu1  ;;  %v2653_v3 = vadd.f32 %v2652_v13, %v8127_v17 }
 0x112   :  { %13396 = vst [vmem:[#allocation57_spill] sm:$0xff] %v8297_v60  ;;  %v8301_v58 = vpop.f32.mrf.mxu0  ;;  %v2585_v5 = vadd.f32 %v2584_v48, %v8142_v23 }
 0x113   :  { %13397 = vst [vmem:[#allocation58_spill] sm:$0xff] %v8301_v58  ;;  %v8303_v56 = vpop.f32.mrf.mxu1  ;;  %v2654_v8 = vadd.f32 %v2653_v3, %v8147_v25 }
 0x114   :  { %13398 = vst [vmem:[#allocation59_spill] sm:$0xff] %v8303_v56  ;;  %v8305_v21 = vpop.f32.mrf.mxu0  ;;  %v2586_v13 = vadd.f32 %v8117_v14, %v2585_v5 }
 0x115   :  { %v8307_v7 = vpop.f32.mrf.mxu1  ;;  %v2655_v17 = vadd.f32 %v8120_v15, %v2654_v8 }
 0x116   :  { %13399 = vst [vmem:[#allocation60_spill] sm:$0xff] %v8307_v7  ;;  %v8311_v4 = vpop.f32.mrf.mxu0  ;;  %v2587_v3 = vadd.f32 %v8129_v18, %v2586_v13 }
 0x117   :  { %13400 = vst [vmem:[#allocation61_spill] sm:$0xff] %v8311_v4  ;;  %v8313_v34 = vpop.f32.mrf.mxu1  ;;  %v2656_v25 = vadd.f32 %v8134_v20, %v2655_v17 }
 0x118   :  { %13401 = vst [vmem:[#allocation62_spill] sm:$0xff] %v8313_v34  ;;  %v8315_v63 = vpop.f32.mrf.mxu0  ;;  %v2588_v8 = vadd.f32 %v2587_v3, %v8156_v28 }
 0x119   :  { %v8317_v57 = vpop.f32.mrf.mxu1  ;;  %v2657_v15 = vadd.f32 %v2656_v25, %v8159_v29 }
 0x11a   :  { %13402 = vst [vmem:[#allocation63_spill] sm:$0xff] %v8317_v57  ;;  %v8321_v11 = vpop.f32.mrf.mxu0  ;;  %v2589_v17 = vadd.f32 %v2588_v8, %v8174_v35 }
 0x11b   :  { %13403 = vst [vmem:[#allocation64_spill] sm:$0xff] %v8321_v11  ;;  %v8323_v56 = vpop.f32.mrf.mxu1  ;;  %v2658_v20 = vadd.f32 %v2657_v15, %v8179_v37 }
 0x11c   :  { %13404 = vst [vmem:[#allocation65_spill] sm:$0xff] %v8323_v56  ;;  %v8325_v58 = vpop.f32.mrf.mxu0  ;;  %v2590_v25 = vadd.f32 %v8149_v26, %v2589_v17 }
 0x11d   :  { %v8327_v45 = vpop.f32.mrf.mxu1  ;;  %v2659_v29 = vadd.f32 %v8152_v27, %v2658_v20 }
 0x11e   :  { %13405 = vst [vmem:[#allocation66_spill] sm:$0xff] %v8327_v45  ;;  %v8331_v2 = vpop.f32.mrf.mxu0  ;;  %v2591_v15 = vadd.f32 %v8161_v30, %v2590_v25 }
 0x11f   :  { %13406 = vst [vmem:[#allocation67_spill] sm:$0xff] %v8331_v2  ;;  %v8333_v34 = vpop.f32.mrf.mxu1  ;;  %v2660_v37 = vadd.f32 %v8166_v32, %v2659_v29 }
 0x120   :  { %13407 = vst [vmem:[#allocation68_spill] sm:$0xff] %v8333_v34  ;;  %v8335_v4 = vpop.f32.mrf.mxu0  ;;  %v2592_v20 = vadd.f32 %v2591_v15, %v8188_v40 }
 0x121   :  { %v8337_v10 = vpop.f32.mrf.mxu1  ;;  %v2661_v27 = vadd.f32 %v2660_v37, %v8191_v41 }
 0x122   :  { %13408 = vst [vmem:[#allocation69_spill] sm:$0xff] %v8337_v10  ;;  %v8341_v6 = vpop.f32.mrf.mxu0  ;;  %v2593_v29 = vadd.f32 %v2592_v20, %v8206_v47 }
 0x123   :  { %13409 = vst [vmem:[#allocation70_spill] sm:$0xff] %v8341_v6  ;;  %v8343_v56 = vpop.f32.mrf.mxu1  ;;  %v2662_v32 = vadd.f32 %v2661_v27, %v8211_v49 }
 0x124   :  { %13410 = vst [vmem:[#allocation71_spill] sm:$0xff] %v8343_v56  ;;  %v8345_v11 = vpop.f32.mrf.mxu0  ;;  %v2594_v37 = vadd.f32 %v8181_v38, %v2593_v29 }
 0x125   :  { %v8347_v54 = vpop.f32.mrf.mxu1  ;;  %v2663_v41 = vadd.f32 %v8184_v39, %v2662_v32 }
 0x126   :  { %13411 = vst [vmem:[#allocation72_spill] sm:$0xff] %v8347_v54  ;;  %v8351_v16 = vpop.f32.mrf.mxu0  ;;  %v2595_v27 = vadd.f32 %v8193_v42, %v2594_v37 }
 0x127   :  { %13412 = vst [vmem:[#allocation73_spill] sm:$0xff] %v8351_v16  ;;  %v8353_v34 = vpop.f32.mrf.mxu1  ;;  %v2664_v49 = vadd.f32 %v8198_v44, %v2663_v41 }
 0x128   :  { %13413 = vst [vmem:[#allocation74_spill] sm:$0xff] %v8353_v34  ;;  %v8355_v2 = vpop.f32.mrf.mxu0  ;;  %v2596_v32 = vadd.f32 %v2595_v27, %v8220_v52 }
 0x129   :  { %v8357_v48 = vpop.f32.mrf.mxu1  ;;  %v2665_v39 = vadd.f32 %v2664_v49, %v8223_v53 }
 0x12a   :  { %13414 = vst [vmem:[#allocation75_spill] sm:$0xff] %v8357_v48  ;;  %v8361_v23 = vpop.f32.mrf.mxu0  ;;  %v2597_v41 = vadd.f32 %v2596_v32, %v8238_v9 }
 0x12b   :  { %13415 = vst [vmem:[#allocation76_spill] sm:$0xff] %v8361_v23  ;;  %v8363_v56 = vpop.f32.mrf.mxu1  ;;  %v2666_v44 = vadd.f32 %v2665_v39, %v8243_v12 }
 0x12c   :  { %13416 = vst [vmem:[#allocation77_spill] sm:$0xff] %v8363_v56  ;;  %v8365_v6 = vpop.f32.mrf.mxu0  ;;  %v2598_v49 = vadd.f32 %v8213_v50, %v2597_v41 }
 0x12d   :  { %v8367_v5 = vpop.f32.mrf.mxu1  ;;  %v2667_v53 = vadd.f32 %v8216_v51, %v2666_v44 }
 0x12e   :  { %13417 = vst [vmem:[#allocation78_spill] sm:$0xff] %v8367_v5  ;;  %v8371_v14 = vpop.f32.mrf.mxu0  ;;  %v2599_v12 = vadd.f32 %v8225_v59, %v2598_v49 }
 0x12f   :  { %13418 = vst [vmem:[#allocation79_spill] sm:$0xff] %v8371_v14  ;;  %v8373_v34 = vpop.f32.mrf.mxu1  ;;  %v2668_v9 = vadd.f32 %v8230_v62, %v2667_v53 }
 0x130   :  { %13419 = vst [vmem:[#allocation80_spill] sm:$0xff] %v8373_v34  ;;  %v8375_v16 = vpop.f32.mrf.mxu0  ;;  %v2600_v49 = vadd.f32 %v2599_v12, %v8256_v31 }
 0x131   :  { %v8377_v13 = vpop.f32.mrf.mxu1  ;;  %v2669_v53 = vadd.f32 %v2668_v9, %v8259_v33 }
 0x132   :  { %13420 = vst [vmem:[#allocation81_spill] sm:$0xff] %v8377_v13  ;;  %v8381_v18 = vpop.f32.mrf.mxu0  ;;  %v2601_v12 = vadd.f32 %v2600_v49, %v8273_v61 }
 0x133   :  { %13421 = vst [vmem:[#allocation82_spill] sm:$0xff] %v8381_v18  ;;  %v8383_v56 = vpop.f32.mrf.mxu1  ;;  %v2670_v9 = vadd.f32 %v2669_v53, %v8275_v0 }
 0x134   :  { %13422 = vst [vmem:[#allocation83_spill] sm:$0xff] %v8383_v56  ;;  %v8385_v23 = vpop.f32.mrf.mxu0  ;;  %v2602_v49 = vadd.f32 %v8249_v22, %v2601_v12 }
 0x135   :  { %v8387_v3 = vpop.f32.mrf.mxu1  ;;  %v2671_v53 = vadd.f32 %v8252_v24, %v2670_v9 }
 0x136   :  { %13423 = vst [vmem:[#allocation84_spill] sm:$0xff] %v8387_v3  ;;  %v8391_v28 = vpop.f32.mrf.mxu0  ;;  %v2603_v12 = vadd.f32 %v8263_v43, %v2602_v49 }
 0x137   :  { %13424 = vst [vmem:[#allocation85_spill] sm:$0xff] %v8391_v28  ;;  %v8393_v34 = vpop.f32.mrf.mxu1  ;;  %v2672_v9 = vadd.f32 %v8268_v46, %v2671_v53  ;;  %v13489_v46 = vld [vmem:[#allocation56_spill] sm:$0xff] }
 0x138   :  { %13425 = vst [vmem:[#allocation86_spill] sm:$0xff] %v8393_v34  ;;  %v8395_v14 = vpop.f32.mrf.mxu0  ;;  %v2604_v49 = vadd.f32 %v2603_v12, %v8285_v55 }
 0x139   :  { %v8397_v8 = vpop.f32.mrf.mxu1  ;;  %v2673_v53 = vadd.f32 %v2672_v9, %v8287_v1  ;;  %v13483_v1 = vld [vmem:[#allocation53_spill] sm:$0xff] }
 0x13a   :  { %13426 = vst [vmem:[#allocation87_spill] sm:$0xff] %v8397_v8  ;;  %v8401_v35 = vpop.f32.mrf.mxu0  ;;  %v2605_v12 = vadd.f32 %v2604_v49, %v8295_v36 }
 0x13b   :  { %13427 = vst [vmem:[#allocation88_spill] sm:$0xff] %v8401_v35  ;;  %v8403_v56 = vpop.f32.mrf.mxu1  ;;  %v2674_v9 = vadd.f32 %v2673_v53, %v8297_v60  ;;  %v13488_v60 = vld [vmem:[#allocation55_spill] sm:$0xff] }
 0x13c   :  { %13428 = vst [vmem:[#allocation89_spill] sm:$0xff] %v8403_v56  ;;  %v8405_v18 = vpop.f32.mrf.mxu0  ;;  %v2606_v49 = vadd.f32 %v8279_v19, %v2605_v12 }
 0x13d   :  { %v8407_v17 = vpop.f32.mrf.mxu1  ;;  %v2675_v53 = vadd.f32 %v13483_v1, %v2674_v9  ;;  %v13509_v1 = vld [vmem:[#allocation62_spill] sm:$0xff] }
 0x13e   :  { %13429 = vst [vmem:[#allocation90_spill] sm:$0xff] %v8407_v17  ;;  %v8411_v26 = vpop.f32.mrf.mxu0  ;;  %v2607_v12 = vadd.f32 %v13488_v60, %v2606_v49 }
 0x13f   :  { %13430 = vst [vmem:[#allocation91_spill] sm:$0xff] %v8411_v26  ;;  %v8413_v34 = vpop.f32.mrf.mxu1  ;;  %v2676_v9 = vadd.f32 %v13489_v46, %v2675_v53  ;;  %v13503_v46 = vld [vmem:[#allocation59_spill] sm:$0xff] }
 0x140   :  { %13431 = vst [vmem:[#allocation92_spill] sm:$0xff] %v8413_v34  ;;  %v8415_v28 = vpop.f32.mrf.mxu0  ;;  %v2608_v49 = vadd.f32 %v2607_v12, %v8305_v21 }
 0x141   :  { %v8417_v25 = vpop.f32.mrf.mxu1  ;;  %v2677_v53 = vadd.f32 %v2676_v9, %v8307_v7  ;;  %v13502_v7 = vld [vmem:[#allocation58_spill] sm:$0xff] }
 0x142   :  { %13432 = vst [vmem:[#allocation93_spill] sm:$0xff] %v8417_v25  ;;  %v8421_v30 = vpop.f32.mrf.mxu0  ;;  %v2609_v12 = vadd.f32 %v2608_v49, %v8315_v63 }
 0x143   :  { %13433 = vst [vmem:[#allocation94_spill] sm:$0xff] %v8421_v30  ;;  %v8423_v56 = vpop.f32.mrf.mxu1  ;;  %v2678_v9 = vadd.f32 %v2677_v53, %v8317_v57  ;;  %v13508_v57 = vld [vmem:[#allocation61_spill] sm:$0xff] }
 0x144   :  { %13434 = vst [vmem:[#allocation95_spill] sm:$0xff] %v8423_v56  ;;  %v8425_v35 = vpop.f32.mrf.mxu0  ;;  %v2610_v49 = vadd.f32 %v13502_v7, %v2609_v12 }
 0x145   :  { %v8427_v15 = vpop.f32.mrf.mxu1  ;;  %v2679_v53 = vadd.f32 %v13503_v46, %v2678_v9  ;;  %v13529_v46 = vld [vmem:[#allocation68_spill] sm:$0xff] }
 0x146   :  { %13435 = vst [vmem:[#allocation96_spill] sm:$0xff] %v8427_v15  ;;  %v8431_v40 = vpop.f32.mrf.mxu0  ;;  %v2611_v12 = vadd.f32 %v13508_v57, %v2610_v49 }
 0x147   :  { %13436 = vst [vmem:[#allocation97_spill] sm:$0xff] %v8431_v40  ;;  %v8433_v34 = vpop.f32.mrf.mxu1  ;;  %v2680_v9 = vadd.f32 %v13509_v1, %v2679_v53  ;;  %v13523_v1 = vld [vmem:[#allocation65_spill] sm:$0xff] }
 0x148   :  { %13437 = vst [vmem:[#allocation98_spill] sm:$0xff] %v8433_v34  ;;  %v8435_v26 = vpop.f32.mrf.mxu0  ;;  %v2612_v49 = vadd.f32 %v2611_v12, %v8325_v58 }
 0x149   :  { %v8437_v20 = vpop.f32.mrf.mxu1  ;;  %v2681_v53 = vadd.f32 %v2680_v9, %v8327_v45  ;;  %v13522_v45 = vld [vmem:[#allocation64_spill] sm:$0xff] }
 0x14a   :  { %13438 = vst [vmem:[#allocation99_spill] sm:$0xff] %v8437_v20  ;;  %v8441_v47 = vpop.f32.mrf.mxu0  ;;  %v2613_v12 = vadd.f32 %v2612_v49, %v8335_v4 }
 0x14b   :  { %13439 = vst [vmem:[#allocation100_spill] sm:$0xff] %v8441_v47  ;;  %v8443_v56 = vpop.f32.mrf.mxu1  ;;  %v2682_v9 = vadd.f32 %v2681_v53, %v8337_v10  ;;  %v13528_v10 = vld [vmem:[#allocation67_spill] sm:$0xff] }
 0x14c   :  { %13440 = vst [vmem:[#allocation101_spill] sm:$0xff] %v8443_v56  ;;  %v8445_v30 = vpop.f32.mrf.mxu0  ;;  %v2614_v49 = vadd.f32 %v13522_v45, %v2613_v12 }
 0x14d   :  { %13441 = vst [vmem:[#allocation102_spill] sm:$0xff] %v8445_v30  ;;  %v8447_v29 = vpop.f32.mrf.mxu1  ;;  %v2683_v53 = vadd.f32 %v13523_v1, %v2682_v9  ;;  %v13549_v1 = vld [vmem:[#allocation74_spill] sm:$0xff] }
 0x14e   :  { %13442 = vst [vmem:[#allocation103_spill] sm:$0xff] %v8447_v29  ;;  %v8451_v38 = vpop.f32.mrf.mxu0  ;;  %v2615_v12 = vadd.f32 %v13528_v10, %v2614_v49 }
 0x14f   :  { %13443 = vst [vmem:[#allocation104_spill] sm:$0xff] %v8451_v38  ;;  %v8453_v34 = vpop.f32.mrf.mxu1  ;;  %v2684_v9 = vadd.f32 %v13529_v46, %v2683_v53  ;;  %v13543_v46 = vld [vmem:[#allocation71_spill] sm:$0xff] }
 0x150   :  { %13444 = vst [vmem:[#allocation105_spill] sm:$0xff] %v8453_v34  ;;  %v8455_v40 = vpop.f32.mrf.mxu0  ;;  %v2616_v49 = vadd.f32 %v2615_v12, %v8345_v11 }
 0x151   :  { %13445 = vst [vmem:[#allocation106_spill] sm:$0xff] %v8455_v40  ;;  %v8457_v37 = vpop.f32.mrf.mxu1  ;;  %v2685_v53 = vadd.f32 %v2684_v9, %v8347_v54  ;;  %v13542_v54 = vld [vmem:[#allocation70_spill] sm:$0xff] }
 0x152   :  { %13446 = vst [vmem:[#allocation107_spill] sm:$0xff] %v8457_v37  ;;  %v8461_v42 = vpop.f32.mrf.mxu0  ;;  %v2617_v12 = vadd.f32 %v2616_v49, %v8355_v2 }
 0x153   :  { %13447 = vst [vmem:[#allocation108_spill] sm:$0xff] %v8461_v42  ;;  %v8463_v56 = vpop.f32.mrf.mxu1  ;;  %v2686_v9 = vadd.f32 %v2685_v53, %v8357_v48  ;;  %v13548_v48 = vld [vmem:[#allocation73_spill] sm:$0xff] }
 0x154   :  { %13448 = vst [vmem:[#allocation109_spill] sm:$0xff] %v8463_v56  ;;  %v8465_v47 = vpop.f32.mrf.mxu0  ;;  %v2618_v49 = vadd.f32 %v13542_v54, %v2617_v12 }
 0x155   :  { %13449 = vst [vmem:[#allocation110_spill] sm:$0xff] %v8465_v47  ;;  %v8467_v27 = vpop.f32.mrf.mxu1  ;;  %v2687_v53 = vadd.f32 %v13543_v46, %v2686_v9 }
 0x156   :  { %13450 = vst [vmem:[#allocation111_spill] sm:$0xff] %v8467_v27  ;;  %v8471_v52 = vpop.f32.mrf.mxu0  ;;  %v2619_v12 = vadd.f32 %v13548_v48, %v2618_v49 }
 0x157   :  { %13451 = vst [vmem:[#allocation112_spill] sm:$0xff] %v8471_v52  ;;  %v8473_v34 = vpop.f32.mrf.mxu1  ;;  %v2688_v9 = vadd.f32 %v13549_v1, %v2687_v53  ;;  %v13611_v62 = vld [vmem:[#allocation105_spill] sm:$0xff] }
 0x158   :  { %13452 = vst [vmem:[#allocation113_spill] sm:$0xff] %v8473_v34  ;;  %v8475_v38 = vpop.f32.mrf.mxu0 }
 0x159   :  { %13453 = vst [vmem:[#allocation114_spill] sm:$0xff] %v8475_v38  ;;  %v2715_v39 = vadd.f32 %v8475_v38, %v8465_v47  ;;  %v8479_v32 = vpop.f32.mrf.mxu1 }
 0x15a   :  { %13454 = vst [vmem:[#allocation115_spill] sm:$0xff] %v8479_v32  ;;  %v2784_v41 = vadd.f32 %v8479_v32, %v8467_v27  ;;  %v8485_v50 = vpop.f32.mrf.mxu0 }
 0x15b   :  { %13455 = vst [vmem:[#allocation116_spill] sm:$0xff] %v8485_v50  ;;  %v2716_v44 = vadd.f32 %v8461_v42, %v2715_v39  ;;  %v8488_v51 = vpop.f32.mrf.mxu1 }
 0x15c   :  { %13456 = vst [vmem:[#allocation117_spill] sm:$0xff] %v8488_v51  ;;  %v2785_v37 = vadd.f32 %v8463_v56, %v2784_v41  ;;  %v8491_v40 = vpop.f32.mrf.mxu0 }
 0x15d   :  { %13457 = vst [vmem:[#allocation118_spill] sm:$0xff] %v8491_v40  ;;  %v2717_v38 = vadd.f32 %v8471_v52, %v2716_v44  ;;  %v8494_v47 = vpop.f32.mrf.mxu1 }
 0x15e   :  { %13458 = vst [vmem:[#allocation119_spill] sm:$0xff] %v8494_v47  ;;  %v2786_v32 = vadd.f32 %v8473_v34, %v2785_v37  ;;  %v8499_v27 = vpop.f32.mrf.mxu0 }
 0x15f   :  { %13459 = vst [vmem:[#allocation120_spill] sm:$0xff] %v8499_v27  ;;  %v2718_v39 = vadd.f32 %v2717_v38, %v8491_v40  ;;  %v8502_v42 = vpop.f32.mrf.mxu1 }
 0x160   :  { %13460 = vst [vmem:[#allocation121_spill] sm:$0xff] %v8502_v42  ;;  %v2787_v41 = vadd.f32 %v2786_v32, %v8494_v47  ;;  %v8505_v56 = vpop.f32.mrf.mxu0 }
 0x161   :  { %13461 = vst [vmem:[#allocation122_spill] sm:$0xff] %v8505_v56  ;;  %v2719_v44 = vadd.f32 %v2718_v39, %v8505_v56  ;;  %v8508_v52 = vpop.f32.mrf.mxu1 }
 0x162   :  { %13462 = vst [vmem:[#allocation123_spill] sm:$0xff] %v8508_v52  ;;  %v2788_v37 = vadd.f32 %v2787_v41, %v8508_v52  ;;  %v8513_v34 = vpop.f32.mrf.mxu0 }
 0x163   :  { %13463 = vst [vmem:[#allocation124_spill] sm:$0xff] %v8513_v34  ;;  %v2720_v38 = vadd.f32 %v8485_v50, %v2719_v44  ;;  %v8516_v40 = vpop.f32.mrf.mxu1 }
 0x164   :  { %13464 = vst [vmem:[#allocation125_spill] sm:$0xff] %v8516_v40  ;;  %v2789_v32 = vadd.f32 %v8488_v51, %v2788_v37  ;;  %v8519_v47 = vpop.f32.mrf.mxu0 }
 0x165   :  { %13465 = vst [vmem:[#allocation126_spill] sm:$0xff] %v8519_v47  ;;  %v2721_v39 = vadd.f32 %v8499_v27, %v2720_v38  ;;  %v8522_v56 = vpop.f32.mrf.mxu1 }
 0x166   :  { %13466 = vst [vmem:[#allocation127_spill] sm:$0xff] %v8522_v56  ;;  %v2790_v41 = vadd.f32 %v8502_v42, %v2789_v32  ;;  %v8527_v52 = vpop.f32.mrf.mxu0 }
 0x167   :  { %13467 = vst [vmem:[#allocation128_spill] sm:$0xff] %v8527_v52  ;;  %v2722_v44 = vadd.f32 %v2721_v39, %v8519_v47  ;;  %v8530_v50 = vpop.f32.mrf.mxu1 }
 0x168   :  { %13468 = vst [vmem:[#allocation129_spill] sm:$0xff] %v8530_v50  ;;  %v2791_v37 = vadd.f32 %v2790_v41, %v8522_v56  ;;  %v8533_v51 = vpop.f32.mrf.mxu0 }
 0x169   :  { %13469 = vst [vmem:[#allocation130_spill] sm:$0xff] %v8533_v51  ;;  %v2723_v38 = vadd.f32 %v2722_v44, %v8533_v51  ;;  %v8536_v27 = vpop.f32.mrf.mxu1 }
 0x16a   :  { %13470 = vst [vmem:[#allocation131_spill] sm:$0xff] %v8536_v27  ;;  %v2792_v32 = vadd.f32 %v2791_v37, %v8536_v27  ;;  %v8541_v42 = vpop.f32.mrf.mxu0 }
 0x16b   :  { %13471 = vst [vmem:[#allocation132_spill] sm:$0xff] %v8541_v42  ;;  %v2724_v39 = vadd.f32 %v8513_v34, %v2723_v38  ;;  %v8544_v47 = vpop.f32.mrf.mxu1 }
 0x16c   :  { %13472 = vst [vmem:[#allocation133_spill] sm:$0xff] %v8544_v47  ;;  %v2793_v41 = vadd.f32 %v8516_v40, %v2792_v32  ;;  %v8547_v56 = vpop.f32.mrf.mxu0 }
 0x16d   :  { %13473 = vst [vmem:[#allocation134_spill] sm:$0xff] %v8547_v56  ;;  %v2725_v44 = vadd.f32 %v8527_v52, %v2724_v39  ;;  %v8550_v51 = vpop.f32.mrf.mxu1 }
 0x16e   :  { %13474 = vst [vmem:[#allocation135_spill] sm:$0xff] %v8550_v51  ;;  %v2794_v37 = vadd.f32 %v8530_v50, %v2793_v41  ;;  %v8555_v27 = vpop.f32.mrf.mxu0 }
 0x16f   :  { %13475 = vst [vmem:[#allocation136_spill] sm:$0xff] %v8555_v27  ;;  %v2726_v38 = vadd.f32 %v2725_v44, %v8547_v56  ;;  %v8558_v34 = vpop.f32.mrf.mxu1 }
 0x170   :  { %13476 = vst [vmem:[#allocation137_spill] sm:$0xff] %v8558_v34  ;;  %v2795_v32 = vadd.f32 %v2794_v37, %v8550_v51  ;;  %v8561_v40 = vpop.f32.mrf.mxu0 }
 0x171   :  { %13477 = vst [vmem:[#allocation138_spill] sm:$0xff] %v8561_v40  ;;  %v2727_v39 = vadd.f32 %v2726_v38, %v8561_v40  ;;  %v8564_v52 = vpop.f32.mrf.mxu1 }
 0x172   :  { %13478 = vst [vmem:[#allocation139_spill] sm:$0xff] %v8564_v52  ;;  %v2796_v41 = vadd.f32 %v2795_v32, %v8564_v52  ;;  %v8569_v50 = vpop.f32.mrf.mxu0 }
 0x173   :  { %13479 = vst [vmem:[#allocation140_spill] sm:$0xff] %v8569_v50  ;;  %v2728_v44 = vadd.f32 %v8541_v42, %v2727_v39  ;;  %v8572_v56 = vpop.f32.mrf.mxu1 }
 0x174   :  { %13480 = vst [vmem:[#allocation141_spill] sm:$0xff] %v8572_v56  ;;  %v2797_v37 = vadd.f32 %v8544_v47, %v2796_v41  ;;  %v8575_v51 = vpop.f32.mrf.mxu0 }
 0x175   :  { %13481 = vst [vmem:[#allocation142_spill] sm:$0xff] %v8575_v51  ;;  %v2729_v38 = vadd.f32 %v8555_v27, %v2728_v44  ;;  %v8578_v40 = vpop.f32.mrf.mxu1 }
 0x176   :  { %13482 = vst [vmem:[#allocation143_spill] sm:$0xff] %v8578_v40  ;;  %v2798_v32 = vadd.f32 %v8558_v34, %v2797_v37  ;;  %v8583_v52 = vpop.f32.mrf.mxu0 }
 0x177   :  { %13484 = vst [vmem:[#allocation144_spill] sm:$0xff] %v8583_v52  ;;  %v2730_v39 = vadd.f32 %v2729_v38, %v8575_v51  ;;  %v8586_v42 = vpop.f32.mrf.mxu1 }
 0x178   :  { %13485 = vst [vmem:[#allocation145_spill] sm:$0xff] %v8586_v42  ;;  %v2799_v41 = vadd.f32 %v2798_v32, %v8578_v40  ;;  %v8589_v47 = vpop.f32.mrf.mxu0 }
 0x179   :  { %13486 = vst [vmem:[#allocation146_spill] sm:$0xff] %v8589_v47  ;;  %v2731_v44 = vadd.f32 %v2730_v39, %v8589_v47  ;;  %v8592_v27 = vpop.f32.mrf.mxu1 }
 0x17a   :  { %13487 = vst [vmem:[#allocation147_spill] sm:$0xff] %v8592_v27  ;;  %v2800_v37 = vadd.f32 %v2799_v41, %v8592_v27  ;;  %v8597_v34 = vpop.f32.mrf.mxu0 }
 0x17b   :  { %13490 = vst [vmem:[#allocation55_spill] sm:$0xff] %v8597_v34  ;;  %v2732_v38 = vadd.f32 %v8569_v50, %v2731_v44  ;;  %v8600_v51 = vpop.f32.mrf.mxu1 }
 0x17c   :  { %13491 = vst [vmem:[#allocation148_spill] sm:$0xff] %v8600_v51  ;;  %v2801_v32 = vadd.f32 %v8572_v56, %v2800_v37  ;;  %v8603_v40 = vpop.f32.mrf.mxu0 }
 0x17d   :  { %13492 = vst [vmem:[#allocation149_spill] sm:$0xff] %v8603_v40  ;;  %v2733_v39 = vadd.f32 %v8583_v52, %v2732_v38  ;;  %v8606_v47 = vpop.f32.mrf.mxu1 }
 0x17e   :  { %13493 = vst [vmem:[#allocation150_spill] sm:$0xff] %v8606_v47  ;;  %v2802_v41 = vadd.f32 %v8586_v42, %v2801_v32  ;;  %v8611_v27 = vpop.f32.mrf.mxu0 }
 0x17f   :  { %13494 = vst [vmem:[#allocation151_spill] sm:$0xff] %v8611_v27  ;;  %v2734_v44 = vadd.f32 %v2733_v39, %v8603_v40  ;;  %v8614_v50 = vpop.f32.mrf.mxu1 }
 0x180   :  { %13495 = vst [vmem:[#allocation152_spill] sm:$0xff] %v8614_v50  ;;  %v2803_v37 = vadd.f32 %v2802_v41, %v8606_v47  ;;  %v8617_v56 = vpop.f32.mrf.mxu0 }
 0x181   :  { %13496 = vst [vmem:[#allocation153_spill] sm:$0xff] %v8617_v56  ;;  %v2735_v38 = vadd.f32 %v2734_v44, %v8617_v56  ;;  %v8620_v52 = vpop.f32.mrf.mxu1 }
 0x182   :  { %13497 = vst [vmem:[#allocation154_spill] sm:$0xff] %v8620_v52  ;;  %v2804_v32 = vadd.f32 %v2803_v37, %v8620_v52  ;;  %v8625_v42 = vpop.f32.mrf.mxu0 }
 0x183   :  { %13498 = vst [vmem:[#allocation155_spill] sm:$0xff] %v8625_v42  ;;  %v2736_v39 = vadd.f32 %v8597_v34, %v2735_v38  ;;  %v8628_v40 = vpop.f32.mrf.mxu1 }
 0x184   :  { %13499 = vst [vmem:[#allocation156_spill] sm:$0xff] %v8628_v40  ;;  %v2805_v41 = vadd.f32 %v8600_v51, %v2804_v32  ;;  %v8631_v47 = vpop.f32.mrf.mxu0 }
 0x185   :  { %13500 = vst [vmem:[#allocation157_spill] sm:$0xff] %v8631_v47  ;;  %v2737_v44 = vadd.f32 %v8611_v27, %v2736_v39  ;;  %v8634_v56 = vpop.f32.mrf.mxu1 }
 0x186   :  { %13501 = vst [vmem:[#allocation158_spill] sm:$0xff] %v8634_v56  ;;  %v2806_v37 = vadd.f32 %v8614_v50, %v2805_v41  ;;  %v8639_v52 = vpop.f32.mrf.mxu0 }
 0x187   :  { %13504 = vst [vmem:[#allocation58_spill] sm:$0xff] %v8639_v52  ;;  %v2738_v38 = vadd.f32 %v2737_v44, %v8631_v47  ;;  %v8642_v34 = vpop.f32.mrf.mxu1 }
 0x188   :  { %13505 = vst [vmem:[#allocation159_spill] sm:$0xff] %v8642_v34  ;;  %v2807_v32 = vadd.f32 %v2806_v37, %v8634_v56  ;;  %v8645_v51 = vpop.f32.mrf.mxu0 }
 0x189   :  { %13506 = vst [vmem:[#allocation160_spill] sm:$0xff] %v8645_v51  ;;  %v2739_v39 = vadd.f32 %v2738_v38, %v8645_v51  ;;  %v8648_v27 = vpop.f32.mrf.mxu1 }
 0x18a   :  { %13507 = vst [vmem:[#allocation161_spill] sm:$0xff] %v8648_v27  ;;  %v2808_v41 = vadd.f32 %v2807_v32, %v8648_v27  ;;  %v8653_v50 = vpop.f32.mrf.mxu0 }
 0x18b   :  { %13510 = vst [vmem:[#allocation61_spill] sm:$0xff] %v8653_v50  ;;  %v2740_v44 = vadd.f32 %v8625_v42, %v2739_v39  ;;  %v8656_v47 = vpop.f32.mrf.mxu1 }
 0x18c   :  { %13511 = vst [vmem:[#allocation162_spill] sm:$0xff] %v8656_v47  ;;  %v2809_v37 = vadd.f32 %v8628_v40, %v2808_v41  ;;  %v8659_v56 = vpop.f32.mrf.mxu0 }
 0x18d   :  { %13512 = vst [vmem:[#allocation163_spill] sm:$0xff] %v8659_v56  ;;  %v2741_v38 = vadd.f32 %v8639_v52, %v2740_v44  ;;  %v8662_v51 = vpop.f32.mrf.mxu1 }
 0x18e   :  { %13513 = vst [vmem:[#allocation164_spill] sm:$0xff] %v8662_v51  ;;  %v2810_v32 = vadd.f32 %v8642_v34, %v2809_v37  ;;  %v8667_v27 = vpop.f32.mrf.mxu0 }
 0x18f   :  { %13514 = vst [vmem:[#allocation165_spill] sm:$0xff] %v8667_v27  ;;  %v2742_v39 = vadd.f32 %v2741_v38, %v8659_v56  ;;  %v8670_v42 = vpop.f32.mrf.mxu1 }
 0x190   :  { %13515 = vst [vmem:[#allocation166_spill] sm:$0xff] %v8670_v42  ;;  %v2811_v41 = vadd.f32 %v2810_v32, %v8662_v51  ;;  %v8673_v40 = vpop.f32.mrf.mxu0 }
 0x191   :  { %13516 = vst [vmem:[#allocation167_spill] sm:$0xff] %v8673_v40  ;;  %v2743_v44 = vadd.f32 %v2742_v39, %v8673_v40  ;;  %v8676_v52 = vpop.f32.mrf.mxu1 }
 0x192   :  { %13517 = vst [vmem:[#allocation168_spill] sm:$0xff] %v8676_v52  ;;  %v2812_v37 = vadd.f32 %v2811_v41, %v8676_v52  ;;  %v8681_v34 = vpop.f32.mrf.mxu0 }
 0x193   :  { %13518 = vst [vmem:[#allocation169_spill] sm:$0xff] %v8681_v34  ;;  %v2744_v38 = vadd.f32 %v8653_v50, %v2743_v44  ;;  %v8684_v56 = vpop.f32.mrf.mxu1 }
 0x194   :  { %13519 = vst [vmem:[#allocation170_spill] sm:$0xff] %v8684_v56  ;;  %v2813_v32 = vadd.f32 %v8656_v47, %v2812_v37  ;;  %v8687_v51 = vpop.f32.mrf.mxu0 }
 0x195   :  { %13520 = vst [vmem:[#allocation171_spill] sm:$0xff] %v8687_v51  ;;  %v2745_v39 = vadd.f32 %v8667_v27, %v2744_v38  ;;  %v8690_v40 = vpop.f32.mrf.mxu1 }
 0x196   :  { %13521 = vst [vmem:[#allocation172_spill] sm:$0xff] %v8690_v40  ;;  %v2814_v41 = vadd.f32 %v8670_v42, %v2813_v32  ;;  %v8695_v52 = vpop.f32.mrf.mxu0 }
 0x197   :  { %13524 = vst [vmem:[#allocation64_spill] sm:$0xff] %v8695_v52  ;;  %v2746_v44 = vadd.f32 %v2745_v39, %v8687_v51  ;;  %v8698_v50 = vpop.f32.mrf.mxu1 }
 0x198   :  { %13525 = vst [vmem:[#allocation173_spill] sm:$0xff] %v8698_v50  ;;  %v2815_v37 = vadd.f32 %v2814_v41, %v8690_v40  ;;  %v8701_v47 = vpop.f32.mrf.mxu0 }
 0x199   :  { %13526 = vst [vmem:[#allocation174_spill] sm:$0xff] %v8701_v47  ;;  %v2747_v38 = vadd.f32 %v2746_v44, %v8701_v47  ;;  %v8704_v27 = vpop.f32.mrf.mxu1 }
 0x19a   :  { %13527 = vst [vmem:[#allocation175_spill] sm:$0xff] %v8704_v27  ;;  %v2816_v32 = vadd.f32 %v2815_v37, %v8704_v27  ;;  %v8709_v42 = vpop.f32.mrf.mxu0 }
 0x19b   :  { %13530 = vst [vmem:[#allocation67_spill] sm:$0xff] %v8709_v42  ;;  %v2748_v39 = vadd.f32 %v8681_v34, %v2747_v38  ;;  %v8712_v51 = vpop.f32.mrf.mxu1 }
 0x19c   :  { %13531 = vst [vmem:[#allocation176_spill] sm:$0xff] %v8712_v51  ;;  %v2817_v41 = vadd.f32 %v8684_v56, %v2816_v32  ;;  %v8715_v40 = vpop.f32.mrf.mxu0 }
 0x19d   :  { %13532 = vst [vmem:[#allocation177_spill] sm:$0xff] %v8715_v40  ;;  %v2749_v44 = vadd.f32 %v8695_v52, %v2748_v39  ;;  %v8718_v47 = vpop.f32.mrf.mxu1 }
 0x19e   :  { %13533 = vst [vmem:[#allocation178_spill] sm:$0xff] %v8718_v47  ;;  %v2818_v37 = vadd.f32 %v8698_v50, %v2817_v41  ;;  %v8723_v27 = vpop.f32.mrf.mxu0 }
 0x19f   :  { %13534 = vst [vmem:[#allocation179_spill] sm:$0xff] %v8723_v27  ;;  %v2750_v38 = vadd.f32 %v2749_v44, %v8715_v40  ;;  %v8726_v34 = vpop.f32.mrf.mxu1 }
 0x1a0   :  { %13535 = vst [vmem:[#allocation180_spill] sm:$0xff] %v8726_v34  ;;  %v2819_v32 = vadd.f32 %v2818_v37, %v8718_v47  ;;  %v8729_v56 = vpop.f32.mrf.mxu0 }
 0x1a1   :  { %13536 = vst [vmem:[#allocation181_spill] sm:$0xff] %v8729_v56  ;;  %v2751_v39 = vadd.f32 %v2750_v38, %v8729_v56  ;;  %v8732_v52 = vpop.f32.mrf.mxu1 }
 0x1a2   :  { %13537 = vst [vmem:[#allocation182_spill] sm:$0xff] %v8732_v52  ;;  %v2820_v41 = vadd.f32 %v2819_v32, %v8732_v52  ;;  %v8737_v50 = vpop.f32.mrf.mxu0 }
 0x1a3   :  { %13538 = vst [vmem:[#allocation183_spill] sm:$0xff] %v8737_v50  ;;  %v2752_v44 = vadd.f32 %v8709_v42, %v2751_v39  ;;  %v8740_v40 = vpop.f32.mrf.mxu1 }
 0x1a4   :  { %13539 = vst [vmem:[#allocation184_spill] sm:$0xff] %v8740_v40  ;;  %v2821_v37 = vadd.f32 %v8712_v51, %v2820_v41  ;;  %v8743_v47 = vpop.f32.mrf.mxu0 }
 0x1a5   :  { %13540 = vst [vmem:[#allocation185_spill] sm:$0xff] %v8743_v47  ;;  %v2753_v38 = vadd.f32 %v8723_v27, %v2752_v44  ;;  %v8746_v56 = vpop.f32.mrf.mxu1 }
 0x1a6   :  { %13541 = vst [vmem:[#allocation186_spill] sm:$0xff] %v8746_v56  ;;  %v2822_v32 = vadd.f32 %v8726_v34, %v2821_v37  ;;  %v8751_v52 = vpop.f32.mrf.mxu0 }
 0x1a7   :  { %13544 = vst [vmem:[#allocation70_spill] sm:$0xff] %v8751_v52  ;;  %v2754_v39 = vadd.f32 %v2753_v38, %v8743_v47  ;;  %v8754_v42 = vpop.f32.mrf.mxu1 }
 0x1a8   :  { %13545 = vst [vmem:[#allocation187_spill] sm:$0xff] %v8754_v42  ;;  %v2823_v41 = vadd.f32 %v2822_v32, %v8746_v56  ;;  %v8757_v51 = vpop.f32.mrf.mxu0  ;;  %v2689_v56 = vadd.f32 %v2688_v9, %v8367_v5  ;;  %v13559_v5 = vld [vmem:[#allocation77_spill] sm:$0xff] }
 0x1a9   :  { %13546 = vst [vmem:[#allocation188_spill] sm:$0xff] %v8757_v51  ;;  %v2755_v44 = vadd.f32 %v2754_v39, %v8757_v51  ;;  %v8760_v27 = vpop.f32.mrf.mxu1  ;;  %v2620_v39 = vadd.f32 %v2619_v12, %v8365_v6 }
 0x1aa   :  { %13547 = vst [vmem:[#allocation189_spill] sm:$0xff] %v8760_v27  ;;  %v2824_v37 = vadd.f32 %v2823_v41, %v8760_v27  ;;  %v8765_v34 = vpop.f32.mrf.mxu0 }
 0x1ab   :  { %13550 = vst [vmem:[#allocation73_spill] sm:$0xff] %v8765_v34  ;;  %v2756_v38 = vadd.f32 %v8737_v50, %v2755_v44  ;;  %v8768_v47 = vpop.f32.mrf.mxu1  ;;  %v2621_v44 = vadd.f32 %v2620_v39, %v8375_v16  ;;  %v2690_v50 = vadd.f32 %v2689_v56, %v8377_v13  ;;  %v13562_v56 = vld [vmem:[#allocation79_spill] sm:$0xff] }
 0x1ac   :  { %13551 = vst [vmem:[#allocation190_spill] sm:$0xff] %v8768_v47  ;;  %v8770_v46 = vpop.f32.mrf.mxu0  ;;  %v2825_v49 = vadd.f32 %v8740_v40, %v2824_v37  ;;  %v13558_v37 = vld [vmem:[#allocation76_spill] sm:$0xff] }
 0x1ad   :  { %13552 = vst [vmem:[#allocation191_spill] sm:$0xff] %v8770_v46  ;;  %v2757_v32 = vadd.f32 %v8751_v52, %v2756_v38  ;;  %v8778_v53 = vpop.f32.mrf.mxu1  ;;  %v2622_v40 = vadd.f32 %v13558_v37, %v2621_v44  ;;  %v2691_v1 = vadd.f32 %v13559_v5, %v2690_v50 }
 0x1ae   :  { %v8776_v51 = vpop.f32.mrf.mxu0  ;;  %13554 = vst [vmem:[#allocation193_spill] sm:$0xff] %v8778_v53  ;;  %v2826_v38 = vadd.f32 %v8754_v42, %v2825_v49  ;;  %v13563_v42 = vld [vmem:[#allocation80_spill] sm:$0xff] }
 0x1af   :  { %13553 = vst [vmem:[#allocation192_spill] sm:$0xff] %v8776_v51  ;;  %v2758_v41 = vadd.f32 %v2757_v32, %v8770_v46  ;;  %v8786_v52 = vpop.f32.mrf.mxu1  ;;  %v2623_v49 = vadd.f32 %v13562_v56, %v2622_v40  ;;  %v2692_v13 = vadd.f32 %v13563_v42, %v2691_v1 }
 0x1b0   :  { %v8781_v27 = vpop.f32.mrf.mxu0  ;;  %13556 = vst [vmem:[#allocation195_spill] sm:$0xff] %v8786_v52  ;;  %v2827_v32 = vadd.f32 %v2826_v38, %v8778_v53 }
 0x1b1   :  { %13555 = vst [vmem:[#allocation194_spill] sm:$0xff] %v8781_v27  ;;  %v2759_v12 = vadd.f32 %v2758_v41, %v8781_v27  ;;  %v8794_v46 = vpop.f32.mrf.mxu1  ;;  %v2624_v50 = vadd.f32 %v2623_v49, %v8385_v23  ;;  %v2693_v38 = vadd.f32 %v2692_v13, %v8387_v3  ;;  %v13570_v13 = vld [vmem:[#allocation82_spill] sm:$0xff] }
 0x1b2   :  { %v8789_v9 = vpop.f32.mrf.mxu0  ;;  %13560 = vst [vmem:[#allocation76_spill] sm:$0xff] %v8794_v46  ;;  %v2828_v41 = vadd.f32 %v2827_v32, %v8794_v46 }
 0x1b3   :  { %13557 = vst [vmem:[#allocation196_spill] sm:$0xff] %v8789_v9  ;;  %v2760_v39 = vadd.f32 %v8765_v34, %v2759_v12  ;;  %v8802_v27 = vpop.f32.mrf.mxu1  ;;  %v2625_v1 = vadd.f32 %v2624_v50, %v8395_v14  ;;  %v2694_v32 = vadd.f32 %v2693_v38, %v8397_v8  ;;  %v13574_v38 = vld [vmem:[#allocation85_spill] sm:$0xff] }
 0x1b4   :  { %v8797_v24 = vpop.f32.mrf.mxu0  ;;  %13564 = vst [vmem:[#allocation79_spill] sm:$0xff] %v8802_v27  ;;  %v2829_v12 = vadd.f32 %v8768_v47, %v2828_v41  ;;  %v13571_v47 = vld [vmem:[#allocation83_spill] sm:$0xff] }
 0x1b5   :  { %13561 = vst [vmem:[#allocation197_spill] sm:$0xff] %v8797_v24  ;;  %v2761_v44 = vadd.f32 %v8776_v51, %v2760_v39  ;;  %v8810_v53 = vpop.f32.mrf.mxu1  ;;  %v2626_v41 = vadd.f32 %v13570_v13, %v2625_v1  ;;  %v2695_v3 = vadd.f32 %v13571_v47, %v2694_v32 }
 0x1b6   :  { %v8805_v0 = vpop.f32.mrf.mxu0  ;;  %13566 = vst [vmem:[#allocation199_spill] sm:$0xff] %v8810_v53  ;;  %v2830_v39 = vadd.f32 %v8786_v52, %v2829_v12  ;;  %v13575_v52 = vld [vmem:[#allocation86_spill] sm:$0xff] }
 0x1b7   :  { %13565 = vst [vmem:[#allocation198_spill] sm:$0xff] %v8805_v0  ;;  %v2762_v40 = vadd.f32 %v2761_v44, %v8797_v24  ;;  %v8818_v46 = vpop.f32.mrf.mxu1  ;;  %v2627_v12 = vadd.f32 %v13574_v38, %v2626_v41  ;;  %v2696_v8 = vadd.f32 %v13575_v52, %v2695_v3 }
 0x1b8   :  { %v8813_v34 = vpop.f32.mrf.mxu0  ;;  %13568 = vst [vmem:[#allocation201_spill] sm:$0xff] %v8818_v46  ;;  %v2831_v44 = vadd.f32 %v2830_v39, %v8810_v53 }
 0x1b9   :  { %13567 = vst [vmem:[#allocation200_spill] sm:$0xff] %v8813_v34  ;;  %v2763_v49 = vadd.f32 %v2762_v40, %v8813_v34  ;;  %v8826_v24 = vpop.f32.mrf.mxu1  ;;  %v2628_v32 = vadd.f32 %v2627_v12, %v8405_v18  ;;  %v2697_v39 = vadd.f32 %v2696_v8, %v8407_v17  ;;  %v13582_v8 = vld [vmem:[#allocation88_spill] sm:$0xff] }
 0x1ba   :  { %v8821_v51 = vpop.f32.mrf.mxu0  ;;  %13572 = vst [vmem:[#allocation82_spill] sm:$0xff] %v8826_v24  ;;  %v2832_v40 = vadd.f32 %v2831_v44, %v8826_v24 }
 0x1bb   :  { %13569 = vst [vmem:[#allocation202_spill] sm:$0xff] %v8821_v51  ;;  %v2764_v50 = vadd.f32 %v8789_v9, %v2763_v49  ;;  %v8834_v34 = vpop.f32.mrf.mxu1  ;;  %v2629_v3 = vadd.f32 %v2628_v32, %v8415_v28  ;;  %v2698_v44 = vadd.f32 %v2697_v39, %v8417_v25  ;;  %v13586_v39 = vld [vmem:[#allocation91_spill] sm:$0xff] }
 0x1bc   :  { %v8829_v42 = vpop.f32.mrf.mxu0  ;;  %13576 = vst [vmem:[#allocation85_spill] sm:$0xff] %v8834_v34  ;;  %v2833_v49 = vadd.f32 %v8802_v27, %v2832_v40  ;;  %v13583_v27 = vld [vmem:[#allocation89_spill] sm:$0xff] }
 0x1bd   :  { %13573 = vst [vmem:[#allocation203_spill] sm:$0xff] %v8829_v42  ;;  %v2765_v1 = vadd.f32 %v8805_v0, %v2764_v50  ;;  %v8842_v53 = vpop.f32.mrf.mxu1  ;;  %v2630_v40 = vadd.f32 %v13582_v8, %v2629_v3  ;;  %v2699_v17 = vadd.f32 %v13583_v27, %v2698_v44 }
 0x1be   :  { %v8837_v5 = vpop.f32.mrf.mxu0  ;;  %13578 = vst [vmem:[#allocation205_spill] sm:$0xff] %v8842_v53  ;;  %v2834_v50 = vadd.f32 %v8818_v46, %v2833_v49  ;;  %v13587_v46 = vld [vmem:[#allocation92_spill] sm:$0xff] }
 0x1bf   :  { %13577 = vst [vmem:[#allocation204_spill] sm:$0xff] %v8837_v5  ;;  %v2766_v41 = vadd.f32 %v2765_v1, %v8829_v42  ;;  %v8850_v24 = vpop.f32.mrf.mxu1  ;;  %v2631_v49 = vadd.f32 %v13586_v39, %v2630_v40  ;;  %v2700_v25 = vadd.f32 %v13587_v46, %v2699_v17 }
 0x1c0   :  { %v8845_v9 = vpop.f32.mrf.mxu0  ;;  %13580 = vst [vmem:[#allocation207_spill] sm:$0xff] %v8850_v24  ;;  %v2835_v1 = vadd.f32 %v2834_v50, %v8842_v53 }
 0x1c1   :  { %13579 = vst [vmem:[#allocation206_spill] sm:$0xff] %v8845_v9  ;;  %v2767_v12 = vadd.f32 %v2766_v41, %v8845_v9  ;;  %v8858_v42 = vpop.f32.mrf.mxu1  ;;  %v2632_v44 = vadd.f32 %v2631_v49, %v8425_v35  ;;  %v2701_v50 = vadd.f32 %v2700_v25, %v8427_v15  ;;  %v13594_v25 = vld [vmem:[#allocation94_spill] sm:$0xff] }
 0x1c2   :  { %v8853_v0 = vpop.f32.mrf.mxu0  ;;  %13584 = vst [vmem:[#allocation88_spill] sm:$0xff] %v8858_v42  ;;  %v2836_v41 = vadd.f32 %v2835_v1, %v8858_v42 }
 0x1c3   :  { %13581 = vst [vmem:[#allocation208_spill] sm:$0xff] %v8853_v0  ;;  %v2768_v32 = vadd.f32 %v8821_v51, %v2767_v12  ;;  %v8866_v9 = vpop.f32.mrf.mxu1  ;;  %v2633_v17 = vadd.f32 %v2632_v44, %v8435_v26  ;;  %v2702_v1 = vadd.f32 %v2701_v50, %v8437_v20  ;;  %v13598_v50 = vld [vmem:[#allocation97_spill] sm:$0xff] }
 0x1c4   :  { %v8861_v52 = vpop.f32.mrf.mxu0  ;;  %13588 = vst [vmem:[#allocation91_spill] sm:$0xff] %v8866_v9  ;;  %v2837_v12 = vadd.f32 %v8834_v34, %v2836_v41  ;;  %v13595_v34 = vld [vmem:[#allocation95_spill] sm:$0xff] }
 0x1c5   :  { %13585 = vst [vmem:[#allocation209_spill] sm:$0xff] %v8861_v52  ;;  %v2769_v3 = vadd.f32 %v8837_v5, %v2768_v32  ;;  %v8874_v53 = vpop.f32.mrf.mxu1  ;;  %v2634_v41 = vadd.f32 %v13594_v25, %v2633_v17  ;;  %v2703_v15 = vadd.f32 %v13595_v34, %v2702_v1  ;;  %v13607_v34 = vld [vmem:[#allocation100_spill] sm:$0xff] }
 0x1c6   :  { %v8869_v47 = vpop.f32.mrf.mxu0  ;;  %13590 = vst [vmem:[#allocation211_spill] sm:$0xff] %v8874_v53  ;;  %v2838_v32 = vadd.f32 %v8850_v24, %v2837_v12  ;;  %v13599_v24 = vld [vmem:[#allocation98_spill] sm:$0xff] }
 0x1c7   :  { %13589 = vst [vmem:[#allocation210_spill] sm:$0xff] %v8869_v47  ;;  %v2770_v40 = vadd.f32 %v2769_v3, %v8861_v52  ;;  %v8882_v42 = vpop.f32.mrf.mxu1  ;;  %v2635_v12 = vadd.f32 %v13598_v50, %v2634_v41  ;;  %v2704_v20 = vadd.f32 %v13599_v24, %v2703_v15  ;;  %v13604_v15 = vld [vmem:[#allocation106_spill] sm:$0xff] }
 0x1c8   :  { %v8877_v51 = vpop.f32.mrf.mxu0  ;;  %13592 = vst [vmem:[#allocation213_spill] sm:$0xff] %v8882_v42  ;;  %v2839_v3 = vadd.f32 %v2838_v32, %v8874_v53 }
 0x1c9   :  { %13591 = vst [vmem:[#allocation212_spill] sm:$0xff] %v8877_v51  ;;  %v2771_v49 = vadd.f32 %v2770_v40, %v8877_v51  ;;  %v8890_v52 = vpop.f32.mrf.mxu1  ;;  %v2636_v1 = vadd.f32 %v2635_v12, %v8445_v30  ;;  %v2705_v32 = vadd.f32 %v2704_v20, %v8447_v29  ;;  %v13608_v29 = vld [vmem:[#allocation101_spill] sm:$0xff] }
 0x1ca   :  { %v8885_v5 = vpop.f32.mrf.mxu0  ;;  %13596 = vst [vmem:[#allocation94_spill] sm:$0xff] %v8890_v52  ;;  %v2840_v40 = vadd.f32 %v2839_v3, %v8890_v52  ;;  %v13605_v52 = vld [vmem:[#allocation107_spill] sm:$0xff] }
 0x1cb   :  { %13593 = vst [vmem:[#allocation214_spill] sm:$0xff] %v8885_v5  ;;  %v2772_v44 = vadd.f32 %v8853_v0, %v2771_v49  ;;  %v8898_v51 = vpop.f32.mrf.mxu1  ;;  %v2637_v3 = vadd.f32 %v2636_v1, %v13604_v15  ;;  %v2706_v24 = vadd.f32 %v2705_v32, %v13605_v52 }
 0x1cc   :  { %v8893_v46 = vpop.f32.mrf.mxu0  ;;  %13600 = vst [vmem:[#allocation216_spill] sm:$0xff] %v8898_v51  ;;  %v2841_v49 = vadd.f32 %v8866_v9, %v2840_v40 }
 0x1cd   :  { %13597 = vst [vmem:[#allocation215_spill] sm:$0xff] %v8893_v46  ;;  %v2773_v17 = vadd.f32 %v8869_v47, %v2772_v44  ;;  %v8906_v53 = vpop.f32.mrf.mxu1  ;;  %v2638_v20 = vadd.f32 %v13607_v34, %v2637_v3  ;;  %v2707_v40 = vadd.f32 %v13608_v29, %v2706_v24 }
 0x1ce   :  { %v8901_v27 = vpop.f32.mrf.mxu0  ;;  %13602 = vst [vmem:[#allocation218_spill] sm:$0xff] %v8906_v53  ;;  %v2842_v44 = vadd.f32 %v8882_v42, %v2841_v49 }
 0x1cf   :  { %13601 = vst [vmem:[#allocation217_spill] sm:$0xff] %v8901_v27  ;;  %v2774_v41 = vadd.f32 %v2773_v17, %v8893_v46  ;;  %v8914_v47 = vpop.f32.mrf.mxu1  ;;  %v13610_v46 = vld [vmem:[#allocation104_spill] sm:$0xff]  ;;  %v2708_v32 = vadd.f32 %v13611_v62, %v2707_v40 }
 0x1d0   :  { %v8909_v0 = vpop.f32.mrf.mxu0  ;;  %13606 = vst [vmem:[#allocation220_spill] sm:$0xff] %v8914_v47  ;;  %v2843_v9 = vadd.f32 %v2842_v44, %v8906_v53  ;;  %v2639_v1 = vadd.f32 %v13610_v46, %v2638_v20 }
 0x1d1   :  { %13603 = vst [vmem:[#allocation219_spill] sm:$0xff] %v8909_v0  ;;  %v2775_v12 = vadd.f32 %v2774_v41, %v8909_v0  ;;  %v8920_v33 = vpop.f32.mrf.mxu1  ;;  %v2709_v41 = vrot.slane %v2708_v32, 4 }
 0x1d2   :  { %13609 = vst [vmem:[#allocation221_spill] sm:$0xff] %v8920_v33  ;;  %v2844_v49 = vadd.f32 %v2843_v9, %v8920_v33  ;;  %v2640_v52 = vrot.slane %v2639_v1, 4 }
 0x1d3   :  { %v2776_v17 = vadd.f32 %v8885_v5, %v2775_v12  ;;  %v2710_v29 = vadd.f32 %v2709_v41, %v2708_v32 }
 0x1d4   :  { %v2845_v3 = vadd.f32 %v8898_v51, %v2844_v49  ;;  %v2641_v24 = vadd.f32 %v2640_v52, %v2639_v1 }
 0x1d5   :  { %v2777_v42 = vadd.f32 %v8901_v27, %v2776_v17  ;;  %v2711_v12 = vrot.slane %v2710_v29, 2 }
 0x1d6   :  { %v2846_v44 = vadd.f32 %v8914_v47, %v2845_v3  ;;  %v2642_v34 = vrot.slane %v2641_v24, 2 }
 0x1d7   :  { %v2778_v0 = vrot.slane %v2777_v42, 4  ;;  %v2712_v40 = vadd.f32 %v2711_v12, %v2710_v29 }
 0x1d8   :  { %v2847_v5 = vrot.slane %v2846_v44, 4  ;;  %v2643_v46 = vadd.f32 %v2642_v34, %v2641_v24 }
 0x1d9   :  { %v2779_v53 = vadd.f32 %v2778_v0, %v2777_v42  ;;  %v2713_v17 = vrot.slane %v2712_v40, 1 }
 0x1da   :  { %v2848_v62 = vadd.f32 %v2847_v5, %v2846_v44  ;;  %v2644_v33 = vrot.slane %v2643_v46, 1  ;;  %v13612_v5 = vld [vmem:[#allocation4_spill] sm:$0xff]  ;;  %v13621_v44 = vld [vmem:[#allocation10_spill] sm:$0xff] }
 0x1db   :  { %v2780_v20 = vrot.slane %v2779_v53, 2  ;;  %v2714_v49 = vadd.f32 %v2713_v17, %v2712_v40 }
 0x1dc   :  { %v2849_v27 = vrot.slane %v2848_v62, 2  ;;  %v2645_v30 = vadd.f32 %v2644_v33, %v2643_v46  ;;  %v13614_v33 = vld [vmem:[#allocation8_spill] sm:$0xff] }
 0x1dd   :  { %v2781_v9 = vadd.f32 %v2780_v20, %v2779_v53  ;;  %v2855_v32 = vmul.f32 0.001953125, %v2714_v49  ;;  %v13622_v20 = vld [vmem:[#allocation14_spill] sm:$0xff]  ;;  %v13624_v49 = vld [vmem:[#allocation24_spill] sm:$0xff] }
 0x1de   :  { %v2850_v51 = vadd.f32 %v2849_v27, %v2848_v62  ;;  %v2854_v1 = vmul.f32 0.001953125, %v2645_v30  ;;  %v13616_v30 = vld [vmem:[#allocation2_spill] sm:$0xff] }
 0x1df   :  { %v2782_v15 = vrot.slane %v2781_v9, 1  ;;  %v13618_v27 = vld [vmem:[#allocation6_spill] sm:$0xff] }
 0x1e0   :  { %v2851_v41 = vrot.slane %v2850_v51, 1  ;;  %v2858_v0 = vadd.f32 %v2855_v32, %v2854_v1  ;;  %v13625_v1 = vld [vmem:[#allocation18_spill] sm:$0xff] }
 0x1e1   :  { %v2783_v52 = vadd.f32 %v2782_v15, %v2781_v9  ;;  %v13620_v15 = vld [vmem:[#allocation16_spill] sm:$0xff] }
 0x1e2   :  { %v2852_v3 = vadd.f32 %v2851_v41, %v2850_v51  ;;  %v13623_v9 = vld [vmem:[#allocation20_spill] sm:$0xff]  ;;  %v13626_v41 = vld [vmem:[#allocation22_spill] sm:$0xff] }
 0x1e3   :  { %v2856_v42 = vmul.f32 0.001953125, %v2783_v52 }
 0x1e4   :  { %v2857_v50 = vmul.f32 0.001953125, %v2852_v3 }
 0x1e5   :  { %v2859_v47 = vadd.f32 %v2858_v0, %v2856_v42  ;;  %v13627_v0 = vld [vmem:[#allocation28_spill] sm:$0xff] }
 0x1e7   :  { %v2860_v34 = vadd.f32 %v2859_v47, %v2857_v50  ;;  %v13619_v47 = vld [vmem:[#allocation12_spill] sm:$0xff] }
 0x1e9   :  { %v8929_v29 = vmul.f32 0.25, %v2860_v34  ;;  %v13628_v34 = vld [vmem:[#allocation32_spill] sm:$0xff] }
 0x1eb   :  { %v8933_v53 = vsub.f32 %v13612_v5, %v8929_v29  ;;  %v8937_v46 = vsub.f32 %v13614_v33, %v8929_v29  ;;  %v8941_v62 = vsub.f32 %v13616_v30, %v8929_v29  ;;  %v8945_v51 = vsub.f32 %v13618_v27, %v8929_v29  ;;  %v13630_v33 = vld [vmem:[#allocation26_spill] sm:$0xff] }
 0x1ec   :  { %v8949_v50 = vsub.f32 %v13619_v47, %v8929_v29  ;;  %v8953_v24 = vsub.f32 %v13620_v15, %v8929_v29  ;;  %v8957_v12 = vsub.f32 %v13621_v44, %v8929_v29  ;;  %v8961_v40 = vsub.f32 %v13622_v20, %v8929_v29  ;;  %v13632_v27 = vld [vmem:[#allocation30_spill] sm:$0xff]  ;;  %v13634_v15 = vld [vmem:[#allocation36_spill] sm:$0xff] }
 0x1ed   :  { %13613 = vst [vmem:[#allocation4_spill] sm:$0xff] %v8933_v53  ;;  %13615 = vst [vmem:[#allocation8_spill] sm:$0xff] %v8937_v46  ;;  %v8965_v17 = vsub.f32 %v13623_v9, %v8929_v29  ;;  %v8969_v52 = vsub.f32 %v13624_v49, %v8929_v29  ;;  %v8973_v32 = vsub.f32 %v13625_v1, %v8929_v29  ;;  %v13636_v20 = vld [vmem:[#allocation40_spill] sm:$0xff]  ;;  %v13638_v49 = vld [vmem:[#allocation34_spill] sm:$0xff] }
 0x1ee   :  { %13617 = vst [vmem:[#allocation2_spill] sm:$0xff] %v8941_v62  ;;  %v8977_v42 = vsub.f32 %v13626_v41, %v8929_v29  ;;  %v8981_v3 = vsub.f32 %v13627_v0, %v8929_v29  ;;  %v8985_v5 = vsub.f32 %v13628_v34, %v8929_v29  ;;  %v8989_v30 = vsub.f32 %v13630_v33, %v8929_v29  ;;  %v13640_v41 = vld [vmem:[#allocation38_spill] sm:$0xff]  ;;  %v13642_v34 = vld [vmem:[#allocation44_spill] sm:$0xff] }
 0x1ef   :  { %v8993_v47 = vsub.f32 %v13632_v27, %v8929_v29  ;;  %v8997_v44 = vsub.f32 %v13634_v15, %v8929_v29  ;;  %v9001_v9 = vsub.f32 %v13636_v20, %v8929_v29  ;;  %v9005_v1 = vsub.f32 %v13638_v49, %v8929_v29  ;;  %v13644_v27 = vld [vmem:[#allocation47_spill] sm:$0xff] }
 0x1f0   :  { %13629 = vst [vmem:[#allocation6_spill] sm:$0xff] %v8985_v5  ;;  %13631 = vst [vmem:[#allocation12_spill] sm:$0xff] %v8989_v30  ;;  %v9009_v0 = vsub.f32 %v13640_v41, %v8929_v29  ;;  %v9013_v33 = vsub.f32 %v13642_v34, %v8929_v29  ;;  %v9017_v15 = vsub.f32 %v13644_v27, %v8929_v29  ;;  %v13980_v30 = vld [vmem:[#allocation137_spill] sm:$0xff] }
 0x1f1   :  { %13633 = vst [vmem:[#allocation16_spill] sm:$0xff] %v8993_v47  ;;  %13635 = vst [vmem:[#allocation10_spill] sm:$0xff] %v8997_v44  ;;  %v13646_v44 = vld [vmem:[#allocation42_spill] sm:$0xff]  ;;  %v9025_v49 = vsub.f32 %v8225_v59, %v8929_v29  ;;  %v9029_v41 = vsub.f32 %v8256_v31, %v8929_v29  ;;  %v9033_v34 = vsub.f32 %v8273_v61, %v8929_v29  ;;  %v13974_v47 = vld [vmem:[#allocation135_spill] sm:$0xff] }
 0x1f2   :  { %13637 = vst [vmem:[#allocation14_spill] sm:$0xff] %v9001_v9  ;;  %13639 = vst [vmem:[#allocation20_spill] sm:$0xff] %v9005_v1  ;;  %v9021_v20 = vsub.f32 %v13646_v44, %v8929_v29  ;;  %v9037_v27 = vsub.f32 %v8249_v22, %v8929_v29  ;;  %v9041_v44 = vsub.f32 %v8263_v43, %v8929_v29  ;;  %v13866_v1 = vld [vmem:[#allocation55_spill] sm:$0xff]  ;;  %v13964_v9 = vld [vmem:[#allocation121_spill] sm:$0xff] }
 0x1f3   :  { %13641 = vst [vmem:[#allocation24_spill] sm:$0xff] %v9009_v0  ;;  %13643 = vst [vmem:[#allocation18_spill] sm:$0xff] %v9013_v33  ;;  %v9045_v59 = vsub.f32 %v8285_v55, %v8929_v29  ;;  %v9049_v31 = vsub.f32 %v8295_v36, %v8929_v29  ;;  %v9053_v61 = vsub.f32 %v8279_v19, %v8929_v29  ;;  %v13858_v33 = vld [vmem:[#allocation140_spill] sm:$0xff]  ;;  %v13862_v0 = vld [vmem:[#allocation149_spill] sm:$0xff] }
 0x1f4   :  { %13645 = vst [vmem:[#allocation22_spill] sm:$0xff] %v9017_v15  ;;  %13647 = vst [vmem:[#allocation28_spill] sm:$0xff] %v9021_v20  ;;  %v9057_v22 = vsub.f32 %v13488_v60, %v8929_v29  ;;  %v9061_v43 = vsub.f32 %v8305_v21, %v8929_v29  ;;  %v9065_v55 = vsub.f32 %v8315_v63, %v8929_v29  ;;  %v13850_v20 = vld [vmem:[#allocation132_spill] sm:$0xff]  ;;  %v13854_v15 = vld [vmem:[#allocation142_spill] sm:$0xff] }
 0x1f5   :  { %13648 = vst [vmem:[#allocation32_spill] sm:$0xff] %v9025_v49  ;;  %13649 = vst [vmem:[#allocation26_spill] sm:$0xff] %v9029_v41  ;;  %v9069_v36 = vsub.f32 %v13502_v7, %v8929_v29  ;;  %v9073_v19 = vsub.f32 %v13508_v57, %v8929_v29  ;;  %v9077_v60 = vsub.f32 %v8325_v58, %v8929_v29  ;;  %v13842_v41 = vld [vmem:[#allocation124_spill] sm:$0xff]  ;;  %v13846_v49 = vld [vmem:[#allocation134_spill] sm:$0xff] }
 0x1f6   :  { %13650 = vst [vmem:[#allocation30_spill] sm:$0xff] %v9033_v34  ;;  %13651 = vst [vmem:[#allocation36_spill] sm:$0xff] %v9037_v27  ;;  %v9081_v21 = vsub.f32 %v8335_v4, %v8929_v29  ;;  %v9085_v63 = vsub.f32 %v13522_v45, %v8929_v29  ;;  %v9089_v7 = vsub.f32 %v13528_v10, %v8929_v29  ;;  %v13834_v27 = vld [vmem:[#allocation116_spill] sm:$0xff]  ;;  %v13838_v34 = vld [vmem:[#allocation126_spill] sm:$0xff] }
 0x1f7   :  { %13652 = vst [vmem:[#allocation40_spill] sm:$0xff] %v9041_v44  ;;  %13653 = vst [vmem:[#allocation34_spill] sm:$0xff] %v9045_v59  ;;  %v9093_v57 = vsub.f32 %v8345_v11, %v8929_v29  ;;  %v9097_v58 = vsub.f32 %v8355_v2, %v8929_v29  ;;  %v9101_v4 = vsub.f32 %v13542_v54, %v8929_v29  ;;  %v13754_v59 = vld [vmem:[#allocation53_spill] sm:$0xff]  ;;  %v13756_v44 = vld [vmem:[#allocation56_spill] sm:$0xff] }
 0x1f8   :  { %13654 = vst [vmem:[#allocation38_spill] sm:$0xff] %v9049_v31  ;;  %13655 = vst [vmem:[#allocation44_spill] sm:$0xff] %v9053_v61  ;;  %v9105_v45 = vsub.f32 %v13548_v48, %v8929_v29  ;;  %v9109_v10 = vsub.f32 %v8365_v6, %v8929_v29  ;;  %v9113_v11 = vsub.f32 %v8375_v16, %v8929_v29  ;;  %v13750_v61 = vld [vmem:[#allocation54_spill] sm:$0xff]  ;;  %v13752_v31 = vld [vmem:[#allocation57_spill] sm:$0xff] }
 0x1f9   :  { %13656 = vst [vmem:[#allocation47_spill] sm:$0xff] %v9057_v22  ;;  %13657 = vst [vmem:[#allocation42_spill] sm:$0xff] %v9061_v43  ;;  %v9117_v2 = vsub.f32 %v13558_v37, %v8929_v29  ;;  %v9121_v54 = vsub.f32 %v13562_v56, %v8929_v29  ;;  %v9125_v48 = vsub.f32 %v8385_v23, %v8929_v29  ;;  %v13746_v43 = vld [vmem:[#allocation49_spill] sm:$0xff]  ;;  %v13748_v22 = vld [vmem:[#allocation51_spill] sm:$0xff] }
 0x1fa   :  { %13658 = vst [vmem:[#allocation222_spill] sm:$0xff] %v9065_v55  ;;  %13659 = vst [vmem:[#allocation223_spill] sm:$0xff] %v9069_v36  ;;  %v9129_v6 = vsub.f32 %v8395_v14, %v8929_v29  ;;  %v9133_v16 = vsub.f32 %v13570_v13, %v8929_v29  ;;  %v9137_v37 = vsub.f32 %v13574_v38, %v8929_v29  ;;  %v13742_v36 = vld [vmem:[#allocation50_spill] sm:$0xff]  ;;  %v13744_v55 = vld [vmem:[#allocation52_spill] sm:$0xff] }
 0x1fb   :  { %13660 = vst [vmem:[#allocation224_spill] sm:$0xff] %v9073_v19  ;;  %13661 = vst [vmem:[#allocation225_spill] sm:$0xff] %v9077_v60  ;;  %v9141_v56 = vsub.f32 %v8405_v18, %v8929_v29  ;;  %v9145_v23 = vsub.f32 %v8415_v28, %v8929_v29  ;;  %v9149_v14 = vsub.f32 %v13582_v8, %v8929_v29  ;;  %v13738_v60 = vld [vmem:[#allocation43_spill] sm:$0xff]  ;;  %v13740_v19 = vld [vmem:[#allocation46_spill] sm:$0xff] }
 0x1fc   :  { %13662 = vst [vmem:[#allocation226_spill] sm:$0xff] %v9081_v21  ;;  %13663 = vst [vmem:[#allocation227_spill] sm:$0xff] %v9085_v63  ;;  %v9153_v13 = vsub.f32 %v13586_v39, %v8929_v29  ;;  %v9157_v38 = vsub.f32 %v8425_v35, %v8929_v29  ;;  %v9161_v18 = vsub.f32 %v8435_v26, %v8929_v29  ;;  %v13734_v63 = vld [vmem:[#allocation45_spill] sm:$0xff]  ;;  %v13736_v21 = vld [vmem:[#allocation48_spill] sm:$0xff] }
 0x1fd   :  { %13664 = vst [vmem:[#allocation228_spill] sm:$0xff] %v9089_v7  ;;  %13665 = vst [vmem:[#allocation229_spill] sm:$0xff] %v9093_v57  ;;  %v9165_v28 = vsub.f32 %v13594_v25, %v8929_v29  ;;  %v13730_v57 = vld [vmem:[#allocation35_spill] sm:$0xff]  ;;  %v13986_v5 = vld [vmem:[#allocation141_spill] sm:$0xff] }
 0x1fe   :  { %13666 = vst [vmem:[#allocation230_spill] sm:$0xff] %v9097_v58  ;;  %13667 = vst [vmem:[#allocation231_spill] sm:$0xff] %v9101_v4  ;;  %v13726_v4 = vld [vmem:[#allocation37_spill] sm:$0xff]  ;;  %v13732_v7 = vld [vmem:[#allocation39_spill] sm:$0xff] }
 0x1ff   :  { %13668 = vst [vmem:[#allocation232_spill] sm:$0xff] %v9105_v45  ;;  %13669 = vst [vmem:[#allocation233_spill] sm:$0xff] %v9109_v10  ;;  %v13722_v10 = vld [vmem:[#allocation27_spill] sm:$0xff]  ;;  %v13728_v58 = vld [vmem:[#allocation41_spill] sm:$0xff] }
 0x200   :  { %13670 = vst [vmem:[#allocation234_spill] sm:$0xff] %v9113_v11  ;;  %13671 = vst [vmem:[#allocation235_spill] sm:$0xff] %v9117_v2  ;;  %v13718_v2 = vld [vmem:[#allocation29_spill] sm:$0xff]  ;;  %v13724_v45 = vld [vmem:[#allocation31_spill] sm:$0xff] }
 0x201   :  { %13672 = vst [vmem:[#allocation236_spill] sm:$0xff] %v9121_v54  ;;  %13673 = vst [vmem:[#allocation237_spill] sm:$0xff] %v9125_v48  ;;  %v13714_v48 = vld [vmem:[#allocation19_spill] sm:$0xff]  ;;  %v13720_v11 = vld [vmem:[#allocation33_spill] sm:$0xff] }
 0x202   :  { %13674 = vst [vmem:[#allocation238_spill] sm:$0xff] %v9129_v6  ;;  %13675 = vst [vmem:[#allocation239_spill] sm:$0xff] %v9133_v16  ;;  %v13710_v16 = vld [vmem:[#allocation21_spill] sm:$0xff]  ;;  %v13716_v54 = vld [vmem:[#allocation23_spill] sm:$0xff] }
 0x203   :  { %13676 = vst [vmem:[#allocation240_spill] sm:$0xff] %v9137_v37  ;;  %13677 = vst [vmem:[#allocation241_spill] sm:$0xff] %v9141_v56  ;;  %v13706_v56 = vld [vmem:[#allocation11_spill] sm:$0xff]  ;;  %v13712_v6 = vld [vmem:[#allocation25_spill] sm:$0xff] }
 0x204   :  { %13678 = vst [vmem:[#allocation242_spill] sm:$0xff] %v9145_v23  ;;  %13679 = vst [vmem:[#allocation243_spill] sm:$0xff] %v9149_v14  ;;  %v13684_v23 = vld [vmem:[#allocation97_spill] sm:$0xff]  ;;  %v13686_v14 = vld [vmem:[#allocation102_spill] sm:$0xff] }
 0x205   :  { %13680 = vst [vmem:[#allocation244_spill] sm:$0xff] %v9153_v13  ;;  %13681 = vst [vmem:[#allocation245_spill] sm:$0xff] %v9157_v38  ;;  %v9169_v8 = vsub.f32 %v13684_v23, %v8929_v29  ;;  %v9173_v39 = vsub.f32 %v13686_v14, %v8929_v29  ;;  %v13688_v13 = vld [vmem:[#allocation106_spill] sm:$0xff]  ;;  %v13690_v38 = vld [vmem:[#allocation100_spill] sm:$0xff] }
 0x206   :  { %13682 = vst [vmem:[#allocation246_spill] sm:$0xff] %v9161_v18  ;;  %13683 = vst [vmem:[#allocation247_spill] sm:$0xff] %v9165_v28  ;;  %v9177_v35 = vsub.f32 %v13688_v13, %v8929_v29  ;;  %v9181_v26 = vsub.f32 %v13690_v38, %v8929_v29  ;;  %v13692_v18 = vld [vmem:[#allocation104_spill] sm:$0xff]  ;;  %v13694_v28 = vld [vmem:[#allocation5_spill] sm:$0xff] }
 0x207   :  { %13685 = vst [vmem:[#allocation97_spill] sm:$0xff] %v9169_v8  ;;  %13687 = vst [vmem:[#allocation102_spill] sm:$0xff] %v9173_v39  ;;  %v9185_v25 = vsub.f32 %v13692_v18, %v8929_v29  ;;  %v9189_v23 = vsub.f32 %v13694_v28, %v8929_v29  ;;  %v13696_v8 = vld [vmem:[#allocation9_spill] sm:$0xff]  ;;  %v13698_v39 = vld [vmem:[#allocation3_spill] sm:$0xff] }
 0x208   :  { %13689 = vst [vmem:[#allocation106_spill] sm:$0xff] %v9177_v35  ;;  %13691 = vst [vmem:[#allocation100_spill] sm:$0xff] %v9181_v26  ;;  %v9193_v14 = vsub.f32 %v13696_v8, %v8929_v29  ;;  %v9197_v13 = vsub.f32 %v13698_v39, %v8929_v29  ;;  %v13700_v35 = vld [vmem:[#allocation7_spill] sm:$0xff]  ;;  %v13702_v26 = vld [vmem:[#allocation13_spill] sm:$0xff]  ;;  %v9213_v8 = vsub.f32 %v13706_v56, %v8929_v29 }
 0x209   :  { %13693 = vst [vmem:[#allocation104_spill] sm:$0xff] %v9185_v25  ;;  %13695 = vst [vmem:[#allocation5_spill] sm:$0xff] %v9189_v23  ;;  %v9201_v38 = vsub.f32 %v13700_v35, %v8929_v29  ;;  %v9205_v18 = vsub.f32 %v13702_v26, %v8929_v29  ;;  %v13704_v25 = vld [vmem:[#allocation17_spill] sm:$0xff]  ;;  %v13708_v37 = vld [vmem:[#allocation15_spill] sm:$0xff]  ;;  %v9221_v35 = vsub.f32 %v13710_v16, %v8929_v29 }
 0x20a   :  { %13697 = vst [vmem:[#allocation9_spill] sm:$0xff] %v9193_v14  ;;  %13699 = vst [vmem:[#allocation3_spill] sm:$0xff] %v9197_v13  ;;  %v9209_v28 = vsub.f32 %v13704_v25, %v8929_v29  ;;  %v9217_v39 = vsub.f32 %v13708_v37, %v8929_v29  ;;  %v9225_v26 = vsub.f32 %v13712_v6, %v8929_v29 }
 0x20b   :  { %13701 = vst [vmem:[#allocation7_spill] sm:$0xff] %v9201_v38  ;;  %13703 = vst [vmem:[#allocation13_spill] sm:$0xff] %v9205_v18  ;;  %v9229_v25 = vsub.f32 %v13714_v48, %v8929_v29  ;;  %v9233_v56 = vsub.f32 %v13716_v54, %v8929_v29  ;;  %v9237_v37 = vsub.f32 %v13718_v2, %v8929_v29 }
 0x20c   :  { %13705 = vst [vmem:[#allocation17_spill] sm:$0xff] %v9209_v28  ;;  %13707 = vst [vmem:[#allocation11_spill] sm:$0xff] %v9213_v8  ;;  %v9241_v16 = vsub.f32 %v13720_v11, %v8929_v29  ;;  %v9245_v6 = vsub.f32 %v13722_v10, %v8929_v29  ;;  %v9249_v48 = vsub.f32 %v13724_v45, %v8929_v29 }
 0x20d   :  { %13709 = vst [vmem:[#allocation15_spill] sm:$0xff] %v9217_v39  ;;  %13711 = vst [vmem:[#allocation21_spill] sm:$0xff] %v9221_v35  ;;  %v9253_v54 = vsub.f32 %v13726_v4, %v8929_v29  ;;  %v9257_v2 = vsub.f32 %v13728_v58, %v8929_v29  ;;  %v9261_v11 = vsub.f32 %v13730_v57, %v8929_v29 }
 0x20e   :  { %13713 = vst [vmem:[#allocation25_spill] sm:$0xff] %v9225_v26  ;;  %13715 = vst [vmem:[#allocation19_spill] sm:$0xff] %v9229_v25  ;;  %v9265_v10 = vsub.f32 %v13732_v7, %v8929_v29  ;;  %v9269_v45 = vsub.f32 %v13734_v63, %v8929_v29  ;;  %v9273_v4 = vsub.f32 %v13736_v21, %v8929_v29 }
 0x20f   :  { %13717 = vst [vmem:[#allocation23_spill] sm:$0xff] %v9233_v56  ;;  %13719 = vst [vmem:[#allocation29_spill] sm:$0xff] %v9237_v37  ;;  %v9277_v58 = vsub.f32 %v13738_v60, %v8929_v29  ;;  %v9281_v57 = vsub.f32 %v13740_v19, %v8929_v29  ;;  %v9285_v7 = vsub.f32 %v13742_v36, %v8929_v29 }
 0x210   :  { %13721 = vst [vmem:[#allocation33_spill] sm:$0xff] %v9241_v16  ;;  %13723 = vst [vmem:[#allocation27_spill] sm:$0xff] %v9245_v6  ;;  %v9289_v63 = vsub.f32 %v13744_v55, %v8929_v29  ;;  %v9293_v21 = vsub.f32 %v13746_v43, %v8929_v29  ;;  %v9297_v60 = vsub.f32 %v13748_v22, %v8929_v29  ;;  %v13978_v6 = vld [vmem:[#allocation133_spill] sm:$0xff]  ;;  %v13984_v16 = vld [vmem:[#allocation147_spill] sm:$0xff] }
 0x211   :  { %13725 = vst [vmem:[#allocation31_spill] sm:$0xff] %v9249_v48  ;;  %13727 = vst [vmem:[#allocation37_spill] sm:$0xff] %v9253_v54  ;;  %v9301_v19 = vsub.f32 %v13750_v61, %v8929_v29  ;;  %v9305_v36 = vsub.f32 %v13752_v31, %v8929_v29  ;;  %v9309_v55 = vsub.f32 %v13754_v59, %v8929_v29  ;;  %v13968_v54 = vld [vmem:[#allocation131_spill] sm:$0xff]  ;;  %v13972_v48 = vld [vmem:[#allocation129_spill] sm:$0xff] }
 0x212   :  { %13729 = vst [vmem:[#allocation41_spill] sm:$0xff] %v9257_v2  ;;  %13731 = vst [vmem:[#allocation35_spill] sm:$0xff] %v9261_v11  ;;  %v9313_v43 = vsub.f32 %v13756_v44, %v8929_v29  ;;  %v13864_v11 = vld [vmem:[#allocation153_spill] sm:$0xff] }
 0x213   :  { %13733 = vst [vmem:[#allocation39_spill] sm:$0xff] %v9265_v10  ;;  %13735 = vst [vmem:[#allocation45_spill] sm:$0xff] %v9269_v45  ;;  %v13856_v45 = vld [vmem:[#allocation146_spill] sm:$0xff]  ;;  %v13860_v10 = vld [vmem:[#allocation144_spill] sm:$0xff] }
 0x214   :  { %13737 = vst [vmem:[#allocation48_spill] sm:$0xff] %v9273_v4  ;;  %13739 = vst [vmem:[#allocation43_spill] sm:$0xff] %v9277_v58  ;;  %v13848_v58 = vld [vmem:[#allocation138_spill] sm:$0xff]  ;;  %v13852_v4 = vld [vmem:[#allocation136_spill] sm:$0xff] }
 0x215   :  { %13741 = vst [vmem:[#allocation46_spill] sm:$0xff] %v9281_v57  ;;  %13743 = vst [vmem:[#allocation50_spill] sm:$0xff] %v9285_v7  ;;  %v13840_v7 = vld [vmem:[#allocation130_spill] sm:$0xff]  ;;  %v13844_v57 = vld [vmem:[#allocation128_spill] sm:$0xff] }
 0x216   :  { %13745 = vst [vmem:[#allocation52_spill] sm:$0xff] %v9289_v63  ;;  %13747 = vst [vmem:[#allocation49_spill] sm:$0xff] %v9293_v21  ;;  %v13758_v21 = vld [vmem:[#allocation60_spill] sm:$0xff]  ;;  %v13962_v2 = vld [vmem:[#allocation117_spill] sm:$0xff] }
 0x217   :  { %13749 = vst [vmem:[#allocation51_spill] sm:$0xff] %v9297_v60  ;;  %13751 = vst [vmem:[#allocation54_spill] sm:$0xff] %v9301_v19  ;;  %v9317_v22 = vsub.f32 %v13758_v21, %v8929_v29  ;;  %v13760_v60 = vld [vmem:[#allocation63_spill] sm:$0xff]  ;;  %v13836_v63 = vld [vmem:[#allocation120_spill] sm:$0xff] }
 0x218   :  { %13753 = vst [vmem:[#allocation57_spill] sm:$0xff] %v9305_v36  ;;  %13755 = vst [vmem:[#allocation53_spill] sm:$0xff] %v9309_v55  ;;  %v9321_v61 = vsub.f32 %v13760_v60, %v8929_v29  ;;  %v13762_v19 = vld [vmem:[#allocation59_spill] sm:$0xff]  ;;  %v13764_v36 = vld [vmem:[#allocation62_spill] sm:$0xff] }
 0x219   :  { %13757 = vst [vmem:[#allocation56_spill] sm:$0xff] %v9313_v43  ;;  %13759 = vst [vmem:[#allocation60_spill] sm:$0xff] %v9317_v22  ;;  %v9325_v31 = vsub.f32 %v13762_v19, %v8929_v29  ;;  %v9329_v59 = vsub.f32 %v13764_v36, %v8929_v29  ;;  %v13766_v55 = vld [vmem:[#allocation66_spill] sm:$0xff]  ;;  %v13768_v43 = vld [vmem:[#allocation69_spill] sm:$0xff] }
 0x21a   :  { %13761 = vst [vmem:[#allocation63_spill] sm:$0xff] %v9321_v61  ;;  %v9333_v44 = vsub.f32 %v13766_v55, %v8929_v29  ;;  %v9337_v21 = vsub.f32 %v13768_v43, %v8929_v29  ;;  %v13770_v22 = vld [vmem:[#allocation65_spill] sm:$0xff]  ;;  %v13772_v61 = vld [vmem:[#allocation68_spill] sm:$0xff] }
 0x21b   :  { %13763 = vst [vmem:[#allocation59_spill] sm:$0xff] %v9325_v31  ;;  %13765 = vst [vmem:[#allocation62_spill] sm:$0xff] %v9329_v59  ;;  %v9341_v60 = vsub.f32 %v13770_v22, %v8929_v29  ;;  %v9345_v19 = vsub.f32 %v13772_v61, %v8929_v29  ;;  %v13774_v31 = vld [vmem:[#allocation72_spill] sm:$0xff]  ;;  %v13776_v59 = vld [vmem:[#allocation75_spill] sm:$0xff] }
 0x21c   :  { %13767 = vst [vmem:[#allocation66_spill] sm:$0xff] %v9333_v44  ;;  %13769 = vst [vmem:[#allocation69_spill] sm:$0xff] %v9337_v21  ;;  %v9349_v36 = vsub.f32 %v13774_v31, %v8929_v29  ;;  %v9353_v55 = vsub.f32 %v13776_v59, %v8929_v29  ;;  %v13778_v44 = vld [vmem:[#allocation71_spill] sm:$0xff]  ;;  %v13780_v21 = vld [vmem:[#allocation74_spill] sm:$0xff] }
 0x21d   :  { %13771 = vst [vmem:[#allocation65_spill] sm:$0xff] %v9341_v60  ;;  %13773 = vst [vmem:[#allocation68_spill] sm:$0xff] %v9345_v19  ;;  %v9357_v43 = vsub.f32 %v13778_v44, %v8929_v29  ;;  %v9361_v22 = vsub.f32 %v13780_v21, %v8929_v29  ;;  %v13782_v60 = vld [vmem:[#allocation78_spill] sm:$0xff]  ;;  %v13784_v19 = vld [vmem:[#allocation81_spill] sm:$0xff] }
 0x21e   :  { %13775 = vst [vmem:[#allocation72_spill] sm:$0xff] %v9349_v36  ;;  %13777 = vst [vmem:[#allocation75_spill] sm:$0xff] %v9353_v55  ;;  %v9365_v61 = vsub.f32 %v13782_v60, %v8929_v29  ;;  %v9369_v31 = vsub.f32 %v13784_v19, %v8929_v29  ;;  %v13786_v36 = vld [vmem:[#allocation77_spill] sm:$0xff]  ;;  %v13788_v55 = vld [vmem:[#allocation80_spill] sm:$0xff] }
 0x21f   :  { %13779 = vst [vmem:[#allocation71_spill] sm:$0xff] %v9357_v43  ;;  %13781 = vst [vmem:[#allocation74_spill] sm:$0xff] %v9361_v22  ;;  %v9373_v59 = vsub.f32 %v13786_v36, %v8929_v29  ;;  %v9377_v44 = vsub.f32 %v13788_v55, %v8929_v29  ;;  %v13790_v43 = vld [vmem:[#allocation84_spill] sm:$0xff]  ;;  %v13792_v22 = vld [vmem:[#allocation87_spill] sm:$0xff] }
 0x220   :  { %13783 = vst [vmem:[#allocation78_spill] sm:$0xff] %v9365_v61  ;;  %13785 = vst [vmem:[#allocation81_spill] sm:$0xff] %v9369_v31  ;;  %v9381_v21 = vsub.f32 %v13790_v43, %v8929_v29  ;;  %v9385_v60 = vsub.f32 %v13792_v22, %v8929_v29  ;;  %v13794_v61 = vld [vmem:[#allocation83_spill] sm:$0xff]  ;;  %v13796_v31 = vld [vmem:[#allocation86_spill] sm:$0xff] }
 0x221   :  { %13787 = vst [vmem:[#allocation77_spill] sm:$0xff] %v9373_v59  ;;  %13789 = vst [vmem:[#allocation80_spill] sm:$0xff] %v9377_v44  ;;  %v9389_v19 = vsub.f32 %v13794_v61, %v8929_v29  ;;  %v9393_v36 = vsub.f32 %v13796_v31, %v8929_v29  ;;  %v13798_v59 = vld [vmem:[#allocation90_spill] sm:$0xff]  ;;  %v13800_v44 = vld [vmem:[#allocation93_spill] sm:$0xff] }
 0x222   :  { %13791 = vst [vmem:[#allocation84_spill] sm:$0xff] %v9381_v21  ;;  %13793 = vst [vmem:[#allocation87_spill] sm:$0xff] %v9385_v60  ;;  %v9397_v55 = vsub.f32 %v13798_v59, %v8929_v29  ;;  %v9401_v43 = vsub.f32 %v13800_v44, %v8929_v29  ;;  %v13802_v21 = vld [vmem:[#allocation89_spill] sm:$0xff]  ;;  %v13804_v60 = vld [vmem:[#allocation92_spill] sm:$0xff] }
 0x223   :  { %13795 = vst [vmem:[#allocation83_spill] sm:$0xff] %v9389_v19  ;;  %13797 = vst [vmem:[#allocation86_spill] sm:$0xff] %v9393_v36  ;;  %v9405_v22 = vsub.f32 %v13802_v21, %v8929_v29  ;;  %v9409_v61 = vsub.f32 %v13804_v60, %v8929_v29  ;;  %v13806_v19 = vld [vmem:[#allocation96_spill] sm:$0xff]  ;;  %v13808_v36 = vld [vmem:[#allocation99_spill] sm:$0xff] }
 0x224   :  { %13799 = vst [vmem:[#allocation90_spill] sm:$0xff] %v9397_v55  ;;  %13801 = vst [vmem:[#allocation93_spill] sm:$0xff] %v9401_v43  ;;  %v9413_v31 = vsub.f32 %v13806_v19, %v8929_v29  ;;  %v9417_v59 = vsub.f32 %v13808_v36, %v8929_v29  ;;  %v13810_v55 = vld [vmem:[#allocation95_spill] sm:$0xff]  ;;  %v13812_v43 = vld [vmem:[#allocation98_spill] sm:$0xff] }
 0x225   :  { %13803 = vst [vmem:[#allocation89_spill] sm:$0xff] %v9405_v22  ;;  %13805 = vst [vmem:[#allocation92_spill] sm:$0xff] %v9409_v61  ;;  %v9421_v44 = vsub.f32 %v13810_v55, %v8929_v29  ;;  %v9425_v21 = vsub.f32 %v13812_v43, %v8929_v29  ;;  %v13814_v22 = vld [vmem:[#allocation103_spill] sm:$0xff] }
 0x226   :  { %13807 = vst [vmem:[#allocation96_spill] sm:$0xff] %v9413_v31  ;;  %13809 = vst [vmem:[#allocation99_spill] sm:$0xff] %v9417_v59  ;;  %v9429_v60 = vsub.f32 %v13814_v22, %v8929_v29  ;;  %v13816_v61 = vld [vmem:[#allocation107_spill] sm:$0xff]  ;;  %v13818_v31 = vld [vmem:[#allocation101_spill] sm:$0xff] }
 0x227   :  { %13811 = vst [vmem:[#allocation95_spill] sm:$0xff] %v9421_v44  ;;  %13813 = vst [vmem:[#allocation98_spill] sm:$0xff] %v9425_v21  ;;  %v9433_v19 = vsub.f32 %v13816_v61, %v8929_v29  ;;  %v9437_v36 = vsub.f32 %v13818_v31, %v8929_v29  ;;  %v13820_v59 = vld [vmem:[#allocation105_spill] sm:$0xff]  ;;  %v13822_v44 = vld [vmem:[#allocation110_spill] sm:$0xff] }
 0x228   :  { %13815 = vst [vmem:[#allocation103_spill] sm:$0xff] %v9429_v60  ;;  %v9441_v55 = vsub.f32 %v13820_v59, %v8929_v29  ;;  %v9445_v43 = vsub.f32 %v13822_v44, %v8929_v29  ;;  %v13824_v21 = vld [vmem:[#allocation114_spill] sm:$0xff]  ;;  %v13826_v60 = vld [vmem:[#allocation108_spill] sm:$0xff] }
 0x229   :  { %13817 = vst [vmem:[#allocation107_spill] sm:$0xff] %v9433_v19  ;;  %13819 = vst [vmem:[#allocation101_spill] sm:$0xff] %v9437_v36  ;;  %v9449_v22 = vsub.f32 %v13824_v21, %v8929_v29  ;;  %v9453_v61 = vsub.f32 %v13826_v60, %v8929_v29  ;;  %v13828_v19 = vld [vmem:[#allocation112_spill] sm:$0xff]  ;;  %v13830_v36 = vld [vmem:[#allocation118_spill] sm:$0xff]  ;;  %v9469_v21 = vsub.f32 %v13834_v27, %v8929_v29 }
 0x22a   :  { %13821 = vst [vmem:[#allocation105_spill] sm:$0xff] %v9441_v55  ;;  %13823 = vst [vmem:[#allocation110_spill] sm:$0xff] %v9445_v43  ;;  %v9457_v31 = vsub.f32 %v13828_v19, %v8929_v29  ;;  %v9461_v59 = vsub.f32 %v13830_v36, %v8929_v29  ;;  %v13832_v55 = vld [vmem:[#allocation122_spill] sm:$0xff]  ;;  %v9473_v60 = vsub.f32 %v13836_v63, %v8929_v29 }
 0x22b   :  { %13825 = vst [vmem:[#allocation114_spill] sm:$0xff] %v9449_v22  ;;  %13827 = vst [vmem:[#allocation108_spill] sm:$0xff] %v9453_v61  ;;  %v9465_v44 = vsub.f32 %v13832_v55, %v8929_v29  ;;  %v9477_v19 = vsub.f32 %v13838_v34, %v8929_v29  ;;  %v9481_v36 = vsub.f32 %v13840_v7, %v8929_v29 }
 0x22c   :  { %13829 = vst [vmem:[#allocation112_spill] sm:$0xff] %v9457_v31  ;;  %13831 = vst [vmem:[#allocation118_spill] sm:$0xff] %v9461_v59  ;;  %v9485_v55 = vsub.f32 %v13842_v41, %v8929_v29  ;;  %v9489_v27 = vsub.f32 %v13844_v57, %v8929_v29  ;;  %v9493_v63 = vsub.f32 %v13846_v49, %v8929_v29 }
 0x22d   :  { %13833 = vst [vmem:[#allocation122_spill] sm:$0xff] %v9465_v44  ;;  %13835 = vst [vmem:[#allocation116_spill] sm:$0xff] %v9469_v21  ;;  %v9497_v34 = vsub.f32 %v13848_v58, %v8929_v29  ;;  %v9501_v7 = vsub.f32 %v13850_v20, %v8929_v29  ;;  %v9505_v41 = vsub.f32 %v13852_v4, %v8929_v29 }
 0x22e   :  { %13837 = vst [vmem:[#allocation120_spill] sm:$0xff] %v9473_v60  ;;  %13839 = vst [vmem:[#allocation126_spill] sm:$0xff] %v9477_v19  ;;  %v9509_v57 = vsub.f32 %v13854_v15, %v8929_v29  ;;  %v9513_v49 = vsub.f32 %v13856_v45, %v8929_v29  ;;  %v9517_v58 = vsub.f32 %v13858_v33, %v8929_v29 }
 0x22f   :  { %13841 = vst [vmem:[#allocation130_spill] sm:$0xff] %v9481_v36  ;;  %13843 = vst [vmem:[#allocation124_spill] sm:$0xff] %v9485_v55  ;;  %v9521_v20 = vsub.f32 %v13860_v10, %v8929_v29  ;;  %v9525_v4 = vsub.f32 %v13862_v0, %v8929_v29  ;;  %v9529_v15 = vsub.f32 %v13864_v11, %v8929_v29 }
 0x230   :  { %13845 = vst [vmem:[#allocation128_spill] sm:$0xff] %v9489_v27  ;;  %13847 = vst [vmem:[#allocation134_spill] sm:$0xff] %v9493_v63  ;;  %v9533_v45 = vsub.f32 %v13866_v1, %v8929_v29 }
 0x231   :  { %13849 = vst [vmem:[#allocation138_spill] sm:$0xff] %v9497_v34  ;;  %13851 = vst [vmem:[#allocation132_spill] sm:$0xff] %v9501_v7  ;;  %v13976_v7 = vld [vmem:[#allocation139_spill] sm:$0xff] }
 0x232   :  { %13853 = vst [vmem:[#allocation136_spill] sm:$0xff] %v9505_v41  ;;  %13855 = vst [vmem:[#allocation142_spill] sm:$0xff] %v9509_v57  ;;  %v13966_v57 = vld [vmem:[#allocation127_spill] sm:$0xff]  ;;  %v13970_v41 = vld [vmem:[#allocation125_spill] sm:$0xff] }
 0x233   :  { %13857 = vst [vmem:[#allocation146_spill] sm:$0xff] %v9513_v49  ;;  %13859 = vst [vmem:[#allocation140_spill] sm:$0xff] %v9517_v58  ;;  %v13868_v49 = vld [vmem:[#allocation151_spill] sm:$0xff]  ;;  %v13870_v58 = vld [vmem:[#allocation157_spill] sm:$0xff] }
 0x234   :  { %13861 = vst [vmem:[#allocation144_spill] sm:$0xff] %v9521_v20  ;;  %13863 = vst [vmem:[#allocation149_spill] sm:$0xff] %v9525_v4  ;;  %v9537_v33 = vsub.f32 %v13868_v49, %v8929_v29  ;;  %v9541_v10 = vsub.f32 %v13870_v58, %v8929_v29  ;;  %v13872_v20 = vld [vmem:[#allocation160_spill] sm:$0xff]  ;;  %v13874_v4 = vld [vmem:[#allocation155_spill] sm:$0xff] }
 0x235   :  { %13865 = vst [vmem:[#allocation153_spill] sm:$0xff] %v9529_v15  ;;  %13867 = vst [vmem:[#allocation55_spill] sm:$0xff] %v9533_v45  ;;  %v9545_v0 = vsub.f32 %v13872_v20, %v8929_v29  ;;  %v9549_v11 = vsub.f32 %v13874_v4, %v8929_v29  ;;  %v13876_v15 = vld [vmem:[#allocation58_spill] sm:$0xff]  ;;  %v13878_v45 = vld [vmem:[#allocation163_spill] sm:$0xff] }
 0x236   :  { %13869 = vst [vmem:[#allocation151_spill] sm:$0xff] %v9537_v33  ;;  %13871 = vst [vmem:[#allocation157_spill] sm:$0xff] %v9541_v10  ;;  %v9553_v1 = vsub.f32 %v13876_v15, %v8929_v29  ;;  %v9557_v49 = vsub.f32 %v13878_v45, %v8929_v29  ;;  %v13880_v33 = vld [vmem:[#allocation167_spill] sm:$0xff]  ;;  %v13882_v10 = vld [vmem:[#allocation61_spill] sm:$0xff] }
 0x237   :  { %13873 = vst [vmem:[#allocation160_spill] sm:$0xff] %v9545_v0  ;;  %13875 = vst [vmem:[#allocation155_spill] sm:$0xff] %v9549_v11  ;;  %v9561_v58 = vsub.f32 %v13880_v33, %v8929_v29  ;;  %v9565_v20 = vsub.f32 %v13882_v10, %v8929_v29  ;;  %v13884_v0 = vld [vmem:[#allocation165_spill] sm:$0xff]  ;;  %v13886_v11 = vld [vmem:[#allocation171_spill] sm:$0xff] }
 0x238   :  { %13877 = vst [vmem:[#allocation58_spill] sm:$0xff] %v9553_v1  ;;  %13879 = vst [vmem:[#allocation163_spill] sm:$0xff] %v9557_v49  ;;  %v9569_v4 = vsub.f32 %v13884_v0, %v8929_v29  ;;  %v9573_v15 = vsub.f32 %v13886_v11, %v8929_v29  ;;  %v13888_v1 = vld [vmem:[#allocation174_spill] sm:$0xff]  ;;  %v13890_v49 = vld [vmem:[#allocation169_spill] sm:$0xff] }
 0x239   :  { %13881 = vst [vmem:[#allocation167_spill] sm:$0xff] %v9561_v58  ;;  %13883 = vst [vmem:[#allocation61_spill] sm:$0xff] %v9565_v20  ;;  %v9577_v45 = vsub.f32 %v13888_v1, %v8929_v29  ;;  %v9581_v33 = vsub.f32 %v13890_v49, %v8929_v29  ;;  %v13892_v58 = vld [vmem:[#allocation64_spill] sm:$0xff]  ;;  %v13894_v20 = vld [vmem:[#allocation177_spill] sm:$0xff] }
 0x23a   :  { %13885 = vst [vmem:[#allocation165_spill] sm:$0xff] %v9569_v4  ;;  %13887 = vst [vmem:[#allocation171_spill] sm:$0xff] %v9573_v15  ;;  %v9585_v10 = vsub.f32 %v13892_v58, %v8929_v29  ;;  %v9589_v0 = vsub.f32 %v13894_v20, %v8929_v29  ;;  %v13896_v4 = vld [vmem:[#allocation181_spill] sm:$0xff]  ;;  %v13898_v15 = vld [vmem:[#allocation67_spill] sm:$0xff] }
 0x23b   :  { %13889 = vst [vmem:[#allocation174_spill] sm:$0xff] %v9577_v45  ;;  %13891 = vst [vmem:[#allocation169_spill] sm:$0xff] %v9581_v33  ;;  %v9593_v11 = vsub.f32 %v13896_v4, %v8929_v29  ;;  %v9597_v1 = vsub.f32 %v13898_v15, %v8929_v29  ;;  %v13900_v45 = vld [vmem:[#allocation179_spill] sm:$0xff]  ;;  %v13902_v33 = vld [vmem:[#allocation185_spill] sm:$0xff] }
 0x23c   :  { %13893 = vst [vmem:[#allocation64_spill] sm:$0xff] %v9585_v10  ;;  %13895 = vst [vmem:[#allocation177_spill] sm:$0xff] %v9589_v0  ;;  %v9601_v49 = vsub.f32 %v13900_v45, %v8929_v29  ;;  %v9605_v58 = vsub.f32 %v13902_v33, %v8929_v29  ;;  %v13904_v10 = vld [vmem:[#allocation188_spill] sm:$0xff]  ;;  %v13906_v0 = vld [vmem:[#allocation183_spill] sm:$0xff] }
 0x23d   :  { %13897 = vst [vmem:[#allocation181_spill] sm:$0xff] %v9593_v11  ;;  %13899 = vst [vmem:[#allocation67_spill] sm:$0xff] %v9597_v1  ;;  %v9609_v20 = vsub.f32 %v13904_v10, %v8929_v29  ;;  %v9613_v4 = vsub.f32 %v13906_v0, %v8929_v29  ;;  %v13908_v11 = vld [vmem:[#allocation70_spill] sm:$0xff]  ;;  %v13910_v1 = vld [vmem:[#allocation191_spill] sm:$0xff] }
 0x23e   :  { %13901 = vst [vmem:[#allocation179_spill] sm:$0xff] %v9601_v49  ;;  %13903 = vst [vmem:[#allocation185_spill] sm:$0xff] %v9605_v58  ;;  %v9617_v15 = vsub.f32 %v13908_v11, %v8929_v29  ;;  %v9621_v45 = vsub.f32 %v13910_v1, %v8929_v29  ;;  %v13912_v49 = vld [vmem:[#allocation194_spill] sm:$0xff]  ;;  %v13914_v58 = vld [vmem:[#allocation73_spill] sm:$0xff] }
 0x23f   :  { %13905 = vst [vmem:[#allocation188_spill] sm:$0xff] %v9609_v20  ;;  %13907 = vst [vmem:[#allocation183_spill] sm:$0xff] %v9613_v4  ;;  %v9625_v33 = vsub.f32 %v13912_v49, %v8929_v29  ;;  %v9629_v10 = vsub.f32 %v13914_v58, %v8929_v29  ;;  %v13916_v20 = vld [vmem:[#allocation192_spill] sm:$0xff]  ;;  %v13918_v4 = vld [vmem:[#allocation197_spill] sm:$0xff] }
 0x240   :  { %13909 = vst [vmem:[#allocation70_spill] sm:$0xff] %v9617_v15  ;;  %13911 = vst [vmem:[#allocation191_spill] sm:$0xff] %v9621_v45  ;;  %v9633_v0 = vsub.f32 %v13916_v20, %v8929_v29  ;;  %v9637_v11 = vsub.f32 %v13918_v4, %v8929_v29  ;;  %v13920_v15 = vld [vmem:[#allocation200_spill] sm:$0xff]  ;;  %v13982_v34 = vld [vmem:[#allocation143_spill] sm:$0xff] }
 0x241   :  { %13913 = vst [vmem:[#allocation194_spill] sm:$0xff] %v9625_v33  ;;  %13915 = vst [vmem:[#allocation73_spill] sm:$0xff] %v9629_v10  ;;  %v9641_v1 = vsub.f32 %v13920_v15, %v8929_v29  ;;  %v13922_v45 = vld [vmem:[#allocation196_spill] sm:$0xff]  ;;  %v13924_v33 = vld [vmem:[#allocation198_spill] sm:$0xff] }
 0x242   :  { %13917 = vst [vmem:[#allocation192_spill] sm:$0xff] %v9633_v0  ;;  %13919 = vst [vmem:[#allocation197_spill] sm:$0xff] %v9637_v11  ;;  %v9645_v49 = vsub.f32 %v13922_v45, %v8929_v29  ;;  %v9649_v58 = vsub.f32 %v13924_v33, %v8929_v29  ;;  %v13926_v10 = vld [vmem:[#allocation203_spill] sm:$0xff]  ;;  %v13928_v0 = vld [vmem:[#allocation206_spill] sm:$0xff] }
 0x243   :  { %13921 = vst [vmem:[#allocation200_spill] sm:$0xff] %v9641_v1  ;;  %v9653_v20 = vsub.f32 %v13926_v10, %v8929_v29  ;;  %v9657_v4 = vsub.f32 %v13928_v0, %v8929_v29  ;;  %v13930_v11 = vld [vmem:[#allocation202_spill] sm:$0xff]  ;;  %v13932_v1 = vld [vmem:[#allocation204_spill] sm:$0xff] }
 0x244   :  { %13923 = vst [vmem:[#allocation196_spill] sm:$0xff] %v9645_v49  ;;  %13925 = vst [vmem:[#allocation198_spill] sm:$0xff] %v9649_v58  ;;  %v9661_v15 = vsub.f32 %v13930_v11, %v8929_v29  ;;  %v9665_v45 = vsub.f32 %v13932_v1, %v8929_v29  ;;  %v13934_v49 = vld [vmem:[#allocation209_spill] sm:$0xff]  ;;  %v13936_v58 = vld [vmem:[#allocation212_spill] sm:$0xff] }
 0x245   :  { %13927 = vst [vmem:[#allocation203_spill] sm:$0xff] %v9653_v20  ;;  %13929 = vst [vmem:[#allocation206_spill] sm:$0xff] %v9657_v4  ;;  %v9669_v33 = vsub.f32 %v13934_v49, %v8929_v29  ;;  %v9673_v10 = vsub.f32 %v13936_v58, %v8929_v29  ;;  %v13938_v20 = vld [vmem:[#allocation208_spill] sm:$0xff]  ;;  %v13940_v4 = vld [vmem:[#allocation210_spill] sm:$0xff] }
 0x246   :  { %13931 = vst [vmem:[#allocation202_spill] sm:$0xff] %v9661_v15  ;;  %13933 = vst [vmem:[#allocation204_spill] sm:$0xff] %v9665_v45  ;;  %v9677_v0 = vsub.f32 %v13938_v20, %v8929_v29  ;;  %v9681_v11 = vsub.f32 %v13940_v4, %v8929_v29  ;;  %v13942_v15 = vld [vmem:[#allocation215_spill] sm:$0xff] }
 0x247   :  { %13935 = vst [vmem:[#allocation209_spill] sm:$0xff] %v9669_v33  ;;  %13937 = vst [vmem:[#allocation212_spill] sm:$0xff] %v9673_v10  ;;  %v9685_v1 = vsub.f32 %v13942_v15, %v8929_v29  ;;  %v13944_v45 = vld [vmem:[#allocation219_spill] sm:$0xff]  ;;  %v13946_v33 = vld [vmem:[#allocation214_spill] sm:$0xff] }
 0x248   :  { %13939 = vst [vmem:[#allocation208_spill] sm:$0xff] %v9677_v0  ;;  %13941 = vst [vmem:[#allocation210_spill] sm:$0xff] %v9681_v11  ;;  %v9689_v49 = vsub.f32 %v13944_v45, %v8929_v29  ;;  %v9693_v58 = vsub.f32 %v13946_v33, %v8929_v29  ;;  %v13948_v10 = vld [vmem:[#allocation217_spill] sm:$0xff]  ;;  %v13950_v0 = vld [vmem:[#allocation111_spill] sm:$0xff] }
 0x249   :  { %13943 = vst [vmem:[#allocation215_spill] sm:$0xff] %v9685_v1  ;;  %v9697_v20 = vsub.f32 %v13948_v10, %v8929_v29  ;;  %v9701_v4 = vsub.f32 %v13950_v0, %v8929_v29  ;;  %v13952_v11 = vld [vmem:[#allocation115_spill] sm:$0xff]  ;;  %v13954_v1 = vld [vmem:[#allocation109_spill] sm:$0xff] }
 0x24a   :  { %13945 = vst [vmem:[#allocation219_spill] sm:$0xff] %v9689_v49  ;;  %13947 = vst [vmem:[#allocation214_spill] sm:$0xff] %v9693_v58  ;;  %v9705_v15 = vsub.f32 %v13952_v11, %v8929_v29  ;;  %v9709_v45 = vsub.f32 %v13954_v1, %v8929_v29  ;;  %v13956_v49 = vld [vmem:[#allocation113_spill] sm:$0xff]  ;;  %v13958_v58 = vld [vmem:[#allocation119_spill] sm:$0xff]  ;;  %v9725_v11 = vsub.f32 %v13962_v2, %v8929_v29 }
 0x24b   :  { %13949 = vst [vmem:[#allocation217_spill] sm:$0xff] %v9697_v20  ;;  %13951 = vst [vmem:[#allocation111_spill] sm:$0xff] %v9701_v4  ;;  %v9713_v33 = vsub.f32 %v13956_v49, %v8929_v29  ;;  %v9717_v10 = vsub.f32 %v13958_v58, %v8929_v29  ;;  %v13960_v20 = vld [vmem:[#allocation123_spill] sm:$0xff]  ;;  %v9729_v1 = vsub.f32 %v13964_v9, %v8929_v29 }
 0x24c   :  { %13953 = vst [vmem:[#allocation115_spill] sm:$0xff] %v9705_v15  ;;  %13955 = vst [vmem:[#allocation109_spill] sm:$0xff] %v9709_v45  ;;  %v9721_v0 = vsub.f32 %v13960_v20, %v8929_v29  ;;  %v9733_v49 = vsub.f32 %v13966_v57, %v8929_v29  ;;  %v9737_v58 = vsub.f32 %v13968_v54, %v8929_v29 }
 0x24d   :  { %13957 = vst [vmem:[#allocation113_spill] sm:$0xff] %v9713_v33  ;;  %13959 = vst [vmem:[#allocation119_spill] sm:$0xff] %v9717_v10  ;;  %v9741_v20 = vsub.f32 %v13970_v41, %v8929_v29  ;;  %v9745_v2 = vsub.f32 %v13972_v48, %v8929_v29  ;;  %v9749_v9 = vsub.f32 %v13974_v47, %v8929_v29 }
 0x24e   :  { %13961 = vst [vmem:[#allocation123_spill] sm:$0xff] %v9721_v0  ;;  %13963 = vst [vmem:[#allocation117_spill] sm:$0xff] %v9725_v11  ;;  %v9753_v57 = vsub.f32 %v13976_v7, %v8929_v29  ;;  %v9757_v54 = vsub.f32 %v13978_v6, %v8929_v29  ;;  %v9761_v41 = vsub.f32 %v13980_v30, %v8929_v29 }
 0x24f   :  { %13965 = vst [vmem:[#allocation121_spill] sm:$0xff] %v9729_v1  ;;  %13967 = vst [vmem:[#allocation127_spill] sm:$0xff] %v9733_v49  ;;  %v9765_v48 = vsub.f32 %v13982_v34, %v8929_v29  ;;  %v9769_v47 = vsub.f32 %v13984_v16, %v8929_v29  ;;  %v9773_v7 = vsub.f32 %v13986_v5, %v8929_v29 }
 0x250   :  { %13969 = vst [vmem:[#allocation131_spill] sm:$0xff] %v9737_v58  ;;  %13971 = vst [vmem:[#allocation125_spill] sm:$0xff] %v9741_v20 }
 0x251   :  { %13973 = vst [vmem:[#allocation129_spill] sm:$0xff] %v9745_v2  ;;  %13975 = vst [vmem:[#allocation135_spill] sm:$0xff] %v9749_v9 }
 0x252   :  { %13977 = vst [vmem:[#allocation139_spill] sm:$0xff] %v9753_v57  ;;  %13979 = vst [vmem:[#allocation133_spill] sm:$0xff] %v9757_v54  ;;  %v13988_v57 = vld [vmem:[#allocation145_spill] sm:$0xff]  ;;  %v13990_v54 = vld [vmem:[#allocation150_spill] sm:$0xff] }
 0x253   :  { %13981 = vst [vmem:[#allocation137_spill] sm:$0xff] %v9761_v41  ;;  %13983 = vst [vmem:[#allocation143_spill] sm:$0xff] %v9765_v48  ;;  %v9777_v6 = vsub.f32 %v13988_v57, %v8929_v29  ;;  %v9781_v30 = vsub.f32 %v13990_v54, %v8929_v29  ;;  %v13992_v41 = vld [vmem:[#allocation154_spill] sm:$0xff]  ;;  %v13994_v48 = vld [vmem:[#allocation148_spill] sm:$0xff] }
 0x254   :  { %13985 = vst [vmem:[#allocation147_spill] sm:$0xff] %v9769_v47  ;;  %13987 = vst [vmem:[#allocation141_spill] sm:$0xff] %v9773_v7  ;;  %v9785_v34 = vsub.f32 %v13992_v41, %v8929_v29  ;;  %v9789_v16 = vsub.f32 %v13994_v48, %v8929_v29  ;;  %v13996_v47 = vld [vmem:[#allocation152_spill] sm:$0xff]  ;;  %v13998_v7 = vld [vmem:[#allocation158_spill] sm:$0xff] }
 0x255   :  { %13989 = vst [vmem:[#allocation145_spill] sm:$0xff] %v9777_v6  ;;  %13991 = vst [vmem:[#allocation150_spill] sm:$0xff] %v9781_v30  ;;  %v9793_v5 = vsub.f32 %v13996_v47, %v8929_v29  ;;  %v9797_v57 = vsub.f32 %v13998_v7, %v8929_v29  ;;  %v14000_v6 = vld [vmem:[#allocation161_spill] sm:$0xff]  ;;  %v14002_v30 = vld [vmem:[#allocation156_spill] sm:$0xff] }
 0x256   :  { %13993 = vst [vmem:[#allocation154_spill] sm:$0xff] %v9785_v34  ;;  %13995 = vst [vmem:[#allocation148_spill] sm:$0xff] %v9789_v16  ;;  %v9801_v54 = vsub.f32 %v14000_v6, %v8929_v29  ;;  %v9805_v41 = vsub.f32 %v14002_v30, %v8929_v29  ;;  %v14004_v34 = vld [vmem:[#allocation159_spill] sm:$0xff]  ;;  %v14006_v16 = vld [vmem:[#allocation164_spill] sm:$0xff] }
 0x257   :  { %13997 = vst [vmem:[#allocation152_spill] sm:$0xff] %v9793_v5  ;;  %13999 = vst [vmem:[#allocation158_spill] sm:$0xff] %v9797_v57  ;;  %v9809_v48 = vsub.f32 %v14004_v34, %v8929_v29  ;;  %v9813_v47 = vsub.f32 %v14006_v16, %v8929_v29  ;;  %v14008_v5 = vld [vmem:[#allocation168_spill] sm:$0xff]  ;;  %v14010_v57 = vld [vmem:[#allocation162_spill] sm:$0xff] }
 0x258   :  { %14001 = vst [vmem:[#allocation161_spill] sm:$0xff] %v9801_v54  ;;  %14003 = vst [vmem:[#allocation156_spill] sm:$0xff] %v9805_v41  ;;  %v9817_v7 = vsub.f32 %v14008_v5, %v8929_v29  ;;  %v9821_v6 = vsub.f32 %v14010_v57, %v8929_v29  ;;  %v14012_v54 = vld [vmem:[#allocation166_spill] sm:$0xff]  ;;  %v14014_v41 = vld [vmem:[#allocation172_spill] sm:$0xff] }
 0x259   :  { %14005 = vst [vmem:[#allocation159_spill] sm:$0xff] %v9809_v48  ;;  %14007 = vst [vmem:[#allocation164_spill] sm:$0xff] %v9813_v47  ;;  %v9825_v30 = vsub.f32 %v14012_v54, %v8929_v29  ;;  %v9829_v34 = vsub.f32 %v14014_v41, %v8929_v29  ;;  %v14016_v48 = vld [vmem:[#allocation175_spill] sm:$0xff]  ;;  %v14018_v47 = vld [vmem:[#allocation170_spill] sm:$0xff] }
 0x25a   :  { %14009 = vst [vmem:[#allocation168_spill] sm:$0xff] %v9817_v7  ;;  %14011 = vst [vmem:[#allocation162_spill] sm:$0xff] %v9821_v6  ;;  %v9833_v16 = vsub.f32 %v14016_v48, %v8929_v29  ;;  %v9837_v5 = vsub.f32 %v14018_v47, %v8929_v29  ;;  %v14020_v7 = vld [vmem:[#allocation173_spill] sm:$0xff]  ;;  %v14022_v6 = vld [vmem:[#allocation178_spill] sm:$0xff] }
 0x25b   :  { %14013 = vst [vmem:[#allocation166_spill] sm:$0xff] %v9825_v30  ;;  %14015 = vst [vmem:[#allocation172_spill] sm:$0xff] %v9829_v34  ;;  %v9841_v57 = vsub.f32 %v14020_v7, %v8929_v29  ;;  %v9845_v54 = vsub.f32 %v14022_v6, %v8929_v29  ;;  %v14024_v30 = vld [vmem:[#allocation182_spill] sm:$0xff]  ;;  %v14026_v34 = vld [vmem:[#allocation176_spill] sm:$0xff] }
 0x25c   :  { %14017 = vst [vmem:[#allocation175_spill] sm:$0xff] %v9833_v16  ;;  %14019 = vst [vmem:[#allocation170_spill] sm:$0xff] %v9837_v5  ;;  %v9849_v41 = vsub.f32 %v14024_v30, %v8929_v29  ;;  %v9853_v48 = vsub.f32 %v14026_v34, %v8929_v29  ;;  %v14028_v16 = vld [vmem:[#allocation180_spill] sm:$0xff]  ;;  %v14030_v5 = vld [vmem:[#allocation186_spill] sm:$0xff] }
 0x25d   :  { %14021 = vst [vmem:[#allocation173_spill] sm:$0xff] %v9841_v57  ;;  %14023 = vst [vmem:[#allocation178_spill] sm:$0xff] %v9845_v54  ;;  %v9857_v47 = vsub.f32 %v14028_v16, %v8929_v29  ;;  %v9861_v7 = vsub.f32 %v14030_v5, %v8929_v29  ;;  %v14032_v57 = vld [vmem:[#allocation189_spill] sm:$0xff]  ;;  %v14034_v54 = vld [vmem:[#allocation184_spill] sm:$0xff] }
 0x25e   :  { %14025 = vst [vmem:[#allocation182_spill] sm:$0xff] %v9849_v41  ;;  %14027 = vst [vmem:[#allocation176_spill] sm:$0xff] %v9853_v48  ;;  %v9865_v6 = vsub.f32 %v14032_v57, %v8929_v29  ;;  %v9869_v30 = vsub.f32 %v14034_v54, %v8929_v29  ;;  %v14036_v41 = vld [vmem:[#allocation187_spill] sm:$0xff]  ;;  %v14038_v48 = vld [vmem:[#allocation193_spill] sm:$0xff] }
 0x25f   :  { %14029 = vst [vmem:[#allocation180_spill] sm:$0xff] %v9857_v47  ;;  %14031 = vst [vmem:[#allocation186_spill] sm:$0xff] %v9861_v7  ;;  %v9873_v34 = vsub.f32 %v14036_v41, %v8929_v29  ;;  %v9877_v16 = vsub.f32 %v14038_v48, %v8929_v29  ;;  %v14040_v47 = vld [vmem:[#allocation76_spill] sm:$0xff]  ;;  %v14042_v7 = vld [vmem:[#allocation190_spill] sm:$0xff] }
 0x260   :  { %14033 = vst [vmem:[#allocation189_spill] sm:$0xff] %v9865_v6  ;;  %14035 = vst [vmem:[#allocation184_spill] sm:$0xff] %v9869_v30  ;;  %v9881_v5 = vsub.f32 %v14040_v47, %v8929_v29  ;;  %v9885_v57 = vsub.f32 %v14042_v7, %v8929_v29  ;;  %v14044_v6 = vld [vmem:[#allocation195_spill] sm:$0xff] }
 0x261   :  { %14037 = vst [vmem:[#allocation187_spill] sm:$0xff] %v9873_v34  ;;  %14039 = vst [vmem:[#allocation193_spill] sm:$0xff] %v9877_v16  ;;  %v9889_v54 = vsub.f32 %v14044_v6, %v8929_v29  ;;  %v14046_v30 = vld [vmem:[#allocation199_spill] sm:$0xff]  ;;  %v14048_v34 = vld [vmem:[#allocation82_spill] sm:$0xff] }
 0x262   :  { %14041 = vst [vmem:[#allocation76_spill] sm:$0xff] %v9881_v5  ;;  %14043 = vst [vmem:[#allocation190_spill] sm:$0xff] %v9885_v57  ;;  %v9893_v41 = vsub.f32 %v14046_v30, %v8929_v29  ;;  %v9897_v48 = vsub.f32 %v14048_v34, %v8929_v29  ;;  %v14050_v16 = vld [vmem:[#allocation79_spill] sm:$0xff]  ;;  %v14052_v5 = vld [vmem:[#allocation201_spill] sm:$0xff] }
 0x263   :  { %14045 = vst [vmem:[#allocation195_spill] sm:$0xff] %v9889_v54  ;;  %v9901_v47 = vsub.f32 %v14050_v16, %v8929_v29  ;;  %v9905_v7 = vsub.f32 %v14052_v5, %v8929_v29  ;;  %v14054_v57 = vld [vmem:[#allocation205_spill] sm:$0xff]  ;;  %v14056_v54 = vld [vmem:[#allocation88_spill] sm:$0xff]  ;;  %v3119_v5 = vmul.f32 %v8933_v53, %v8933_v53  ;;  %v3312_v53 = vmul.f32 %v9705_v15, %v9705_v15 }
 0x264   :  { %14047 = vst [vmem:[#allocation199_spill] sm:$0xff] %v9893_v41  ;;  %14049 = vst [vmem:[#allocation82_spill] sm:$0xff] %v9897_v48  ;;  %v9909_v6 = vsub.f32 %v14054_v57, %v8929_v29  ;;  %v9913_v30 = vsub.f32 %v14056_v54, %v8929_v29  ;;  %v14058_v41 = vld [vmem:[#allocation85_spill] sm:$0xff]  ;;  %v14060_v48 = vld [vmem:[#allocation207_spill] sm:$0xff]  ;;  %v3183_v57 = vmul.f32 %v9189_v23, %v9189_v23 }
 0x265   :  { %14051 = vst [vmem:[#allocation79_spill] sm:$0xff] %v9901_v47  ;;  %14053 = vst [vmem:[#allocation201_spill] sm:$0xff] %v9905_v7  ;;  %v9917_v34 = vsub.f32 %v14058_v41, %v8929_v29  ;;  %v9921_v16 = vsub.f32 %v14060_v48, %v8929_v29  ;;  %v3120_v7 = vmul.f32 %v8937_v46, %v8937_v46  ;;  %v14062_v46 = vld [vmem:[#allocation211_spill] sm:$0xff]  ;;  %v14064_v23 = vld [vmem:[#allocation94_spill] sm:$0xff] }
 0x266   :  { %14055 = vst [vmem:[#allocation205_spill] sm:$0xff] %v9909_v6  ;;  %14057 = vst [vmem:[#allocation88_spill] sm:$0xff] %v9913_v30  ;;  %v3184_v54 = vmul.f32 %v9193_v14, %v9193_v14  ;;  %v3247_v41 = vmul.f32 %v9445_v43, %v9445_v43  ;;  %v3311_v48 = vmul.f32 %v9701_v4, %v9701_v4  ;;  %v14066_v14 = vld [vmem:[#allocation91_spill] sm:$0xff]  ;;  %v14070_v4 = vld [vmem:[#allocation218_spill] sm:$0xff] }
 0x267   :  { %14059 = vst [vmem:[#allocation85_spill] sm:$0xff] %v9917_v34  ;;  %14061 = vst [vmem:[#allocation207_spill] sm:$0xff] %v9921_v16  ;;  %v3248_v34 = vmul.f32 %v9449_v22, %v9449_v22  ;;  %v9941_v16 = vsub.f32 %v14062_v46, %v8929_v29  ;;  %v9945_v30 = vsub.f32 %v14064_v23, %v8929_v29  ;;  %v14068_v22 = vld [vmem:[#allocation213_spill] sm:$0xff] }
 0x268   :  { %v9949_v43 = vsub.f32 %v14066_v14, %v8929_v29  ;;  %v9953_v6 = vsub.f32 %v14068_v22, %v8929_v29  ;;  %v9957_v47 = vsub.f32 %v14070_v4, %v8929_v29  ;;  %v14072_v15 = vld [vmem:[#allocation221_spill] sm:$0xff]  ;;  %v3121_v22 = vmul.f32 %v8941_v62, %v8941_v62 }
 0x269   :  { %14063 = vst [vmem:[#allocation211_spill] sm:$0xff] %v9941_v16  ;;  %14065 = vst [vmem:[#allocation94_spill] sm:$0xff] %v9945_v30  ;;  %v9961_v46 = vsub.f32 %v14072_v15, %v8929_v29  ;;  %v14074_v16 = vld [vmem:[#allocation216_spill] sm:$0xff]  ;;  %v3249_v4 = vmul.f32 %v9453_v61, %v9453_v61  ;;  %v3313_v15 = vmul.f32 %v9709_v45, %v9709_v45 }
 0x26a   :  { %14067 = vst [vmem:[#allocation91_spill] sm:$0xff] %v9949_v43  ;;  %14069 = vst [vmem:[#allocation213_spill] sm:$0xff] %v9953_v6  ;;  %v9965_v23 = vsub.f32 %v14074_v16, %v8929_v29  ;;  %v14076_v30 = vld [vmem:[#allocation220_spill] sm:$0xff]  ;;  %v3185_v6 = vmul.f32 %v9197_v13, %v9197_v13  ;;  %v3513_v16 = vadd.f32 %v3248_v34, %v3247_v41 }
 0x26b   :  { %14071 = vst [vmem:[#allocation218_spill] sm:$0xff] %v9957_v47  ;;  %14073 = vst [vmem:[#allocation221_spill] sm:$0xff] %v9961_v46  ;;  %v9969_v14 = vsub.f32 %v14076_v30, %v8929_v29  ;;  %v3375_v46 = vadd.f32 %v3120_v7, %v3119_v5  ;;  %v3444_v47 = vadd.f32 %v3184_v54, %v3183_v57 }
 0x26c   :  { %14075 = vst [vmem:[#allocation216_spill] sm:$0xff] %v9965_v23  ;;  %v3582_v23 = vadd.f32 %v3312_v53, %v3311_v48  ;;  %v3122_v29 = vmul.f32 %v8945_v51, %v8945_v51  ;;  %v3186_v30 = vmul.f32 %v9201_v38, %v9201_v38  ;;  %v3250_v62 = vmul.f32 %v9457_v31, %v9457_v31 }
 0x26d   :  { %14077 = vst [vmem:[#allocation220_spill] sm:$0xff] %v9969_v14  ;;  %v3314_v13 = vmul.f32 %v9713_v33, %v9713_v33  ;;  %v3376_v61 = vadd.f32 %v3375_v46, %v3121_v22  ;;  %v3445_v14 = vadd.f32 %v3444_v47, %v3185_v6  ;;  %v3514_v43 = vadd.f32 %v3513_v16, %v3249_v4 }
 0x26e   :  { %v3583_v45 = vadd.f32 %v3582_v23, %v3313_v15  ;;  %v3123_v7 = vmul.f32 %v8949_v50, %v8949_v50  ;;  %v3187_v53 = vmul.f32 %v9205_v18, %v9205_v18  ;;  %v3251_v34 = vmul.f32 %v9461_v59, %v9461_v59 }
 0x26f   :  { %v3315_v5 = vmul.f32 %v9717_v10, %v9717_v10  ;;  %v3377_v57 = vadd.f32 %v3376_v61, %v3122_v29  ;;  %v3446_v54 = vadd.f32 %v3445_v14, %v3186_v30  ;;  %v3515_v41 = vadd.f32 %v3514_v43, %v3250_v62 }
 0x270   :  { %v3584_v48 = vadd.f32 %v3583_v45, %v3314_v13  ;;  %v3124_v47 = vmul.f32 %v8953_v24, %v8953_v24  ;;  %v3188_v6 = vmul.f32 %v9209_v28, %v9209_v28  ;;  %v3252_v46 = vmul.f32 %v9465_v44, %v9465_v44 }
 0x271   :  { %v3316_v23 = vmul.f32 %v9721_v0, %v9721_v0  ;;  %v3378_v22 = vadd.f32 %v3377_v57, %v3123_v7  ;;  %v3447_v4 = vadd.f32 %v3446_v54, %v3187_v53  ;;  %v3516_v15 = vadd.f32 %v3515_v41, %v3251_v34 }
 0x272   :  { %v3585_v16 = vadd.f32 %v3584_v48, %v3315_v5  ;;  %v3125_v62 = vmul.f32 %v8957_v12, %v8957_v12  ;;  %v3189_v13 = vmul.f32 %v9213_v8, %v9213_v8  ;;  %v3253_v43 = vmul.f32 %v9469_v21, %v9469_v21 }
 0x273   :  { %v3317_v61 = vmul.f32 %v9725_v11, %v9725_v11  ;;  %v3379_v45 = vadd.f32 %v3378_v22, %v3124_v47  ;;  %v3448_v14 = vadd.f32 %v3447_v4, %v3188_v6  ;;  %v3517_v29 = vadd.f32 %v3516_v15, %v3252_v46 }
 0x274   :  { %v3586_v30 = vadd.f32 %v3585_v16, %v3316_v23  ;;  %v3126_v7 = vmul.f32 %v8961_v40, %v8961_v40  ;;  %v3190_v53 = vmul.f32 %v9217_v39, %v9217_v39  ;;  %v3254_v34 = vmul.f32 %v9473_v60, %v9473_v60 }
 0x275   :  { %v3318_v5 = vmul.f32 %v9729_v1, %v9729_v1  ;;  %v3380_v57 = vadd.f32 %v3379_v45, %v3125_v62  ;;  %v3449_v54 = vadd.f32 %v3448_v14, %v3189_v13  ;;  %v3518_v41 = vadd.f32 %v3517_v29, %v3253_v43 }
 0x276   :  { %v3587_v48 = vadd.f32 %v3586_v30, %v3317_v61  ;;  %v3127_v47 = vmul.f32 %v8965_v17, %v8965_v17  ;;  %v3191_v6 = vmul.f32 %v9221_v35, %v9221_v35  ;;  %v3255_v46 = vmul.f32 %v9477_v19, %v9477_v19 }
 0x277   :  { %v3319_v23 = vmul.f32 %v9733_v49, %v9733_v49  ;;  %v3381_v22 = vadd.f32 %v3380_v57, %v3126_v7  ;;  %v3450_v4 = vadd.f32 %v3449_v54, %v3190_v53  ;;  %v3519_v15 = vadd.f32 %v3518_v41, %v3254_v34 }
 0x278   :  { %v3588_v16 = vadd.f32 %v3587_v48, %v3318_v5  ;;  %v3128_v62 = vmul.f32 %v8969_v52, %v8969_v52  ;;  %v3192_v13 = vmul.f32 %v9225_v26, %v9225_v26  ;;  %v3256_v43 = vmul.f32 %v9481_v36, %v9481_v36 }
 0x279   :  { %v3320_v61 = vmul.f32 %v9737_v58, %v9737_v58  ;;  %v3382_v45 = vadd.f32 %v3381_v22, %v3127_v47  ;;  %v3451_v14 = vadd.f32 %v3450_v4, %v3191_v6  ;;  %v3520_v29 = vadd.f32 %v3519_v15, %v3255_v46 }
 0x27a   :  { %v3589_v30 = vadd.f32 %v3588_v16, %v3319_v23  ;;  %v3129_v7 = vmul.f32 %v8973_v32, %v8973_v32  ;;  %v3193_v53 = vmul.f32 %v9229_v25, %v9229_v25  ;;  %v3257_v34 = vmul.f32 %v9485_v55, %v9485_v55 }
 0x27b   :  { %v3321_v5 = vmul.f32 %v9741_v20, %v9741_v20  ;;  %v3383_v57 = vadd.f32 %v3382_v45, %v3128_v62  ;;  %v3452_v54 = vadd.f32 %v3451_v14, %v3192_v13  ;;  %v3521_v41 = vadd.f32 %v3520_v29, %v3256_v43 }
 0x27c   :  { %v3590_v48 = vadd.f32 %v3589_v30, %v3320_v61  ;;  %v3130_v47 = vmul.f32 %v8977_v42, %v8977_v42  ;;  %v3194_v6 = vmul.f32 %v9233_v56, %v9233_v56  ;;  %v3258_v46 = vmul.f32 %v9489_v27, %v9489_v27 }
 0x27d   :  { %v3322_v23 = vmul.f32 %v9745_v2, %v9745_v2  ;;  %v3384_v22 = vadd.f32 %v3383_v57, %v3129_v7  ;;  %v3453_v4 = vadd.f32 %v3452_v54, %v3193_v53  ;;  %v3522_v15 = vadd.f32 %v3521_v41, %v3257_v34  ;;  %v14078_v7 = vld [vmem:[#allocation6_spill] sm:$0xff]  ;;  %v14079_v34 = vld [vmem:[#allocation33_spill] sm:$0xff]  ;;  %v14081_v41 = vld [vmem:[#allocation139_spill] sm:$0xff] }
 0x27e   :  { %v3591_v16 = vadd.f32 %v3590_v48, %v3321_v5  ;;  %v3131_v62 = vmul.f32 %v8981_v3, %v8981_v3  ;;  %v3195_v13 = vmul.f32 %v9237_v37, %v9237_v37  ;;  %v3259_v43 = vmul.f32 %v9493_v63, %v9493_v63  ;;  %v14080_v57 = vld [vmem:[#allocation138_spill] sm:$0xff] }
 0x27f   :  { %v3323_v61 = vmul.f32 %v9749_v9, %v9749_v9  ;;  %v3385_v45 = vadd.f32 %v3384_v22, %v3130_v47  ;;  %v3454_v14 = vadd.f32 %v3453_v4, %v3194_v6  ;;  %v3523_v29 = vadd.f32 %v3522_v15, %v3258_v46  ;;  %v14082_v47 = vld [vmem:[#allocation12_spill] sm:$0xff]  ;;  %v14083_v46 = vld [vmem:[#allocation27_spill] sm:$0xff]  ;;  %v14085_v15 = vld [vmem:[#allocation133_spill] sm:$0xff] }
 0x280   :  { %v3592_v30 = vadd.f32 %v3591_v16, %v3322_v23  ;;  %v3132_v53 = vmul.f32 %v14078_v7, %v14078_v7  ;;  %v3196_v5 = vmul.f32 %v14079_v34, %v14079_v34  ;;  %v3260_v54 = vmul.f32 %v14080_v57, %v14080_v57  ;;  %v14084_v22 = vld [vmem:[#allocation132_spill] sm:$0xff] }
 0x281   :  { %v3324_v48 = vmul.f32 %v14081_v41, %v14081_v41  ;;  %v3386_v2 = vadd.f32 %v3385_v45, %v3131_v62  ;;  %v3455_v20 = vadd.f32 %v3454_v14, %v3195_v13  ;;  %v3524_v58 = vadd.f32 %v3523_v29, %v3259_v43  ;;  %v14086_v62 = vld [vmem:[#allocation16_spill] sm:$0xff]  ;;  %v14087_v43 = vld [vmem:[#allocation31_spill] sm:$0xff]  ;;  %v14089_v29 = vld [vmem:[#allocation137_spill] sm:$0xff] }
 0x282   :  { %v3593_v9 = vadd.f32 %v3592_v30, %v3323_v61  ;;  %v3133_v6 = vmul.f32 %v14082_v47, %v14082_v47  ;;  %v3197_v23 = vmul.f32 %v14083_v46, %v14083_v46  ;;  %v3261_v4 = vmul.f32 %v14084_v22, %v14084_v22  ;;  %v14088_v45 = vld [vmem:[#allocation136_spill] sm:$0xff] }
 0x283   :  { %v3325_v16 = vmul.f32 %v14085_v15, %v14085_v15  ;;  %v3387_v49 = vadd.f32 %v3386_v2, %v3132_v53  ;;  %v3456_v1 = vadd.f32 %v3455_v20, %v3196_v5  ;;  %v3525_v11 = vadd.f32 %v3524_v58, %v3260_v54  ;;  %v14090_v2 = vld [vmem:[#allocation10_spill] sm:$0xff]  ;;  %v14091_v20 = vld [vmem:[#allocation37_spill] sm:$0xff]  ;;  %v14093_v54 = vld [vmem:[#allocation143_spill] sm:$0xff] }
 0x284   :  { %v3594_v41 = vadd.f32 %v3593_v9, %v3324_v48  ;;  %v3134_v13 = vmul.f32 %v14086_v62, %v14086_v62  ;;  %v3198_v61 = vmul.f32 %v14087_v43, %v14087_v43  ;;  %v3262_v14 = vmul.f32 %v14088_v45, %v14088_v45  ;;  %v14092_v53 = vld [vmem:[#allocation142_spill] sm:$0xff] }
 0x285   :  { %v3326_v30 = vmul.f32 %v14089_v29, %v14089_v29  ;;  %v3388_v0 = vadd.f32 %v3387_v49, %v3133_v6  ;;  %v3457_v10 = vadd.f32 %v3456_v1, %v3197_v23  ;;  %v3526_v33 = vadd.f32 %v3525_v11, %v3261_v4  ;;  %v14094_v49 = vld [vmem:[#allocation14_spill] sm:$0xff]  ;;  %v14095_v1 = vld [vmem:[#allocation41_spill] sm:$0xff]  ;;  %v14097_v4 = vld [vmem:[#allocation147_spill] sm:$0xff] }
 0x286   :  { %v3595_v15 = vadd.f32 %v3594_v41, %v3325_v16  ;;  %v3135_v58 = vmul.f32 %v14090_v2, %v14090_v2  ;;  %v3199_v9 = vmul.f32 %v14091_v20, %v14091_v20  ;;  %v3263_v5 = vmul.f32 %v14092_v53, %v14092_v53  ;;  %v14096_v6 = vld [vmem:[#allocation146_spill] sm:$0xff] }
 0x287   :  { %v3327_v48 = vmul.f32 %v14093_v54, %v14093_v54  ;;  %v3389_v45 = vadd.f32 %v3388_v0, %v3134_v13  ;;  %v3458_v22 = vadd.f32 %v3457_v10, %v3198_v61  ;;  %v3527_v57 = vadd.f32 %v3526_v33, %v3262_v14  ;;  %v14098_v0 = vld [vmem:[#allocation20_spill] sm:$0xff]  ;;  %v14099_v10 = vld [vmem:[#allocation35_spill] sm:$0xff]  ;;  %v14101_v14 = vld [vmem:[#allocation141_spill] sm:$0xff] }
 0x288   :  { %v3596_v29 = vadd.f32 %v3595_v15, %v3326_v30  ;;  %v3136_v11 = vmul.f32 %v14094_v49, %v14094_v49  ;;  %v3200_v41 = vmul.f32 %v14095_v1, %v14095_v1  ;;  %v3264_v23 = vmul.f32 %v14096_v6, %v14096_v6  ;;  %v14100_v13 = vld [vmem:[#allocation140_spill] sm:$0xff] }
 0x289   :  { %v3328_v16 = vmul.f32 %v14097_v4, %v14097_v4  ;;  %v3390_v53 = vadd.f32 %v3389_v45, %v3135_v58  ;;  %v3459_v63 = vadd.f32 %v3458_v22, %v3199_v9  ;;  %v3528_v27 = vadd.f32 %v3527_v57, %v3263_v5  ;;  %v14102_v45 = vld [vmem:[#allocation24_spill] sm:$0xff]  ;;  %v14103_v22 = vld [vmem:[#allocation39_spill] sm:$0xff]  ;;  %v14105_v5 = vld [vmem:[#allocation145_spill] sm:$0xff] }
 0x28a   :  { %v3597_v54 = vadd.f32 %v3596_v29, %v3327_v48  ;;  %v3137_v33 = vmul.f32 %v14098_v0, %v14098_v0  ;;  %v3201_v15 = vmul.f32 %v14099_v10, %v14099_v10  ;;  %v3265_v61 = vmul.f32 %v14100_v13, %v14100_v13  ;;  %v14104_v58 = vld [vmem:[#allocation144_spill] sm:$0xff] }
 0x28b   :  { %v3329_v30 = vmul.f32 %v14101_v14, %v14101_v14  ;;  %v3391_v6 = vadd.f32 %v3390_v53, %v3136_v11  ;;  %v3460_v55 = vadd.f32 %v3459_v63, %v3200_v41  ;;  %v3529_v36 = vadd.f32 %v3528_v27, %v3264_v23  ;;  %v14106_v53 = vld [vmem:[#allocation18_spill] sm:$0xff]  ;;  %v14107_v63 = vld [vmem:[#allocation45_spill] sm:$0xff] }
 0x28c   :  { %v3598_v4 = vadd.f32 %v3597_v54, %v3328_v16  ;;  %v3138_v57 = vmul.f32 %v14102_v45, %v14102_v45  ;;  %v3202_v29 = vmul.f32 %v14103_v22, %v14103_v22  ;;  %v3266_v9 = vmul.f32 %v14104_v58, %v14104_v58  ;;  %v14108_v11 = vld [vmem:[#allocation149_spill] sm:$0xff]  ;;  %v14109_v23 = vld [vmem:[#allocation150_spill] sm:$0xff] }
 0x28d   :  { %v3330_v48 = vmul.f32 %v14105_v5, %v14105_v5  ;;  %v3392_v13 = vadd.f32 %v3391_v6, %v3137_v33  ;;  %v3461_v19 = vadd.f32 %v3460_v55, %v3201_v15  ;;  %v3530_v60 = vadd.f32 %v3529_v36, %v3265_v61  ;;  %v14110_v6 = vld [vmem:[#allocation22_spill] sm:$0xff]  ;;  %v14111_v55 = vld [vmem:[#allocation48_spill] sm:$0xff]  ;;  %v14112_v33 = vld [vmem:[#allocation153_spill] sm:$0xff] }
 0x28e   :  { %v3599_v14 = vadd.f32 %v3598_v4, %v3329_v30  ;;  %v3139_v27 = vmul.f32 %v14106_v53, %v14106_v53  ;;  %v3203_v54 = vmul.f32 %v14107_v63, %v14107_v63  ;;  %v3267_v41 = vmul.f32 %v14108_v11, %v14108_v11  ;;  %v14113_v61 = vld [vmem:[#allocation154_spill] sm:$0xff] }
 0x28f   :  { %v3331_v16 = vmul.f32 %v14109_v23, %v14109_v23  ;;  %v3393_v58 = vadd.f32 %v3392_v13, %v3138_v57  ;;  %v3462_v21 = vadd.f32 %v3461_v19, %v3202_v29  ;;  %v3531_v44 = vadd.f32 %v3530_v60, %v3266_v9  ;;  %v14114_v13 = vld [vmem:[#allocation28_spill] sm:$0xff]  ;;  %v14115_v19 = vld [vmem:[#allocation43_spill] sm:$0xff] }
 0x290   :  { %v3600_v5 = vadd.f32 %v3599_v14, %v3330_v48  ;;  %v3140_v36 = vmul.f32 %v14110_v6, %v14110_v6  ;;  %v3204_v4 = vmul.f32 %v14111_v55, %v14111_v55  ;;  %v3268_v15 = vmul.f32 %v14112_v33, %v14112_v33  ;;  %v14116_v57 = vld [vmem:[#allocation55_spill] sm:$0xff]  ;;  %v14117_v9 = vld [vmem:[#allocation148_spill] sm:$0xff] }
 0x291   :  { %v3332_v30 = vmul.f32 %v14113_v61, %v14113_v61  ;;  %v3394_v11 = vadd.f32 %v3393_v58, %v3139_v27  ;;  %v3463_v59 = vadd.f32 %v3462_v21, %v3203_v54  ;;  %v3532_v31 = vadd.f32 %v3531_v44, %v3267_v41  ;;  %v14118_v58 = vld [vmem:[#allocation32_spill] sm:$0xff]  ;;  %v14119_v21 = vld [vmem:[#allocation46_spill] sm:$0xff]  ;;  %v14120_v27 = vld [vmem:[#allocation151_spill] sm:$0xff] }
 0x292   :  { %v3601_v23 = vadd.f32 %v3600_v5, %v3331_v16  ;;  %v3141_v60 = vmul.f32 %v14114_v13, %v14114_v13  ;;  %v3205_v14 = vmul.f32 %v14115_v19, %v14115_v19  ;;  %v3269_v29 = vmul.f32 %v14116_v57, %v14116_v57  ;;  %v14121_v41 = vld [vmem:[#allocation152_spill] sm:$0xff] }
 0x293   :  { %v3333_v48 = vmul.f32 %v14117_v9, %v14117_v9  ;;  %v3395_v33 = vadd.f32 %v3394_v11, %v3140_v36  ;;  %v3464_v55 = vadd.f32 %v3463_v59, %v3204_v4  ;;  %v3533_v63 = vadd.f32 %v3532_v31, %v3268_v15  ;;  %v14122_v11 = vld [vmem:[#allocation26_spill] sm:$0xff]  ;;  %v14124_v36 = vld [vmem:[#allocation157_spill] sm:$0xff] }
 0x294   :  { %v3602_v61 = vadd.f32 %v3601_v23, %v3332_v30  ;;  %v3142_v44 = vmul.f32 %v14118_v58, %v14118_v58  ;;  %v3206_v5 = vmul.f32 %v14119_v21, %v14119_v21  ;;  %v3270_v54 = vmul.f32 %v14120_v27, %v14120_v27  ;;  %v14123_v59 = vld [vmem:[#allocation50_spill] sm:$0xff] }
 0x295   :  { %v3334_v16 = vmul.f32 %v14121_v41, %v14121_v41  ;;  %v3396_v57 = vadd.f32 %v3395_v33, %v3141_v60  ;;  %v3465_v19 = vadd.f32 %v3464_v55, %v3205_v14  ;;  %v3534_v22 = vadd.f32 %v3533_v63, %v3269_v29  ;;  %v14125_v15 = vld [vmem:[#allocation158_spill] sm:$0xff]  ;;  %v14127_v55 = vld [vmem:[#allocation52_spill] sm:$0xff]  ;;  %v14129_v29 = vld [vmem:[#allocation161_spill] sm:$0xff] }
 0x296   :  { %v3603_v9 = vadd.f32 %v3602_v61, %v3333_v48  ;;  %v3143_v31 = vmul.f32 %v14122_v11, %v14122_v11  ;;  %v3207_v23 = vmul.f32 %v14123_v59, %v14123_v59  ;;  %v3271_v4 = vmul.f32 %v14124_v36, %v14124_v36  ;;  %v14126_v33 = vld [vmem:[#allocation30_spill] sm:$0xff]  ;;  %v14128_v60 = vld [vmem:[#allocation160_spill] sm:$0xff] }
 0x297   :  { %v3335_v30 = vmul.f32 %v14125_v15, %v14125_v15  ;;  %v3397_v27 = vadd.f32 %v3396_v57, %v3142_v44  ;;  %v3466_v21 = vadd.f32 %v3465_v19, %v3206_v5  ;;  %v3535_v10 = vadd.f32 %v3534_v22, %v3270_v54  ;;  %v14130_v57 = vld [vmem:[#allocation36_spill] sm:$0xff]  ;;  %v14131_v19 = vld [vmem:[#allocation49_spill] sm:$0xff]  ;;  %v14132_v44 = vld [vmem:[#allocation155_spill] sm:$0xff] }
 0x298   :  { %v3604_v41 = vadd.f32 %v3603_v9, %v3334_v16  ;;  %v3144_v63 = vmul.f32 %v14126_v33, %v14126_v33  ;;  %v3208_v61 = vmul.f32 %v14127_v55, %v14127_v55  ;;  %v3272_v14 = vmul.f32 %v14128_v60, %v14128_v60  ;;  %v14133_v54 = vld [vmem:[#allocation156_spill] sm:$0xff] }
 0x299   :  { %v3336_v48 = vmul.f32 %v14129_v29, %v14129_v29  ;;  %v3398_v36 = vadd.f32 %v3397_v27, %v3143_v31  ;;  %v3467_v59 = vadd.f32 %v3466_v21, %v3207_v23  ;;  %v3536_v1 = vadd.f32 %v3535_v10, %v3271_v4  ;;  %v14134_v27 = vld [vmem:[#allocation40_spill] sm:$0xff]  ;;  %v14135_v21 = vld [vmem:[#allocation51_spill] sm:$0xff]  ;;  %v14136_v31 = vld [vmem:[#allocation58_spill] sm:$0xff] }
 0x29a   :  { %v3605_v15 = vadd.f32 %v3604_v41, %v3335_v30  ;;  %v3145_v22 = vmul.f32 %v14130_v57, %v14130_v57  ;;  %v3209_v9 = vmul.f32 %v14131_v19, %v14131_v19  ;;  %v3273_v5 = vmul.f32 %v14132_v44, %v14132_v44  ;;  %v14137_v4 = vld [vmem:[#allocation159_spill] sm:$0xff] }
 0x29b   :  { %v3337_v16 = vmul.f32 %v14133_v54, %v14133_v54  ;;  %v3399_v60 = vadd.f32 %v3398_v36, %v3144_v63  ;;  %v3468_v55 = vadd.f32 %v3467_v59, %v3208_v61  ;;  %v3537_v20 = vadd.f32 %v3536_v1, %v3272_v14  ;;  %v14138_v36 = vld [vmem:[#allocation34_spill] sm:$0xff]  ;;  %v14140_v63 = vld [vmem:[#allocation163_spill] sm:$0xff]  ;;  %v14141_v14 = vld [vmem:[#allocation164_spill] sm:$0xff] }
 0x29c   :  { %v3606_v29 = vadd.f32 %v3605_v15, %v3336_v48  ;;  %v3146_v10 = vmul.f32 %v14134_v27, %v14134_v27  ;;  %v3210_v41 = vmul.f32 %v14135_v21, %v14135_v21  ;;  %v3274_v23 = vmul.f32 %v14136_v31, %v14136_v31  ;;  %v14139_v59 = vld [vmem:[#allocation54_spill] sm:$0xff] }
 0x29d   :  { %v3338_v30 = vmul.f32 %v14137_v4, %v14137_v4  ;;  %v3400_v44 = vadd.f32 %v3399_v60, %v3145_v22  ;;  %v3469_v19 = vadd.f32 %v3468_v55, %v3209_v9  ;;  %v3538_v43 = vadd.f32 %v3537_v20, %v3273_v5  ;;  %v14142_v60 = vld [vmem:[#allocation38_spill] sm:$0xff]  ;;  %v14143_v55 = vld [vmem:[#allocation57_spill] sm:$0xff]  ;;  %v14144_v22 = vld [vmem:[#allocation167_spill] sm:$0xff] }
 0x29e   :  { %v3607_v54 = vadd.f32 %v3606_v29, %v3337_v16  ;;  %v3147_v1 = vmul.f32 %v14138_v36, %v14138_v36  ;;  %v3211_v15 = vmul.f32 %v14139_v59, %v14139_v59  ;;  %v3275_v61 = vmul.f32 %v14140_v63, %v14140_v63  ;;  %v14145_v5 = vld [vmem:[#allocation168_spill] sm:$0xff] }
 0x29f   :  { %v3339_v48 = vmul.f32 %v14141_v14, %v14141_v14  ;;  %v3401_v31 = vadd.f32 %v3400_v44, %v3146_v10  ;;  %v3470_v21 = vadd.f32 %v3469_v19, %v3210_v41  ;;  %v3539_v46 = vadd.f32 %v3538_v43, %v3274_v23  ;;  %v14146_v44 = vld [vmem:[#allocation44_spill] sm:$0xff]  ;;  %v14147_v19 = vld [vmem:[#allocation53_spill] sm:$0xff]  ;;  %v14149_v23 = vld [vmem:[#allocation162_spill] sm:$0xff] }
 0x2a0   :  { %v3608_v4 = vadd.f32 %v3607_v54, %v3338_v30  ;;  %v3148_v20 = vmul.f32 %v14142_v60, %v14142_v60  ;;  %v3212_v29 = vmul.f32 %v14143_v55, %v14143_v55  ;;  %v3276_v9 = vmul.f32 %v14144_v22, %v14144_v22  ;;  %v14148_v10 = vld [vmem:[#allocation61_spill] sm:$0xff] }
 0x2a1   :  { %v3340_v16 = vmul.f32 %v14145_v5, %v14145_v5  ;;  %v3402_v63 = vadd.f32 %v3401_v31, %v3147_v1  ;;  %v3471_v59 = vadd.f32 %v3470_v21, %v3211_v15  ;;  %v3540_v34 = vadd.f32 %v3539_v46, %v3275_v61  ;;  %v14150_v31 = vld [vmem:[#allocation47_spill] sm:$0xff]  ;;  %v14151_v21 = vld [vmem:[#allocation56_spill] sm:$0xff]  ;;  %v14152_v1 = vld [vmem:[#allocation165_spill] sm:$0xff] }
 0x2a2   :  { %v3609_v14 = vadd.f32 %v3608_v4, %v3339_v48  ;;  %v3149_v43 = vmul.f32 %v14146_v44, %v14146_v44  ;;  %v3213_v54 = vmul.f32 %v14147_v19, %v14147_v19  ;;  %v3277_v41 = vmul.f32 %v14148_v10, %v14148_v10  ;;  %v14153_v61 = vld [vmem:[#allocation166_spill] sm:$0xff] }
 0x2a3   :  { %v3341_v30 = vmul.f32 %v14149_v23, %v14149_v23  ;;  %v3403_v22 = vadd.f32 %v3402_v63, %v3148_v20  ;;  %v3472_v55 = vadd.f32 %v3471_v59, %v3212_v29  ;;  %v3541_v37 = vadd.f32 %v3540_v34, %v3276_v9  ;;  %v14154_v63 = vld [vmem:[#allocation42_spill] sm:$0xff]  ;;  %v14155_v59 = vld [vmem:[#allocation60_spill] sm:$0xff]  ;;  %v14156_v20 = vld [vmem:[#allocation171_spill] sm:$0xff] }
 0x2a4   :  { %v3610_v5 = vadd.f32 %v3609_v14, %v3340_v16  ;;  %v3150_v46 = vmul.f32 %v14150_v31, %v14150_v31  ;;  %v3214_v4 = vmul.f32 %v14151_v21, %v14151_v21  ;;  %v3278_v15 = vmul.f32 %v14152_v1, %v14152_v1  ;;  %v14157_v9 = vld [vmem:[#allocation172_spill] sm:$0xff] }
 0x2a5   :  { %v3342_v48 = vmul.f32 %v14153_v61, %v14153_v61  ;;  %v3404_v10 = vadd.f32 %v3403_v22, %v3149_v43  ;;  %v3473_v19 = vadd.f32 %v3472_v55, %v3213_v54  ;;  %v3542_v56 = vadd.f32 %v3541_v37, %v3277_v41  ;;  %v14158_v22 = vld [vmem:[#allocation222_spill] sm:$0xff]  ;;  %v14159_v55 = vld [vmem:[#allocation63_spill] sm:$0xff] }
 0x2a6   :  { %v3611_v23 = vadd.f32 %v3610_v5, %v3341_v30  ;;  %v3151_v34 = vmul.f32 %v14154_v63, %v14154_v63  ;;  %v3215_v14 = vmul.f32 %v14155_v59, %v14155_v59  ;;  %v3279_v29 = vmul.f32 %v14156_v20, %v14156_v20  ;;  %v14160_v43 = vld [vmem:[#allocation174_spill] sm:$0xff]  ;;  %v14161_v41 = vld [vmem:[#allocation175_spill] sm:$0xff] }
 0x2a7   :  { %v3343_v16 = vmul.f32 %v14157_v9, %v14157_v9  ;;  %v3405_v1 = vadd.f32 %v3404_v10, %v3150_v46  ;;  %v3474_v21 = vadd.f32 %v3473_v19, %v3214_v4  ;;  %v3543_v25 = vadd.f32 %v3542_v56, %v3278_v15  ;;  %v14162_v10 = vld [vmem:[#allocation223_spill] sm:$0xff]  ;;  %v14164_v46 = vld [vmem:[#allocation169_spill] sm:$0xff]  ;;  %v14165_v15 = vld [vmem:[#allocation170_spill] sm:$0xff] }
 0x2a8   :  { %v3612_v61 = vadd.f32 %v3611_v23, %v3342_v48  ;;  %v3152_v37 = vmul.f32 %v14158_v22, %v14158_v22  ;;  %v3216_v5 = vmul.f32 %v14159_v55, %v14159_v55  ;;  %v3280_v54 = vmul.f32 %v14160_v43, %v14160_v43  ;;  %v14163_v19 = vld [vmem:[#allocation59_spill] sm:$0xff] }
 0x2a9   :  { %v3344_v30 = vmul.f32 %v14161_v41, %v14161_v41  ;;  %v3406_v20 = vadd.f32 %v3405_v1, %v3151_v34  ;;  %v3475_v59 = vadd.f32 %v3474_v21, %v3215_v14  ;;  %v3544_v26 = vadd.f32 %v3543_v25, %v3279_v29  ;;  %v14166_v1 = vld [vmem:[#allocation224_spill] sm:$0xff]  ;;  %v14167_v21 = vld [vmem:[#allocation62_spill] sm:$0xff]  ;;  %v14169_v29 = vld [vmem:[#allocation173_spill] sm:$0xff] }
 0x2aa   :  { %v3613_v9 = vadd.f32 %v3612_v61, %v3343_v16  ;;  %v3153_v56 = vmul.f32 %v14162_v10, %v14162_v10  ;;  %v3217_v23 = vmul.f32 %v14163_v19, %v14163_v19  ;;  %v3281_v4 = vmul.f32 %v14164_v46, %v14164_v46  ;;  %v14168_v34 = vld [vmem:[#allocation64_spill] sm:$0xff] }
 0x2ab   :  { %v3345_v48 = vmul.f32 %v14165_v15, %v14165_v15  ;;  %v3407_v43 = vadd.f32 %v3406_v20, %v3152_v37  ;;  %v3476_v55 = vadd.f32 %v3475_v59, %v3216_v5  ;;  %v3545_v35 = vadd.f32 %v3544_v26, %v3280_v54  ;;  %v14170_v20 = vld [vmem:[#allocation225_spill] sm:$0xff]  ;;  %v14171_v59 = vld [vmem:[#allocation66_spill] sm:$0xff] }
 0x2ac   :  { %v3614_v41 = vadd.f32 %v3613_v9, %v3344_v30  ;;  %v3154_v25 = vmul.f32 %v14166_v1, %v14166_v1  ;;  %v3218_v61 = vmul.f32 %v14167_v21, %v14167_v21  ;;  %v3282_v14 = vmul.f32 %v14168_v34, %v14168_v34  ;;  %v14172_v37 = vld [vmem:[#allocation177_spill] sm:$0xff]  ;;  %v14173_v54 = vld [vmem:[#allocation178_spill] sm:$0xff] }
 0x2ad   :  { %v3346_v16 = vmul.f32 %v14169_v29, %v14169_v29  ;;  %v3408_v46 = vadd.f32 %v3407_v43, %v3153_v56  ;;  %v3477_v19 = vadd.f32 %v3476_v55, %v3217_v23  ;;  %v3546_v39 = vadd.f32 %v3545_v35, %v3281_v4  ;;  %v14174_v43 = vld [vmem:[#allocation226_spill] sm:$0xff]  ;;  %v14175_v55 = vld [vmem:[#allocation69_spill] sm:$0xff] }
 0x2ae   :  { %v3615_v15 = vadd.f32 %v3614_v41, %v3345_v48  ;;  %v3155_v26 = vmul.f32 %v14170_v20, %v14170_v20  ;;  %v3219_v9 = vmul.f32 %v14171_v59, %v14171_v59  ;;  %v3283_v5 = vmul.f32 %v14172_v37, %v14172_v37  ;;  %v14176_v56 = vld [vmem:[#allocation181_spill] sm:$0xff]  ;;  %v14177_v4 = vld [vmem:[#allocation182_spill] sm:$0xff] }
 0x2af   :  { %v3347_v30 = vmul.f32 %v14173_v54, %v14173_v54  ;;  %v3409_v34 = vadd.f32 %v3408_v46, %v3154_v25  ;;  %v3478_v21 = vadd.f32 %v3477_v19, %v3218_v61  ;;  %v3547_v8 = vadd.f32 %v3546_v39, %v3282_v14  ;;  %v14178_v46 = vld [vmem:[#allocation227_spill] sm:$0xff]  ;;  %v14179_v19 = vld [vmem:[#allocation65_spill] sm:$0xff]  ;;  %v14181_v14 = vld [vmem:[#allocation176_spill] sm:$0xff] }
 0x2b0   :  { %v3616_v29 = vadd.f32 %v3615_v15, %v3346_v16  ;;  %v3156_v35 = vmul.f32 %v14174_v43, %v14174_v43  ;;  %v3220_v41 = vmul.f32 %v14175_v55, %v14175_v55  ;;  %v3284_v23 = vmul.f32 %v14176_v56, %v14176_v56  ;;  %v14180_v25 = vld [vmem:[#allocation67_spill] sm:$0xff] }
 0x2b1   :  { %v3348_v48 = vmul.f32 %v14177_v4, %v14177_v4  ;;  %v3410_v37 = vadd.f32 %v3409_v34, %v3155_v26  ;;  %v3479_v59 = vadd.f32 %v3478_v21, %v3219_v9  ;;  %v3548_v28 = vadd.f32 %v3547_v8, %v3283_v5  ;;  %v14182_v34 = vld [vmem:[#allocation228_spill] sm:$0xff]  ;;  %v14184_v26 = vld [vmem:[#allocation179_spill] sm:$0xff] }
 0x2b2   :  { %v3617_v54 = vadd.f32 %v3616_v29, %v3347_v30  ;;  %v3157_v39 = vmul.f32 %v14178_v46, %v14178_v46  ;;  %v3221_v15 = vmul.f32 %v14179_v19, %v14179_v19  ;;  %v3285_v61 = vmul.f32 %v14180_v25, %v14180_v25  ;;  %v14183_v21 = vld [vmem:[#allocation68_spill] sm:$0xff] }
 0x2b3   :  { %v3349_v16 = vmul.f32 %v14181_v14, %v14181_v14  ;;  %v3411_v56 = vadd.f32 %v3410_v37, %v3156_v35  ;;  %v3480_v55 = vadd.f32 %v3479_v59, %v3220_v41  ;;  %v3549_v18 = vadd.f32 %v3548_v28, %v3284_v23  ;;  %v14185_v5 = vld [vmem:[#allocation180_spill] sm:$0xff]  ;;  %v14186_v37 = vld [vmem:[#allocation229_spill] sm:$0xff]  ;;  %v14189_v23 = vld [vmem:[#allocation186_spill] sm:$0xff] }
 0x2b4   :  { %v3618_v4 = vadd.f32 %v3617_v54, %v3348_v48  ;;  %v3158_v8 = vmul.f32 %v14182_v34, %v14182_v34  ;;  %v3222_v29 = vmul.f32 %v14183_v21, %v14183_v21  ;;  %v3286_v9 = vmul.f32 %v14184_v26, %v14184_v26  ;;  %v14187_v59 = vld [vmem:[#allocation72_spill] sm:$0xff]  ;;  %v14188_v35 = vld [vmem:[#allocation185_spill] sm:$0xff] }
 0x2b5   :  { %v3350_v30 = vmul.f32 %v14185_v5, %v14185_v5  ;;  %v3412_v25 = vadd.f32 %v3411_v56, %v3157_v39  ;;  %v3481_v19 = vadd.f32 %v3480_v55, %v3221_v15  ;;  %v3550_v38 = vadd.f32 %v3549_v18, %v3285_v61  ;;  %v14190_v56 = vld [vmem:[#allocation230_spill] sm:$0xff]  ;;  %v14191_v55 = vld [vmem:[#allocation75_spill] sm:$0xff]  ;;  %v14192_v39 = vld [vmem:[#allocation188_spill] sm:$0xff] }
 0x2b6   :  { %v3619_v14 = vadd.f32 %v3618_v4, %v3349_v16  ;;  %v3159_v28 = vmul.f32 %v14186_v37, %v14186_v37  ;;  %v3223_v54 = vmul.f32 %v14187_v59, %v14187_v59  ;;  %v3287_v41 = vmul.f32 %v14188_v35, %v14188_v35  ;;  %v14193_v61 = vld [vmem:[#allocation189_spill] sm:$0xff] }
 0x2b7   :  { %v3351_v48 = vmul.f32 %v14189_v23, %v14189_v23  ;;  %v3413_v26 = vadd.f32 %v3412_v25, %v3158_v8  ;;  %v3482_v21 = vadd.f32 %v3481_v19, %v3222_v29  ;;  %v3551_v34 = vadd.f32 %v3550_v38, %v3286_v9  ;;  %v14194_v25 = vld [vmem:[#allocation231_spill] sm:$0xff]  ;;  %v14197_v9 = vld [vmem:[#allocation184_spill] sm:$0xff] }
 0x2b8   :  { %v3620_v5 = vadd.f32 %v3619_v14, %v3350_v30  ;;  %v3160_v18 = vmul.f32 %v14190_v56, %v14190_v56  ;;  %v3224_v4 = vmul.f32 %v14191_v55, %v14191_v55  ;;  %v3288_v15 = vmul.f32 %v14192_v39, %v14192_v39  ;;  %v14195_v19 = vld [vmem:[#allocation71_spill] sm:$0xff] }
 0x2b9   :  { %v3352_v16 = vmul.f32 %v14193_v61, %v14193_v61  ;;  %v3414_v35 = vadd.f32 %v3413_v26, %v3159_v28  ;;  %v3483_v59 = vadd.f32 %v3482_v21, %v3223_v54  ;;  %v3552_v37 = vadd.f32 %v3551_v34, %v3287_v41  ;;  %v14196_v8 = vld [vmem:[#allocation183_spill] sm:$0xff]  ;;  %v14198_v26 = vld [vmem:[#allocation232_spill] sm:$0xff]  ;;  %v14199_v21 = vld [vmem:[#allocation74_spill] sm:$0xff] }
 0x2ba   :  { %v3621_v23 = vadd.f32 %v3620_v5, %v3351_v48  ;;  %v3161_v38 = vmul.f32 %v14194_v25, %v14194_v25  ;;  %v3225_v14 = vmul.f32 %v14195_v19, %v14195_v19  ;;  %v3289_v29 = vmul.f32 %v14196_v8, %v14196_v8  ;;  %v14200_v28 = vld [vmem:[#allocation70_spill] sm:$0xff]  ;;  %v14201_v41 = vld [vmem:[#allocation187_spill] sm:$0xff] }
 0x2bb   :  { %v3353_v30 = vmul.f32 %v14197_v9, %v14197_v9  ;;  %v3415_v39 = vadd.f32 %v3414_v35, %v3160_v18  ;;  %v3484_v55 = vadd.f32 %v3483_v59, %v3224_v4  ;;  %v3553_v56 = vadd.f32 %v3552_v37, %v3288_v15  ;;  %v14202_v35 = vld [vmem:[#allocation233_spill] sm:$0xff]  ;;  %v14203_v59 = vld [vmem:[#allocation78_spill] sm:$0xff]  ;;  %v14204_v18 = vld [vmem:[#allocation191_spill] sm:$0xff] }
 0x2bc   :  { %v3622_v61 = vadd.f32 %v3621_v23, %v3352_v16  ;;  %v3162_v34 = vmul.f32 %v14198_v26, %v14198_v26  ;;  %v3226_v5 = vmul.f32 %v14199_v21, %v14199_v21  ;;  %v3290_v54 = vmul.f32 %v14200_v28, %v14200_v28  ;;  %v14205_v15 = vld [vmem:[#allocation193_spill] sm:$0xff] }
 0x2bd   :  { %v3354_v48 = vmul.f32 %v14201_v41, %v14201_v41  ;;  %v3416_v8 = vadd.f32 %v3415_v39, %v3161_v38  ;;  %v3485_v19 = vadd.f32 %v3484_v55, %v3225_v14  ;;  %v3554_v25 = vadd.f32 %v3553_v56, %v3289_v29  ;;  %v14206_v39 = vld [vmem:[#allocation234_spill] sm:$0xff]  ;;  %v14207_v55 = vld [vmem:[#allocation81_spill] sm:$0xff]  ;;  %v14209_v29 = vld [vmem:[#allocation76_spill] sm:$0xff] }
 0x2be   :  { %v3623_v9 = vadd.f32 %v3622_v61, %v3353_v30  ;;  %v3163_v37 = vmul.f32 %v14202_v35, %v14202_v35  ;;  %v3227_v23 = vmul.f32 %v14203_v59, %v14203_v59  ;;  %v3291_v4 = vmul.f32 %v14204_v18, %v14204_v18  ;;  %v14208_v38 = vld [vmem:[#allocation194_spill] sm:$0xff] }
 0x2bf   :  { %v3355_v16 = vmul.f32 %v14205_v15, %v14205_v15  ;;  %v3417_v28 = vadd.f32 %v3416_v8, %v3162_v34  ;;  %v3486_v21 = vadd.f32 %v3485_v19, %v3226_v5  ;;  %v3555_v26 = vadd.f32 %v3554_v25, %v3290_v54  ;;  %v14210_v8 = vld [vmem:[#allocation235_spill] sm:$0xff]  ;;  %v14211_v19 = vld [vmem:[#allocation77_spill] sm:$0xff]  ;;  %v14213_v54 = vld [vmem:[#allocation190_spill] sm:$0xff] }
 0x2c0   :  { %v3624_v41 = vadd.f32 %v3623_v9, %v3354_v48  ;;  %v3164_v56 = vmul.f32 %v14206_v39, %v14206_v39  ;;  %v3228_v61 = vmul.f32 %v14207_v55, %v14207_v55  ;;  %v3292_v14 = vmul.f32 %v14208_v38, %v14208_v38  ;;  %v14212_v34 = vld [vmem:[#allocation73_spill] sm:$0xff] }
 0x2c1   :  { %v3356_v30 = vmul.f32 %v14209_v29, %v14209_v29  ;;  %v3418_v18 = vadd.f32 %v3417_v28, %v3163_v37  ;;  %v3487_v59 = vadd.f32 %v3486_v21, %v3227_v23  ;;  %v3556_v35 = vadd.f32 %v3555_v26, %v3291_v4  ;;  %v14214_v28 = vld [vmem:[#allocation236_spill] sm:$0xff]  ;;  %v14217_v4 = vld [vmem:[#allocation195_spill] sm:$0xff] }
 0x2c2   :  { %v3625_v15 = vadd.f32 %v3624_v41, %v3355_v16  ;;  %v3165_v25 = vmul.f32 %v14210_v8, %v14210_v8  ;;  %v3229_v9 = vmul.f32 %v14211_v19, %v14211_v19  ;;  %v3293_v5 = vmul.f32 %v14212_v34, %v14212_v34  ;;  %v14215_v21 = vld [vmem:[#allocation80_spill] sm:$0xff] }
 0x2c3   :  { %v3357_v48 = vmul.f32 %v14213_v54, %v14213_v54  ;;  %v3419_v38 = vadd.f32 %v3418_v18, %v3164_v56  ;;  %v3488_v55 = vadd.f32 %v3487_v59, %v3228_v61  ;;  %v3557_v39 = vadd.f32 %v3556_v35, %v3292_v14  ;;  %v14216_v37 = vld [vmem:[#allocation192_spill] sm:$0xff]  ;;  %v14218_v18 = vld [vmem:[#allocation237_spill] sm:$0xff]  ;;  %v14221_v14 = vld [vmem:[#allocation199_spill] sm:$0xff] }
 0x2c4   :  { %v3626_v29 = vadd.f32 %v3625_v15, %v3356_v30  ;;  %v3166_v26 = vmul.f32 %v14214_v28, %v14214_v28  ;;  %v3230_v41 = vmul.f32 %v14215_v21, %v14215_v21  ;;  %v3294_v23 = vmul.f32 %v14216_v37, %v14216_v37  ;;  %v14219_v59 = vld [vmem:[#allocation84_spill] sm:$0xff]  ;;  %v14220_v56 = vld [vmem:[#allocation197_spill] sm:$0xff] }
 0x2c5   :  { %v3358_v16 = vmul.f32 %v14217_v4, %v14217_v4  ;;  %v3420_v34 = vadd.f32 %v3419_v38, %v3165_v25  ;;  %v3489_v19 = vadd.f32 %v3488_v55, %v3229_v9  ;;  %v3558_v8 = vadd.f32 %v3557_v39, %v3293_v5  ;;  %v14222_v38 = vld [vmem:[#allocation238_spill] sm:$0xff]  ;;  %v14223_v55 = vld [vmem:[#allocation87_spill] sm:$0xff]  ;;  %v14224_v25 = vld [vmem:[#allocation200_spill] sm:$0xff] }
 0x2c6   :  { %v3627_v54 = vadd.f32 %v3626_v29, %v3357_v48  ;;  %v3167_v35 = vmul.f32 %v14218_v18, %v14218_v18  ;;  %v3231_v15 = vmul.f32 %v14219_v59, %v14219_v59  ;;  %v3295_v61 = vmul.f32 %v14220_v56, %v14220_v56  ;;  %v14225_v5 = vld [vmem:[#allocation82_spill] sm:$0xff] }
 0x2c7   :  { %v3359_v30 = vmul.f32 %v14221_v14, %v14221_v14  ;;  %v3421_v37 = vadd.f32 %v3420_v34, %v3166_v26  ;;  %v3490_v21 = vadd.f32 %v3489_v19, %v3230_v41  ;;  %v3559_v28 = vadd.f32 %v3558_v8, %v3294_v23  ;;  %v14226_v34 = vld [vmem:[#allocation239_spill] sm:$0xff]  ;;  %v14228_v26 = vld [vmem:[#allocation196_spill] sm:$0xff] }
 0x2c8   :  { %v3628_v4 = vadd.f32 %v3627_v54, %v3358_v16  ;;  %v3168_v39 = vmul.f32 %v14222_v38, %v14222_v38  ;;  %v3232_v29 = vmul.f32 %v14223_v55, %v14223_v55  ;;  %v3296_v9 = vmul.f32 %v14224_v25, %v14224_v25  ;;  %v14227_v19 = vld [vmem:[#allocation83_spill] sm:$0xff] }
 0x2c9   :  { %v3360_v48 = vmul.f32 %v14225_v5, %v14225_v5  ;;  %v3422_v56 = vadd.f32 %v3421_v37, %v3167_v35  ;;  %v3491_v59 = vadd.f32 %v3490_v21, %v3231_v15  ;;  %v3560_v18 = vadd.f32 %v3559_v28, %v3295_v61  ;;  %v14229_v23 = vld [vmem:[#allocation79_spill] sm:$0xff]  ;;  %v14230_v37 = vld [vmem:[#allocation240_spill] sm:$0xff]  ;;  %v14231_v21 = vld [vmem:[#allocation86_spill] sm:$0xff] }
 0x2ca   :  { %v3629_v14 = vadd.f32 %v3628_v4, %v3359_v30  ;;  %v3169_v8 = vmul.f32 %v14226_v34, %v14226_v34  ;;  %v3233_v54 = vmul.f32 %v14227_v19, %v14227_v19  ;;  %v3297_v41 = vmul.f32 %v14228_v26, %v14228_v26  ;;  %v14232_v35 = vld [vmem:[#allocation198_spill] sm:$0xff]  ;;  %v14233_v61 = vld [vmem:[#allocation201_spill] sm:$0xff] }
 0x2cb   :  { %v3361_v16 = vmul.f32 %v14229_v23, %v14229_v23  ;;  %v3423_v25 = vadd.f32 %v3422_v56, %v3168_v39  ;;  %v3492_v55 = vadd.f32 %v3491_v59, %v3232_v29  ;;  %v3561_v38 = vadd.f32 %v3560_v18, %v3296_v9  ;;  %v14234_v56 = vld [vmem:[#allocation241_spill] sm:$0xff]  ;;  %v14235_v59 = vld [vmem:[#allocation90_spill] sm:$0xff]  ;;  %v14236_v39 = vld [vmem:[#allocation203_spill] sm:$0xff] }
 0x2cc   :  { %v3630_v5 = vadd.f32 %v3629_v14, %v3360_v48  ;;  %v3170_v28 = vmul.f32 %v14230_v37, %v14230_v37  ;;  %v3234_v4 = vmul.f32 %v14231_v21, %v14231_v21  ;;  %v3298_v15 = vmul.f32 %v14232_v35, %v14232_v35  ;;  %v14237_v9 = vld [vmem:[#allocation205_spill] sm:$0xff] }
 0x2cd   :  { %v3362_v30 = vmul.f32 %v14233_v61, %v14233_v61  ;;  %v3424_v26 = vadd.f32 %v3423_v25, %v3169_v8  ;;  %v3493_v19 = vadd.f32 %v3492_v55, %v3233_v54  ;;  %v3562_v34 = vadd.f32 %v3561_v38, %v3297_v41  ;;  %v14238_v25 = vld [vmem:[#allocation242_spill] sm:$0xff]  ;;  %v14239_v55 = vld [vmem:[#allocation93_spill] sm:$0xff]  ;;  %v14241_v41 = vld [vmem:[#allocation88_spill] sm:$0xff] }
 0x2ce   :  { %v3631_v23 = vadd.f32 %v3630_v5, %v3361_v16  ;;  %v3171_v18 = vmul.f32 %v14234_v56, %v14234_v56  ;;  %v3235_v14 = vmul.f32 %v14235_v59, %v14235_v59  ;;  %v3299_v29 = vmul.f32 %v14236_v39, %v14236_v39  ;;  %v14240_v8 = vld [vmem:[#allocation206_spill] sm:$0xff] }
 0x2cf   :  { %v3363_v48 = vmul.f32 %v14237_v9, %v14237_v9  ;;  %v3425_v35 = vadd.f32 %v3424_v26, %v3170_v28  ;;  %v3494_v21 = vadd.f32 %v3493_v19, %v3234_v4  ;;  %v3563_v37 = vadd.f32 %v3562_v34, %v3298_v15  ;;  %v14242_v26 = vld [vmem:[#allocation243_spill] sm:$0xff]  ;;  %v14243_v19 = vld [vmem:[#allocation89_spill] sm:$0xff]  ;;  %v14244_v28 = vld [vmem:[#allocation202_spill] sm:$0xff] }
 0x2d0   :  { %v3632_v61 = vadd.f32 %v3631_v23, %v3362_v30  ;;  %v3172_v38 = vmul.f32 %v14238_v25, %v14238_v25  ;;  %v3236_v5 = vmul.f32 %v14239_v55, %v14239_v55  ;;  %v3300_v54 = vmul.f32 %v14240_v8, %v14240_v8  ;;  %v14245_v15 = vld [vmem:[#allocation85_spill] sm:$0xff] }
 0x2d1   :  { %v3364_v16 = vmul.f32 %v14241_v41, %v14241_v41  ;;  %v3426_v39 = vadd.f32 %v3425_v35, %v3171_v18  ;;  %v3495_v59 = vadd.f32 %v3494_v21, %v3235_v14  ;;  %v3564_v56 = vadd.f32 %v3563_v37, %v3299_v29  ;;  %v14246_v35 = vld [vmem:[#allocation244_spill] sm:$0xff]  ;;  %v14249_v29 = vld [vmem:[#allocation207_spill] sm:$0xff] }
 0x2d2   :  { %v3633_v9 = vadd.f32 %v3632_v61, %v3363_v48  ;;  %v3173_v34 = vmul.f32 %v14242_v26, %v14242_v26  ;;  %v3237_v23 = vmul.f32 %v14243_v19, %v14243_v19  ;;  %v3301_v4 = vmul.f32 %v14244_v28, %v14244_v28  ;;  %v14247_v21 = vld [vmem:[#allocation92_spill] sm:$0xff] }
 0x2d3   :  { %v3365_v30 = vmul.f32 %v14245_v15, %v14245_v15  ;;  %v3427_v8 = vadd.f32 %v3426_v39, %v3172_v38  ;;  %v3496_v55 = vadd.f32 %v3495_v59, %v3236_v5  ;;  %v3565_v25 = vadd.f32 %v3564_v56, %v3300_v54  ;;  %v14248_v18 = vld [vmem:[#allocation204_spill] sm:$0xff]  ;;  %v14250_v39 = vld [vmem:[#allocation245_spill] sm:$0xff]  ;;  %v14253_v54 = vld [vmem:[#allocation211_spill] sm:$0xff] }
 0x2d4   :  { %v3634_v41 = vadd.f32 %v3633_v9, %v3364_v16  ;;  %v3174_v37 = vmul.f32 %v14246_v35, %v14246_v35  ;;  %v3238_v61 = vmul.f32 %v14247_v21, %v14247_v21  ;;  %v3302_v14 = vmul.f32 %v14248_v18, %v14248_v18  ;;  %v14251_v59 = vld [vmem:[#allocation96_spill] sm:$0xff]  ;;  %v14252_v38 = vld [vmem:[#allocation209_spill] sm:$0xff] }
 0x2d5   :  { %v3366_v48 = vmul.f32 %v14249_v29, %v14249_v29  ;;  %v3428_v28 = vadd.f32 %v3427_v8, %v3173_v34  ;;  %v3497_v19 = vadd.f32 %v3496_v55, %v3237_v23  ;;  %v3566_v26 = vadd.f32 %v3565_v25, %v3301_v4  ;;  %v14254_v8 = vld [vmem:[#allocation246_spill] sm:$0xff]  ;;  %v14255_v55 = vld [vmem:[#allocation99_spill] sm:$0xff]  ;;  %v14256_v34 = vld [vmem:[#allocation212_spill] sm:$0xff] }
 0x2d6   :  { %v3635_v15 = vadd.f32 %v3634_v41, %v3365_v30  ;;  %v3175_v56 = vmul.f32 %v14250_v39, %v14250_v39  ;;  %v3239_v9 = vmul.f32 %v14251_v59, %v14251_v59  ;;  %v3303_v5 = vmul.f32 %v14252_v38, %v14252_v38  ;;  %v14257_v4 = vld [vmem:[#allocation94_spill] sm:$0xff] }
 0x2d7   :  { %v3367_v16 = vmul.f32 %v14253_v54, %v14253_v54  ;;  %v3429_v18 = vadd.f32 %v3428_v28, %v3174_v37  ;;  %v3498_v21 = vadd.f32 %v3497_v19, %v3238_v61  ;;  %v3567_v35 = vadd.f32 %v3566_v26, %v3302_v14  ;;  %v14258_v28 = vld [vmem:[#allocation247_spill] sm:$0xff]  ;;  %v14260_v37 = vld [vmem:[#allocation208_spill] sm:$0xff] }
 0x2d8   :  { %v3636_v29 = vadd.f32 %v3635_v15, %v3366_v48  ;;  %v3176_v25 = vmul.f32 %v14254_v8, %v14254_v8  ;;  %v3240_v41 = vmul.f32 %v14255_v55, %v14255_v55  ;;  %v3304_v23 = vmul.f32 %v14256_v34, %v14256_v34  ;;  %v14259_v19 = vld [vmem:[#allocation95_spill] sm:$0xff] }
 0x2d9   :  { %v3368_v30 = vmul.f32 %v14257_v4, %v14257_v4  ;;  %v3430_v38 = vadd.f32 %v3429_v18, %v3175_v56  ;;  %v3499_v59 = vadd.f32 %v3498_v21, %v3239_v9  ;;  %v3568_v39 = vadd.f32 %v3567_v35, %v3303_v5  ;;  %v14261_v14 = vld [vmem:[#allocation91_spill] sm:$0xff]  ;;  %v14262_v18 = vld [vmem:[#allocation97_spill] sm:$0xff]  ;;  %v14263_v21 = vld [vmem:[#allocation98_spill] sm:$0xff] }
 0x2da   :  { %v3637_v54 = vadd.f32 %v3636_v29, %v3367_v16  ;;  %v3177_v26 = vmul.f32 %v14258_v28, %v14258_v28  ;;  %v3241_v15 = vmul.f32 %v14259_v19, %v14259_v19  ;;  %v3305_v61 = vmul.f32 %v14260_v37, %v14260_v37  ;;  %v14264_v56 = vld [vmem:[#allocation210_spill] sm:$0xff]  ;;  %v14265_v5 = vld [vmem:[#allocation213_spill] sm:$0xff] }
 0x2db   :  { %v3369_v48 = vmul.f32 %v14261_v14, %v14261_v14  ;;  %v3431_v34 = vadd.f32 %v3430_v38, %v3176_v25  ;;  %v3500_v55 = vadd.f32 %v3499_v59, %v3240_v41  ;;  %v3569_v8 = vadd.f32 %v3568_v39, %v3304_v23  ;;  %v14266_v38 = vld [vmem:[#allocation102_spill] sm:$0xff]  ;;  %v14267_v59 = vld [vmem:[#allocation103_spill] sm:$0xff] }
 0x2dc   :  { %v3638_v4 = vadd.f32 %v3637_v54, %v3368_v30  ;;  %v3178_v35 = vmul.f32 %v14262_v18, %v14262_v18  ;;  %v3242_v29 = vmul.f32 %v14263_v21, %v14263_v21  ;;  %v3306_v9 = vmul.f32 %v14264_v56, %v14264_v56  ;;  %v14268_v25 = vld [vmem:[#allocation215_spill] sm:$0xff]  ;;  %v14269_v23 = vld [vmem:[#allocation218_spill] sm:$0xff] }
 0x2dd   :  { %v3370_v16 = vmul.f32 %v14265_v5, %v14265_v5  ;;  %v3432_v37 = vadd.f32 %v3431_v34, %v3177_v26  ;;  %v3501_v19 = vadd.f32 %v3500_v55, %v3241_v15  ;;  %v3570_v28 = vadd.f32 %v3569_v8, %v3305_v61  ;;  %v14270_v34 = vld [vmem:[#allocation106_spill] sm:$0xff]  ;;  %v14271_v55 = vld [vmem:[#allocation107_spill] sm:$0xff]  ;;  %v14273_v61 = vld [vmem:[#allocation221_spill] sm:$0xff] }
 0x2de   :  { %v3639_v14 = vadd.f32 %v3638_v4, %v3369_v48  ;;  %v3179_v39 = vmul.f32 %v14266_v38, %v14266_v38  ;;  %v3243_v54 = vmul.f32 %v14267_v59, %v14267_v59  ;;  %v3307_v41 = vmul.f32 %v14268_v25, %v14268_v25  ;;  %v14272_v26 = vld [vmem:[#allocation219_spill] sm:$0xff] }
 0x2df   :  { %v3371_v30 = vmul.f32 %v14269_v23, %v14269_v23  ;;  %v3433_v56 = vadd.f32 %v3432_v37, %v3178_v35  ;;  %v3502_v21 = vadd.f32 %v3501_v19, %v3242_v29  ;;  %v3571_v18 = vadd.f32 %v3570_v28, %v3306_v9  ;;  %v14274_v37 = vld [vmem:[#allocation100_spill] sm:$0xff]  ;;  %v14275_v19 = vld [vmem:[#allocation101_spill] sm:$0xff]  ;;  %v14276_v35 = vld [vmem:[#allocation214_spill] sm:$0xff] }
 0x2e0   :  { %v3640_v5 = vadd.f32 %v3639_v14, %v3370_v16  ;;  %v3180_v8 = vmul.f32 %v14270_v34, %v14270_v34  ;;  %v3244_v4 = vmul.f32 %v14271_v55, %v14271_v55  ;;  %v3308_v15 = vmul.f32 %v14272_v26, %v14272_v26  ;;  %v14277_v9 = vld [vmem:[#allocation216_spill] sm:$0xff] }
 0x2e1   :  { %v3372_v48 = vmul.f32 %v14273_v61, %v14273_v61  ;;  %v3434_v25 = vadd.f32 %v3433_v56, %v3179_v39  ;;  %v3503_v59 = vadd.f32 %v3502_v21, %v3243_v54  ;;  %v3572_v38 = vadd.f32 %v3571_v18, %v3307_v41  ;;  %v14278_v56 = vld [vmem:[#allocation104_spill] sm:$0xff]  ;;  %v14279_v21 = vld [vmem:[#allocation105_spill] sm:$0xff] }
 0x2e2   :  { %v3641_v23 = vadd.f32 %v3640_v5, %v3371_v30  ;;  %v3181_v28 = vmul.f32 %v14274_v37, %v14274_v37  ;;  %v3245_v14 = vmul.f32 %v14275_v19, %v14275_v19  ;;  %v3309_v29 = vmul.f32 %v14276_v35, %v14276_v35  ;;  %v14280_v39 = vld [vmem:[#allocation217_spill] sm:$0xff]  ;;  %v14281_v41 = vld [vmem:[#allocation220_spill] sm:$0xff] }
 0x2e3   :  { %v3373_v16 = vmul.f32 %v14277_v9, %v14277_v9  ;;  %v3435_v26 = vadd.f32 %v3434_v25, %v3180_v8  ;;  %v3504_v55 = vadd.f32 %v3503_v59, %v3244_v4  ;;  %v3573_v34 = vadd.f32 %v3572_v38, %v3308_v15 }
 0x2e4   :  { %v3642_v61 = vadd.f32 %v3641_v23, %v3372_v48  ;;  %v3182_v18 = vmul.f32 %v14278_v56, %v14278_v56  ;;  %v3246_v5 = vmul.f32 %v14279_v21, %v14279_v21  ;;  %v3310_v54 = vmul.f32 %v14280_v39, %v14280_v39 }
 0x2e5   :  { %v3374_v30 = vmul.f32 %v14281_v41, %v14281_v41  ;;  %v3436_v35 = vadd.f32 %v3435_v26, %v3181_v28  ;;  %v3505_v19 = vadd.f32 %v3504_v55, %v3245_v14  ;;  %v3574_v37 = vadd.f32 %v3573_v34, %v3309_v29 }
 0x2e6   :  { %v3643_v9 = vadd.f32 %v3642_v61, %v3373_v16 }
 0x2e7   :  { %v3437_v25 = vadd.f32 %v3436_v35, %v3182_v18  ;;  %v3506_v59 = vadd.f32 %v3505_v19, %v3246_v5  ;;  %v3575_v38 = vadd.f32 %v3574_v37, %v3310_v54 }
 0x2e8   :  { %v3644_v23 = vadd.f32 %v3643_v9, %v3374_v30 }
 0x2e9   :  { %v3438_v8 = vrot.slane %v3437_v25, 4  ;;  %v3507_v4 = vrot.slane %v3506_v59, 4  ;;  %v3576_v15 = vrot.slane %v3575_v38, 4 }
 0x2ea   :  { %v3645_v48 = vrot.slane %v3644_v23, 4 }
 0x2eb   :  { %v3439_v56 = vadd.f32 %v3438_v8, %v3437_v25  ;;  %v3508_v21 = vadd.f32 %v3507_v4, %v3506_v59  ;;  %v3577_v46 = vadd.f32 %v3576_v15, %v3575_v38 }
 0x2ec   :  { %v3646_v43 = vadd.f32 %v3645_v48, %v3644_v23 }
 0x2ed   :  { %v3440_v39 = vrot.slane %v3439_v56, 2  ;;  %v3509_v20 = vrot.slane %v3508_v21, 2  ;;  %v3578_v1 = vrot.slane %v3577_v46, 2 }
 0x2ee   :  { %v3647_v41 = vrot.slane %v3646_v43, 2 }
 0x2ef   :  { %v3441_v26 = vadd.f32 %v3440_v39, %v3439_v56  ;;  %v3510_v55 = vadd.f32 %v3509_v20, %v3508_v21  ;;  %v3579_v34 = vadd.f32 %v3578_v1, %v3577_v46  ;;  %v14282_v20 = vld [vmem:[#allocation4_spill] sm:$0xff]  ;;  %v14284_v39 = vld [vmem:[#allocation2_spill] sm:$0xff] }
 0x2f0   :  { %v3648_v61 = vadd.f32 %v3647_v41, %v3646_v43  ;;  %v14283_v46 = vld [vmem:[#allocation8_spill] sm:$0xff] }
 0x2f1   :  { %v3442_v28 = vrot.slane %v3441_v26, 1  ;;  %v3511_v19 = vrot.slane %v3510_v55, 1  ;;  %v3580_v37 = vrot.slane %v3579_v34, 1 }
 0x2f2   :  { %v3649_v14 = vrot.slane %v3648_v61, 1 }
 0x2f3   :  { %v3443_v35 = vadd.f32 %v3442_v28, %v3441_v26  ;;  %v3512_v29 = vadd.f32 %v3511_v19, %v3510_v55  ;;  %v3581_v9 = vadd.f32 %v3580_v37, %v3579_v34  ;;  %v14285_v55 = vld [vmem:[#allocation224_spill] sm:$0xff]  ;;  %v14286_v34 = vld [vmem:[#allocation225_spill] sm:$0xff]  ;;  %v14288_v28 = vld [vmem:[#allocation227_spill] sm:$0xff] }
 0x2f4   :  { %v3650_v16 = vadd.f32 %v3649_v14, %v3648_v61  ;;  %v14287_v61 = vld [vmem:[#allocation226_spill] sm:$0xff]  ;;  %v14289_v19 = vld [vmem:[#allocation228_spill] sm:$0xff]  ;;  %v14290_v37 = vld [vmem:[#allocation229_spill] sm:$0xff] }
 0x2f5   :  { %v3651_v18 = vmul.f32 0.001953125, %v3443_v35  ;;  %v3652_v5 = vmul.f32 0.001953125, %v3512_v29  ;;  %v3653_v54 = vmul.f32 0.001953125, %v3581_v9  ;;  %v14291_v35 = vld [vmem:[#allocation230_spill] sm:$0xff]  ;;  %v14292_v9 = vld [vmem:[#allocation231_spill] sm:$0xff] }
 0x2f6   :  { %v3654_v25 = vmul.f32 0.001953125, %v3650_v16 }
 0x2f7   :  { %v3655_v30 = vadd.f32 %v3652_v5, %v3651_v18  ;;  %v14294_v18 = vld [vmem:[#allocation232_spill] sm:$0xff] }
 0x2f9   :  { %v3656_v59 = vadd.f32 %v3655_v30, %v3653_v54  ;;  %v14296_v54 = vld [vmem:[#allocation233_spill] sm:$0xff] }
 0x2fb   :  { %v3657_v38 = vadd.f32 %v3656_v59, %v3654_v25  ;;  %v14298_v25 = vld [vmem:[#allocation234_spill] sm:$0xff] }
 0x2fd   :  { %v3658_v23 = vmul.f32 0.25, %v3657_v38  ;;  %v14300_v38 = vld [vmem:[#allocation235_spill] sm:$0xff] }
 0x2ff   :  { %v3659_v56 = vadd.f32 1e-05, %v3658_v23 }
 0x301   :  { %7584 = vrsqrt.f32 %v3659_v56  ;;  %v14302_v56 = vld [vmem:[#allocation236_spill] sm:$0xff] }
 0x30e   :  { %v10467_v1 = vpop.eup %7584 }
 0x30f   :  { %v10471_v43 = vmul.f32 %v10467_v1, %v14282_v20  ;;  %v10475_v21 = vmul.f32 %v10467_v1, %v14283_v46  ;;  %v10479_v41 = vmul.f32 %v10467_v1, %v14284_v39  ;;  %v10483_v8 = vmul.f32 %v10467_v1, %v8945_v51  ;;  %v14304_v46 = vld [vmem:[#allocation237_spill] sm:$0xff] }
 0x310   :  { %v10487_v4 = vmul.f32 %v10467_v1, %v8949_v50  ;;  %v10491_v15 = vmul.f32 %v10467_v1, %v8953_v24  ;;  %v10495_v48 = vmul.f32 %v10467_v1, %v8957_v12  ;;  %v10499_v26 = vmul.f32 %v10467_v1, %v8961_v40 }
 0x311   :  { %v10503_v51 = vmul.f32 %v10467_v1, %v8965_v17  ;;  %v10507_v50 = vmul.f32 %v10467_v1, %v8969_v52  ;;  %v10511_v24 = vmul.f32 %v10467_v1, %v8973_v32  ;;  %v10515_v12 = vmul.f32 %v10467_v1, %v8977_v42 }
 0x312   :  { %v10519_v40 = vmul.f32 %v10467_v1, %v8981_v3  ;;  %v10523_v17 = vmul.f32 %v10467_v1, %v14078_v7  ;;  %v10527_v52 = vmul.f32 %v10467_v1, %v14082_v47  ;;  %v10531_v32 = vmul.f32 %v10467_v1, %v14086_v62 }
 0x313   :  { %v10535_v42 = vmul.f32 %v10467_v1, %v14090_v2  ;;  %v10539_v3 = vmul.f32 %v10467_v1, %v14094_v49  ;;  %v10543_v7 = vmul.f32 %v10467_v1, %v14098_v0  ;;  %v10547_v47 = vmul.f32 %v10467_v1, %v14102_v45 }
 0x314   :  { %v10551_v62 = vmul.f32 %v10467_v1, %v14106_v53  ;;  %v10555_v2 = vmul.f32 %v10467_v1, %v14110_v6  ;;  %v10559_v49 = vmul.f32 %v10467_v1, %v14114_v13  ;;  %v10563_v0 = vmul.f32 %v10467_v1, %v14118_v58 }
 0x315   :  { %v10567_v45 = vmul.f32 %v10467_v1, %v14122_v11  ;;  %v10571_v53 = vmul.f32 %v10467_v1, %v14126_v33  ;;  %v10575_v6 = vmul.f32 %v10467_v1, %v14130_v57  ;;  %v10579_v13 = vmul.f32 %v10467_v1, %v14134_v27 }
 0x316   :  { %v10583_v58 = vmul.f32 %v10467_v1, %v14138_v36  ;;  %v10587_v11 = vmul.f32 %v10467_v1, %v14142_v60  ;;  %v10591_v33 = vmul.f32 %v10467_v1, %v14146_v44  ;;  %v10595_v57 = vmul.f32 %v10467_v1, %v14150_v31 }
 0x317   :  { %v10599_v27 = vmul.f32 %v10467_v1, %v14154_v63  ;;  %v10603_v36 = vmul.f32 %v10467_v1, %v14158_v22  ;;  %v10607_v60 = vmul.f32 %v10467_v1, %v14162_v10  ;;  %v10611_v44 = vmul.f32 %v10467_v1, %v14285_v55  ;;  %v14306_v55 = vld [vmem:[#allocation238_spill] sm:$0xff] }
 0x318   :  { %v10615_v31 = vmul.f32 %v10467_v1, %v14286_v34  ;;  %v10619_v63 = vmul.f32 %v10467_v1, %v14287_v61  ;;  %v10623_v22 = vmul.f32 %v10467_v1, %v14288_v28  ;;  %v10627_v10 = vmul.f32 %v10467_v1, %v14289_v19  ;;  %v14308_v61 = vld [vmem:[#allocation239_spill] sm:$0xff]  ;;  %v14310_v19 = vld [vmem:[#allocation240_spill] sm:$0xff] }
 0x319   :  { %v10631_v14 = vmul.f32 %v10467_v1, %v14290_v37  ;;  %v10635_v29 = vmul.f32 %v10467_v1, %v14291_v35  ;;  %v10639_v16 = vmul.f32 %v10467_v1, %v14292_v9  ;;  %v10643_v5 = vmul.f32 %v10467_v1, %v14294_v18  ;;  %v14312_v35 = vld [vmem:[#allocation241_spill] sm:$0xff]  ;;  %v14314_v18 = vld [vmem:[#allocation242_spill] sm:$0xff] }
 0x31a   :  { %v10647_v30 = vmul.f32 %v10467_v1, %v14296_v54  ;;  %v10651_v59 = vmul.f32 %v10467_v1, %v14298_v25  ;;  %v10655_v23 = vmul.f32 %v10467_v1, %v14300_v38  ;;  %v10659_v20 = vmul.f32 %v10467_v1, %v14302_v56  ;;  %v14316_v25 = vld [vmem:[#allocation243_spill] sm:$0xff]  ;;  %v14318_v56 = vld [vmem:[#allocation244_spill] sm:$0xff] }
 0x31b   :  { %14293 = vst [vmem:[#allocation6_spill] sm:$0xff] %v10639_v16  ;;  %14295 = vst [vmem:[#allocation12_spill] sm:$0xff] %v10643_v5  ;;  %v10663_v39 = vmul.f32 %v10467_v1, %v14304_v46  ;;  %v10667_v34 = vmul.f32 %v10467_v1, %v14306_v55  ;;  %v10671_v28 = vmul.f32 %v10467_v1, %v14308_v61  ;;  %v14320_v55 = vld [vmem:[#allocation245_spill] sm:$0xff] }
 0x31c   :  { %14297 = vst [vmem:[#allocation16_spill] sm:$0xff] %v10647_v30  ;;  %14299 = vst [vmem:[#allocation10_spill] sm:$0xff] %v10651_v59  ;;  %v10675_v37 = vmul.f32 %v10467_v1, %v14310_v19  ;;  %v10679_v9 = vmul.f32 %v10467_v1, %v14312_v35  ;;  %v10683_v54 = vmul.f32 %v10467_v1, %v14314_v18  ;;  %v14322_v19 = vld [vmem:[#allocation246_spill] sm:$0xff] }
 0x31d   :  { %14301 = vst [vmem:[#allocation14_spill] sm:$0xff] %v10655_v23  ;;  %14303 = vst [vmem:[#allocation20_spill] sm:$0xff] %v10659_v20  ;;  %v10687_v38 = vmul.f32 %v10467_v1, %v14316_v25  ;;  %v10691_v46 = vmul.f32 %v10467_v1, %v14318_v56  ;;  %v10695_v61 = vmul.f32 %v10467_v1, %v14320_v55 }
 0x31e   :  { %14305 = vst [vmem:[#allocation24_spill] sm:$0xff] %v10663_v39  ;;  %14307 = vst [vmem:[#allocation18_spill] sm:$0xff] %v10667_v34  ;;  %v10699_v35 = vmul.f32 %v10467_v1, %v14322_v19 }
 0x31f   :  { %14309 = vst [vmem:[#allocation22_spill] sm:$0xff] %v10671_v28  ;;  %14311 = vst [vmem:[#allocation28_spill] sm:$0xff] %v10675_v37 }
 0x320   :  { %14313 = vst [vmem:[#allocation32_spill] sm:$0xff] %v10679_v9  ;;  %14315 = vst [vmem:[#allocation26_spill] sm:$0xff] %v10683_v54  ;;  %v14324_v9 = vld [vmem:[#allocation247_spill] sm:$0xff]  ;;  %v14326_v54 = vld [vmem:[#allocation97_spill] sm:$0xff] }
 0x321   :  { %14317 = vst [vmem:[#allocation30_spill] sm:$0xff] %v10687_v38  ;;  %14319 = vst [vmem:[#allocation36_spill] sm:$0xff] %v10691_v46  ;;  %v10703_v18 = vmul.f32 %v10467_v1, %v14324_v9  ;;  %v10707_v25 = vmul.f32 %v10467_v1, %v14326_v54  ;;  %v14328_v38 = vld [vmem:[#allocation102_spill] sm:$0xff] }
 0x322   :  { %14321 = vst [vmem:[#allocation40_spill] sm:$0xff] %v10695_v61  ;;  %14323 = vst [vmem:[#allocation34_spill] sm:$0xff] %v10699_v35  ;;  %v10711_v56 = vmul.f32 %v10467_v1, %v14328_v38  ;;  %v14330_v46 = vld [vmem:[#allocation106_spill] sm:$0xff]  ;;  %v14332_v61 = vld [vmem:[#allocation100_spill] sm:$0xff] }
 0x323   :  { %14325 = vst [vmem:[#allocation38_spill] sm:$0xff] %v10703_v18  ;;  %14327 = vst [vmem:[#allocation44_spill] sm:$0xff] %v10707_v25  ;;  %v10715_v55 = vmul.f32 %v10467_v1, %v14330_v46  ;;  %v10719_v19 = vmul.f32 %v10467_v1, %v14332_v61  ;;  %v14334_v35 = vld [vmem:[#allocation104_spill] sm:$0xff]  ;;  %v14336_v18 = vld [vmem:[#allocation5_spill] sm:$0xff] }
 0x324   :  { %14329 = vst [vmem:[#allocation47_spill] sm:$0xff] %v10711_v56  ;;  %v10723_v9 = vmul.f32 %v10467_v1, %v14334_v35  ;;  %v10727_v54 = vmul.f32 %v10467_v1, %v14336_v18  ;;  %v14338_v25 = vld [vmem:[#allocation9_spill] sm:$0xff]  ;;  %v14340_v56 = vld [vmem:[#allocation3_spill] sm:$0xff] }
 0x325   :  { %14331 = vst [vmem:[#allocation42_spill] sm:$0xff] %v10715_v55  ;;  %14333 = vst [vmem:[#allocation222_spill] sm:$0xff] %v10719_v19  ;;  %v10731_v38 = vmul.f32 %v10467_v1, %v14338_v25  ;;  %v10735_v46 = vmul.f32 %v10467_v1, %v14340_v56  ;;  %v14342_v55 = vld [vmem:[#allocation7_spill] sm:$0xff]  ;;  %v14344_v19 = vld [vmem:[#allocation13_spill] sm:$0xff] }
 0x326   :  { %14335 = vst [vmem:[#allocation223_spill] sm:$0xff] %v10723_v9  ;;  %14337 = vst [vmem:[#allocation4_spill] sm:$0xff] %v10727_v54  ;;  %v10739_v61 = vmul.f32 %v10467_v1, %v14342_v55  ;;  %v10743_v35 = vmul.f32 %v10467_v1, %v14344_v19  ;;  %v14346_v9 = vld [vmem:[#allocation17_spill] sm:$0xff]  ;;  %v14348_v54 = vld [vmem:[#allocation11_spill] sm:$0xff] }
 0x327   :  { %14339 = vst [vmem:[#allocation8_spill] sm:$0xff] %v10731_v38  ;;  %14341 = vst [vmem:[#allocation2_spill] sm:$0xff] %v10735_v46  ;;  %v10747_v18 = vmul.f32 %v10467_v1, %v14346_v9  ;;  %v10751_v25 = vmul.f32 %v10467_v1, %v14348_v54  ;;  %v14350_v38 = vld [vmem:[#allocation15_spill] sm:$0xff]  ;;  %v14352_v46 = vld [vmem:[#allocation21_spill] sm:$0xff] }
 0x328   :  { %14343 = vst [vmem:[#allocation224_spill] sm:$0xff] %v10739_v61  ;;  %14345 = vst [vmem:[#allocation225_spill] sm:$0xff] %v10743_v35  ;;  %v10755_v56 = vmul.f32 %v10467_v1, %v14350_v38  ;;  %v10759_v55 = vmul.f32 %v10467_v1, %v14352_v46  ;;  %v14354_v61 = vld [vmem:[#allocation25_spill] sm:$0xff]  ;;  %v14356_v35 = vld [vmem:[#allocation19_spill] sm:$0xff] }
 0x329   :  { %14347 = vst [vmem:[#allocation226_spill] sm:$0xff] %v10747_v18  ;;  %14349 = vst [vmem:[#allocation227_spill] sm:$0xff] %v10751_v25  ;;  %v10763_v19 = vmul.f32 %v10467_v1, %v14354_v61  ;;  %v10767_v9 = vmul.f32 %v10467_v1, %v14356_v35  ;;  %v14358_v18 = vld [vmem:[#allocation23_spill] sm:$0xff]  ;;  %v14360_v25 = vld [vmem:[#allocation29_spill] sm:$0xff] }
 0x32a   :  { %14351 = vst [vmem:[#allocation228_spill] sm:$0xff] %v10755_v56  ;;  %14353 = vst [vmem:[#allocation229_spill] sm:$0xff] %v10759_v55  ;;  %v10771_v54 = vmul.f32 %v10467_v1, %v14358_v18  ;;  %v10775_v38 = vmul.f32 %v10467_v1, %v14360_v25  ;;  %v14362_v56 = vld [vmem:[#allocation33_spill] sm:$0xff]  ;;  %v14364_v55 = vld [vmem:[#allocation27_spill] sm:$0xff] }
 0x32b   :  { %14355 = vst [vmem:[#allocation230_spill] sm:$0xff] %v10763_v19  ;;  %14357 = vst [vmem:[#allocation231_spill] sm:$0xff] %v10767_v9  ;;  %v10779_v46 = vmul.f32 %v10467_v1, %v14362_v56  ;;  %v10783_v61 = vmul.f32 %v10467_v1, %v14364_v55  ;;  %v14366_v19 = vld [vmem:[#allocation31_spill] sm:$0xff]  ;;  %v14368_v9 = vld [vmem:[#allocation37_spill] sm:$0xff] }
 0x32c   :  { %14359 = vst [vmem:[#allocation232_spill] sm:$0xff] %v10771_v54  ;;  %14361 = vst [vmem:[#allocation233_spill] sm:$0xff] %v10775_v38  ;;  %v10787_v35 = vmul.f32 %v10467_v1, %v14366_v19  ;;  %v10791_v18 = vmul.f32 %v10467_v1, %v14368_v9  ;;  %v14370_v54 = vld [vmem:[#allocation41_spill] sm:$0xff]  ;;  %v14372_v38 = vld [vmem:[#allocation35_spill] sm:$0xff] }
 0x32d   :  { %14363 = vst [vmem:[#allocation234_spill] sm:$0xff] %v10779_v46  ;;  %14365 = vst [vmem:[#allocation235_spill] sm:$0xff] %v10783_v61  ;;  %v10795_v25 = vmul.f32 %v10467_v1, %v14370_v54  ;;  %v10799_v56 = vmul.f32 %v10467_v1, %v14372_v38  ;;  %v14374_v46 = vld [vmem:[#allocation39_spill] sm:$0xff]  ;;  %v14376_v61 = vld [vmem:[#allocation45_spill] sm:$0xff] }
 0x32e   :  { %14367 = vst [vmem:[#allocation236_spill] sm:$0xff] %v10787_v35  ;;  %14369 = vst [vmem:[#allocation237_spill] sm:$0xff] %v10791_v18  ;;  %v10803_v55 = vmul.f32 %v10467_v1, %v14374_v46  ;;  %v10807_v19 = vmul.f32 %v10467_v1, %v14376_v61  ;;  %v14378_v35 = vld [vmem:[#allocation48_spill] sm:$0xff]  ;;  %v14380_v18 = vld [vmem:[#allocation43_spill] sm:$0xff] }
 0x32f   :  { %14371 = vst [vmem:[#allocation238_spill] sm:$0xff] %v10795_v25  ;;  %14373 = vst [vmem:[#allocation239_spill] sm:$0xff] %v10799_v56  ;;  %v10811_v9 = vmul.f32 %v10467_v1, %v14378_v35  ;;  %v10815_v54 = vmul.f32 %v10467_v1, %v14380_v18  ;;  %v14382_v25 = vld [vmem:[#allocation46_spill] sm:$0xff] }
 0x330   :  { %14375 = vst [vmem:[#allocation240_spill] sm:$0xff] %v10803_v55  ;;  %14377 = vst [vmem:[#allocation241_spill] sm:$0xff] %v10807_v19  ;;  %v10819_v38 = vmul.f32 %v10467_v1, %v14382_v25  ;;  %v14384_v56 = vld [vmem:[#allocation50_spill] sm:$0xff]  ;;  %v14386_v55 = vld [vmem:[#allocation52_spill] sm:$0xff] }
 0x331   :  { %14379 = vst [vmem:[#allocation242_spill] sm:$0xff] %v10811_v9  ;;  %14381 = vst [vmem:[#allocation243_spill] sm:$0xff] %v10815_v54  ;;  %v10823_v46 = vmul.f32 %v10467_v1, %v14384_v56  ;;  %v10827_v61 = vmul.f32 %v10467_v1, %v14386_v55  ;;  %v14388_v19 = vld [vmem:[#allocation49_spill] sm:$0xff]  ;;  %v14390_v9 = vld [vmem:[#allocation51_spill] sm:$0xff] }
 0x332   :  { %14383 = vst [vmem:[#allocation244_spill] sm:$0xff] %v10819_v38  ;;  %v10831_v35 = vmul.f32 %v10467_v1, %v14388_v19  ;;  %v10835_v18 = vmul.f32 %v10467_v1, %v14390_v9  ;;  %v14392_v54 = vld [vmem:[#allocation54_spill] sm:$0xff]  ;;  %v14394_v38 = vld [vmem:[#allocation57_spill] sm:$0xff] }
 0x333   :  { %14385 = vst [vmem:[#allocation245_spill] sm:$0xff] %v10823_v46  ;;  %14387 = vst [vmem:[#allocation246_spill] sm:$0xff] %v10827_v61  ;;  %v10839_v25 = vmul.f32 %v10467_v1, %v14392_v54  ;;  %v10843_v56 = vmul.f32 %v10467_v1, %v14394_v38  ;;  %v14396_v46 = vld [vmem:[#allocation53_spill] sm:$0xff]  ;;  %v14398_v61 = vld [vmem:[#allocation56_spill] sm:$0xff] }
 0x334   :  { %14389 = vst [vmem:[#allocation247_spill] sm:$0xff] %v10831_v35  ;;  %14391 = vst [vmem:[#allocation97_spill] sm:$0xff] %v10835_v18  ;;  %v10847_v55 = vmul.f32 %v10467_v1, %v14396_v46  ;;  %v10851_v19 = vmul.f32 %v10467_v1, %v14398_v61  ;;  %v14400_v35 = vld [vmem:[#allocation60_spill] sm:$0xff]  ;;  %v14402_v18 = vld [vmem:[#allocation63_spill] sm:$0xff] }
 0x335   :  { %14393 = vst [vmem:[#allocation102_spill] sm:$0xff] %v10839_v25  ;;  %14395 = vst [vmem:[#allocation106_spill] sm:$0xff] %v10843_v56  ;;  %v10855_v9 = vmul.f32 %v10467_v1, %v14400_v35  ;;  %v10859_v54 = vmul.f32 %v10467_v1, %v14402_v18  ;;  %v14404_v25 = vld [vmem:[#allocation59_spill] sm:$0xff]  ;;  %v14406_v56 = vld [vmem:[#allocation62_spill] sm:$0xff] }
 0x336   :  { %14397 = vst [vmem:[#allocation100_spill] sm:$0xff] %v10847_v55  ;;  %14399 = vst [vmem:[#allocation104_spill] sm:$0xff] %v10851_v19  ;;  %v10863_v38 = vmul.f32 %v10467_v1, %v14404_v25  ;;  %v10867_v46 = vmul.f32 %v10467_v1, %v14406_v56  ;;  %v14408_v55 = vld [vmem:[#allocation66_spill] sm:$0xff]  ;;  %v14410_v19 = vld [vmem:[#allocation69_spill] sm:$0xff] }
 0x337   :  { %14401 = vst [vmem:[#allocation5_spill] sm:$0xff] %v10855_v9  ;;  %14403 = vst [vmem:[#allocation9_spill] sm:$0xff] %v10859_v54  ;;  %v10871_v61 = vmul.f32 %v10467_v1, %v14408_v55  ;;  %v10875_v35 = vmul.f32 %v10467_v1, %v14410_v19  ;;  %v14412_v9 = vld [vmem:[#allocation65_spill] sm:$0xff]  ;;  %v14414_v54 = vld [vmem:[#allocation68_spill] sm:$0xff] }
 0x338   :  { %14405 = vst [vmem:[#allocation3_spill] sm:$0xff] %v10863_v38  ;;  %14407 = vst [vmem:[#allocation7_spill] sm:$0xff] %v10867_v46  ;;  %v10879_v18 = vmul.f32 %v10467_v1, %v14412_v9  ;;  %v10883_v25 = vmul.f32 %v10467_v1, %v14414_v54  ;;  %v14416_v38 = vld [vmem:[#allocation72_spill] sm:$0xff]  ;;  %v14418_v46 = vld [vmem:[#allocation75_spill] sm:$0xff] }
 0x339   :  { %14409 = vst [vmem:[#allocation13_spill] sm:$0xff] %v10871_v61  ;;  %14411 = vst [vmem:[#allocation17_spill] sm:$0xff] %v10875_v35  ;;  %v10887_v56 = vmul.f32 %v10467_v1, %v14416_v38  ;;  %v10891_v55 = vmul.f32 %v10467_v1, %v14418_v46  ;;  %v14420_v61 = vld [vmem:[#allocation71_spill] sm:$0xff]  ;;  %v14422_v35 = vld [vmem:[#allocation74_spill] sm:$0xff] }
 0x33a   :  { %14413 = vst [vmem:[#allocation11_spill] sm:$0xff] %v10879_v18  ;;  %14415 = vst [vmem:[#allocation15_spill] sm:$0xff] %v10883_v25  ;;  %v10895_v19 = vmul.f32 %v10467_v1, %v14420_v61  ;;  %v10899_v9 = vmul.f32 %v10467_v1, %v14422_v35  ;;  %v14424_v18 = vld [vmem:[#allocation78_spill] sm:$0xff]  ;;  %v14426_v25 = vld [vmem:[#allocation81_spill] sm:$0xff] }
 0x33b   :  { %14417 = vst [vmem:[#allocation21_spill] sm:$0xff] %v10887_v56  ;;  %14419 = vst [vmem:[#allocation25_spill] sm:$0xff] %v10891_v55  ;;  %v10903_v54 = vmul.f32 %v10467_v1, %v14424_v18  ;;  %v10907_v38 = vmul.f32 %v10467_v1, %v14426_v25  ;;  %v14428_v56 = vld [vmem:[#allocation77_spill] sm:$0xff]  ;;  %v14430_v55 = vld [vmem:[#allocation80_spill] sm:$0xff] }
 0x33c   :  { %14421 = vst [vmem:[#allocation19_spill] sm:$0xff] %v10895_v19  ;;  %14423 = vst [vmem:[#allocation23_spill] sm:$0xff] %v10899_v9  ;;  %v10911_v46 = vmul.f32 %v10467_v1, %v14428_v56  ;;  %v10915_v61 = vmul.f32 %v10467_v1, %v14430_v55  ;;  %v14432_v19 = vld [vmem:[#allocation84_spill] sm:$0xff]  ;;  %v14434_v9 = vld [vmem:[#allocation87_spill] sm:$0xff] }
 0x33d   :  { %14425 = vst [vmem:[#allocation29_spill] sm:$0xff] %v10903_v54  ;;  %14427 = vst [vmem:[#allocation33_spill] sm:$0xff] %v10907_v38  ;;  %v10919_v35 = vmul.f32 %v10467_v1, %v14432_v19  ;;  %v10923_v18 = vmul.f32 %v10467_v1, %v14434_v9  ;;  %v14436_v54 = vld [vmem:[#allocation83_spill] sm:$0xff]  ;;  %v14438_v38 = vld [vmem:[#allocation86_spill] sm:$0xff] }
 0x33e   :  { %14429 = vst [vmem:[#allocation27_spill] sm:$0xff] %v10911_v46  ;;  %14431 = vst [vmem:[#allocation31_spill] sm:$0xff] %v10915_v61  ;;  %v10927_v25 = vmul.f32 %v10467_v1, %v14436_v54  ;;  %v10931_v56 = vmul.f32 %v10467_v1, %v14438_v38  ;;  %v14440_v46 = vld [vmem:[#allocation90_spill] sm:$0xff]  ;;  %v14442_v61 = vld [vmem:[#allocation93_spill] sm:$0xff] }
 0x33f   :  { %14433 = vst [vmem:[#allocation37_spill] sm:$0xff] %v10919_v35  ;;  %14435 = vst [vmem:[#allocation41_spill] sm:$0xff] %v10923_v18  ;;  %v10935_v55 = vmul.f32 %v10467_v1, %v14440_v46  ;;  %v10939_v19 = vmul.f32 %v10467_v1, %v14442_v61  ;;  %v14444_v35 = vld [vmem:[#allocation89_spill] sm:$0xff]  ;;  %v14446_v18 = vld [vmem:[#allocation92_spill] sm:$0xff] }
 0x340   :  { %14437 = vst [vmem:[#allocation35_spill] sm:$0xff] %v10927_v25  ;;  %14439 = vst [vmem:[#allocation39_spill] sm:$0xff] %v10931_v56  ;;  %v10943_v9 = vmul.f32 %v10467_v1, %v14444_v35  ;;  %v10947_v54 = vmul.f32 %v10467_v1, %v14446_v18  ;;  %v14448_v25 = vld [vmem:[#allocation96_spill] sm:$0xff]  ;;  %v14450_v56 = vld [vmem:[#allocation99_spill] sm:$0xff] }
 0x341   :  { %14441 = vst [vmem:[#allocation45_spill] sm:$0xff] %v10935_v55  ;;  %14443 = vst [vmem:[#allocation48_spill] sm:$0xff] %v10939_v19  ;;  %v10951_v38 = vmul.f32 %v10467_v1, %v14448_v25  ;;  %v10955_v46 = vmul.f32 %v10467_v1, %v14450_v56  ;;  %v14452_v55 = vld [vmem:[#allocation95_spill] sm:$0xff]  ;;  %v14454_v19 = vld [vmem:[#allocation98_spill] sm:$0xff] }
 0x342   :  { %14445 = vst [vmem:[#allocation43_spill] sm:$0xff] %v10943_v9  ;;  %14447 = vst [vmem:[#allocation46_spill] sm:$0xff] %v10947_v54  ;;  %v10959_v61 = vmul.f32 %v10467_v1, %v14452_v55  ;;  %v10963_v35 = vmul.f32 %v10467_v1, %v14454_v19  ;;  %v14456_v9 = vld [vmem:[#allocation103_spill] sm:$0xff] }
 0x343   :  { %14449 = vst [vmem:[#allocation50_spill] sm:$0xff] %v10951_v38  ;;  %14451 = vst [vmem:[#allocation52_spill] sm:$0xff] %v10955_v46  ;;  %v10967_v18 = vmul.f32 %v10467_v1, %v14456_v9  ;;  %v14458_v54 = vld [vmem:[#allocation107_spill] sm:$0xff]  ;;  %v14460_v38 = vld [vmem:[#allocation101_spill] sm:$0xff] }
 0x344   :  { %14453 = vst [vmem:[#allocation49_spill] sm:$0xff] %v10959_v61  ;;  %14455 = vst [vmem:[#allocation51_spill] sm:$0xff] %v10963_v35  ;;  %v10971_v25 = vmul.f32 %v10467_v1, %v14458_v54  ;;  %v10975_v56 = vmul.f32 %v10467_v1, %v14460_v38  ;;  %v14462_v46 = vld [vmem:[#allocation105_spill] sm:$0xff]  ;;  %v14464_v61 = vld [vmem:[#allocation110_spill] sm:$0xff] }
 0x345   :  { %14457 = vst [vmem:[#allocation54_spill] sm:$0xff] %v10967_v18  ;;  %v10979_v55 = vmul.f32 %v10467_v1, %v14462_v46  ;;  %v10983_v19 = vmul.f32 %v10467_v1, %v14464_v61  ;;  %v14466_v35 = vld [vmem:[#allocation114_spill] sm:$0xff]  ;;  %v14468_v18 = vld [vmem:[#allocation108_spill] sm:$0xff] }
 0x346   :  { %14459 = vst [vmem:[#allocation57_spill] sm:$0xff] %v10971_v25  ;;  %14461 = vst [vmem:[#allocation53_spill] sm:$0xff] %v10975_v56  ;;  %v10987_v9 = vmul.f32 %v10467_v1, %v14466_v35  ;;  %v10991_v54 = vmul.f32 %v10467_v1, %v14468_v18  ;;  %v14470_v25 = vld [vmem:[#allocation112_spill] sm:$0xff]  ;;  %v14472_v56 = vld [vmem:[#allocation118_spill] sm:$0xff] }
 0x347   :  { %14463 = vst [vmem:[#allocation56_spill] sm:$0xff] %v10979_v55  ;;  %14465 = vst [vmem:[#allocation60_spill] sm:$0xff] %v10983_v19  ;;  %v10995_v38 = vmul.f32 %v10467_v1, %v14470_v25  ;;  %v10999_v46 = vmul.f32 %v10467_v1, %v14472_v56  ;;  %v14474_v55 = vld [vmem:[#allocation122_spill] sm:$0xff]  ;;  %v14476_v19 = vld [vmem:[#allocation116_spill] sm:$0xff] }
 0x348   :  { %14467 = vst [vmem:[#allocation63_spill] sm:$0xff] %v10987_v9  ;;  %14469 = vst [vmem:[#allocation59_spill] sm:$0xff] %v10991_v54  ;;  %v11003_v61 = vmul.f32 %v10467_v1, %v14474_v55  ;;  %v11007_v35 = vmul.f32 %v10467_v1, %v14476_v19  ;;  %v14478_v9 = vld [vmem:[#allocation120_spill] sm:$0xff]  ;;  %v14480_v54 = vld [vmem:[#allocation126_spill] sm:$0xff] }
 0x349   :  { %14471 = vst [vmem:[#allocation62_spill] sm:$0xff] %v10995_v38  ;;  %14473 = vst [vmem:[#allocation66_spill] sm:$0xff] %v10999_v46  ;;  %v11011_v18 = vmul.f32 %v10467_v1, %v14478_v9  ;;  %v11015_v25 = vmul.f32 %v10467_v1, %v14480_v54  ;;  %v14482_v38 = vld [vmem:[#allocation130_spill] sm:$0xff]  ;;  %v14484_v46 = vld [vmem:[#allocation124_spill] sm:$0xff] }
 0x34a   :  { %14475 = vst [vmem:[#allocation69_spill] sm:$0xff] %v11003_v61  ;;  %14477 = vst [vmem:[#allocation65_spill] sm:$0xff] %v11007_v35  ;;  %v11019_v56 = vmul.f32 %v10467_v1, %v14482_v38  ;;  %v11023_v55 = vmul.f32 %v10467_v1, %v14484_v46  ;;  %v14486_v61 = vld [vmem:[#allocation128_spill] sm:$0xff]  ;;  %v14488_v35 = vld [vmem:[#allocation134_spill] sm:$0xff] }
 0x34b   :  { %14479 = vst [vmem:[#allocation68_spill] sm:$0xff] %v11011_v18  ;;  %14481 = vst [vmem:[#allocation72_spill] sm:$0xff] %v11015_v25  ;;  %v11027_v19 = vmul.f32 %v10467_v1, %v14486_v61  ;;  %v11031_v9 = vmul.f32 %v10467_v1, %v14488_v35  ;;  %v14490_v18 = vld [vmem:[#allocation138_spill] sm:$0xff]  ;;  %v14492_v25 = vld [vmem:[#allocation132_spill] sm:$0xff] }
 0x34c   :  { %14483 = vst [vmem:[#allocation75_spill] sm:$0xff] %v11019_v56  ;;  %14485 = vst [vmem:[#allocation71_spill] sm:$0xff] %v11023_v55  ;;  %v11035_v54 = vmul.f32 %v10467_v1, %v14490_v18  ;;  %v11039_v38 = vmul.f32 %v10467_v1, %v14492_v25  ;;  %v14494_v56 = vld [vmem:[#allocation136_spill] sm:$0xff]  ;;  %v14496_v55 = vld [vmem:[#allocation142_spill] sm:$0xff] }
 0x34d   :  { %14487 = vst [vmem:[#allocation74_spill] sm:$0xff] %v11027_v19  ;;  %14489 = vst [vmem:[#allocation78_spill] sm:$0xff] %v11031_v9  ;;  %v11043_v46 = vmul.f32 %v10467_v1, %v14494_v56  ;;  %v11047_v61 = vmul.f32 %v10467_v1, %v14496_v55  ;;  %v14498_v19 = vld [vmem:[#allocation146_spill] sm:$0xff]  ;;  %v14500_v9 = vld [vmem:[#allocation140_spill] sm:$0xff] }
 0x34e   :  { %14491 = vst [vmem:[#allocation81_spill] sm:$0xff] %v11035_v54  ;;  %14493 = vst [vmem:[#allocation77_spill] sm:$0xff] %v11039_v38  ;;  %v11051_v35 = vmul.f32 %v10467_v1, %v14498_v19  ;;  %v11055_v18 = vmul.f32 %v10467_v1, %v14500_v9  ;;  %v14502_v54 = vld [vmem:[#allocation144_spill] sm:$0xff]  ;;  %v14504_v38 = vld [vmem:[#allocation149_spill] sm:$0xff] }
 0x34f   :  { %14495 = vst [vmem:[#allocation80_spill] sm:$0xff] %v11043_v46  ;;  %14497 = vst [vmem:[#allocation84_spill] sm:$0xff] %v11047_v61  ;;  %v11059_v25 = vmul.f32 %v10467_v1, %v14502_v54  ;;  %v11063_v56 = vmul.f32 %v10467_v1, %v14504_v38  ;;  %v14506_v46 = vld [vmem:[#allocation153_spill] sm:$0xff]  ;;  %v14508_v61 = vld [vmem:[#allocation55_spill] sm:$0xff] }
 0x350   :  { %14499 = vst [vmem:[#allocation87_spill] sm:$0xff] %v11051_v35  ;;  %14501 = vst [vmem:[#allocation83_spill] sm:$0xff] %v11055_v18  ;;  %v11067_v55 = vmul.f32 %v10467_v1, %v14506_v46  ;;  %v11071_v19 = vmul.f32 %v10467_v1, %v14508_v61  ;;  %v14510_v35 = vld [vmem:[#allocation151_spill] sm:$0xff]  ;;  %v14512_v18 = vld [vmem:[#allocation157_spill] sm:$0xff] }
 0x351   :  { %14503 = vst [vmem:[#allocation86_spill] sm:$0xff] %v11059_v25  ;;  %14505 = vst [vmem:[#allocation90_spill] sm:$0xff] %v11063_v56  ;;  %v11075_v9 = vmul.f32 %v10467_v1, %v14510_v35  ;;  %v11079_v54 = vmul.f32 %v10467_v1, %v14512_v18  ;;  %v14514_v25 = vld [vmem:[#allocation160_spill] sm:$0xff]  ;;  %v14516_v56 = vld [vmem:[#allocation155_spill] sm:$0xff] }
 0x352   :  { %14507 = vst [vmem:[#allocation93_spill] sm:$0xff] %v11067_v55  ;;  %14509 = vst [vmem:[#allocation89_spill] sm:$0xff] %v11071_v19  ;;  %v11083_v38 = vmul.f32 %v10467_v1, %v14514_v25  ;;  %v11087_v46 = vmul.f32 %v10467_v1, %v14516_v56  ;;  %v14518_v55 = vld [vmem:[#allocation58_spill] sm:$0xff]  ;;  %v14520_v19 = vld [vmem:[#allocation163_spill] sm:$0xff] }
 0x353   :  { %14511 = vst [vmem:[#allocation92_spill] sm:$0xff] %v11075_v9  ;;  %14513 = vst [vmem:[#allocation96_spill] sm:$0xff] %v11079_v54  ;;  %v11091_v61 = vmul.f32 %v10467_v1, %v14518_v55  ;;  %v11095_v35 = vmul.f32 %v10467_v1, %v14520_v19  ;;  %v14522_v9 = vld [vmem:[#allocation167_spill] sm:$0xff]  ;;  %v14524_v54 = vld [vmem:[#allocation61_spill] sm:$0xff] }
 0x354   :  { %14515 = vst [vmem:[#allocation99_spill] sm:$0xff] %v11083_v38  ;;  %14517 = vst [vmem:[#allocation95_spill] sm:$0xff] %v11087_v46  ;;  %v11099_v18 = vmul.f32 %v10467_v1, %v14522_v9  ;;  %v11103_v25 = vmul.f32 %v10467_v1, %v14524_v54  ;;  %v14526_v38 = vld [vmem:[#allocation165_spill] sm:$0xff]  ;;  %v14528_v46 = vld [vmem:[#allocation171_spill] sm:$0xff] }
 0x355   :  { %14519 = vst [vmem:[#allocation98_spill] sm:$0xff] %v11091_v61  ;;  %14521 = vst [vmem:[#allocation103_spill] sm:$0xff] %v11095_v35  ;;  %v11107_v56 = vmul.f32 %v10467_v1, %v14526_v38  ;;  %v11111_v55 = vmul.f32 %v10467_v1, %v14528_v46  ;;  %v14530_v61 = vld [vmem:[#allocation174_spill] sm:$0xff]  ;;  %v14532_v35 = vld [vmem:[#allocation169_spill] sm:$0xff] }
 0x356   :  { %14523 = vst [vmem:[#allocation107_spill] sm:$0xff] %v11099_v18  ;;  %14525 = vst [vmem:[#allocation101_spill] sm:$0xff] %v11103_v25  ;;  %v11115_v19 = vmul.f32 %v10467_v1, %v14530_v61  ;;  %v11119_v9 = vmul.f32 %v10467_v1, %v14532_v35  ;;  %v14534_v18 = vld [vmem:[#allocation64_spill] sm:$0xff]  ;;  %v14536_v25 = vld [vmem:[#allocation177_spill] sm:$0xff] }
 0x357   :  { %14527 = vst [vmem:[#allocation105_spill] sm:$0xff] %v11107_v56  ;;  %14529 = vst [vmem:[#allocation110_spill] sm:$0xff] %v11111_v55  ;;  %v11123_v54 = vmul.f32 %v10467_v1, %v14534_v18  ;;  %v11127_v38 = vmul.f32 %v10467_v1, %v14536_v25  ;;  %v14538_v56 = vld [vmem:[#allocation181_spill] sm:$0xff]  ;;  %v14540_v55 = vld [vmem:[#allocation67_spill] sm:$0xff] }
 0x358   :  { %14531 = vst [vmem:[#allocation114_spill] sm:$0xff] %v11115_v19  ;;  %14533 = vst [vmem:[#allocation108_spill] sm:$0xff] %v11119_v9  ;;  %v11131_v46 = vmul.f32 %v10467_v1, %v14538_v56  ;;  %v11135_v61 = vmul.f32 %v10467_v1, %v14540_v55  ;;  %v14542_v19 = vld [vmem:[#allocation179_spill] sm:$0xff]  ;;  %v14544_v9 = vld [vmem:[#allocation185_spill] sm:$0xff] }
 0x359   :  { %14535 = vst [vmem:[#allocation112_spill] sm:$0xff] %v11123_v54  ;;  %14537 = vst [vmem:[#allocation118_spill] sm:$0xff] %v11127_v38  ;;  %v11139_v35 = vmul.f32 %v10467_v1, %v14542_v19  ;;  %v11143_v18 = vmul.f32 %v10467_v1, %v14544_v9  ;;  %v14546_v54 = vld [vmem:[#allocation188_spill] sm:$0xff]  ;;  %v14548_v38 = vld [vmem:[#allocation183_spill] sm:$0xff] }
 0x35a   :  { %14539 = vst [vmem:[#allocation122_spill] sm:$0xff] %v11131_v46  ;;  %14541 = vst [vmem:[#allocation116_spill] sm:$0xff] %v11135_v61  ;;  %v11147_v25 = vmul.f32 %v10467_v1, %v14546_v54  ;;  %v11151_v56 = vmul.f32 %v10467_v1, %v14548_v38  ;;  %v14550_v46 = vld [vmem:[#allocation70_spill] sm:$0xff]  ;;  %v14552_v61 = vld [vmem:[#allocation191_spill] sm:$0xff] }
 0x35b   :  { %14543 = vst [vmem:[#allocation120_spill] sm:$0xff] %v11139_v35  ;;  %14545 = vst [vmem:[#allocation126_spill] sm:$0xff] %v11143_v18  ;;  %v11155_v55 = vmul.f32 %v10467_v1, %v14550_v46  ;;  %v11159_v19 = vmul.f32 %v10467_v1, %v14552_v61  ;;  %v14554_v35 = vld [vmem:[#allocation194_spill] sm:$0xff]  ;;  %v14556_v18 = vld [vmem:[#allocation73_spill] sm:$0xff] }
 0x35c   :  { %14547 = vst [vmem:[#allocation130_spill] sm:$0xff] %v11147_v25  ;;  %14549 = vst [vmem:[#allocation124_spill] sm:$0xff] %v11151_v56  ;;  %v11163_v9 = vmul.f32 %v10467_v1, %v14554_v35  ;;  %v11167_v54 = vmul.f32 %v10467_v1, %v14556_v18  ;;  %v14558_v25 = vld [vmem:[#allocation192_spill] sm:$0xff]  ;;  %v14560_v56 = vld [vmem:[#allocation197_spill] sm:$0xff] }
 0x35d   :  { %14551 = vst [vmem:[#allocation128_spill] sm:$0xff] %v11155_v55  ;;  %14553 = vst [vmem:[#allocation134_spill] sm:$0xff] %v11159_v19  ;;  %v11171_v38 = vmul.f32 %v10467_v1, %v14558_v25  ;;  %v11175_v46 = vmul.f32 %v10467_v1, %v14560_v56  ;;  %v14562_v55 = vld [vmem:[#allocation200_spill] sm:$0xff] }
 0x35e   :  { %14555 = vst [vmem:[#allocation138_spill] sm:$0xff] %v11163_v9  ;;  %14557 = vst [vmem:[#allocation132_spill] sm:$0xff] %v11167_v54  ;;  %v11179_v61 = vmul.f32 %v10467_v1, %v14562_v55  ;;  %v14564_v19 = vld [vmem:[#allocation196_spill] sm:$0xff]  ;;  %v14566_v9 = vld [vmem:[#allocation198_spill] sm:$0xff] }
 0x35f   :  { %14559 = vst [vmem:[#allocation136_spill] sm:$0xff] %v11171_v38  ;;  %14561 = vst [vmem:[#allocation142_spill] sm:$0xff] %v11175_v46  ;;  %v11183_v35 = vmul.f32 %v10467_v1, %v14564_v19  ;;  %v11187_v18 = vmul.f32 %v10467_v1, %v14566_v9  ;;  %v14568_v54 = vld [vmem:[#allocation203_spill] sm:$0xff]  ;;  %v14570_v38 = vld [vmem:[#allocation206_spill] sm:$0xff] }
 0x360   :  { %14563 = vst [vmem:[#allocation146_spill] sm:$0xff] %v11179_v61  ;;  %v11191_v25 = vmul.f32 %v10467_v1, %v14568_v54  ;;  %v11195_v56 = vmul.f32 %v10467_v1, %v14570_v38  ;;  %v14572_v46 = vld [vmem:[#allocation202_spill] sm:$0xff]  ;;  %v14574_v61 = vld [vmem:[#allocation204_spill] sm:$0xff] }
 0x361   :  { %14565 = vst [vmem:[#allocation140_spill] sm:$0xff] %v11183_v35  ;;  %14567 = vst [vmem:[#allocation144_spill] sm:$0xff] %v11187_v18  ;;  %v11199_v55 = vmul.f32 %v10467_v1, %v14572_v46  ;;  %v11203_v19 = vmul.f32 %v10467_v1, %v14574_v61  ;;  %v14576_v35 = vld [vmem:[#allocation209_spill] sm:$0xff]  ;;  %v14578_v18 = vld [vmem:[#allocation212_spill] sm:$0xff] }
 0x362   :  { %14569 = vst [vmem:[#allocation149_spill] sm:$0xff] %v11191_v25  ;;  %14571 = vst [vmem:[#allocation153_spill] sm:$0xff] %v11195_v56  ;;  %v11207_v9 = vmul.f32 %v10467_v1, %v14576_v35  ;;  %v11211_v54 = vmul.f32 %v10467_v1, %v14578_v18  ;;  %v14580_v25 = vld [vmem:[#allocation208_spill] sm:$0xff]  ;;  %v14582_v56 = vld [vmem:[#allocation210_spill] sm:$0xff] }
 0x363   :  { %14573 = vst [vmem:[#allocation55_spill] sm:$0xff] %v11199_v55  ;;  %14575 = vst [vmem:[#allocation151_spill] sm:$0xff] %v11203_v19  ;;  %v11215_v38 = vmul.f32 %v10467_v1, %v14580_v25  ;;  %v11219_v46 = vmul.f32 %v10467_v1, %v14582_v56  ;;  %v14584_v55 = vld [vmem:[#allocation215_spill] sm:$0xff] }
 0x364   :  { %14577 = vst [vmem:[#allocation157_spill] sm:$0xff] %v11207_v9  ;;  %14579 = vst [vmem:[#allocation160_spill] sm:$0xff] %v11211_v54  ;;  %v11223_v61 = vmul.f32 %v10467_v1, %v14584_v55  ;;  %v14586_v19 = vld [vmem:[#allocation219_spill] sm:$0xff]  ;;  %v14588_v9 = vld [vmem:[#allocation214_spill] sm:$0xff] }
 0x365   :  { %14581 = vst [vmem:[#allocation155_spill] sm:$0xff] %v11215_v38  ;;  %14583 = vst [vmem:[#allocation58_spill] sm:$0xff] %v11219_v46  ;;  %v11227_v35 = vmul.f32 %v10467_v1, %v14586_v19  ;;  %v11231_v18 = vmul.f32 %v10467_v1, %v14588_v9  ;;  %v14590_v54 = vld [vmem:[#allocation217_spill] sm:$0xff]  ;;  %v14592_v38 = vld [vmem:[#allocation111_spill] sm:$0xff] }
 0x366   :  { %14585 = vst [vmem:[#allocation163_spill] sm:$0xff] %v11223_v61  ;;  %v11235_v25 = vmul.f32 %v10467_v1, %v14590_v54  ;;  %v11239_v56 = vmul.f32 %v10467_v1, %v14592_v38  ;;  %v14594_v46 = vld [vmem:[#allocation115_spill] sm:$0xff]  ;;  %v14596_v61 = vld [vmem:[#allocation109_spill] sm:$0xff] }
 0x367   :  { %14587 = vst [vmem:[#allocation167_spill] sm:$0xff] %v11227_v35  ;;  %14589 = vst [vmem:[#allocation61_spill] sm:$0xff] %v11231_v18  ;;  %v11243_v55 = vmul.f32 %v10467_v1, %v14594_v46  ;;  %v11247_v19 = vmul.f32 %v10467_v1, %v14596_v61  ;;  %v14598_v35 = vld [vmem:[#allocation113_spill] sm:$0xff]  ;;  %v14600_v18 = vld [vmem:[#allocation119_spill] sm:$0xff] }
 0x368   :  { %14591 = vst [vmem:[#allocation165_spill] sm:$0xff] %v11235_v25  ;;  %14593 = vst [vmem:[#allocation171_spill] sm:$0xff] %v11239_v56  ;;  %v11251_v9 = vmul.f32 %v10467_v1, %v14598_v35  ;;  %v11255_v54 = vmul.f32 %v10467_v1, %v14600_v18  ;;  %v14602_v25 = vld [vmem:[#allocation123_spill] sm:$0xff]  ;;  %v14604_v56 = vld [vmem:[#allocation117_spill] sm:$0xff] }
 0x369   :  { %14595 = vst [vmem:[#allocation174_spill] sm:$0xff] %v11243_v55  ;;  %14597 = vst [vmem:[#allocation169_spill] sm:$0xff] %v11247_v19  ;;  %v11259_v38 = vmul.f32 %v10467_v1, %v14602_v25  ;;  %v11263_v46 = vmul.f32 %v10467_v1, %v14604_v56  ;;  %v14606_v55 = vld [vmem:[#allocation121_spill] sm:$0xff]  ;;  %v14608_v19 = vld [vmem:[#allocation127_spill] sm:$0xff] }
 0x36a   :  { %14599 = vst [vmem:[#allocation64_spill] sm:$0xff] %v11251_v9  ;;  %14601 = vst [vmem:[#allocation177_spill] sm:$0xff] %v11255_v54  ;;  %v11267_v61 = vmul.f32 %v10467_v1, %v14606_v55  ;;  %v11271_v35 = vmul.f32 %v10467_v1, %v14608_v19  ;;  %v14610_v9 = vld [vmem:[#allocation131_spill] sm:$0xff]  ;;  %v14612_v54 = vld [vmem:[#allocation125_spill] sm:$0xff] }
 0x36b   :  { %14603 = vst [vmem:[#allocation181_spill] sm:$0xff] %v11259_v38  ;;  %14605 = vst [vmem:[#allocation67_spill] sm:$0xff] %v11263_v46  ;;  %v11275_v18 = vmul.f32 %v10467_v1, %v14610_v9  ;;  %v11279_v25 = vmul.f32 %v10467_v1, %v14612_v54  ;;  %v14614_v38 = vld [vmem:[#allocation129_spill] sm:$0xff]  ;;  %v14616_v46 = vld [vmem:[#allocation135_spill] sm:$0xff] }
 0x36c   :  { %14607 = vst [vmem:[#allocation179_spill] sm:$0xff] %v11267_v61  ;;  %14609 = vst [vmem:[#allocation185_spill] sm:$0xff] %v11271_v35  ;;  %v11283_v56 = vmul.f32 %v10467_v1, %v14614_v38  ;;  %v11287_v55 = vmul.f32 %v10467_v1, %v14616_v46  ;;  %v14618_v61 = vld [vmem:[#allocation139_spill] sm:$0xff]  ;;  %v14620_v35 = vld [vmem:[#allocation133_spill] sm:$0xff] }
 0x36d   :  { %14611 = vst [vmem:[#allocation188_spill] sm:$0xff] %v11275_v18  ;;  %14613 = vst [vmem:[#allocation183_spill] sm:$0xff] %v11279_v25  ;;  %v11291_v19 = vmul.f32 %v10467_v1, %v14618_v61  ;;  %v11295_v9 = vmul.f32 %v10467_v1, %v14620_v35  ;;  %v14622_v18 = vld [vmem:[#allocation137_spill] sm:$0xff]  ;;  %v14624_v25 = vld [vmem:[#allocation143_spill] sm:$0xff] }
 0x36e   :  { %14615 = vst [vmem:[#allocation70_spill] sm:$0xff] %v11283_v56  ;;  %14617 = vst [vmem:[#allocation191_spill] sm:$0xff] %v11287_v55  ;;  %v11299_v54 = vmul.f32 %v10467_v1, %v14622_v18  ;;  %v11303_v38 = vmul.f32 %v10467_v1, %v14624_v25  ;;  %v14626_v56 = vld [vmem:[#allocation147_spill] sm:$0xff]  ;;  %v14628_v55 = vld [vmem:[#allocation141_spill] sm:$0xff] }
 0x36f   :  { %14619 = vst [vmem:[#allocation194_spill] sm:$0xff] %v11291_v19  ;;  %14621 = vst [vmem:[#allocation73_spill] sm:$0xff] %v11295_v9  ;;  %v11307_v46 = vmul.f32 %v10467_v1, %v14626_v56  ;;  %v11311_v61 = vmul.f32 %v10467_v1, %v14628_v55  ;;  %v14630_v19 = vld [vmem:[#allocation145_spill] sm:$0xff]  ;;  %v14632_v9 = vld [vmem:[#allocation150_spill] sm:$0xff] }
 0x370   :  { %14623 = vst [vmem:[#allocation192_spill] sm:$0xff] %v11299_v54  ;;  %14625 = vst [vmem:[#allocation197_spill] sm:$0xff] %v11303_v38  ;;  %v11315_v35 = vmul.f32 %v10467_v1, %v14630_v19  ;;  %v11319_v18 = vmul.f32 %v10467_v1, %v14632_v9  ;;  %v14634_v54 = vld [vmem:[#allocation154_spill] sm:$0xff]  ;;  %v14636_v38 = vld [vmem:[#allocation148_spill] sm:$0xff] }
 0x371   :  { %14627 = vst [vmem:[#allocation200_spill] sm:$0xff] %v11307_v46  ;;  %14629 = vst [vmem:[#allocation196_spill] sm:$0xff] %v11311_v61  ;;  %v11323_v25 = vmul.f32 %v10467_v1, %v14634_v54  ;;  %v11327_v56 = vmul.f32 %v10467_v1, %v14636_v38  ;;  %v14638_v46 = vld [vmem:[#allocation152_spill] sm:$0xff]  ;;  %v14640_v61 = vld [vmem:[#allocation158_spill] sm:$0xff] }
 0x372   :  { %14631 = vst [vmem:[#allocation198_spill] sm:$0xff] %v11315_v35  ;;  %14633 = vst [vmem:[#allocation203_spill] sm:$0xff] %v11319_v18  ;;  %v11331_v55 = vmul.f32 %v10467_v1, %v14638_v46  ;;  %v11335_v19 = vmul.f32 %v10467_v1, %v14640_v61  ;;  %v14642_v35 = vld [vmem:[#allocation161_spill] sm:$0xff]  ;;  %v14644_v18 = vld [vmem:[#allocation156_spill] sm:$0xff] }
 0x373   :  { %14635 = vst [vmem:[#allocation206_spill] sm:$0xff] %v11323_v25  ;;  %14637 = vst [vmem:[#allocation202_spill] sm:$0xff] %v11327_v56  ;;  %v11339_v9 = vmul.f32 %v10467_v1, %v14642_v35  ;;  %v11343_v54 = vmul.f32 %v10467_v1, %v14644_v18  ;;  %v14646_v25 = vld [vmem:[#allocation159_spill] sm:$0xff]  ;;  %v14648_v56 = vld [vmem:[#allocation164_spill] sm:$0xff] }
 0x374   :  { %14639 = vst [vmem:[#allocation204_spill] sm:$0xff] %v11331_v55  ;;  %14641 = vst [vmem:[#allocation209_spill] sm:$0xff] %v11335_v19  ;;  %v11347_v38 = vmul.f32 %v10467_v1, %v14646_v25  ;;  %v11351_v46 = vmul.f32 %v10467_v1, %v14648_v56  ;;  %v14650_v55 = vld [vmem:[#allocation168_spill] sm:$0xff]  ;;  %v14652_v19 = vld [vmem:[#allocation162_spill] sm:$0xff] }
 0x375   :  { %14643 = vst [vmem:[#allocation212_spill] sm:$0xff] %v11339_v9  ;;  %14645 = vst [vmem:[#allocation208_spill] sm:$0xff] %v11343_v54  ;;  %v11355_v61 = vmul.f32 %v10467_v1, %v14650_v55  ;;  %v11359_v35 = vmul.f32 %v10467_v1, %v14652_v19  ;;  %v14654_v9 = vld [vmem:[#allocation166_spill] sm:$0xff]  ;;  %v14656_v54 = vld [vmem:[#allocation172_spill] sm:$0xff] }
 0x376   :  { %14647 = vst [vmem:[#allocation210_spill] sm:$0xff] %v11347_v38  ;;  %14649 = vst [vmem:[#allocation215_spill] sm:$0xff] %v11351_v46  ;;  %v11363_v18 = vmul.f32 %v10467_v1, %v14654_v9  ;;  %v11367_v25 = vmul.f32 %v10467_v1, %v14656_v54  ;;  %v14658_v38 = vld [vmem:[#allocation175_spill] sm:$0xff]  ;;  %v14660_v46 = vld [vmem:[#allocation170_spill] sm:$0xff] }
 0x377   :  { %14651 = vst [vmem:[#allocation219_spill] sm:$0xff] %v11355_v61  ;;  %14653 = vst [vmem:[#allocation214_spill] sm:$0xff] %v11359_v35  ;;  %v11371_v56 = vmul.f32 %v10467_v1, %v14658_v38  ;;  %v11375_v55 = vmul.f32 %v10467_v1, %v14660_v46  ;;  %v14662_v61 = vld [vmem:[#allocation173_spill] sm:$0xff]  ;;  %v14664_v35 = vld [vmem:[#allocation178_spill] sm:$0xff] }
 0x378   :  { %14655 = vst [vmem:[#allocation217_spill] sm:$0xff] %v11363_v18  ;;  %14657 = vst [vmem:[#allocation111_spill] sm:$0xff] %v11367_v25  ;;  %v11379_v19 = vmul.f32 %v10467_v1, %v14662_v61  ;;  %v11383_v9 = vmul.f32 %v10467_v1, %v14664_v35  ;;  %v14666_v18 = vld [vmem:[#allocation182_spill] sm:$0xff]  ;;  %v14668_v25 = vld [vmem:[#allocation176_spill] sm:$0xff] }
 0x379   :  { %14659 = vst [vmem:[#allocation115_spill] sm:$0xff] %v11371_v56  ;;  %14661 = vst [vmem:[#allocation109_spill] sm:$0xff] %v11375_v55  ;;  %v11387_v54 = vmul.f32 %v10467_v1, %v14666_v18  ;;  %v11391_v38 = vmul.f32 %v10467_v1, %v14668_v25  ;;  %v14670_v56 = vld [vmem:[#allocation180_spill] sm:$0xff]  ;;  %v14672_v55 = vld [vmem:[#allocation186_spill] sm:$0xff] }
 0x37a   :  { %14663 = vst [vmem:[#allocation113_spill] sm:$0xff] %v11379_v19  ;;  %14665 = vst [vmem:[#allocation119_spill] sm:$0xff] %v11383_v9  ;;  %v11395_v46 = vmul.f32 %v10467_v1, %v14670_v56  ;;  %v11399_v61 = vmul.f32 %v10467_v1, %v14672_v55  ;;  %v14674_v19 = vld [vmem:[#allocation189_spill] sm:$0xff]  ;;  %v14676_v9 = vld [vmem:[#allocation184_spill] sm:$0xff] }
 0x37b   :  { %14667 = vst [vmem:[#allocation123_spill] sm:$0xff] %v11387_v54  ;;  %14669 = vst [vmem:[#allocation117_spill] sm:$0xff] %v11391_v38  ;;  %v11403_v35 = vmul.f32 %v10467_v1, %v14674_v19  ;;  %v11407_v18 = vmul.f32 %v10467_v1, %v14676_v9  ;;  %v14678_v54 = vld [vmem:[#allocation187_spill] sm:$0xff]  ;;  %v14680_v38 = vld [vmem:[#allocation193_spill] sm:$0xff] }
 0x37c   :  { %14671 = vst [vmem:[#allocation121_spill] sm:$0xff] %v11395_v46  ;;  %14673 = vst [vmem:[#allocation127_spill] sm:$0xff] %v11399_v61  ;;  %v11411_v25 = vmul.f32 %v10467_v1, %v14678_v54  ;;  %v11415_v56 = vmul.f32 %v10467_v1, %v14680_v38  ;;  %v14682_v46 = vld [vmem:[#allocation76_spill] sm:$0xff]  ;;  %v14684_v61 = vld [vmem:[#allocation190_spill] sm:$0xff] }
 0x37d   :  { %14675 = vst [vmem:[#allocation131_spill] sm:$0xff] %v11403_v35  ;;  %14677 = vst [vmem:[#allocation125_spill] sm:$0xff] %v11407_v18  ;;  %v11419_v55 = vmul.f32 %v10467_v1, %v14682_v46  ;;  %v11423_v19 = vmul.f32 %v10467_v1, %v14684_v61  ;;  %v14686_v35 = vld [vmem:[#allocation195_spill] sm:$0xff] }
 0x37e   :  { %14679 = vst [vmem:[#allocation129_spill] sm:$0xff] %v11411_v25  ;;  %14681 = vst [vmem:[#allocation135_spill] sm:$0xff] %v11415_v56  ;;  %v11427_v9 = vmul.f32 %v10467_v1, %v14686_v35  ;;  %v14688_v18 = vld [vmem:[#allocation199_spill] sm:$0xff]  ;;  %v14690_v25 = vld [vmem:[#allocation82_spill] sm:$0xff] }
 0x37f   :  { %14683 = vst [vmem:[#allocation139_spill] sm:$0xff] %v11419_v55  ;;  %14685 = vst [vmem:[#allocation133_spill] sm:$0xff] %v11423_v19  ;;  %v11431_v54 = vmul.f32 %v10467_v1, %v14688_v18  ;;  %v11435_v38 = vmul.f32 %v10467_v1, %v14690_v25  ;;  %v14692_v56 = vld [vmem:[#allocation79_spill] sm:$0xff]  ;;  %v14694_v55 = vld [vmem:[#allocation201_spill] sm:$0xff] }
 0x380   :  { %14687 = vst [vmem:[#allocation137_spill] sm:$0xff] %v11427_v9  ;;  %v11439_v46 = vmul.f32 %v10467_v1, %v14692_v56  ;;  %v11443_v61 = vmul.f32 %v10467_v1, %v14694_v55  ;;  %v14696_v19 = vld [vmem:[#allocation205_spill] sm:$0xff]  ;;  %v14698_v9 = vld [vmem:[#allocation88_spill] sm:$0xff] }
 0x381   :  { %14689 = vst [vmem:[#allocation143_spill] sm:$0xff] %v11431_v54  ;;  %14691 = vst [vmem:[#allocation147_spill] sm:$0xff] %v11435_v38  ;;  %v11447_v35 = vmul.f32 %v10467_v1, %v14696_v19  ;;  %v11451_v18 = vmul.f32 %v10467_v1, %v14698_v9  ;;  %v14700_v54 = vld [vmem:[#allocation85_spill] sm:$0xff]  ;;  %v14702_v38 = vld [vmem:[#allocation207_spill] sm:$0xff] }
 0x382   :  { %14693 = vst [vmem:[#allocation141_spill] sm:$0xff] %v11439_v46  ;;  %14695 = vst [vmem:[#allocation145_spill] sm:$0xff] %v11443_v61  ;;  %v11455_v25 = vmul.f32 %v10467_v1, %v14700_v54  ;;  %v11459_v56 = vmul.f32 %v10467_v1, %v14702_v38  ;;  %v14704_v46 = vld [vmem:[#allocation211_spill] sm:$0xff]  ;;  %v14706_v61 = vld [vmem:[#allocation94_spill] sm:$0xff] }
 0x383   :  { %14697 = vst [vmem:[#allocation150_spill] sm:$0xff] %v11447_v35  ;;  %14699 = vst [vmem:[#allocation154_spill] sm:$0xff] %v11451_v18  ;;  %v11463_v55 = vmul.f32 %v10467_v1, %v14704_v46  ;;  %v11467_v19 = vmul.f32 %v10467_v1, %v14706_v61  ;;  %v14708_v35 = vld [vmem:[#allocation91_spill] sm:$0xff]  ;;  %v14710_v18 = vld [vmem:[#allocation213_spill] sm:$0xff] }
 0x384   :  { %14701 = vst [vmem:[#allocation148_spill] sm:$0xff] %v11455_v25  ;;  %14703 = vst [vmem:[#allocation152_spill] sm:$0xff] %v11459_v56  ;;  %v11471_v9 = vmul.f32 %v10467_v1, %v14708_v35  ;;  %v11475_v54 = vmul.f32 %v10467_v1, %v14710_v18  ;;  %v14712_v25 = vld [vmem:[#allocation218_spill] sm:$0xff]  ;;  %v14714_v56 = vld [vmem:[#allocation221_spill] sm:$0xff]  ;;  %v14926_v18 = vmax.f32 %v10487_v4, 0.0  ;;  %v14934_v4 = vmax.f32 %v10519_v40, 0.0 }
 0x385   :  { %14705 = vst [vmem:[#allocation158_spill] sm:$0xff] %v11463_v55  ;;  %14707 = vst [vmem:[#allocation161_spill] sm:$0xff] %v11467_v19  ;;  %v11479_v38 = vmul.f32 %v10467_v1, %v14712_v25  ;;  %v11483_v46 = vmul.f32 %v10467_v1, %v14714_v56  ;;  %v14716_v55 = vld [vmem:[#allocation216_spill] sm:$0xff]  ;;  %v14928_v25 = vmax.f32 %v10495_v48, 0.0  ;;  %v14936_v48 = vmax.f32 %v10527_v52, 0.0 }
 0x386   :  { %14709 = vst [vmem:[#allocation156_spill] sm:$0xff] %v11471_v9  ;;  %14711 = vst [vmem:[#allocation159_spill] sm:$0xff] %v11475_v54  ;;  %v11487_v61 = vmul.f32 %v10467_v1, %v14716_v55  ;;  %v14718_v19 = vld [vmem:[#allocation220_spill] sm:$0xff]  ;;  %v14918_v16 = vmov %v11475_v54  ;;  %v14923_v55 = vmax.f32 %v10475_v21, 0.0  ;;  %v14927_v54 = vmax.f32 %v10491_v15, 0.0 }
 0x387   :  { %14713 = vst [vmem:[#allocation164_spill] sm:$0xff] %v11479_v38  ;;  %14715 = vst [vmem:[#allocation168_spill] sm:$0xff] %v11483_v46  ;;  %v11491_v35 = vmul.f32 %v10467_v1, %v14718_v19  ;;  %v14920_v30 = vmov %v11483_v46  ;;  %v14922_v46 = vmax.f32 %v10471_v43, 0.0  ;;  %v14925_v1 = vmax.f32 %v10483_v8, 0.0 }
 0x388   :  { %14717 = vst [vmem:[#allocation162_spill] sm:$0xff] %v11487_v61  ;;  %v14921_v59 = vmov %v11487_v61  ;;  %v14924_v61 = vmax.f32 %v10479_v41, 0.0  ;;  %v6254_v5 = vpack.c.bf16 %v14927_v54, %v14926_v18  ;;  %v14929_v38 = vmax.f32 %v10499_v26, 0.0 }
 0x389   :  { %v6244_v34 = vpack.c.bf16 %v14923_v55, %v14922_v46  ;;  %v14930_v43 = vmax.f32 %v10503_v51, 0.0  ;;  %v14931_v21 = vmax.f32 %v10507_v50, 0.0  ;;  %v14932_v41 = vmax.f32 %v10511_v24, 0.0 }
 0x38a   :  { %v14911_v23 = vld [vmem:[#allocation150_spill] sm:$0xff]  ;;  %v6249_v19 = vpack.c.bf16 %v14925_v1, %v14924_v61  ;;  %v6259_v56 = vpack.c.bf16 %v14929_v38, %v14928_v25  ;;  %v14933_v8 = vmax.f32 %v10515_v12, 0.0  ;;  %v14935_v15 = vmax.f32 %v10523_v17, 0.0  ;;  %6882 = vst [vmem:[%s12647_s2 + $0x10] sm:$0xff] %v6254_v5  }
 0x38b   :  { %v14912_v20 = vld [vmem:[#allocation154_spill] sm:$0xff]  ;;  %v14913_v39 = vld [vmem:[#allocation148_spill] sm:$0xff]  ;;  %v6264_v46 = vpack.c.bf16 %v14931_v21, %v14930_v43  ;;  %v14937_v26 = vmax.f32 %v10531_v32, 0.0  ;;  %6245 = vst [vmem:[%s12647_s2] sm:$0xff] %v6244_v34   ;;  %v14938_v51 = vmax.f32 %v10535_v42, 0.0  ;;  %v14939_v50 = vmax.f32 %v10539_v3, 0.0 }
 0x38c   :  { %v14915_v28 = vld [vmem:[#allocation158_spill] sm:$0xff]  ;;  %v14916_v37 = vld [vmem:[#allocation161_spill] sm:$0xff]  ;;  %v6269_v61 = vpack.c.bf16 %v14933_v8, %v14932_v41  ;;  %v6274_v54 = vpack.c.bf16 %v14935_v15, %v14934_v4  ;;  %6881 = vst [vmem:[%s12647_s2 + $0x8] sm:$0xff] %v6249_v19   ;;  %6883 = vst [vmem:[%s12647_s2 + $0x18] sm:$0xff] %v6259_v56   ;;  %v14940_v12 = vmax.f32 %v10543_v7, 0.0  ;;  %v14941_v40 = vmax.f32 %v10547_v47, 0.0 }
 0x38d   :  { %v14917_v9 = vld [vmem:[#allocation156_spill] sm:$0xff]  ;;  %v6279_v38 = vpack.c.bf16 %v14937_v26, %v14936_v48  ;;  %v6284_v24 = vpack.c.bf16 %v14939_v50, %v14938_v51  ;;  %v14942_v52 = vmax.f32 %v10551_v62, 0.0  ;;  %v14943_v32 = vmax.f32 %v10555_v2, 0.0  ;;  %6884 = vst [vmem:[%s12647_s2 + $0x20] sm:$0xff] %v6264_v46   ;;  %v14970_v4 = vld [vmem:[#allocation10_spill] sm:$0xff] }
 0x38e   :  { %v6289_v17 = vpack.c.bf16 %v14941_v40, %v14940_v12  ;;  %v14944_v5 = vmax.f32 %v10559_v49, 0.0  ;;  %v14945_v18 = vmax.f32 %v10563_v0, 0.0  ;;  %6885 = vst [vmem:[%s12647_s2 + $0x28] sm:$0xff] %v6269_v61   ;;  %6886 = vst [vmem:[%s12647_s2 + $0x30] sm:$0xff] %v6274_v54   ;;  %v14946_v42 = vmax.f32 %v10567_v45, 0.0  ;;  %v14968_v8 = vld [vmem:[#allocation16_spill] sm:$0xff] }
 0x38f   :  { %v6294_v34 = vpack.c.bf16 %v14943_v32, %v14942_v52  ;;  %6887 = vst [vmem:[%s12647_s2 + $0x38] sm:$0xff] %v6279_v38   ;;  %v14947_v3 = vmax.f32 %v10571_v53, 0.0  ;;  %v14948_v47 = vmax.f32 %v10575_v6, 0.0  ;;  %v14949_v62 = vmax.f32 %v10579_v13, 0.0  ;;  %6888 = vst [vmem:[%s12647_s2 + $0x40] sm:$0xff] %v6284_v24   ;;  %v14972_v48 = vld [vmem:[#allocation14_spill] sm:$0xff] }
 0x390   :  { %v6299_v25 = vpack.c.bf16 %v14945_v18, %v14944_v5  ;;  %v14950_v49 = vmax.f32 %v10583_v58, 0.0  ;;  %v14951_v0 = vmax.f32 %v10587_v11, 0.0  ;;  %v14952_v55 = vmax.f32 %v10591_v33, 0.0  ;;  %6889 = vst [vmem:[%s12647_s2 + $0x48] sm:$0xff] %v6289_v17   ;;  %v14974_v38 = vld [vmem:[#allocation20_spill] sm:$0xff]  ;;  %v14978_v24 = vld [vmem:[#allocation18_spill] sm:$0xff] }
 0x391   :  { %v6304_v7 = vpack.c.bf16 %v14947_v3, %v14946_v42  ;;  %v6309_v2 = vpack.c.bf16 %v14949_v62, %v14948_v47  ;;  %v14953_v1 = vmax.f32 %v10595_v57, 0.0  ;;  %6890 = vst [vmem:[%s12647_s2 + $0x50] sm:$0xff] %v6294_v34   ;;  %v14954_v45 = vmax.f32 %v10599_v27, 0.0  ;;  %v14980_v17 = vld [vmem:[#allocation22_spill] sm:$0xff]  ;;  %v14982_v32 = vld [vmem:[#allocation28_spill] sm:$0xff] }
 0x392   :  { %v6314_v56 = vpack.c.bf16 %v14951_v0, %v14950_v49  ;;  %6891 = vst [vmem:[%s12647_s2 + $0x58] sm:$0xff] %v6299_v25   ;;  %v14955_v53 = vmax.f32 %v10603_v36, 0.0  ;;  %v14956_v13 = vmax.f32 %v10607_v60, 0.0  ;;  %v14957_v58 = vmax.f32 %v10611_v44, 0.0  ;;  %v14964_v44 = vld [vmem:[#allocation6_spill] sm:$0xff]  ;;  %v14984_v18 = vld [vmem:[#allocation32_spill] sm:$0xff] }
 0x393   :  { %v6319_v19 = vpack.c.bf16 %v14953_v1, %v14952_v55  ;;  %v14958_v33 = vmax.f32 %v10615_v31, 0.0  ;;  %v14959_v57 = vmax.f32 %v10619_v63, 0.0  ;;  %v14960_v21 = vmax.f32 %v10623_v22, 0.0  ;;  %6892 = vst [vmem:[%s12647_s2 + $0x60] sm:$0xff] %v6304_v7   ;;  %6893 = vst [vmem:[%s12647_s2 + $0x68] sm:$0xff] %v6309_v2   ;;  %v14966_v63 = vld [vmem:[#allocation12_spill] sm:$0xff] }
 0x394   :  { %v6324_v6 = vpack.c.bf16 %v14955_v53, %v14954_v45  ;;  %v6329_v11 = vpack.c.bf16 %v14957_v58, %v14956_v13  ;;  %v14961_v46 = vmax.f32 %v10627_v10, 0.0  ;;  %6894 = vst [vmem:[%s12647_s2 + $0x70] sm:$0xff] %v6314_v56   ;;  %v14962_v27 = vmax.f32 %v10631_v14, 0.0  ;;  %v14976_v14 = vld [vmem:[#allocation24_spill] sm:$0xff]  ;;  %v14986_v42 = vld [vmem:[#allocation26_spill] sm:$0xff] }
 0x395   :  { %v6334_v43 = vpack.c.bf16 %v14959_v57, %v14958_v33  ;;  %6895 = vst [vmem:[%s12647_s2 + $0x78] sm:$0xff] %v6319_v19   ;;  %v14963_v36 = vmax.f32 %v10635_v29, 0.0  ;;  %v14965_v31 = vmax.f32 %v14964_v44, 0.0  ;;  %v14967_v22 = vmax.f32 %v14966_v63, 0.0  ;;  %v14988_v47 = vld [vmem:[#allocation30_spill] sm:$0xff]  ;;  %v14990_v2 = vld [vmem:[#allocation36_spill] sm:$0xff] }
 0x396   :  { %v6339_v41 = vpack.c.bf16 %v14961_v46, %v14960_v21  ;;  %v14969_v61 = vmax.f32 %v14968_v8, 0.0  ;;  %v14971_v15 = vmax.f32 %v14970_v4, 0.0  ;;  %v14973_v26 = vmax.f32 %v14972_v48, 0.0  ;;  %6896 = vst [vmem:[%s12647_s2 + $0x80] sm:$0xff] %v6324_v6   ;;  %6897 = vst [vmem:[%s12647_s2 + $0x88] sm:$0xff] %v6329_v11   ;;  %v14992_v56 = vld [vmem:[#allocation40_spill] sm:$0xff] }
 0x397   :  { %v6344_v60 = vpack.c.bf16 %v14963_v36, %v14962_v27  ;;  %v6349_v10 = vpack.c.bf16 %v14967_v22, %v14965_v31  ;;  %v14975_v51 = vmax.f32 %v14974_v38, 0.0  ;;  %6898 = vst [vmem:[%s12647_s2 + $0x90] sm:$0xff] %v6334_v43   ;;  %v14977_v29 = vmax.f32 %v14976_v14, 0.0  ;;  %v14994_v1 = vld [vmem:[#allocation34_spill] sm:$0xff]  ;;  %v14998_v13 = vld [vmem:[#allocation44_spill] sm:$0xff]  ;;  %v15000_v33 = vld [vmem:[#allocation47_spill] sm:$0xff] }
 0x398   :  { %v6354_v54 = vpack.c.bf16 %v14971_v15, %v14969_v61  ;;  %6899 = vst [vmem:[%s12647_s2 + $0x98] sm:$0xff] %v6339_v41   ;;  %v14979_v12 = vmax.f32 %v14978_v24, 0.0  ;;  %v14981_v52 = vmax.f32 %v14980_v17, 0.0  ;;  %v14983_v34 = vmax.f32 %v14982_v32, 0.0  ;;  %v14996_v53 = vld [vmem:[#allocation38_spill] sm:$0xff]  ;;  %v15006_v36 = vld [vmem:[#allocation223_spill] sm:$0xff] }
 0x399   :  { %v6359_v50 = vpack.c.bf16 %v14975_v51, %v14973_v26  ;;  %v14985_v25 = vmax.f32 %v14984_v18, 0.0  ;;  %v14987_v3 = vmax.f32 %v14986_v42, 0.0  ;;  %v14989_v62 = vmax.f32 %v14988_v47, 0.0  ;;  %6900 = vst [vmem:[%s12647_s2 + $0xa0] sm:$0xff] %v6344_v60   ;;  %6901 = vst [vmem:[%s12647_s2 + $0xa8] sm:$0xff] %v6349_v10   ;;  %v15002_v43 = vld [vmem:[#allocation42_spill] sm:$0xff] }
 0x39a   :  { %v6364_v40 = vpack.c.bf16 %v14979_v12, %v14977_v29  ;;  %v6369_v5 = vpack.c.bf16 %v14983_v34, %v14981_v52  ;;  %v14991_v49 = vmax.f32 %v14990_v2, 0.0  ;;  %6902 = vst [vmem:[%s12647_s2 + $0xb0] sm:$0xff] %v6354_v54   ;;  %v14993_v55 = vmax.f32 %v14992_v56, 0.0  ;;  %v15004_v41 = vld [vmem:[#allocation222_spill] sm:$0xff]  ;;  %v15008_v31 = vld [vmem:[#allocation4_spill] sm:$0xff]  ;;  %v15016_v26 = vld [vmem:[#allocation225_spill] sm:$0xff] }
 0x39b   :  { %v6374_v7 = vpack.c.bf16 %v14987_v3, %v14985_v25  ;;  %6903 = vst [vmem:[%s12647_s2 + $0xb8] sm:$0xff] %v6359_v50   ;;  %v14995_v19 = vmax.f32 %v14994_v1, 0.0  ;;  %v14997_v6 = vmax.f32 %v14996_v53, 0.0  ;;  %v14999_v58 = vmax.f32 %v14998_v13, 0.0  ;;  %v15010_v22 = vld [vmem:[#allocation8_spill] sm:$0xff]  ;;  %v15012_v61 = vld [vmem:[#allocation2_spill] sm:$0xff] }
 0x39c   :  { %v6379_v0 = vpack.c.bf16 %v14991_v49, %v14989_v62  ;;  %v15001_v57 = vmax.f32 %v15000_v33, 0.0  ;;  %v15003_v21 = vmax.f32 %v15002_v43, 0.0  ;;  %v15005_v27 = vmax.f32 %v15004_v41, 0.0  ;;  %6904 = vst [vmem:[%s12647_s2 + $0xc0] sm:$0xff] %v6364_v40   ;;  %6905 = vst [vmem:[%s12647_s2 + $0xc8] sm:$0xff] %v6369_v5   ;;  %v15014_v15 = vld [vmem:[#allocation224_spill] sm:$0xff] }
 0x39d   :  { %v6384_v45 = vpack.c.bf16 %v14995_v19, %v14993_v55  ;;  %v6389_v11 = vpack.c.bf16 %v14999_v58, %v14997_v6  ;;  %v15007_v60 = vmax.f32 %v15006_v36, 0.0  ;;  %6906 = vst [vmem:[%s12647_s2 + $0xd0] sm:$0xff] %v6374_v7   ;;  %v15009_v63 = vmax.f32 %v15008_v31, 0.0  ;;  %v15018_v51 = vld [vmem:[#allocation226_spill] sm:$0xff]  ;;  %v15020_v29 = vld [vmem:[#allocation227_spill] sm:$0xff]  ;;  %v15022_v12 = vld [vmem:[#allocation228_spill] sm:$0xff] }
 0x39e   :  { %v6394_v46 = vpack.c.bf16 %v15003_v21, %v15001_v57  ;;  %6907 = vst [vmem:[%s12647_s2 + $0xd8] sm:$0xff] %v6379_v0   ;;  %v15011_v10 = vmax.f32 %v15010_v22, 0.0  ;;  %v15013_v4 = vmax.f32 %v15012_v61, 0.0  ;;  %v15015_v54 = vmax.f32 %v15014_v15, 0.0  ;;  %v15024_v52 = vld [vmem:[#allocation229_spill] sm:$0xff]  ;;  %v15026_v34 = vld [vmem:[#allocation230_spill] sm:$0xff] }
 0x39f   :  { %v6399_v44 = vpack.c.bf16 %v15007_v60, %v15005_v27  ;;  %v15017_v38 = vmax.f32 %v15016_v26, 0.0  ;;  %v15019_v50 = vmax.f32 %v15018_v51, 0.0  ;;  %v15021_v24 = vmax.f32 %v15020_v29, 0.0  ;;  %6908 = vst [vmem:[%s12647_s2 + $0xe0] sm:$0xff] %v6384_v45   ;;  %6909 = vst [vmem:[%s12647_s2 + $0xe8] sm:$0xff] %v6389_v11   ;;  %v15028_v25 = vld [vmem:[#allocation231_spill] sm:$0xff] }
 0x3a0   :  { %v6404_v8 = vpack.c.bf16 %v15011_v10, %v15009_v63  ;;  %v6409_v48 = vpack.c.bf16 %v15015_v54, %v15013_v4  ;;  %v15023_v40 = vmax.f32 %v15022_v12, 0.0  ;;  %6910 = vst [vmem:[%s12647_s2 + $0xf0] sm:$0xff] %v6394_v46   ;;  %v15025_v32 = vmax.f32 %v15024_v52, 0.0  ;;  %v15030_v3 = vld [vmem:[#allocation232_spill] sm:$0xff]  ;;  %v15032_v62 = vld [vmem:[#allocation233_spill] sm:$0xff]  ;;  %v15034_v49 = vld [vmem:[#allocation234_spill] sm:$0xff] }
 0x3a1   :  { %v6414_v14 = vpack.c.bf16 %v15019_v50, %v15017_v38  ;;  %6911 = vst [vmem:[%s12647_s2 + $0xf8] sm:$0xff] %v6399_v44   ;;  %v15027_v5 = vmax.f32 %v15026_v34, 0.0  ;;  %v15029_v42 = vmax.f32 %v15028_v25, 0.0  ;;  %v15031_v7 = vmax.f32 %v15030_v3, 0.0  ;;  %v15036_v55 = vld [vmem:[#allocation235_spill] sm:$0xff]  ;;  %v15038_v19 = vld [vmem:[#allocation236_spill] sm:$0xff] }
 0x3a2   :  { %v6419_v17 = vpack.c.bf16 %v15023_v40, %v15021_v24  ;;  %v15033_v2 = vmax.f32 %v15032_v62, 0.0  ;;  %v15035_v0 = vmax.f32 %v15034_v49, 0.0  ;;  %v15037_v1 = vmax.f32 %v15036_v55, 0.0  ;;  %6912 = vst [vmem:[%s12647_s2 + $0x100] sm:$0xff] %v6404_v8   ;;  %6913 = vst [vmem:[%s12647_s2 + $0x108] sm:$0xff] %v6409_v48   ;;  %v15040_v6 = vld [vmem:[#allocation237_spill] sm:$0xff] }
 0x3a3   :  { %v6424_v18 = vpack.c.bf16 %v15027_v5, %v15025_v32  ;;  %v6429_v47 = vpack.c.bf16 %v15031_v7, %v15029_v42  ;;  %v15039_v45 = vmax.f32 %v15038_v19, 0.0  ;;  %6914 = vst [vmem:[%s12647_s2 + $0x110] sm:$0xff] %v6414_v14   ;;  %v15041_v13 = vmax.f32 %v15040_v6, 0.0  ;;  %v15042_v58 = vld [vmem:[#allocation238_spill] sm:$0xff]  ;;  %v15044_v57 = vld [vmem:[#allocation239_spill] sm:$0xff]  ;;  %v15046_v21 = vld [vmem:[#allocation240_spill] sm:$0xff] }
 0x3a4   :  { %v6434_v56 = vpack.c.bf16 %v15035_v0, %v15033_v2  ;;  %6915 = vst [vmem:[%s12647_s2 + $0x118] sm:$0xff] %v6419_v17   ;;  %v15043_v11 = vmax.f32 %v15042_v58, 0.0  ;;  %v15045_v43 = vmax.f32 %v15044_v57, 0.0  ;;  %v15047_v46 = vmax.f32 %v15046_v21, 0.0  ;;  %v15048_v27 = vld [vmem:[#allocation241_spill] sm:$0xff]  ;;  %v15050_v60 = vld [vmem:[#allocation242_spill] sm:$0xff] }
 0x3a5   :  { %v6439_v53 = vpack.c.bf16 %v15039_v45, %v15037_v1  ;;  %v15049_v36 = vmax.f32 %v15048_v27, 0.0  ;;  %v15051_v44 = vmax.f32 %v15050_v60, 0.0  ;;  %v15052_v63 = vld [vmem:[#allocation243_spill] sm:$0xff]  ;;  %v15054_v10 = vld [vmem:[#allocation244_spill] sm:$0xff]  ;;  %6916 = vst [vmem:[%s12647_s2 + $0x120] sm:$0xff] %v6424_v18   ;;  %6917 = vst [vmem:[%s12647_s2 + $0x128] sm:$0xff] %v6429_v47  }
 0x3a6   :  { %v6444_v33 = vpack.c.bf16 %v15043_v11, %v15041_v13  ;;  %v6449_v41 = vpack.c.bf16 %v15047_v46, %v15045_v43  ;;  %v15053_v22 = vmax.f32 %v15052_v63, 0.0  ;;  %v15055_v8 = vmax.f32 %v15054_v10, 0.0  ;;  %6918 = vst [vmem:[%s12647_s2 + $0x130] sm:$0xff] %v6434_v56   ;;  %v15056_v4 = vld [vmem:[#allocation245_spill] sm:$0xff]  ;;  %v15058_v54 = vld [vmem:[#allocation246_spill] sm:$0xff]  ;;  %v15060_v38 = vld [vmem:[#allocation247_spill] sm:$0xff] }
 0x3a7   :  { %v6454_v31 = vpack.c.bf16 %v15051_v44, %v15049_v36  ;;  %6919 = vst [vmem:[%s12647_s2 + $0x138] sm:$0xff] %v6439_v53   ;;  %v15057_v15 = vmax.f32 %v15056_v4, 0.0  ;;  %v15059_v48 = vmax.f32 %v15058_v54, 0.0  ;;  %v15061_v51 = vmax.f32 %v15060_v38, 0.0  ;;  %v15062_v50 = vld [vmem:[#allocation97_spill] sm:$0xff]  ;;  %v15064_v24 = vld [vmem:[#allocation102_spill] sm:$0xff] }
 0x3a8   :  { %v6459_v61 = vpack.c.bf16 %v15055_v8, %v15053_v22  ;;  %v15063_v14 = vmax.f32 %v15062_v50, 0.0  ;;  %v15065_v12 = vmax.f32 %v15064_v24, 0.0  ;;  %v15066_v40 = vld [vmem:[#allocation106_spill] sm:$0xff]  ;;  %v15068_v32 = vld [vmem:[#allocation100_spill] sm:$0xff]  ;;  %6920 = vst [vmem:[%s12647_s2 + $0x140] sm:$0xff] %v6444_v33   ;;  %6921 = vst [vmem:[%s12647_s2 + $0x148] sm:$0xff] %v6449_v41  }
 0x3a9   :  { %v6464_v26 = vpack.c.bf16 %v15059_v48, %v15057_v15  ;;  %v15067_v17 = vmax.f32 %v15066_v40, 0.0  ;;  %v15069_v34 = vmax.f32 %v15068_v32, 0.0  ;;  %v15070_v5 = vld [vmem:[#allocation104_spill] sm:$0xff]  ;;  %6922 = vst [vmem:[%s12647_s2 + $0x150] sm:$0xff] %v6454_v31   ;;  %v15072_v42 = vld [vmem:[#allocation5_spill] sm:$0xff]  ;;  %v15076_v2 = vld [vmem:[#allocation3_spill] sm:$0xff] }
 0x3aa   :  { %v6469_v29 = vpack.c.bf16 %v15063_v14, %v15061_v51  ;;  %v15071_v18 = vmax.f32 %v15070_v5, 0.0  ;;  %6923 = vst [vmem:[%s12647_s2 + $0x158] sm:$0xff] %v6459_v61   ;;  %v15073_v3 = vmax.f32 %v15072_v42, 0.0  ;;  %v15074_v7 = vld [vmem:[#allocation9_spill] sm:$0xff]  ;;  %v15077_v49 = vmax.f32 %v15076_v2, 0.0  ;;  %v15078_v0 = vld [vmem:[#allocation7_spill] sm:$0xff] }
 0x3ab   :  { %v6474_v52 = vpack.c.bf16 %v15067_v17, %v15065_v12  ;;  %v15075_v47 = vmax.f32 %v15074_v7, 0.0  ;;  %v15079_v56 = vmax.f32 %v15078_v0, 0.0  ;;  %v15080_v1 = vld [vmem:[#allocation13_spill] sm:$0xff]  ;;  %v15084_v13 = vld [vmem:[#allocation11_spill] sm:$0xff]  ;;  %6924 = vst [vmem:[%s12647_s2 + $0x160] sm:$0xff] %v6464_v26  }
 0x3ac   :  { %v6479_v25 = vpack.c.bf16 %v15071_v18, %v15069_v34  ;;  %v15081_v19 = vmax.f32 %v15080_v1, 0.0  ;;  %v15082_v45 = vld [vmem:[#allocation17_spill] sm:$0xff]  ;;  %v15085_v58 = vmax.f32 %v15084_v13, 0.0  ;;  %v15086_v11 = vld [vmem:[#allocation15_spill] sm:$0xff]  ;;  %6925 = vst [vmem:[%s12647_s2 + $0x168] sm:$0xff] %v6469_v29   ;;  %v15114_v18 = vld [vmem:[#allocation48_spill] sm:$0xff] }
 0x3ad   :  { %v6484_v62 = vpack.c.bf16 %v15075_v47, %v15073_v3  ;;  %v6489_v55 = vpack.c.bf16 %v15079_v56, %v15077_v49  ;;  %v15083_v53 = vmax.f32 %v15082_v45, 0.0  ;;  %v15087_v33 = vmax.f32 %v15086_v11, 0.0  ;;  %6926 = vst [vmem:[%s12647_s2 + $0x170] sm:$0xff] %v6474_v52   ;;  %v15088_v43 = vld [vmem:[#allocation21_spill] sm:$0xff]  ;;  %v15092_v36 = vld [vmem:[#allocation19_spill] sm:$0xff]  ;;  %v15118_v47 = vld [vmem:[#allocation46_spill] sm:$0xff] }
 0x3ae   :  { %6927 = vst [vmem:[%s12647_s2 + $0x178] sm:$0xff] %v6479_v25   ;;  %v15089_v21 = vmax.f32 %v15088_v43, 0.0  ;;  %v15090_v46 = vld [vmem:[#allocation25_spill] sm:$0xff]  ;;  %v15093_v60 = vmax.f32 %v15092_v36, 0.0  ;;  %v15094_v44 = vld [vmem:[#allocation23_spill] sm:$0xff]  ;;  %v15115_v25 = vmax.f32 %v15114_v18, 0.0 }
 0x3af   :  { %v6494_v6 = vpack.c.bf16 %v15083_v53, %v15081_v19  ;;  %v6499_v57 = vpack.c.bf16 %v15087_v33, %v15085_v58  ;;  %v15091_v41 = vmax.f32 %v15090_v46, 0.0  ;;  %v15095_v31 = vmax.f32 %v15094_v44, 0.0  ;;  %v15096_v22 = vld [vmem:[#allocation29_spill] sm:$0xff]  ;;  %v15100_v15 = vld [vmem:[#allocation27_spill] sm:$0xff]  ;;  %6928 = vst [vmem:[%s12647_s2 + $0x180] sm:$0xff] %v6484_v62   ;;  %6929 = vst [vmem:[%s12647_s2 + $0x188] sm:$0xff] %v6489_v55  }
 0x3b0   :  { %v15097_v10 = vmax.f32 %v15096_v22, 0.0  ;;  %v15098_v8 = vld [vmem:[#allocation33_spill] sm:$0xff]  ;;  %v15101_v54 = vmax.f32 %v15100_v15, 0.0  ;;  %v15102_v48 = vld [vmem:[#allocation31_spill] sm:$0xff]  ;;  %v15119_v62 = vmax.f32 %v15118_v47, 0.0  ;;  %v15120_v49 = vld [vmem:[#allocation50_spill] sm:$0xff] }
 0x3b1   :  { %v6504_v27 = vpack.c.bf16 %v15091_v41, %v15089_v21  ;;  %v6509_v63 = vpack.c.bf16 %v15095_v31, %v15093_v60  ;;  %v15099_v61 = vmax.f32 %v15098_v8, 0.0  ;;  %v15103_v26 = vmax.f32 %v15102_v48, 0.0  ;;  %6930 = vst [vmem:[%s12647_s2 + $0x190] sm:$0xff] %v6494_v6   ;;  %6931 = vst [vmem:[%s12647_s2 + $0x198] sm:$0xff] %v6499_v57   ;;  %v15104_v51 = vld [vmem:[#allocation37_spill] sm:$0xff]  ;;  %v15108_v12 = vld [vmem:[#allocation35_spill] sm:$0xff] }
 0x3b2   :  { %v15105_v50 = vmax.f32 %v15104_v51, 0.0  ;;  %v15106_v14 = vld [vmem:[#allocation41_spill] sm:$0xff]  ;;  %v15109_v40 = vmax.f32 %v15108_v12, 0.0  ;;  %v15110_v17 = vld [vmem:[#allocation39_spill] sm:$0xff]  ;;  %v15121_v0 = vmax.f32 %v15120_v49, 0.0  ;;  %v15122_v56 = vld [vmem:[#allocation52_spill] sm:$0xff] }
 0x3b3   :  { %v6514_v4 = vpack.c.bf16 %v15099_v61, %v15097_v10  ;;  %v6519_v38 = vpack.c.bf16 %v15103_v26, %v15101_v54  ;;  %v15107_v29 = vmax.f32 %v15106_v14, 0.0  ;;  %v15111_v52 = vmax.f32 %v15110_v17, 0.0  ;;  %v15112_v34 = vld [vmem:[#allocation45_spill] sm:$0xff]  ;;  %v15116_v3 = vld [vmem:[#allocation43_spill] sm:$0xff]  ;;  %6932 = vst [vmem:[%s12647_s2 + $0x1a0] sm:$0xff] %v6504_v27   ;;  %6933 = vst [vmem:[%s12647_s2 + $0x1a8] sm:$0xff] %v6509_v63  }
 0x3b4   :  { %v15113_v5 = vmax.f32 %v15112_v34, 0.0  ;;  %v15117_v7 = vmax.f32 %v15116_v3, 0.0  ;;  %v15123_v55 = vmax.f32 %v15122_v56, 0.0  ;;  %v15124_v19 = vld [vmem:[#allocation49_spill] sm:$0xff]  ;;  %v15126_v53 = vld [vmem:[#allocation51_spill] sm:$0xff]  ;;  %v15128_v58 = vld [vmem:[#allocation54_spill] sm:$0xff] }
 0x3b5   :  { %v6524_v24 = vpack.c.bf16 %v15107_v29, %v15105_v50  ;;  %v6529_v32 = vpack.c.bf16 %v15111_v52, %v15109_v40  ;;  %6934 = vst [vmem:[%s12647_s2 + $0x1b0] sm:$0xff] %v6514_v4   ;;  %6935 = vst [vmem:[%s12647_s2 + $0x1b8] sm:$0xff] %v6519_v38   ;;  %v15125_v45 = vmax.f32 %v15124_v19, 0.0  ;;  %v15127_v6 = vmax.f32 %v15126_v53, 0.0  ;;  %v15130_v33 = vld [vmem:[#allocation57_spill] sm:$0xff]  ;;  %v15134_v41 = vld [vmem:[#allocation56_spill] sm:$0xff] }
 0x3b6   :  { %v6534_v42 = vpack.c.bf16 %v15115_v25, %v15113_v5  ;;  %v6539_v2 = vpack.c.bf16 %v15119_v62, %v15117_v7  ;;  %v6544_v1 = vpack.c.bf16 %v15123_v55, %v15121_v0  ;;  %v15129_v11 = vmax.f32 %v15128_v58, 0.0  ;;  %v15132_v21 = vld [vmem:[#allocation53_spill] sm:$0xff]  ;;  %v15136_v60 = vld [vmem:[#allocation60_spill] sm:$0xff]  ;;  %v15138_v31 = vld [vmem:[#allocation63_spill] sm:$0xff] }
 0x3b7   :  { %v6549_v13 = vpack.c.bf16 %v15127_v6, %v15125_v45  ;;  %v15131_v57 = vmax.f32 %v15130_v33, 0.0  ;;  %v15133_v46 = vmax.f32 %v15132_v21, 0.0  ;;  %v15135_v27 = vmax.f32 %v15134_v41, 0.0  ;;  %6936 = vst [vmem:[%s12647_s2 + $0x1c0] sm:$0xff] %v6524_v24   ;;  %6937 = vst [vmem:[%s12647_s2 + $0x1c8] sm:$0xff] %v6529_v32   ;;  %v15140_v10 = vld [vmem:[#allocation59_spill] sm:$0xff] }
 0x3b8   :  { %6938 = vst [vmem:[%s12647_s2 + $0x1d0] sm:$0xff] %v6534_v42   ;;  %6939 = vst [vmem:[%s12647_s2 + $0x1d8] sm:$0xff] %v6539_v2   ;;  %v15137_v44 = vmax.f32 %v15136_v60, 0.0  ;;  %v15139_v63 = vmax.f32 %v15138_v31, 0.0  ;;  %v15141_v8 = vmax.f32 %v15140_v10, 0.0  ;;  %v15142_v61 = vld [vmem:[#allocation62_spill] sm:$0xff] }
 0x3b9   :  { %v6554_v43 = vpack.c.bf16 %v15131_v57, %v15129_v11  ;;  %v6559_v36 = vpack.c.bf16 %v15135_v27, %v15133_v46  ;;  %v15143_v4 = vmax.f32 %v15142_v61, 0.0  ;;  %v15144_v54 = vld [vmem:[#allocation66_spill] sm:$0xff]  ;;  %v15146_v26 = vld [vmem:[#allocation69_spill] sm:$0xff]  ;;  %v15150_v29 = vld [vmem:[#allocation68_spill] sm:$0xff]  ;;  %6940 = vst [vmem:[%s12647_s2 + $0x1e0] sm:$0xff] %v6544_v1  }
 0x3ba   :  { %v6564_v22 = vpack.c.bf16 %v15139_v63, %v15137_v44  ;;  %v15145_v48 = vmax.f32 %v15144_v54, 0.0  ;;  %v15147_v38 = vmax.f32 %v15146_v26, 0.0  ;;  %v15148_v50 = vld [vmem:[#allocation65_spill] sm:$0xff]  ;;  %v15151_v24 = vmax.f32 %v15150_v29, 0.0  ;;  %6941 = vst [vmem:[%s12647_s2 + $0x1e8] sm:$0xff] %v6549_v13   ;;  %v15152_v40 = vld [vmem:[#allocation72_spill] sm:$0xff] }
 0x3bb   :  { %v6569_v15 = vpack.c.bf16 %v15143_v4, %v15141_v8  ;;  %v15149_v14 = vmax.f32 %v15148_v50, 0.0  ;;  %6942 = vst [vmem:[%s12647_s2 + $0x1f0] sm:$0xff] %v6554_v43   ;;  %6943 = vst [vmem:[%s12647_s2 + $0x1f8] sm:$0xff] %v6559_v36   ;;  %v15153_v17 = vmax.f32 %v15152_v40, 0.0  ;;  %v15154_v52 = vld [vmem:[#allocation75_spill] sm:$0xff]  ;;  %v15158_v25 = vld [vmem:[#allocation74_spill] sm:$0xff] }
 0x3bc   :  { %v6574_v51 = vpack.c.bf16 %v15147_v38, %v15145_v48  ;;  %v15155_v32 = vmax.f32 %v15154_v52, 0.0  ;;  %v15156_v5 = vld [vmem:[#allocation71_spill] sm:$0xff]  ;;  %v15159_v42 = vmax.f32 %v15158_v25, 0.0  ;;  %v15160_v7 = vld [vmem:[#allocation78_spill] sm:$0xff]  ;;  %v15162_v62 = vld [vmem:[#allocation81_spill] sm:$0xff]  ;;  %6944 = vst [vmem:[%s12647_s2 + $0x200] sm:$0xff] %v6564_v22  }
 0x3bd   :  { %v6579_v12 = vpack.c.bf16 %v15151_v24, %v15149_v14  ;;  %v15157_v18 = vmax.f32 %v15156_v5, 0.0  ;;  %v15161_v47 = vmax.f32 %v15160_v7, 0.0  ;;  %v15163_v2 = vmax.f32 %v15162_v62, 0.0  ;;  %v15164_v0 = vld [vmem:[#allocation77_spill] sm:$0xff]  ;;  %v15166_v55 = vld [vmem:[#allocation80_spill] sm:$0xff]  ;;  %6945 = vst [vmem:[%s12647_s2 + $0x208] sm:$0xff] %v6569_v15  }
 0x3be   :  { %v6584_v34 = vpack.c.bf16 %v15155_v32, %v15153_v17  ;;  %v15165_v56 = vmax.f32 %v15164_v0, 0.0  ;;  %v15167_v1 = vmax.f32 %v15166_v55, 0.0  ;;  %6946 = vst [vmem:[%s12647_s2 + $0x210] sm:$0xff] %v6574_v51   ;;  %v15168_v45 = vld [vmem:[#allocation84_spill] sm:$0xff]  ;;  %v15170_v6 = vld [vmem:[#allocation87_spill] sm:$0xff]  ;;  %v15174_v57 = vld [vmem:[#allocation86_spill] sm:$0xff] }
 0x3bf   :  { %v6589_v3 = vpack.c.bf16 %v15159_v42, %v15157_v18  ;;  %v6594_v49 = vpack.c.bf16 %v15163_v2, %v15161_v47  ;;  %6947 = vst [vmem:[%s12647_s2 + $0x218] sm:$0xff] %v6579_v12   ;;  %v15169_v53 = vmax.f32 %v15168_v45, 0.0  ;;  %v15171_v13 = vmax.f32 %v15170_v6, 0.0  ;;  %v15172_v11 = vld [vmem:[#allocation83_spill] sm:$0xff]  ;;  %v15176_v46 = vld [vmem:[#allocation90_spill] sm:$0xff]  ;;  %v15178_v27 = vld [vmem:[#allocation93_spill] sm:$0xff] }
 0x3c0   :  { %v6599_v19 = vpack.c.bf16 %v15167_v1, %v15165_v56  ;;  %v15173_v33 = vmax.f32 %v15172_v11, 0.0  ;;  %v15175_v43 = vmax.f32 %v15174_v57, 0.0  ;;  %v15177_v41 = vmax.f32 %v15176_v46, 0.0  ;;  %v15180_v44 = vld [vmem:[#allocation89_spill] sm:$0xff]  ;;  %v15182_v63 = vld [vmem:[#allocation92_spill] sm:$0xff]  ;;  %6948 = vst [vmem:[%s12647_s2 + $0x220] sm:$0xff] %v6584_v34  }
 0x3c1   :  { %v6604_v58 = vpack.c.bf16 %v15171_v13, %v15169_v53  ;;  %v15179_v36 = vmax.f32 %v15178_v27, 0.0  ;;  %v15181_v31 = vmax.f32 %v15180_v44, 0.0  ;;  %v15183_v22 = vmax.f32 %v15182_v63, 0.0  ;;  %6949 = vst [vmem:[%s12647_s2 + $0x228] sm:$0xff] %v6589_v3   ;;  %6950 = vst [vmem:[%s12647_s2 + $0x230] sm:$0xff] %v6594_v49   ;;  %v15184_v8 = vld [vmem:[#allocation96_spill] sm:$0xff] }
 0x3c2   :  { %v6609_v21 = vpack.c.bf16 %v15175_v43, %v15173_v33  ;;  %6951 = vst [vmem:[%s12647_s2 + $0x238] sm:$0xff] %v6599_v19   ;;  %v15185_v61 = vmax.f32 %v15184_v8, 0.0  ;;  %v15186_v4 = vld [vmem:[#allocation99_spill] sm:$0xff]  ;;  %v15190_v38 = vld [vmem:[#allocation98_spill] sm:$0xff]  ;;  %v15196_v17 = vld [vmem:[#allocation101_spill] sm:$0xff] }
 0x3c3   :  { %v6614_v60 = vpack.c.bf16 %v15179_v36, %v15177_v41  ;;  %v6619_v10 = vpack.c.bf16 %v15183_v22, %v15181_v31  ;;  %v15187_v15 = vmax.f32 %v15186_v4, 0.0  ;;  %v15188_v48 = vld [vmem:[#allocation95_spill] sm:$0xff]  ;;  %v15191_v51 = vmax.f32 %v15190_v38, 0.0  ;;  %v15198_v32 = vld [vmem:[#allocation105_spill] sm:$0xff]  ;;  %6952 = vst [vmem:[%s12647_s2 + $0x240] sm:$0xff] %v6604_v58   ;;  %v15200_v18 = vld [vmem:[#allocation110_spill] sm:$0xff] }
 0x3c4   :  { %v15189_v26 = vmax.f32 %v15188_v48, 0.0  ;;  %v15192_v14 = vld [vmem:[#allocation103_spill] sm:$0xff]  ;;  %v15197_v52 = vmax.f32 %v15196_v17, 0.0  ;;  %v15199_v34 = vmax.f32 %v15198_v32, 0.0  ;;  %6953 = vst [vmem:[%s12647_s2 + $0x248] sm:$0xff] %v6609_v21   ;;  %v15201_v25 = vmax.f32 %v15200_v18, 0.0 }
 0x3c5   :  { %v6624_v54 = vpack.c.bf16 %v15187_v15, %v15185_v61  ;;  %v15193_v29 = vmax.f32 %v15192_v14, 0.0  ;;  %v15194_v24 = vld [vmem:[#allocation107_spill] sm:$0xff]  ;;  %6954 = vst [vmem:[%s12647_s2 + $0x250] sm:$0xff] %v6614_v60   ;;  %6955 = vst [vmem:[%s12647_s2 + $0x258] sm:$0xff] %v6619_v10   ;;  %v15202_v42 = vld [vmem:[#allocation114_spill] sm:$0xff] }
 0x3c6   :  { %v6629_v50 = vpack.c.bf16 %v15191_v51, %v15189_v26  ;;  %v15195_v12 = vmax.f32 %v15194_v24, 0.0  ;;  %v6639_v5 = vpack.c.bf16 %v15199_v34, %v15197_v52  ;;  %v15203_v3 = vmax.f32 %v15202_v42, 0.0  ;;  %v15204_v47 = vld [vmem:[#allocation108_spill] sm:$0xff]  ;;  %v15208_v56 = vld [vmem:[#allocation118_spill] sm:$0xff]  ;;  %v15240_v52 = vld [vmem:[#allocation149_spill] sm:$0xff] }
 0x3c7   :  { %v15205_v62 = vmax.f32 %v15204_v47, 0.0  ;;  %v15206_v2 = vld [vmem:[#allocation112_spill] sm:$0xff]  ;;  %v15209_v55 = vmax.f32 %v15208_v56, 0.0  ;;  %v15210_v1 = vld [vmem:[#allocation122_spill] sm:$0xff]  ;;  %6956 = vst [vmem:[%s12647_s2 + $0x260] sm:$0xff] %v6624_v54   ;;  %v15241_v32 = vmax.f32 %v15240_v52, 0.0 }
 0x3c8   :  { %v6634_v40 = vpack.c.bf16 %v15195_v12, %v15193_v29  ;;  %v6644_v7 = vpack.c.bf16 %v15203_v3, %v15201_v25  ;;  %v15207_v49 = vmax.f32 %v15206_v2, 0.0  ;;  %v15211_v19 = vmax.f32 %v15210_v1, 0.0  ;;  %v15212_v53 = vld [vmem:[#allocation116_spill] sm:$0xff]  ;;  %6957 = vst [vmem:[%s12647_s2 + $0x268] sm:$0xff] %v6629_v50   ;;  %6959 = vst [vmem:[%s12647_s2 + $0x278] sm:$0xff] %v6639_v5   ;;  %v15216_v33 = vld [vmem:[#allocation126_spill] sm:$0xff] }
 0x3c9   :  { %v15213_v6 = vmax.f32 %v15212_v53, 0.0  ;;  %v15214_v13 = vld [vmem:[#allocation120_spill] sm:$0xff]  ;;  %v15217_v57 = vmax.f32 %v15216_v33, 0.0  ;;  %v15218_v43 = vld [vmem:[#allocation130_spill] sm:$0xff]  ;;  %v15242_v34 = vld [vmem:[#allocation153_spill] sm:$0xff] }
 0x3ca   :  { %v6649_v0 = vpack.c.bf16 %v15207_v49, %v15205_v62  ;;  %v6654_v45 = vpack.c.bf16 %v15211_v19, %v15209_v55  ;;  %v15215_v58 = vmax.f32 %v15214_v13, 0.0  ;;  %6958 = vst [vmem:[%s12647_s2 + $0x270] sm:$0xff] %v6634_v40   ;;  %v15219_v21 = vmax.f32 %v15218_v43, 0.0  ;;  %v15220_v41 = vld [vmem:[#allocation124_spill] sm:$0xff]  ;;  %v15224_v31 = vld [vmem:[#allocation134_spill] sm:$0xff]  ;;  %6960 = vst [vmem:[%s12647_s2 + $0x280] sm:$0xff] %v6644_v7  }
 0x3cb   :  { %v15221_v27 = vmax.f32 %v15220_v41, 0.0  ;;  %v15222_v36 = vld [vmem:[#allocation128_spill] sm:$0xff]  ;;  %v15225_v63 = vmax.f32 %v15224_v31, 0.0  ;;  %v15226_v22 = vld [vmem:[#allocation138_spill] sm:$0xff]  ;;  %v15243_v5 = vmax.f32 %v15242_v34, 0.0  ;;  %v15244_v25 = vld [vmem:[#allocation55_spill] sm:$0xff] }
 0x3cc   :  { %v6659_v11 = vpack.c.bf16 %v15215_v58, %v15213_v6  ;;  %v6664_v46 = vpack.c.bf16 %v15219_v21, %v15217_v57  ;;  %v15223_v60 = vmax.f32 %v15222_v36, 0.0  ;;  %v15227_v10 = vmax.f32 %v15226_v22, 0.0  ;;  %v15228_v61 = vld [vmem:[#allocation132_spill] sm:$0xff]  ;;  %6961 = vst [vmem:[%s12647_s2 + $0x288] sm:$0xff] %v6649_v0   ;;  %6962 = vst [vmem:[%s12647_s2 + $0x290] sm:$0xff] %v6654_v45   ;;  %v15232_v26 = vld [vmem:[#allocation142_spill] sm:$0xff] }
 0x3cd   :  { %v15229_v4 = vmax.f32 %v15228_v61, 0.0  ;;  %v15230_v15 = vld [vmem:[#allocation136_spill] sm:$0xff]  ;;  %v15233_v38 = vmax.f32 %v15232_v26, 0.0  ;;  %v15234_v51 = vld [vmem:[#allocation146_spill] sm:$0xff]  ;;  %v6694_v18 = vpack.c.bf16 %v15243_v5, %v15241_v32  ;;  %v15245_v42 = vmax.f32 %v15244_v25, 0.0  ;;  %v15246_v3 = vld [vmem:[#allocation151_spill] sm:$0xff] }
 0x3ce   :  { %v6669_v44 = vpack.c.bf16 %v15223_v60, %v15221_v27  ;;  %v6674_v8 = vpack.c.bf16 %v15227_v10, %v15225_v63  ;;  %v15231_v54 = vmax.f32 %v15230_v15, 0.0  ;;  %6963 = vst [vmem:[%s12647_s2 + $0x298] sm:$0xff] %v6659_v11   ;;  %v15235_v50 = vmax.f32 %v15234_v51, 0.0  ;;  %v15236_v29 = vld [vmem:[#allocation140_spill] sm:$0xff]  ;;  %6964 = vst [vmem:[%s12647_s2 + $0x2a0] sm:$0xff] %v6664_v46   ;;  %v15248_v62 = vld [vmem:[#allocation157_spill] sm:$0xff] }
 0x3cf   :  { %v15237_v24 = vmax.f32 %v15236_v29, 0.0  ;;  %v15238_v12 = vld [vmem:[#allocation144_spill] sm:$0xff]  ;;  %v15247_v7 = vmax.f32 %v15246_v3, 0.0  ;;  %v15249_v2 = vmax.f32 %v15248_v62, 0.0  ;;  %v15252_v55 = vld [vmem:[#allocation155_spill] sm:$0xff]  ;;  %v15254_v19 = vld [vmem:[#allocation58_spill] sm:$0xff] }
 0x3d0   :  { %v6679_v48 = vpack.c.bf16 %v15231_v54, %v15229_v4  ;;  %v6684_v14 = vpack.c.bf16 %v15235_v50, %v15233_v38  ;;  %v15239_v40 = vmax.f32 %v15238_v12, 0.0  ;;  %6965 = vst [vmem:[%s12647_s2 + $0x2a8] sm:$0xff] %v6669_v44   ;;  %6966 = vst [vmem:[%s12647_s2 + $0x2b0] sm:$0xff] %v6674_v8   ;;  %v15250_v49 = vld [vmem:[#allocation160_spill] sm:$0xff]  ;;  %v15253_v1 = vmax.f32 %v15252_v55, 0.0  ;;  %v15256_v6 = vld [vmem:[#allocation163_spill] sm:$0xff] }
 0x3d1   :  { %v6699_v47 = vpack.c.bf16 %v15247_v7, %v15245_v42  ;;  %v15251_v0 = vmax.f32 %v15250_v49, 0.0  ;;  %v15255_v45 = vmax.f32 %v15254_v19, 0.0  ;;  %v15257_v13 = vmax.f32 %v15256_v6, 0.0  ;;  %v15258_v58 = vld [vmem:[#allocation167_spill] sm:$0xff]  ;;  %v15260_v57 = vld [vmem:[#allocation61_spill] sm:$0xff]  ;;  %6970 = vst [vmem:[%s12647_s2 + $0x2d0] sm:$0xff] %v6694_v18  }
 0x3d2   :  { %v6689_v17 = vpack.c.bf16 %v15239_v40, %v15237_v24  ;;  %6967 = vst [vmem:[%s12647_s2 + $0x2b8] sm:$0xff] %v6679_v48   ;;  %v15259_v11 = vmax.f32 %v15258_v58, 0.0  ;;  %v15261_v43 = vmax.f32 %v15260_v57, 0.0  ;;  %v15262_v21 = vld [vmem:[#allocation165_spill] sm:$0xff]  ;;  %6968 = vst [vmem:[%s12647_s2 + $0x2c0] sm:$0xff] %v6684_v14   ;;  %v15264_v27 = vld [vmem:[#allocation171_spill] sm:$0xff] }
 0x3d3   :  { %v6704_v56 = vpack.c.bf16 %v15251_v0, %v15249_v2  ;;  %v6709_v53 = vpack.c.bf16 %v15255_v45, %v15253_v1  ;;  %v15263_v46 = vmax.f32 %v15262_v21, 0.0  ;;  %6971 = vst [vmem:[%s12647_s2 + $0x2d8] sm:$0xff] %v6699_v47   ;;  %v15265_v36 = vmax.f32 %v15264_v27, 0.0  ;;  %v15266_v60 = vld [vmem:[#allocation174_spill] sm:$0xff]  ;;  %v15268_v63 = vld [vmem:[#allocation169_spill] sm:$0xff]  ;;  %v15270_v10 = vld [vmem:[#allocation64_spill] sm:$0xff] }
 0x3d4   :  { %v6714_v33 = vpack.c.bf16 %v15259_v11, %v15257_v13  ;;  %6969 = vst [vmem:[%s12647_s2 + $0x2c8] sm:$0xff] %v6689_v17   ;;  %v15267_v44 = vmax.f32 %v15266_v60, 0.0  ;;  %v15269_v22 = vmax.f32 %v15268_v63, 0.0  ;;  %v15271_v8 = vmax.f32 %v15270_v10, 0.0  ;;  %v15272_v4 = vld [vmem:[#allocation177_spill] sm:$0xff]  ;;  %v15276_v38 = vld [vmem:[#allocation67_spill] sm:$0xff] }
 0x3d5   :  { %v6719_v41 = vpack.c.bf16 %v15263_v46, %v15261_v43  ;;  %v15273_v15 = vmax.f32 %v15272_v4, 0.0  ;;  %v15274_v54 = vld [vmem:[#allocation181_spill] sm:$0xff]  ;;  %v15277_v51 = vmax.f32 %v15276_v38, 0.0  ;;  %v15278_v50 = vld [vmem:[#allocation179_spill] sm:$0xff]  ;;  %6972 = vst [vmem:[%s12647_s2 + $0x2e0] sm:$0xff] %v6704_v56   ;;  %6973 = vst [vmem:[%s12647_s2 + $0x2e8] sm:$0xff] %v6709_v53  }
 0x3d6   :  { %v6724_v31 = vpack.c.bf16 %v15267_v44, %v15265_v36  ;;  %v6729_v61 = vpack.c.bf16 %v15271_v8, %v15269_v22  ;;  %v15275_v48 = vmax.f32 %v15274_v54, 0.0  ;;  %v15279_v14 = vmax.f32 %v15278_v50, 0.0  ;;  %6974 = vst [vmem:[%s12647_s2 + $0x2f0] sm:$0xff] %v6714_v33   ;;  %v15280_v24 = vld [vmem:[#allocation185_spill] sm:$0xff]  ;;  %v15282_v40 = vld [vmem:[#allocation188_spill] sm:$0xff]  ;;  %v15284_v32 = vld [vmem:[#allocation183_spill] sm:$0xff] }
 0x3d7   :  { %6975 = vst [vmem:[%s12647_s2 + $0x2f8] sm:$0xff] %v6719_v41   ;;  %v15281_v12 = vmax.f32 %v15280_v24, 0.0  ;;  %v15283_v17 = vmax.f32 %v15282_v40, 0.0  ;;  %v15285_v34 = vmax.f32 %v15284_v32, 0.0  ;;  %v15286_v5 = vld [vmem:[#allocation70_spill] sm:$0xff]  ;;  %v15288_v42 = vld [vmem:[#allocation191_spill] sm:$0xff] }
 0x3d8   :  { %v6734_v26 = vpack.c.bf16 %v15275_v48, %v15273_v15  ;;  %v6739_v29 = vpack.c.bf16 %v15279_v14, %v15277_v51  ;;  %v15287_v18 = vmax.f32 %v15286_v5, 0.0  ;;  %v15289_v3 = vmax.f32 %v15288_v42, 0.0  ;;  %v15290_v7 = vld [vmem:[#allocation194_spill] sm:$0xff]  ;;  %v15292_v2 = vld [vmem:[#allocation73_spill] sm:$0xff]  ;;  %v15294_v0 = vld [vmem:[#allocation192_spill] sm:$0xff]  ;;  %6976 = vst [vmem:[%s12647_s2 + $0x300] sm:$0xff] %v6724_v31  }
 0x3d9   :  { %v6744_v52 = vpack.c.bf16 %v15283_v17, %v15281_v12  ;;  %v15291_v47 = vmax.f32 %v15290_v7, 0.0  ;;  %v15293_v49 = vmax.f32 %v15292_v2, 0.0  ;;  %v15295_v56 = vmax.f32 %v15294_v0, 0.0  ;;  %6977 = vst [vmem:[%s12647_s2 + $0x308] sm:$0xff] %v6729_v61   ;;  %v15296_v1 = vld [vmem:[#allocation197_spill] sm:$0xff]  ;;  %v15298_v45 = vld [vmem:[#allocation200_spill] sm:$0xff] }
 0x3da   :  { %v6749_v25 = vpack.c.bf16 %v15287_v18, %v15285_v34  ;;  %6978 = vst [vmem:[%s12647_s2 + $0x310] sm:$0xff] %v6734_v26   ;;  %6979 = vst [vmem:[%s12647_s2 + $0x318] sm:$0xff] %v6739_v29   ;;  %v15297_v19 = vmax.f32 %v15296_v1, 0.0  ;;  %v15299_v53 = vmax.f32 %v15298_v45, 0.0  ;;  %v15300_v13 = vld [vmem:[#allocation196_spill] sm:$0xff]  ;;  %v15302_v11 = vld [vmem:[#allocation198_spill] sm:$0xff] }
 0x3db   :  { %v6754_v62 = vpack.c.bf16 %v15291_v47, %v15289_v3  ;;  %v6759_v55 = vpack.c.bf16 %v15295_v56, %v15293_v49  ;;  %v15301_v58 = vmax.f32 %v15300_v13, 0.0  ;;  %v15303_v33 = vmax.f32 %v15302_v11, 0.0  ;;  %v15304_v43 = vld [vmem:[#allocation203_spill] sm:$0xff]  ;;  %v15306_v46 = vld [vmem:[#allocation206_spill] sm:$0xff]  ;;  %v15310_v44 = vld [vmem:[#allocation204_spill] sm:$0xff]  ;;  %6980 = vst [vmem:[%s12647_s2 + $0x320] sm:$0xff] %v6744_v52  }
 0x3dc   :  { %v6764_v6 = vpack.c.bf16 %v15299_v53, %v15297_v19  ;;  %v15305_v21 = vmax.f32 %v15304_v43, 0.0  ;;  %v15307_v41 = vmax.f32 %v15306_v46, 0.0  ;;  %v15308_v36 = vld [vmem:[#allocation202_spill] sm:$0xff]  ;;  %v15311_v31 = vmax.f32 %v15310_v44, 0.0  ;;  %6981 = vst [vmem:[%s12647_s2 + $0x328] sm:$0xff] %v6749_v25   ;;  %v15312_v22 = vld [vmem:[#allocation209_spill] sm:$0xff] }
 0x3dd   :  { %v6769_v57 = vpack.c.bf16 %v15303_v33, %v15301_v58  ;;  %v15309_v60 = vmax.f32 %v15308_v36, 0.0  ;;  %6982 = vst [vmem:[%s12647_s2 + $0x330] sm:$0xff] %v6754_v62   ;;  %6983 = vst [vmem:[%s12647_s2 + $0x338] sm:$0xff] %v6759_v55   ;;  %v15313_v10 = vmax.f32 %v15312_v22, 0.0  ;;  %v15314_v8 = vld [vmem:[#allocation212_spill] sm:$0xff]  ;;  %v15318_v48 = vld [vmem:[#allocation210_spill] sm:$0xff] }
 0x3de   :  { %v6774_v27 = vpack.c.bf16 %v15307_v41, %v15305_v21  ;;  %v15315_v61 = vmax.f32 %v15314_v8, 0.0  ;;  %v15316_v15 = vld [vmem:[#allocation208_spill] sm:$0xff]  ;;  %v15319_v26 = vmax.f32 %v15318_v48, 0.0  ;;  %v15320_v51 = vld [vmem:[#allocation215_spill] sm:$0xff]  ;;  %v15324_v12 = vld [vmem:[#allocation214_spill] sm:$0xff]  ;;  %6984 = vst [vmem:[%s12647_s2 + $0x340] sm:$0xff] %v6764_v6  }
 0x3df   :  { %v6779_v63 = vpack.c.bf16 %v15311_v31, %v15309_v60  ;;  %v15317_v54 = vmax.f32 %v15316_v15, 0.0  ;;  %v15321_v50 = vmax.f32 %v15320_v51, 0.0  ;;  %v15322_v14 = vld [vmem:[#allocation219_spill] sm:$0xff]  ;;  %v15325_v40 = vmax.f32 %v15324_v12, 0.0  ;;  %v15326_v17 = vld [vmem:[#allocation217_spill] sm:$0xff]  ;;  %6985 = vst [vmem:[%s12647_s2 + $0x348] sm:$0xff] %v6769_v57  }
 0x3e0   :  { %v6784_v4 = vpack.c.bf16 %v15315_v61, %v15313_v10  ;;  %v15323_v29 = vmax.f32 %v15322_v14, 0.0  ;;  %v15327_v52 = vmax.f32 %v15326_v17, 0.0  ;;  %6986 = vst [vmem:[%s12647_s2 + $0x350] sm:$0xff] %v6774_v27   ;;  %v15328_v34 = vld [vmem:[#allocation111_spill] sm:$0xff]  ;;  %v15332_v3 = vld [vmem:[#allocation109_spill] sm:$0xff]  ;;  %v15369_v17 = vmax.f32 %v14912_v20, 0.0 }
 0x3e1   :  { %v6789_v38 = vpack.c.bf16 %v15319_v26, %v15317_v54  ;;  %6987 = vst [vmem:[%s12647_s2 + $0x358] sm:$0xff] %v6779_v63   ;;  %v15329_v5 = vmax.f32 %v15328_v34, 0.0  ;;  %v15330_v18 = vld [vmem:[#allocation115_spill] sm:$0xff]  ;;  %v15333_v7 = vmax.f32 %v15332_v3, 0.0  ;;  %v15334_v47 = vld [vmem:[#allocation113_spill] sm:$0xff]  ;;  %v15371_v34 = vld [vmem:[#allocation152_spill] sm:$0xff] }
 0x3e2   :  { %v6794_v24 = vpack.c.bf16 %v15323_v29, %v15321_v50  ;;  %v6799_v32 = vpack.c.bf16 %v15327_v52, %v15325_v40  ;;  %v15331_v25 = vmax.f32 %v15330_v18, 0.0  ;;  %v15335_v62 = vmax.f32 %v15334_v47, 0.0  ;;  %v15336_v49 = vld [vmem:[#allocation119_spill] sm:$0xff]  ;;  %v15340_v19 = vld [vmem:[#allocation117_spill] sm:$0xff]  ;;  %6988 = vst [vmem:[%s12647_s2 + $0x360] sm:$0xff] %v6784_v4  }
 0x3e3   :  { %v15337_v0 = vmax.f32 %v15336_v49, 0.0  ;;  %v15338_v56 = vld [vmem:[#allocation123_spill] sm:$0xff]  ;;  %v15341_v45 = vmax.f32 %v15340_v19, 0.0  ;;  %v15342_v53 = vld [vmem:[#allocation121_spill] sm:$0xff]  ;;  %6989 = vst [vmem:[%s12647_s2 + $0x368] sm:$0xff] %v6789_v38   ;;  %v15368_v40 = vmax.f32 %v14911_v23, 0.0 }
 0x3e4   :  { %v6804_v42 = vpack.c.bf16 %v15331_v25, %v15329_v5  ;;  %v6809_v2 = vpack.c.bf16 %v15335_v62, %v15333_v7  ;;  %v15339_v55 = vmax.f32 %v15338_v56, 0.0  ;;  %v15343_v6 = vmax.f32 %v15342_v53, 0.0  ;;  %6990 = vst [vmem:[%s12647_s2 + $0x370] sm:$0xff] %v6794_v24   ;;  %6991 = vst [vmem:[%s12647_s2 + $0x378] sm:$0xff] %v6799_v32   ;;  %v15344_v58 = vld [vmem:[#allocation127_spill] sm:$0xff]  ;;  %v15348_v21 = vld [vmem:[#allocation125_spill] sm:$0xff] }
 0x3e5   :  { %v15345_v11 = vmax.f32 %v15344_v58, 0.0  ;;  %v15346_v33 = vld [vmem:[#allocation131_spill] sm:$0xff]  ;;  %v15349_v46 = vmax.f32 %v15348_v21, 0.0  ;;  %v15350_v41 = vld [vmem:[#allocation129_spill] sm:$0xff]  ;;  %v6854_v52 = vpack.c.bf16 %v15369_v17, %v15368_v40  ;;  %v15370_v32 = vmax.f32 %v14913_v39, 0.0  ;;  %v15377_v7 = vld [vmem:[#allocation164_spill] sm:$0xff] }
 0x3e6   :  { %v6814_v1 = vpack.c.bf16 %v15339_v55, %v15337_v0  ;;  %v6819_v13 = vpack.c.bf16 %v15343_v6, %v15341_v45  ;;  %v15347_v57 = vmax.f32 %v15346_v33, 0.0  ;;  %v15351_v27 = vmax.f32 %v15350_v41, 0.0  ;;  %v15352_v60 = vld [vmem:[#allocation135_spill] sm:$0xff]  ;;  %v15356_v10 = vld [vmem:[#allocation133_spill] sm:$0xff]  ;;  %6992 = vst [vmem:[%s12647_s2 + $0x380] sm:$0xff] %v6804_v42   ;;  %6993 = vst [vmem:[%s12647_s2 + $0x388] sm:$0xff] %v6809_v2  }
 0x3e7   :  { %v15353_v44 = vmax.f32 %v15352_v60, 0.0  ;;  %v15354_v31 = vld [vmem:[#allocation139_spill] sm:$0xff]  ;;  %v15357_v8 = vmax.f32 %v15356_v10, 0.0  ;;  %v15358_v61 = vld [vmem:[#allocation137_spill] sm:$0xff]  ;;  %v15372_v5 = vmax.f32 %v15371_v34, 0.0  ;;  %v15373_v23 = vmax.f32 %v14915_v28, 0.0 }
 0x3e8   :  { %v6824_v43 = vpack.c.bf16 %v15347_v57, %v15345_v11  ;;  %v6829_v36 = vpack.c.bf16 %v15351_v27, %v15349_v46  ;;  %v15355_v63 = vmax.f32 %v15354_v31, 0.0  ;;  %v15359_v4 = vmax.f32 %v15358_v61, 0.0  ;;  %6994 = vst [vmem:[%s12647_s2 + $0x390] sm:$0xff] %v6814_v1   ;;  %6995 = vst [vmem:[%s12647_s2 + $0x398] sm:$0xff] %v6819_v13   ;;  %v15360_v54 = vld [vmem:[#allocation143_spill] sm:$0xff]  ;;  %v15364_v50 = vld [vmem:[#allocation141_spill] sm:$0xff] }
 0x3e9   :  { %v15361_v48 = vmax.f32 %v15360_v54, 0.0  ;;  %v15362_v26 = vld [vmem:[#allocation147_spill] sm:$0xff]  ;;  %v15365_v14 = vmax.f32 %v15364_v50, 0.0  ;;  %v15366_v29 = vld [vmem:[#allocation145_spill] sm:$0xff]  ;;  %v6859_v18 = vpack.c.bf16 %v15372_v5, %v15370_v32  ;;  %v15374_v20 = vmax.f32 %v14916_v37, 0.0  ;;  %7002 = vst [vmem:[%s12647_s2 + $0x3d0] sm:$0xff] %v6854_v52  }
 0x3ea   :  { %v6834_v22 = vpack.c.bf16 %v15355_v63, %v15353_v44  ;;  %v6839_v15 = vpack.c.bf16 %v15359_v4, %v15357_v8  ;;  %v15363_v38 = vmax.f32 %v15362_v26, 0.0  ;;  %v15367_v24 = vmax.f32 %v15366_v29, 0.0  ;;  %6996 = vst [vmem:[%s12647_s2 + $0x3a0] sm:$0xff] %v6824_v43   ;;  %6997 = vst [vmem:[%s12647_s2 + $0x3a8] sm:$0xff] %v6829_v36  }
 0x3eb   :  { %v6864_v39 = vpack.c.bf16 %v15374_v20, %v15373_v23  ;;  %v15375_v25 = vmax.f32 %v14917_v9, 0.0  ;;  %v15376_v42 = vmax.f32 %v14918_v16, 0.0  ;;  %v15378_v47 = vmax.f32 %v15377_v7, 0.0  ;;  %7003 = vst [vmem:[%s12647_s2 + $0x3d8] sm:$0xff] %v6859_v18  }
 0x3ec   :  { %v6844_v51 = vpack.c.bf16 %v15363_v38, %v15361_v48  ;;  %v6849_v12 = vpack.c.bf16 %v15367_v24, %v15365_v14  ;;  %6998 = vst [vmem:[%s12647_s2 + $0x3b0] sm:$0xff] %v6834_v22   ;;  %6999 = vst [vmem:[%s12647_s2 + $0x3b8] sm:$0xff] %v6839_v15   ;;  %v15379_v62 = vmax.f32 %v14920_v30, 0.0  ;;  %v15380_v49 = vmax.f32 %v14921_v59, 0.0 }
 0x3ed   :  { %v6869_v3 = vpack.c.bf16 %v15376_v42, %v15375_v25  ;;  %v15381_v0 = vmax.f32 %v11491_v35, 0.0  ;;  %7004 = vst [vmem:[%s12647_s2 + $0x3e0] sm:$0xff] %v6864_v39  }
 0x3ee   :  { %v6874_v2 = vpack.c.bf16 %v15379_v62, %v15378_v47  ;;  %7000 = vst [vmem:[%s12647_s2 + $0x3c0] sm:$0xff] %v6844_v51   ;;  %7001 = vst [vmem:[%s12647_s2 + $0x3c8] sm:$0xff] %v6849_v12  }
 0x3ef   :  { %v6879_v56 = vpack.c.bf16 %v15381_v0, %v15380_v49  ;;  %7005 = vst [vmem:[%s12647_s2 + $0x3e8] sm:$0xff] %v6869_v3  }
 0x3f0   :  { %7006 = vst [vmem:[%s12647_s2 + $0x3f0] sm:$0xff] %v6874_v2  }
 0x3f1   :  { %7007 = vst [vmem:[%s12647_s2 + $0x3f8] sm:$0xff] %v6879_v56  }

// kernel: generator_forward.9
= control target key start
LH: loop header
LB: loop body
LE: loop exit
PB: predicated region body
PF: predicated region fallthrough
CT: control target
= control target key end

     0   :  { %s4439_s9 = smov 0   ;;  %s4980_s0 = inlined_call_operand.vmem [shape: bf16[4,2048,32], index: 0, kind: input, shape index: {}]   ;;  %s4981_s1 = inlined_call_operand.vmem [shape: bf16[4,32,128], index: 1, kind: input, shape index: {}]   ;;  %s4982_s2 = inlined_call_operand.vmem [shape: f32[4,2048,128], index: 2, kind: output, shape index: {}]  }
   0x1 LB: > { %s3098_s10 = sadd.s32 4294967295, %s4422_s9   ;;  %p3102_p0 = scmp.ge.s32.totalorder %s4422_s9, 1  ;;  %s4422_s9 = sphi %s4439_s9, %s12_s9  }
   0x2   : > { %p122_p1 = scmp.lt.s32.totalorder %s4422_s9, 5 }
   0x4   : > { %p123_p2 = pnand %p3102_p0, %p122_p1 }
   0x5   : > { %p149_p3 = scmp.lt.s32.totalorder (!%p123_p2), %s3098_s10, 3 }
   0x6   : > { %126 = sbr.rel (%p123_p2) target bundleno = 486 (0x1e6), region = 28 }
   0xb   : > { %s4984_s10 = smov (!%p149_p3, %s3098_s10), 3  ;;  %vm1077_vm0 = vcmask 261120  }
   0xc   : > { %s3369_s11 = sshll.u32 %s4984_s10, 10  ;;  %s3370_s12 = sshll.u32 %s4984_s10, 4 }
   0xd   : > { %s4454_s15 = scalar_lea.vmem %s4980_s0, %s3369_s11  ;;  %s158_s18 = scalar_lea.vmem %s4981_s1, %s3370_s12 }
   0xe   : > { %v3774_v0 = vld [vmem:[%s158_s18 + $0x8] sm:$0xff]   ;;  %v3775_v1 = vld [vmem:[%s158_s18] sm:$0xff]   ;;  %v3780_v6 = vld [vmem:[%s4454_s15 + $0x10] sm:$0xff]   ;;  %s3371_s19 = sshll.u32 %s4984_s10, 11 }
   0xf   : > { %3502 = vmatprep.subr.bf16.mxu0 %v3774_v0  ;;  %3762 = vmatprep.subr.bf16.mxu1 %v3774_v0  ;;  %v3776_v2 = vld [vmem:[%s4454_s15] sm:$0xff]   ;;  %v3778_v4 = vld [vmem:[%s4454_s15 + $0x8] sm:$0xff]   ;;  %v3781_v7 = vld [vmem:[%s4454_s15 + $0x210] sm:$0xff]   ;;  %s4675_s22 = scalar_lea.vmem %s4982_s2, %s3371_s19 }
  0x10   : > { %3503 = vmatpush3.bf16.msra.mxu0 %v3774_v0  ;;  %3764 = vmatpush3.bf16.msra.mxu1 %v3774_v0  ;;  %v3777_v3 = vld [vmem:[%s4454_s15 + $0x200] sm:$0xff]   ;;  %v3779_v5 = vld [vmem:[%s4454_s15 + $0x208] sm:$0xff]   ;;  %v3782_v8 = vld [vmem:[%s4454_s15 + $0x18] sm:$0xff]  }
  0x11   : > { %3504 = vmatprep.subr.bf16.mxu0 %v3775_v1  ;;  %3763 = vmatprep.subr.bf16.mxu1 %v3775_v1  ;;  %v3783_v9 = vld [vmem:[%s4454_s15 + $0x218] sm:$0xff]   ;;  %v3784_v10 = vld [vmem:[%s4454_s15 + $0x20] sm:$0xff]   ;;  %v3786_v12 = vld [vmem:[%s4454_s15 + $0x28] sm:$0xff]  }
  0x12   : > { %3506 = vmatprep.mubr.msk.bf16.mxu0 %vm1077_vm0, %v3776_v2  ;;  %3634 = vmatprep.mubr.msk.bf16.mxu1 %vm1077_vm0, %v3777_v3  ;;  %v3785_v11 = vld [vmem:[%s4454_s15 + $0x220] sm:$0xff]   ;;  %v3787_v13 = vld [vmem:[%s4454_s15 + $0x228] sm:$0xff]   ;;  %v3788_v14 = vld [vmem:[%s4454_s15 + $0x30] sm:$0xff]  }
  0x13   : > { %v3789_v15 = vld [vmem:[%s4454_s15 + $0x230] sm:$0xff]   ;;  %v3790_v16 = vld [vmem:[%s4454_s15 + $0x38] sm:$0xff]   ;;  %v3792_v18 = vld [vmem:[%s4454_s15 + $0x40] sm:$0xff]  }
  0x14   : > { %3505 = vmatpush3.bf16.msra.mxu0 %v3775_v1  ;;  %3765 = vmatpush3.bf16.msra.mxu1 %v3775_v1  ;;  %v3791_v17 = vld [vmem:[%s4454_s15 + $0x238] sm:$0xff]   ;;  %v3793_v19 = vld [vmem:[%s4454_s15 + $0x240] sm:$0xff]   ;;  %v3794_v20 = vld [vmem:[%s4454_s15 + $0x48] sm:$0xff]  }
  0x15   : > { %v3795_v21 = vld [vmem:[%s4454_s15 + $0x248] sm:$0xff]   ;;  %v3796_v22 = vld [vmem:[%s4454_s15 + $0x50] sm:$0xff]   ;;  %v3798_v24 = vld [vmem:[%s4454_s15 + $0x58] sm:$0xff]  }
  0x16   : > { %v3797_v23 = vld [vmem:[%s4454_s15 + $0x250] sm:$0xff]   ;;  %v3799_v25 = vld [vmem:[%s4454_s15 + $0x258] sm:$0xff]   ;;  %v3800_v26 = vld [vmem:[%s4454_s15 + $0x60] sm:$0xff]  }
  0x17   : > { %3507 = vmatmul.mubr.msk.bf16.vlgmr.msra.gmra.mxu0 %vm1077_vm0, %v3778_v4  ;;  %3635 = vmatmul.mubr.msk.bf16.vlgmr.msra.gmra.mxu1 %vm1077_vm0, %v3779_v5  ;;  %v3801_v27 = vld [vmem:[%s4454_s15 + $0x260] sm:$0xff]   ;;  %v3802_v28 = vld [vmem:[%s4454_s15 + $0x68] sm:$0xff]   ;;  %v3804_v30 = vld [vmem:[%s4454_s15 + $0x70] sm:$0xff]  }
  0x18   : > { %3510 = vmatprep.mubr.msk.bf16.mxu0 %vm1077_vm0, %v3780_v6  ;;  %3638 = vmatprep.mubr.msk.bf16.mxu1 %vm1077_vm0, %v3781_v7  ;;  %v3803_v29 = vld [vmem:[%s4454_s15 + $0x268] sm:$0xff]   ;;  %v3805_v31 = vld [vmem:[%s4454_s15 + $0x270] sm:$0xff]   ;;  %v3806_v32 = vld [vmem:[%s4454_s15 + $0x78] sm:$0xff]  }
  0x19   : > { %v3807_v33 = vld [vmem:[%s4454_s15 + $0x278] sm:$0xff]   ;;  %v3808_v34 = vld [vmem:[%s4454_s15 + $0x80] sm:$0xff]   ;;  %v3810_v36 = vld [vmem:[%s4454_s15 + $0x88] sm:$0xff]  }
  0x1a   : > { %v3809_v35 = vld [vmem:[%s4454_s15 + $0x280] sm:$0xff]   ;;  %v3811_v37 = vld [vmem:[%s4454_s15 + $0x288] sm:$0xff]   ;;  %v3812_v38 = vld [vmem:[%s4454_s15 + $0x90] sm:$0xff]  }
  0x1b   : > { %v3813_v39 = vld [vmem:[%s4454_s15 + $0x290] sm:$0xff]   ;;  %v3814_v40 = vld [vmem:[%s4454_s15 + $0x98] sm:$0xff]   ;;  %v3816_v42 = vld [vmem:[%s4454_s15 + $0xa0] sm:$0xff]  }
  0x1c   : > { %v3815_v41 = vld [vmem:[%s4454_s15 + $0x298] sm:$0xff]   ;;  %v3817_v43 = vld [vmem:[%s4454_s15 + $0x2a0] sm:$0xff]   ;;  %v3818_v44 = vld [vmem:[%s4454_s15 + $0xa8] sm:$0xff]  }
  0x1d   : > { %v3819_v45 = vld [vmem:[%s4454_s15 + $0x2a8] sm:$0xff]   ;;  %v3820_v46 = vld [vmem:[%s4454_s15 + $0xb0] sm:$0xff]   ;;  %v3822_v48 = vld [vmem:[%s4454_s15 + $0xb8] sm:$0xff]  }
  0x1e   : > { %v3821_v47 = vld [vmem:[%s4454_s15 + $0x2b0] sm:$0xff]   ;;  %v3823_v49 = vld [vmem:[%s4454_s15 + $0x2b8] sm:$0xff]   ;;  %v3824_v50 = vld [vmem:[%s4454_s15 + $0xc0] sm:$0xff]  }
  0x1f   : > { %3511 = vmatmul.mubr.msk.bf16.gmra.mxu0 %vm1077_vm0, %v3782_v8  ;;  %3639 = vmatmul.mubr.msk.bf16.gmra.mxu1 %vm1077_vm0, %v3783_v9  ;;  %v3825_v51 = vld [vmem:[%s4454_s15 + $0x2c0] sm:$0xff]   ;;  %v3826_v52 = vld [vmem:[%s4454_s15 + $0xc8] sm:$0xff]   ;;  %v3828_v54 = vld [vmem:[%s4454_s15 + $0xd0] sm:$0xff]  }
  0x20   : > { %3514 = vmatprep.mubr.msk.bf16.mxu0 %vm1077_vm0, %v3784_v10  ;;  %3642 = vmatprep.mubr.msk.bf16.mxu1 %vm1077_vm0, %v3785_v11  ;;  %v3827_v53 = vld [vmem:[%s4454_s15 + $0x2c8] sm:$0xff]   ;;  %v3829_v55 = vld [vmem:[%s4454_s15 + $0x2d0] sm:$0xff]   ;;  %v3830_v56 = vld [vmem:[%s4454_s15 + $0xd8] sm:$0xff]  }
  0x21   : > { %v3831_v57 = vld [vmem:[%s4454_s15 + $0x2d8] sm:$0xff]   ;;  %v3832_v58 = vld [vmem:[%s4454_s15 + $0xe0] sm:$0xff]   ;;  %v3834_v60 = vld [vmem:[%s4454_s15 + $0xe8] sm:$0xff]  }
  0x22   : > { %v3833_v59 = vld [vmem:[%s4454_s15 + $0x2e0] sm:$0xff]   ;;  %v3835_v61 = vld [vmem:[%s4454_s15 + $0x2e8] sm:$0xff]   ;;  %v3836_v62 = vld [vmem:[%s4454_s15 + $0xf0] sm:$0xff]  }
  0x23   : > { %v3837_v63 = vld [vmem:[%s4454_s15 + $0x2f0] sm:$0xff]   ;;  %v3838_v0 = vld [vmem:[%s4454_s15 + $0xf8] sm:$0xff]   ;;  %v3840_v2 = vld [vmem:[%s4454_s15 + $0x100] sm:$0xff]  }
  0x24   : > { %v3839_v1 = vld [vmem:[%s4454_s15 + $0x2f8] sm:$0xff]   ;;  %v3841_v3 = vld [vmem:[%s4454_s15 + $0x300] sm:$0xff]   ;;  %v3842_v4 = vld [vmem:[%s4454_s15 + $0x108] sm:$0xff]  }
  0x25   : > { %v3843_v5 = vld [vmem:[%s4454_s15 + $0x308] sm:$0xff]   ;;  %v3844_v6 = vld [vmem:[%s4454_s15 + $0x110] sm:$0xff]   ;;  %v3846_v8 = vld [vmem:[%s4454_s15 + $0x118] sm:$0xff]  }
  0x26   : > { %v3845_v7 = vld [vmem:[%s4454_s15 + $0x310] sm:$0xff]   ;;  %v3847_v9 = vld [vmem:[%s4454_s15 + $0x318] sm:$0xff]   ;;  %v3848_v10 = vld [vmem:[%s4454_s15 + $0x120] sm:$0xff]  }
  0x27   : > { %3515 = vmatmul.mubr.msk.bf16.gmra.mxu0 %vm1077_vm0, %v3786_v12  ;;  %3643 = vmatmul.mubr.msk.bf16.gmra.mxu1 %vm1077_vm0, %v3787_v13  ;;  %v3849_v11 = vld [vmem:[%s4454_s15 + $0x320] sm:$0xff]   ;;  %v3850_v12 = vld [vmem:[%s4454_s15 + $0x128] sm:$0xff]  }
  0x28   : > { %3518 = vmatprep.mubr.msk.bf16.mxu0 %vm1077_vm0, %v3788_v14  ;;  %3646 = vmatprep.mubr.msk.bf16.mxu1 %vm1077_vm0, %v3789_v15  ;;  %v3851_v13 = vld [vmem:[%s4454_s15 + $0x328] sm:$0xff]   ;;  %v3852_v14 = vld [vmem:[%s4454_s15 + $0x130] sm:$0xff]  }
  0x29   : > { %v3853_v15 = vld [vmem:[%s4454_s15 + $0x330] sm:$0xff]  }
  0x2f   : > { %3519 = vmatmul.mubr.msk.bf16.gmra.mxu0 %vm1077_vm0, %v3790_v16  ;;  %3647 = vmatmul.mubr.msk.bf16.gmra.mxu1 %vm1077_vm0, %v3791_v17  ;;  %v3854_v16 = vld [vmem:[%s4454_s15 + $0x138] sm:$0xff]  }
  0x30   : > { %3522 = vmatprep.mubr.msk.bf16.mxu0 %vm1077_vm0, %v3792_v18  ;;  %3650 = vmatprep.mubr.msk.bf16.mxu1 %vm1077_vm0, %v3793_v19  ;;  %v3855_v17 = vld [vmem:[%s4454_s15 + $0x338] sm:$0xff]   ;;  %v3856_v18 = vld [vmem:[%s4454_s15 + $0x140] sm:$0xff]  }
  0x31   : > { %v3857_v19 = vld [vmem:[%s4454_s15 + $0x340] sm:$0xff]  }
  0x37   : > { %3523 = vmatmul.mubr.msk.bf16.gmra.mxu0 %vm1077_vm0, %v3794_v20  ;;  %3651 = vmatmul.mubr.msk.bf16.gmra.mxu1 %vm1077_vm0, %v3795_v21  ;;  %v3858_v20 = vld [vmem:[%s4454_s15 + $0x148] sm:$0xff]  }
  0x38   : > { %3526 = vmatprep.mubr.msk.bf16.mxu0 %vm1077_vm0, %v3796_v22  ;;  %3654 = vmatprep.mubr.msk.bf16.mxu1 %vm1077_vm0, %v3797_v23  ;;  %v3859_v21 = vld [vmem:[%s4454_s15 + $0x348] sm:$0xff]   ;;  %v3860_v22 = vld [vmem:[%s4454_s15 + $0x150] sm:$0xff]  }
  0x39   : > { %v3861_v23 = vld [vmem:[%s4454_s15 + $0x350] sm:$0xff]  }
  0x3f   : > { %3527 = vmatmul.mubr.msk.bf16.gmra.mxu0 %vm1077_vm0, %v3798_v24  ;;  %3655 = vmatmul.mubr.msk.bf16.gmra.mxu1 %vm1077_vm0, %v3799_v25  ;;  %v3862_v24 = vld [vmem:[%s4454_s15 + $0x158] sm:$0xff]  }
  0x40   : > { %3530 = vmatprep.mubr.msk.bf16.mxu0 %vm1077_vm0, %v3800_v26  ;;  %3658 = vmatprep.mubr.msk.bf16.mxu1 %vm1077_vm0, %v3801_v27  ;;  %v3863_v25 = vld [vmem:[%s4454_s15 + $0x358] sm:$0xff]   ;;  %v3864_v26 = vld [vmem:[%s4454_s15 + $0x160] sm:$0xff]  }
  0x41   : > { %v3865_v27 = vld [vmem:[%s4454_s15 + $0x360] sm:$0xff]  }
  0x47   : > { %3531 = vmatmul.mubr.msk.bf16.gmra.mxu0 %vm1077_vm0, %v3802_v28  ;;  %3659 = vmatmul.mubr.msk.bf16.gmra.mxu1 %vm1077_vm0, %v3803_v29  ;;  %v3866_v28 = vld [vmem:[%s4454_s15 + $0x168] sm:$0xff]  }
  0x48   : > { %3534 = vmatprep.mubr.msk.bf16.mxu0 %vm1077_vm0, %v3804_v30  ;;  %3662 = vmatprep.mubr.msk.bf16.mxu1 %vm1077_vm0, %v3805_v31  ;;  %v3867_v29 = vld [vmem:[%s4454_s15 + $0x368] sm:$0xff]   ;;  %v3868_v30 = vld [vmem:[%s4454_s15 + $0x170] sm:$0xff]  }
  0x49   : > { %v3869_v31 = vld [vmem:[%s4454_s15 + $0x370] sm:$0xff]  }
  0x4f   : > { %3535 = vmatmul.mubr.msk.bf16.gmra.mxu0 %vm1077_vm0, %v3806_v32  ;;  %3663 = vmatmul.mubr.msk.bf16.gmra.mxu1 %vm1077_vm0, %v3807_v33  ;;  %v3870_v32 = vld [vmem:[%s4454_s15 + $0x178] sm:$0xff]  }
  0x50   : > { %3538 = vmatprep.mubr.msk.bf16.mxu0 %vm1077_vm0, %v3808_v34  ;;  %3666 = vmatprep.mubr.msk.bf16.mxu1 %vm1077_vm0, %v3809_v35  ;;  %v3871_v33 = vld [vmem:[%s4454_s15 + $0x378] sm:$0xff]   ;;  %v3872_v34 = vld [vmem:[%s4454_s15 + $0x180] sm:$0xff]  }
  0x51   : > { %v3873_v35 = vld [vmem:[%s4454_s15 + $0x380] sm:$0xff]  }
  0x57   : > { %3539 = vmatmul.mubr.msk.bf16.gmra.mxu0 %vm1077_vm0, %v3810_v36  ;;  %3667 = vmatmul.mubr.msk.bf16.gmra.mxu1 %vm1077_vm0, %v3811_v37  ;;  %v3874_v36 = vld [vmem:[%s4454_s15 + $0x188] sm:$0xff]  }
  0x58   : > { %3542 = vmatprep.mubr.msk.bf16.mxu0 %vm1077_vm0, %v3812_v38  ;;  %3670 = vmatprep.mubr.msk.bf16.mxu1 %vm1077_vm0, %v3813_v39  ;;  %v3875_v37 = vld [vmem:[%s4454_s15 + $0x388] sm:$0xff]   ;;  %v3876_v38 = vld [vmem:[%s4454_s15 + $0x190] sm:$0xff]  }
  0x59   : > { %v3877_v39 = vld [vmem:[%s4454_s15 + $0x390] sm:$0xff]  }
  0x5f   : > { %3543 = vmatmul.mubr.msk.bf16.gmra.mxu0 %vm1077_vm0, %v3814_v40  ;;  %3671 = vmatmul.mubr.msk.bf16.gmra.mxu1 %vm1077_vm0, %v3815_v41 }
  0x60   : > { %3546 = vmatprep.mubr.msk.bf16.mxu0 %vm1077_vm0, %v3816_v42  ;;  %3674 = vmatprep.mubr.msk.bf16.mxu1 %vm1077_vm0, %v3817_v43 }
  0x67   : > { %3547 = vmatmul.mubr.msk.bf16.gmra.mxu0 %vm1077_vm0, %v3818_v44  ;;  %3675 = vmatmul.mubr.msk.bf16.gmra.mxu1 %vm1077_vm0, %v3819_v45 }
  0x68   : > { %3550 = vmatprep.mubr.msk.bf16.mxu0 %vm1077_vm0, %v3820_v46  ;;  %3678 = vmatprep.mubr.msk.bf16.mxu1 %vm1077_vm0, %v3821_v47  ;;  %v3878_v46 = vld [vmem:[%s4454_s15 + $0x198] sm:$0xff]  }
  0x69   : > { %v3879_v47 = vld [vmem:[%s4454_s15 + $0x398] sm:$0xff]  }
  0x6f   : > { %3551 = vmatmul.mubr.msk.bf16.gmra.mxu0 %vm1077_vm0, %v3822_v48  ;;  %3679 = vmatmul.mubr.msk.bf16.gmra.mxu1 %vm1077_vm0, %v3823_v49  ;;  %v3880_v48 = vld [vmem:[%s4454_s15 + $0x1a0] sm:$0xff]  }
  0x70   : > { %3554 = vmatprep.mubr.msk.bf16.mxu0 %vm1077_vm0, %v3824_v50  ;;  %3682 = vmatprep.mubr.msk.bf16.mxu1 %vm1077_vm0, %v3825_v51  ;;  %v3881_v49 = vld [vmem:[%s4454_s15 + $0x3a0] sm:$0xff]  }
  0x77   : > { %3555 = vmatmul.mubr.msk.bf16.gmra.mxu0 %vm1077_vm0, %v3826_v52  ;;  %3683 = vmatmul.mubr.msk.bf16.gmra.mxu1 %vm1077_vm0, %v3827_v53 }
  0x78   : > { %3558 = vmatprep.mubr.msk.bf16.mxu0 %vm1077_vm0, %v3828_v54  ;;  %3686 = vmatprep.mubr.msk.bf16.mxu1 %vm1077_vm0, %v3829_v55 }
  0x7f   : > { %3559 = vmatmul.mubr.msk.bf16.gmra.mxu0 %vm1077_vm0, %v3830_v56  ;;  %3687 = vmatmul.mubr.msk.bf16.gmra.mxu1 %vm1077_vm0, %v3831_v57 }
  0x80   : > { %3562 = vmatprep.mubr.msk.bf16.mxu0 %vm1077_vm0, %v3832_v58  ;;  %3690 = vmatprep.mubr.msk.bf16.mxu1 %vm1077_vm0, %v3833_v59  ;;  %v3882_v58 = vld [vmem:[%s4454_s15 + $0x1a8] sm:$0xff]  }
  0x81   : > { %v3883_v59 = vld [vmem:[%s4454_s15 + $0x3a8] sm:$0xff]  }
  0x87   : > { %3563 = vmatmul.mubr.msk.bf16.gmra.mxu0 %vm1077_vm0, %v3834_v60  ;;  %3691 = vmatmul.mubr.msk.bf16.gmra.mxu1 %vm1077_vm0, %v3835_v61  ;;  %v3884_v60 = vld [vmem:[%s4454_s15 + $0x1b0] sm:$0xff]  }
  0x88   : > { %3566 = vmatprep.mubr.msk.bf16.mxu0 %vm1077_vm0, %v3836_v62  ;;  %3694 = vmatprep.mubr.msk.bf16.mxu1 %vm1077_vm0, %v3837_v63  ;;  %v3885_v61 = vld [vmem:[%s4454_s15 + $0x3b0] sm:$0xff]  }
  0x8f   : > { %3567 = vmatmul.mubr.msk.bf16.gmra.mxu0 %vm1077_vm0, %v3838_v0  ;;  %3695 = vmatmul.mubr.msk.bf16.gmra.mxu1 %vm1077_vm0, %v3839_v1 }
  0x90   : > { %3570 = vmatprep.mubr.msk.bf16.mxu0 %vm1077_vm0, %v3840_v2  ;;  %3698 = vmatprep.mubr.msk.bf16.mxu1 %vm1077_vm0, %v3841_v3 }
  0x97   : > { %3571 = vmatmul.mubr.msk.bf16.gmra.mxu0 %vm1077_vm0, %v3842_v4  ;;  %3699 = vmatmul.mubr.msk.bf16.gmra.mxu1 %vm1077_vm0, %v3843_v5 }
  0x98   : > { %3574 = vmatprep.mubr.msk.bf16.mxu0 %vm1077_vm0, %v3844_v6  ;;  %3702 = vmatprep.mubr.msk.bf16.mxu1 %vm1077_vm0, %v3845_v7 }
  0x9f   : > { %3575 = vmatmul.mubr.msk.bf16.gmra.mxu0 %vm1077_vm0, %v3846_v8  ;;  %3703 = vmatmul.mubr.msk.bf16.gmra.mxu1 %vm1077_vm0, %v3847_v9 }
  0xa0   : > { %3578 = vmatprep.mubr.msk.bf16.mxu0 %vm1077_vm0, %v3848_v10  ;;  %3706 = vmatprep.mubr.msk.bf16.mxu1 %vm1077_vm0, %v3849_v11 }
  0xa7   : > { %3579 = vmatmul.mubr.msk.bf16.gmra.mxu0 %vm1077_vm0, %v3850_v12  ;;  %3707 = vmatmul.mubr.msk.bf16.gmra.mxu1 %vm1077_vm0, %v3851_v13  ;;  %v3886_v13 = vld [vmem:[%s4454_s15 + $0x1b8] sm:$0xff]  }
  0xa8   : > { %3582 = vmatprep.mubr.msk.bf16.mxu0 %vm1077_vm0, %v3852_v14  ;;  %3710 = vmatprep.mubr.msk.bf16.mxu1 %vm1077_vm0, %v3853_v15  ;;  %v3887_v14 = vld [vmem:[%s4454_s15 + $0x3b8] sm:$0xff]  }
  0xaf   : > { %3583 = vmatmul.mubr.msk.bf16.gmra.mxu0 %vm1077_vm0, %v3854_v16  ;;  %3711 = vmatmul.mubr.msk.bf16.gmra.mxu1 %vm1077_vm0, %v3855_v17  ;;  %v3888_v16 = vld [vmem:[%s4454_s15 + $0x1c0] sm:$0xff]  }
  0xb0   : > { %3586 = vmatprep.mubr.msk.bf16.mxu0 %vm1077_vm0, %v3856_v18  ;;  %3714 = vmatprep.mubr.msk.bf16.mxu1 %vm1077_vm0, %v3857_v19  ;;  %v3889_v17 = vld [vmem:[%s4454_s15 + $0x3c0] sm:$0xff]  }
  0xb7   : > { %3587 = vmatmul.mubr.msk.bf16.gmra.mxu0 %vm1077_vm0, %v3858_v20  ;;  %3715 = vmatmul.mubr.msk.bf16.gmra.mxu1 %vm1077_vm0, %v3859_v21 }
  0xb8   : > { %3590 = vmatprep.mubr.msk.bf16.mxu0 %vm1077_vm0, %v3860_v22  ;;  %3718 = vmatprep.mubr.msk.bf16.mxu1 %vm1077_vm0, %v3861_v23 }
  0xbf   : > { %3591 = vmatmul.mubr.msk.bf16.gmra.mxu0 %vm1077_vm0, %v3862_v24  ;;  %3719 = vmatmul.mubr.msk.bf16.gmra.mxu1 %vm1077_vm0, %v3863_v25 }
  0xc0   : > { %3594 = vmatprep.mubr.msk.bf16.mxu0 %vm1077_vm0, %v3864_v26  ;;  %3722 = vmatprep.mubr.msk.bf16.mxu1 %vm1077_vm0, %v3865_v27 }
  0xc7   : > { %3595 = vmatmul.mubr.msk.bf16.gmra.mxu0 %vm1077_vm0, %v3866_v28  ;;  %3723 = vmatmul.mubr.msk.bf16.gmra.mxu1 %vm1077_vm0, %v3867_v29 }
  0xc8   : > { %3598 = vmatprep.mubr.msk.bf16.mxu0 %vm1077_vm0, %v3868_v30  ;;  %3726 = vmatprep.mubr.msk.bf16.mxu1 %vm1077_vm0, %v3869_v31 }
  0xcf   : > { %3599 = vmatmul.mubr.msk.bf16.gmra.mxu0 %vm1077_vm0, %v3870_v32  ;;  %3727 = vmatmul.mubr.msk.bf16.gmra.mxu1 %vm1077_vm0, %v3871_v33  ;;  %v3890_v33 = vld [vmem:[%s4454_s15 + $0x1c8] sm:$0xff]  }
  0xd0   : > { %3602 = vmatprep.mubr.msk.bf16.mxu0 %vm1077_vm0, %v3872_v34  ;;  %3730 = vmatprep.mubr.msk.bf16.mxu1 %vm1077_vm0, %v3873_v35  ;;  %v3891_v34 = vld [vmem:[%s4454_s15 + $0x3c8] sm:$0xff]  }
  0xd7   : > { %v3508_v40 = vpop.f32.mrf.mxu0  ;;  %3603 = vmatmul.mubr.msk.bf16.gmra.mxu0 %vm1077_vm0, %v3874_v36  ;;  %v3636_v41 = vpop.f32.mrf.mxu1  ;;  %3731 = vmatmul.mubr.msk.bf16.gmra.mxu1 %vm1077_vm0, %v3875_v37  ;;  %v3892_v36 = vld [vmem:[%s4454_s15 + $0x1d0] sm:$0xff]  }
  0xd8   : > { %3904 = vtanh.f32 %v3508_v40  ;;  %3606 = vmatprep.mubr.msk.bf16.mxu0 %vm1077_vm0, %v3876_v38  ;;  %3734 = vmatprep.mubr.msk.bf16.mxu1 %vm1077_vm0, %v3877_v39  ;;  %v3893_v37 = vld [vmem:[%s4454_s15 + $0x3d0] sm:$0xff]  }
  0xd9   : > { %3906 = vtanh.f32 %v3636_v41  ;;  %v1496_v42 = vpop.f32.mrf.mxu0  ;;  %v2008_v43 = vpop.f32.mrf.mxu1 }
  0xda   : > { %3908 = vtanh.f32 %v1496_v42 }
  0xdb   : > { %3910 = vtanh.f32 %v2008_v43  ;;  %v3509_v44 = vpop.f32.mrf.mxu0  ;;  %v3637_v45 = vpop.f32.mrf.mxu1 }
  0xdc   : > { %3912 = vtanh.f32 %v3509_v44 }
  0xdd   : > { %3914 = vtanh.f32 %v3637_v45  ;;  %v1499_v50 = vpop.f32.mrf.mxu0  ;;  %v2011_v51 = vpop.f32.mrf.mxu1 }
  0xde   : > { %3916 = vtanh.f32 %v1499_v50 }
  0xdf   : > { %3918 = vtanh.f32 %v2011_v51  ;;  %v3512_v52 = vpop.f32.mrf.mxu0  ;;  %3607 = vmatmul.mubr.msk.bf16.gmra.mxu0 %vm1077_vm0, %v3878_v46  ;;  %v3640_v53 = vpop.f32.mrf.mxu1  ;;  %3735 = vmatmul.mubr.msk.bf16.gmra.mxu1 %vm1077_vm0, %v3879_v47 }
  0xe0   : > { %3920 = vtanh.f32 %v3512_v52  ;;  %3610 = vmatprep.mubr.msk.bf16.mxu0 %vm1077_vm0, %v3880_v48  ;;  %3738 = vmatprep.mubr.msk.bf16.mxu1 %vm1077_vm0, %v3881_v49 }
  0xe1   : > { %3922 = vtanh.f32 %v3640_v53  ;;  %v1512_v54 = vpop.f32.mrf.mxu0  ;;  %v2024_v55 = vpop.f32.mrf.mxu1  ;;  %v3894_v53 = vld [vmem:[%s4454_s15 + $0x1d8] sm:$0xff]  }
  0xe2   : > { %3924 = vtanh.f32 %v1512_v54  ;;  %v3895_v54 = vld [vmem:[%s4454_s15 + $0x3d8] sm:$0xff]  }
  0xe3   : > { %3926 = vtanh.f32 %v2024_v55  ;;  %v3513_v56 = vpop.f32.mrf.mxu0  ;;  %v3641_v57 = vpop.f32.mrf.mxu1 }
  0xe4   : > { %3928 = vtanh.f32 %v3513_v56  ;;  %v3896_v56 = vld [vmem:[%s4454_s15 + $0x1e0] sm:$0xff]  }
  0xe5   : > { %v3905_v62 = vpop.eup %3904  ;;  %3930 = vtanh.f32 %v3641_v57  ;;  %v1515_v63 = vpop.f32.mrf.mxu0  ;;  %v3897_v57 = vld [vmem:[%s4454_s15 + $0x3e0] sm:$0xff]  }
  0xe6   : > { %v2027_v0 = vpop.f32.mrf.mxu1  ;;  %v3907_v1 = vpop.eup %3906  ;;  %2777 = vst [vmem:[%s4675_s22 + $0x10] sm:$0xff] %v3905_v62  ;;  %3932 = vtanh.f32 %v1515_v63 }
  0xe7   : > { %v3909_v2 = vpop.eup %3908  ;;  %2905 = vst [vmem:[%s4675_s22 + $0x410] sm:$0xff] %v3907_v1  ;;  %3934 = vtanh.f32 %v2027_v0  ;;  %v3516_v3 = vpop.f32.mrf.mxu0  ;;  %3611 = vmatmul.mubr.msk.bf16.gmra.mxu0 %vm1077_vm0, %v3882_v58  ;;  %3739 = vmatmul.mubr.msk.bf16.gmra.mxu1 %vm1077_vm0, %v3883_v59 }
  0xe8   : > { %v3644_v4 = vpop.f32.mrf.mxu1  ;;  %v3911_v5 = vpop.eup %3910  ;;  %2775 = vst [vmem:[%s4675_s22] sm:$0xff] %v3909_v2  ;;  %3936 = vtanh.f32 %v3516_v3  ;;  %3614 = vmatprep.mubr.msk.bf16.mxu0 %vm1077_vm0, %v3884_v60  ;;  %3742 = vmatprep.mubr.msk.bf16.mxu1 %vm1077_vm0, %v3885_v61 }
  0xe9   : > { %v3913_v6 = vpop.eup %3912  ;;  %2903 = vst [vmem:[%s4675_s22 + $0x400] sm:$0xff] %v3911_v5  ;;  %3938 = vtanh.f32 %v3644_v4  ;;  %v1528_v7 = vpop.f32.mrf.mxu0 }
  0xea   : > { %v2040_v8 = vpop.f32.mrf.mxu1  ;;  %v3915_v9 = vpop.eup %3914  ;;  %2778 = vst [vmem:[%s4675_s22 + $0x18] sm:$0xff] %v3913_v6  ;;  %3940 = vtanh.f32 %v1528_v7 }
  0xeb   : > { %v3917_v10 = vpop.eup %3916  ;;  %2906 = vst [vmem:[%s4675_s22 + $0x418] sm:$0xff] %v3915_v9  ;;  %3942 = vtanh.f32 %v2040_v8  ;;  %v3517_v11 = vpop.f32.mrf.mxu0  ;;  %v3898_v9 = vld [vmem:[%s4454_s15 + $0x1e8] sm:$0xff]  }
  0xec   : > { %v3645_v12 = vpop.f32.mrf.mxu1  ;;  %v3919_v15 = vpop.eup %3918  ;;  %2776 = vst [vmem:[%s4675_s22 + $0x8] sm:$0xff] %v3917_v10  ;;  %3944 = vtanh.f32 %v3517_v11  ;;  %v3899_v10 = vld [vmem:[%s4454_s15 + $0x3e8] sm:$0xff]  }
  0xed   : > { %v3921_v18 = vpop.eup %3920  ;;  %2904 = vst [vmem:[%s4675_s22 + $0x408] sm:$0xff] %v3919_v15  ;;  %3946 = vtanh.f32 %v3645_v12  ;;  %v1531_v19 = vpop.f32.mrf.mxu0  ;;  %v3900_v12 = vld [vmem:[%s4454_s15 + $0x1f0] sm:$0xff]  }
  0xee   : > { %v2043_v20 = vpop.f32.mrf.mxu1  ;;  %v3923_v21 = vpop.eup %3922  ;;  %2781 = vst [vmem:[%s4675_s22 + $0x30] sm:$0xff] %v3921_v18  ;;  %3948 = vtanh.f32 %v1531_v19 }
  0xef   : > { %v3925_v22 = vpop.eup %3924  ;;  %2909 = vst [vmem:[%s4675_s22 + $0x430] sm:$0xff] %v3923_v21  ;;  %3950 = vtanh.f32 %v2043_v20  ;;  %v3520_v23 = vpop.f32.mrf.mxu0  ;;  %3615 = vmatmul.mubr.msk.bf16.gmra.mxu0 %vm1077_vm0, %v3886_v13  ;;  %3743 = vmatmul.mubr.msk.bf16.gmra.mxu1 %vm1077_vm0, %v3887_v14  ;;  %v3901_v13 = vld [vmem:[%s4454_s15 + $0x3f0] sm:$0xff]  }
  0xf0   : > { %v3648_v24 = vpop.f32.mrf.mxu1  ;;  %v3927_v25 = vpop.eup %3926  ;;  %2779 = vst [vmem:[%s4675_s22 + $0x20] sm:$0xff] %v3925_v22  ;;  %3952 = vtanh.f32 %v3520_v23  ;;  %3618 = vmatprep.mubr.msk.bf16.mxu0 %vm1077_vm0, %v3888_v16  ;;  %3746 = vmatprep.mubr.msk.bf16.mxu1 %vm1077_vm0, %v3889_v17 }
  0xf1   : > { %v3929_v26 = vpop.eup %3928  ;;  %2907 = vst [vmem:[%s4675_s22 + $0x420] sm:$0xff] %v3927_v25  ;;  %3954 = vtanh.f32 %v3648_v24  ;;  %v1544_v27 = vpop.f32.mrf.mxu0 }
  0xf2   : > { %v2056_v28 = vpop.f32.mrf.mxu1  ;;  %v3931_v29 = vpop.eup %3930  ;;  %2782 = vst [vmem:[%s4675_s22 + $0x38] sm:$0xff] %v3929_v26  ;;  %3956 = vtanh.f32 %v1544_v27 }
  0xf3   : > { %v3933_v30 = vpop.eup %3932  ;;  %2910 = vst [vmem:[%s4675_s22 + $0x438] sm:$0xff] %v3931_v29  ;;  %3958 = vtanh.f32 %v2056_v28  ;;  %v3521_v31 = vpop.f32.mrf.mxu0  ;;  %v3902_v29 = vld [vmem:[%s4454_s15 + $0x1f8] sm:$0xff]  }
  0xf4   : > { %v3649_v32 = vpop.f32.mrf.mxu1  ;;  %v3935_v35 = vpop.eup %3934  ;;  %2780 = vst [vmem:[%s4675_s22 + $0x28] sm:$0xff] %v3933_v30  ;;  %3960 = vtanh.f32 %v3521_v31  ;;  %v3903_v30 = vld [vmem:[%s4454_s15 + $0x3f8] sm:$0xff]  }
  0xf5   : > { %v3937_v38 = vpop.eup %3936  ;;  %2908 = vst [vmem:[%s4675_s22 + $0x428] sm:$0xff] %v3935_v35  ;;  %3962 = vtanh.f32 %v3649_v32  ;;  %v1547_v39 = vpop.f32.mrf.mxu0 }
  0xf6   : > { %v2059_v40 = vpop.f32.mrf.mxu1  ;;  %v3939_v41 = vpop.eup %3938  ;;  %2785 = vst [vmem:[%s4675_s22 + $0x50] sm:$0xff] %v3937_v38  ;;  %3964 = vtanh.f32 %v1547_v39 }
  0xf7   : > { %v3941_v42 = vpop.eup %3940  ;;  %2913 = vst [vmem:[%s4675_s22 + $0x450] sm:$0xff] %v3939_v41  ;;  %3966 = vtanh.f32 %v2059_v40  ;;  %v3524_v43 = vpop.f32.mrf.mxu0  ;;  %3619 = vmatmul.mubr.msk.bf16.gmra.mxu0 %vm1077_vm0, %v3890_v33  ;;  %3747 = vmatmul.mubr.msk.bf16.gmra.mxu1 %vm1077_vm0, %v3891_v34 }
  0xf8   : > { %v3652_v44 = vpop.f32.mrf.mxu1  ;;  %v3943_v45 = vpop.eup %3942  ;;  %2783 = vst [vmem:[%s4675_s22 + $0x40] sm:$0xff] %v3941_v42  ;;  %3968 = vtanh.f32 %v3524_v43  ;;  %3622 = vmatprep.mubr.msk.bf16.mxu0 %vm1077_vm0, %v3892_v36  ;;  %3750 = vmatprep.mubr.msk.bf16.mxu1 %vm1077_vm0, %v3893_v37 }
  0xf9   : > { %v3945_v46 = vpop.eup %3944  ;;  %2911 = vst [vmem:[%s4675_s22 + $0x440] sm:$0xff] %v3943_v45  ;;  %3970 = vtanh.f32 %v3652_v44  ;;  %v1560_v47 = vpop.f32.mrf.mxu0 }
  0xfa   : > { %v2072_v48 = vpop.f32.mrf.mxu1  ;;  %v3947_v49 = vpop.eup %3946  ;;  %2786 = vst [vmem:[%s4675_s22 + $0x58] sm:$0xff] %v3945_v46  ;;  %3972 = vtanh.f32 %v1560_v47 }
  0xfb   : > { %v3949_v50 = vpop.eup %3948  ;;  %2914 = vst [vmem:[%s4675_s22 + $0x458] sm:$0xff] %v3947_v49  ;;  %3974 = vtanh.f32 %v2072_v48  ;;  %v3525_v51 = vpop.f32.mrf.mxu0 }
  0xfc   : > { %v3653_v52 = vpop.f32.mrf.mxu1  ;;  %v3951_v55 = vpop.eup %3950  ;;  %2784 = vst [vmem:[%s4675_s22 + $0x48] sm:$0xff] %v3949_v50  ;;  %3976 = vtanh.f32 %v3525_v51 }
  0xfd   : > { %v3953_v58 = vpop.eup %3952  ;;  %2912 = vst [vmem:[%s4675_s22 + $0x448] sm:$0xff] %v3951_v55  ;;  %3978 = vtanh.f32 %v3653_v52  ;;  %v1563_v59 = vpop.f32.mrf.mxu0 }
  0xfe   : > { %v2075_v60 = vpop.f32.mrf.mxu1  ;;  %v3955_v61 = vpop.eup %3954  ;;  %2789 = vst [vmem:[%s4675_s22 + $0x70] sm:$0xff] %v3953_v58  ;;  %3980 = vtanh.f32 %v1563_v59 }
  0xff   : > { %v3957_v62 = vpop.eup %3956  ;;  %2917 = vst [vmem:[%s4675_s22 + $0x470] sm:$0xff] %v3955_v61  ;;  %3982 = vtanh.f32 %v2075_v60  ;;  %v3528_v63 = vpop.f32.mrf.mxu0  ;;  %3623 = vmatmul.mubr.msk.bf16.gmra.mxu0 %vm1077_vm0, %v3894_v53  ;;  %3751 = vmatmul.mubr.msk.bf16.gmra.mxu1 %vm1077_vm0, %v3895_v54 }
 0x100   : > { %v3656_v0 = vpop.f32.mrf.mxu1  ;;  %v3959_v1 = vpop.eup %3958  ;;  %2787 = vst [vmem:[%s4675_s22 + $0x60] sm:$0xff] %v3957_v62  ;;  %3984 = vtanh.f32 %v3528_v63  ;;  %3626 = vmatprep.mubr.msk.bf16.mxu0 %vm1077_vm0, %v3896_v56  ;;  %3754 = vmatprep.mubr.msk.bf16.mxu1 %vm1077_vm0, %v3897_v57 }
 0x101   : > { %v3961_v2 = vpop.eup %3960  ;;  %2915 = vst [vmem:[%s4675_s22 + $0x460] sm:$0xff] %v3959_v1  ;;  %3986 = vtanh.f32 %v3656_v0  ;;  %v1576_v3 = vpop.f32.mrf.mxu0 }
 0x102   : > { %v2088_v4 = vpop.f32.mrf.mxu1  ;;  %v3963_v5 = vpop.eup %3962  ;;  %2790 = vst [vmem:[%s4675_s22 + $0x78] sm:$0xff] %v3961_v2  ;;  %3988 = vtanh.f32 %v1576_v3 }
 0x103   : > { %v3965_v6 = vpop.eup %3964  ;;  %2918 = vst [vmem:[%s4675_s22 + $0x478] sm:$0xff] %v3963_v5  ;;  %3990 = vtanh.f32 %v2088_v4  ;;  %v3529_v7 = vpop.f32.mrf.mxu0 }
 0x104   : > { %v3657_v8 = vpop.f32.mrf.mxu1  ;;  %v3967_v11 = vpop.eup %3966  ;;  %2788 = vst [vmem:[%s4675_s22 + $0x68] sm:$0xff] %v3965_v6  ;;  %3992 = vtanh.f32 %v3529_v7 }
 0x105   : > { %v3969_v14 = vpop.eup %3968  ;;  %2916 = vst [vmem:[%s4675_s22 + $0x468] sm:$0xff] %v3967_v11  ;;  %3994 = vtanh.f32 %v3657_v8  ;;  %v1579_v15 = vpop.f32.mrf.mxu0 }
 0x106   : > { %v2091_v16 = vpop.f32.mrf.mxu1  ;;  %v3971_v17 = vpop.eup %3970  ;;  %2793 = vst [vmem:[%s4675_s22 + $0x90] sm:$0xff] %v3969_v14  ;;  %3996 = vtanh.f32 %v1579_v15 }
 0x107   : > { %v3973_v18 = vpop.eup %3972  ;;  %2921 = vst [vmem:[%s4675_s22 + $0x490] sm:$0xff] %v3971_v17  ;;  %3998 = vtanh.f32 %v2091_v16  ;;  %v3532_v19 = vpop.f32.mrf.mxu0  ;;  %3627 = vmatmul.mubr.msk.bf16.gmra.mxu0 %vm1077_vm0, %v3898_v9  ;;  %3755 = vmatmul.mubr.msk.bf16.gmra.mxu1 %vm1077_vm0, %v3899_v10 }
 0x108   : > { %v3660_v20 = vpop.f32.mrf.mxu1  ;;  %v3975_v21 = vpop.eup %3974  ;;  %2791 = vst [vmem:[%s4675_s22 + $0x80] sm:$0xff] %v3973_v18  ;;  %4000 = vtanh.f32 %v3532_v19  ;;  %3630 = vmatprep.mubr.msk.bf16.mxu0 %vm1077_vm0, %v3900_v12  ;;  %3758 = vmatprep.mubr.msk.bf16.mxu1 %vm1077_vm0, %v3901_v13 }
 0x109   : > { %v3977_v22 = vpop.eup %3976  ;;  %2919 = vst [vmem:[%s4675_s22 + $0x480] sm:$0xff] %v3975_v21  ;;  %4002 = vtanh.f32 %v3660_v20  ;;  %v1592_v23 = vpop.f32.mrf.mxu0 }
 0x10a   : > { %v2104_v24 = vpop.f32.mrf.mxu1  ;;  %v3979_v25 = vpop.eup %3978  ;;  %2794 = vst [vmem:[%s4675_s22 + $0x98] sm:$0xff] %v3977_v22  ;;  %4004 = vtanh.f32 %v1592_v23 }
 0x10b   : > { %v3981_v26 = vpop.eup %3980  ;;  %2922 = vst [vmem:[%s4675_s22 + $0x498] sm:$0xff] %v3979_v25  ;;  %4006 = vtanh.f32 %v2104_v24  ;;  %v3533_v27 = vpop.f32.mrf.mxu0 }
 0x10c   : > { %v3661_v28 = vpop.f32.mrf.mxu1  ;;  %v3983_v31 = vpop.eup %3982  ;;  %2792 = vst [vmem:[%s4675_s22 + $0x88] sm:$0xff] %v3981_v26  ;;  %4008 = vtanh.f32 %v3533_v27 }
 0x10d   : > { %v3985_v32 = vpop.eup %3984  ;;  %2920 = vst [vmem:[%s4675_s22 + $0x488] sm:$0xff] %v3983_v31  ;;  %4010 = vtanh.f32 %v3661_v28  ;;  %v1595_v33 = vpop.f32.mrf.mxu0 }
 0x10e   : > { %v2107_v34 = vpop.f32.mrf.mxu1  ;;  %v3987_v35 = vpop.eup %3986  ;;  %2797 = vst [vmem:[%s4675_s22 + $0xb0] sm:$0xff] %v3985_v32  ;;  %4012 = vtanh.f32 %v1595_v33 }
 0x10f   : > { %v3989_v36 = vpop.eup %3988  ;;  %2925 = vst [vmem:[%s4675_s22 + $0x4b0] sm:$0xff] %v3987_v35  ;;  %4014 = vtanh.f32 %v2107_v34  ;;  %v3536_v37 = vpop.f32.mrf.mxu0  ;;  %3631 = vmatmul.mubr.msk.bf16.gmra.mxu0 %vm1077_vm0, %v3902_v29  ;;  %3759 = vmatmul.mubr.msk.bf16.gmra.mxu1 %vm1077_vm0, %v3903_v30 }
 0x110   : > { %v3664_v38 = vpop.f32.mrf.mxu1  ;;  %v3991_v39 = vpop.eup %3990  ;;  %2795 = vst [vmem:[%s4675_s22 + $0xa0] sm:$0xff] %v3989_v36  ;;  %4016 = vtanh.f32 %v3536_v37 }
 0x111   : > { %v3993_v40 = vpop.eup %3992  ;;  %2923 = vst [vmem:[%s4675_s22 + $0x4a0] sm:$0xff] %v3991_v39  ;;  %4018 = vtanh.f32 %v3664_v38  ;;  %v1608_v41 = vpop.f32.mrf.mxu0 }
 0x112   : > { %v2120_v42 = vpop.f32.mrf.mxu1  ;;  %v3995_v43 = vpop.eup %3994  ;;  %2798 = vst [vmem:[%s4675_s22 + $0xb8] sm:$0xff] %v3993_v40  ;;  %4020 = vtanh.f32 %v1608_v41 }
 0x113   : > { %v3997_v44 = vpop.eup %3996  ;;  %2926 = vst [vmem:[%s4675_s22 + $0x4b8] sm:$0xff] %v3995_v43  ;;  %4022 = vtanh.f32 %v2120_v42  ;;  %v3537_v45 = vpop.f32.mrf.mxu0 }
 0x114   : > { %v3665_v46 = vpop.f32.mrf.mxu1  ;;  %v3999_v47 = vpop.eup %3998  ;;  %2796 = vst [vmem:[%s4675_s22 + $0xa8] sm:$0xff] %v3997_v44  ;;  %4024 = vtanh.f32 %v3537_v45 }
 0x115   : > { %v4001_v48 = vpop.eup %4000  ;;  %2924 = vst [vmem:[%s4675_s22 + $0x4a8] sm:$0xff] %v3999_v47  ;;  %4026 = vtanh.f32 %v3665_v46  ;;  %v1611_v49 = vpop.f32.mrf.mxu0 }
 0x116   : > { %v2123_v50 = vpop.f32.mrf.mxu1  ;;  %v4003_v51 = vpop.eup %4002  ;;  %2801 = vst [vmem:[%s4675_s22 + $0xd0] sm:$0xff] %v4001_v48  ;;  %4028 = vtanh.f32 %v1611_v49 }
 0x117   : > { %v4005_v52 = vpop.eup %4004  ;;  %2929 = vst [vmem:[%s4675_s22 + $0x4d0] sm:$0xff] %v4003_v51  ;;  %4030 = vtanh.f32 %v2123_v50  ;;  %v3540_v53 = vpop.f32.mrf.mxu0 }
 0x118   : > { %v3668_v54 = vpop.f32.mrf.mxu1  ;;  %v4007_v55 = vpop.eup %4006  ;;  %2799 = vst [vmem:[%s4675_s22 + $0xc0] sm:$0xff] %v4005_v52  ;;  %4032 = vtanh.f32 %v3540_v53 }
 0x119   : > { %v4009_v56 = vpop.eup %4008  ;;  %2927 = vst [vmem:[%s4675_s22 + $0x4c0] sm:$0xff] %v4007_v55  ;;  %4034 = vtanh.f32 %v3668_v54  ;;  %v1624_v57 = vpop.f32.mrf.mxu0 }
 0x11a   : > { %v2136_v58 = vpop.f32.mrf.mxu1  ;;  %v4011_v59 = vpop.eup %4010  ;;  %2802 = vst [vmem:[%s4675_s22 + $0xd8] sm:$0xff] %v4009_v56  ;;  %4036 = vtanh.f32 %v1624_v57 }
 0x11b   : > { %v4013_v60 = vpop.eup %4012  ;;  %2930 = vst [vmem:[%s4675_s22 + $0x4d8] sm:$0xff] %v4011_v59  ;;  %4038 = vtanh.f32 %v2136_v58  ;;  %v3541_v61 = vpop.f32.mrf.mxu0 }
 0x11c   : > { %v3669_v62 = vpop.f32.mrf.mxu1  ;;  %v4015_v63 = vpop.eup %4014  ;;  %2800 = vst [vmem:[%s4675_s22 + $0xc8] sm:$0xff] %v4013_v60  ;;  %4040 = vtanh.f32 %v3541_v61 }
 0x11d   : > { %v4017_v0 = vpop.eup %4016  ;;  %2928 = vst [vmem:[%s4675_s22 + $0x4c8] sm:$0xff] %v4015_v63  ;;  %4042 = vtanh.f32 %v3669_v62  ;;  %v1627_v1 = vpop.f32.mrf.mxu0 }
 0x11e   : > { %v2139_v2 = vpop.f32.mrf.mxu1  ;;  %v4019_v3 = vpop.eup %4018  ;;  %2805 = vst [vmem:[%s4675_s22 + $0xf0] sm:$0xff] %v4017_v0  ;;  %4044 = vtanh.f32 %v1627_v1 }
 0x11f   : > { %v4021_v4 = vpop.eup %4020  ;;  %2933 = vst [vmem:[%s4675_s22 + $0x4f0] sm:$0xff] %v4019_v3  ;;  %4046 = vtanh.f32 %v2139_v2  ;;  %v3544_v5 = vpop.f32.mrf.mxu0 }
 0x120   : > { %v3672_v6 = vpop.f32.mrf.mxu1  ;;  %v4023_v7 = vpop.eup %4022  ;;  %2803 = vst [vmem:[%s4675_s22 + $0xe0] sm:$0xff] %v4021_v4  ;;  %4048 = vtanh.f32 %v3544_v5 }
 0x121   : > { %v4025_v8 = vpop.eup %4024  ;;  %2931 = vst [vmem:[%s4675_s22 + $0x4e0] sm:$0xff] %v4023_v7  ;;  %4050 = vtanh.f32 %v3672_v6  ;;  %v1640_v9 = vpop.f32.mrf.mxu0 }
 0x122   : > { %v2152_v10 = vpop.f32.mrf.mxu1  ;;  %v4027_v11 = vpop.eup %4026  ;;  %2806 = vst [vmem:[%s4675_s22 + $0xf8] sm:$0xff] %v4025_v8  ;;  %4052 = vtanh.f32 %v1640_v9 }
 0x123   : > { %v4029_v12 = vpop.eup %4028  ;;  %2934 = vst [vmem:[%s4675_s22 + $0x4f8] sm:$0xff] %v4027_v11  ;;  %4054 = vtanh.f32 %v2152_v10  ;;  %v3545_v13 = vpop.f32.mrf.mxu0 }
 0x124   : > { %v3673_v14 = vpop.f32.mrf.mxu1  ;;  %v4031_v15 = vpop.eup %4030  ;;  %2804 = vst [vmem:[%s4675_s22 + $0xe8] sm:$0xff] %v4029_v12  ;;  %4056 = vtanh.f32 %v3545_v13 }
 0x125   : > { %v4033_v16 = vpop.eup %4032  ;;  %2932 = vst [vmem:[%s4675_s22 + $0x4e8] sm:$0xff] %v4031_v15  ;;  %4058 = vtanh.f32 %v3673_v14  ;;  %v1643_v17 = vpop.f32.mrf.mxu0 }
 0x126   : > { %v2155_v18 = vpop.f32.mrf.mxu1  ;;  %v4035_v19 = vpop.eup %4034  ;;  %2809 = vst [vmem:[%s4675_s22 + $0x110] sm:$0xff] %v4033_v16  ;;  %4060 = vtanh.f32 %v1643_v17 }
 0x127   : > { %v4037_v20 = vpop.eup %4036  ;;  %2937 = vst [vmem:[%s4675_s22 + $0x510] sm:$0xff] %v4035_v19  ;;  %4062 = vtanh.f32 %v2155_v18  ;;  %v3548_v21 = vpop.f32.mrf.mxu0 }
 0x128   : > { %v3676_v22 = vpop.f32.mrf.mxu1  ;;  %v4039_v23 = vpop.eup %4038  ;;  %2807 = vst [vmem:[%s4675_s22 + $0x100] sm:$0xff] %v4037_v20  ;;  %4064 = vtanh.f32 %v3548_v21 }
 0x129   : > { %v4041_v24 = vpop.eup %4040  ;;  %2935 = vst [vmem:[%s4675_s22 + $0x500] sm:$0xff] %v4039_v23  ;;  %4066 = vtanh.f32 %v3676_v22  ;;  %v1656_v25 = vpop.f32.mrf.mxu0 }
 0x12a   : > { %v2168_v26 = vpop.f32.mrf.mxu1  ;;  %v4043_v27 = vpop.eup %4042  ;;  %2810 = vst [vmem:[%s4675_s22 + $0x118] sm:$0xff] %v4041_v24  ;;  %4068 = vtanh.f32 %v1656_v25 }
 0x12b   : > { %v4045_v28 = vpop.eup %4044  ;;  %2938 = vst [vmem:[%s4675_s22 + $0x518] sm:$0xff] %v4043_v27  ;;  %4070 = vtanh.f32 %v2168_v26  ;;  %v3549_v29 = vpop.f32.mrf.mxu0 }
 0x12c   : > { %v3677_v30 = vpop.f32.mrf.mxu1  ;;  %v4047_v31 = vpop.eup %4046  ;;  %2808 = vst [vmem:[%s4675_s22 + $0x108] sm:$0xff] %v4045_v28  ;;  %4072 = vtanh.f32 %v3549_v29 }
 0x12d   : > { %v4049_v32 = vpop.eup %4048  ;;  %2936 = vst [vmem:[%s4675_s22 + $0x508] sm:$0xff] %v4047_v31  ;;  %4074 = vtanh.f32 %v3677_v30  ;;  %v1659_v33 = vpop.f32.mrf.mxu0 }
 0x12e   : > { %v2171_v34 = vpop.f32.mrf.mxu1  ;;  %v4051_v35 = vpop.eup %4050  ;;  %2813 = vst [vmem:[%s4675_s22 + $0x130] sm:$0xff] %v4049_v32  ;;  %4076 = vtanh.f32 %v1659_v33 }
 0x12f   : > { %v4053_v36 = vpop.eup %4052  ;;  %2941 = vst [vmem:[%s4675_s22 + $0x530] sm:$0xff] %v4051_v35  ;;  %4078 = vtanh.f32 %v2171_v34  ;;  %v3552_v37 = vpop.f32.mrf.mxu0 }
 0x130   : > { %v3680_v38 = vpop.f32.mrf.mxu1  ;;  %v4055_v39 = vpop.eup %4054  ;;  %2811 = vst [vmem:[%s4675_s22 + $0x120] sm:$0xff] %v4053_v36  ;;  %4080 = vtanh.f32 %v3552_v37 }
 0x131   : > { %v4057_v40 = vpop.eup %4056  ;;  %2939 = vst [vmem:[%s4675_s22 + $0x520] sm:$0xff] %v4055_v39  ;;  %4082 = vtanh.f32 %v3680_v38  ;;  %v1672_v41 = vpop.f32.mrf.mxu0 }
 0x132   : > { %v2184_v42 = vpop.f32.mrf.mxu1  ;;  %v4059_v43 = vpop.eup %4058  ;;  %2814 = vst [vmem:[%s4675_s22 + $0x138] sm:$0xff] %v4057_v40  ;;  %4084 = vtanh.f32 %v1672_v41 }
 0x133   : > { %v4061_v44 = vpop.eup %4060  ;;  %2942 = vst [vmem:[%s4675_s22 + $0x538] sm:$0xff] %v4059_v43  ;;  %4086 = vtanh.f32 %v2184_v42  ;;  %v3553_v45 = vpop.f32.mrf.mxu0 }
 0x134   : > { %v3681_v46 = vpop.f32.mrf.mxu1  ;;  %v4063_v47 = vpop.eup %4062  ;;  %2812 = vst [vmem:[%s4675_s22 + $0x128] sm:$0xff] %v4061_v44  ;;  %4088 = vtanh.f32 %v3553_v45 }
 0x135   : > { %v4065_v48 = vpop.eup %4064  ;;  %2940 = vst [vmem:[%s4675_s22 + $0x528] sm:$0xff] %v4063_v47  ;;  %4090 = vtanh.f32 %v3681_v46  ;;  %v1675_v49 = vpop.f32.mrf.mxu0 }
 0x136   : > { %v2187_v50 = vpop.f32.mrf.mxu1  ;;  %v4067_v51 = vpop.eup %4066  ;;  %2817 = vst [vmem:[%s4675_s22 + $0x150] sm:$0xff] %v4065_v48  ;;  %4092 = vtanh.f32 %v1675_v49 }
 0x137   : > { %v4069_v52 = vpop.eup %4068  ;;  %2945 = vst [vmem:[%s4675_s22 + $0x550] sm:$0xff] %v4067_v51  ;;  %4094 = vtanh.f32 %v2187_v50  ;;  %v3556_v53 = vpop.f32.mrf.mxu0 }
 0x138   : > { %v3684_v54 = vpop.f32.mrf.mxu1  ;;  %v4071_v55 = vpop.eup %4070  ;;  %2815 = vst [vmem:[%s4675_s22 + $0x140] sm:$0xff] %v4069_v52  ;;  %4096 = vtanh.f32 %v3556_v53 }
 0x139   : > { %v4073_v56 = vpop.eup %4072  ;;  %2943 = vst [vmem:[%s4675_s22 + $0x540] sm:$0xff] %v4071_v55  ;;  %4098 = vtanh.f32 %v3684_v54  ;;  %v1688_v57 = vpop.f32.mrf.mxu0 }
 0x13a   : > { %v2200_v58 = vpop.f32.mrf.mxu1  ;;  %v4075_v59 = vpop.eup %4074  ;;  %2818 = vst [vmem:[%s4675_s22 + $0x158] sm:$0xff] %v4073_v56  ;;  %4100 = vtanh.f32 %v1688_v57 }
 0x13b   : > { %v4077_v60 = vpop.eup %4076  ;;  %2946 = vst [vmem:[%s4675_s22 + $0x558] sm:$0xff] %v4075_v59  ;;  %4102 = vtanh.f32 %v2200_v58  ;;  %v3557_v61 = vpop.f32.mrf.mxu0 }
 0x13c   : > { %v3685_v62 = vpop.f32.mrf.mxu1  ;;  %v4079_v63 = vpop.eup %4078  ;;  %2816 = vst [vmem:[%s4675_s22 + $0x148] sm:$0xff] %v4077_v60  ;;  %4104 = vtanh.f32 %v3557_v61 }
 0x13d   : > { %v4081_v0 = vpop.eup %4080  ;;  %2944 = vst [vmem:[%s4675_s22 + $0x548] sm:$0xff] %v4079_v63  ;;  %4106 = vtanh.f32 %v3685_v62  ;;  %v1691_v1 = vpop.f32.mrf.mxu0 }
 0x13e   : > { %v2203_v2 = vpop.f32.mrf.mxu1  ;;  %v4083_v3 = vpop.eup %4082  ;;  %2821 = vst [vmem:[%s4675_s22 + $0x170] sm:$0xff] %v4081_v0  ;;  %4108 = vtanh.f32 %v1691_v1 }
 0x13f   : > { %v4085_v4 = vpop.eup %4084  ;;  %2949 = vst [vmem:[%s4675_s22 + $0x570] sm:$0xff] %v4083_v3  ;;  %4110 = vtanh.f32 %v2203_v2  ;;  %v3560_v5 = vpop.f32.mrf.mxu0 }
 0x140   : > { %v3688_v6 = vpop.f32.mrf.mxu1  ;;  %v4087_v7 = vpop.eup %4086  ;;  %2819 = vst [vmem:[%s4675_s22 + $0x160] sm:$0xff] %v4085_v4  ;;  %4112 = vtanh.f32 %v3560_v5 }
 0x141   : > { %v4089_v8 = vpop.eup %4088  ;;  %2947 = vst [vmem:[%s4675_s22 + $0x560] sm:$0xff] %v4087_v7  ;;  %4114 = vtanh.f32 %v3688_v6  ;;  %v1704_v9 = vpop.f32.mrf.mxu0 }
 0x142   : > { %v2216_v10 = vpop.f32.mrf.mxu1  ;;  %v4091_v11 = vpop.eup %4090  ;;  %2822 = vst [vmem:[%s4675_s22 + $0x178] sm:$0xff] %v4089_v8  ;;  %4116 = vtanh.f32 %v1704_v9 }
 0x143   : > { %v4093_v12 = vpop.eup %4092  ;;  %2950 = vst [vmem:[%s4675_s22 + $0x578] sm:$0xff] %v4091_v11  ;;  %4118 = vtanh.f32 %v2216_v10  ;;  %v3561_v13 = vpop.f32.mrf.mxu0 }
 0x144   : > { %v3689_v14 = vpop.f32.mrf.mxu1  ;;  %v4095_v15 = vpop.eup %4094  ;;  %2820 = vst [vmem:[%s4675_s22 + $0x168] sm:$0xff] %v4093_v12  ;;  %4120 = vtanh.f32 %v3561_v13 }
 0x145   : > { %v4097_v16 = vpop.eup %4096  ;;  %2948 = vst [vmem:[%s4675_s22 + $0x568] sm:$0xff] %v4095_v15  ;;  %4122 = vtanh.f32 %v3689_v14  ;;  %v1707_v17 = vpop.f32.mrf.mxu0 }
 0x146   : > { %v2219_v18 = vpop.f32.mrf.mxu1  ;;  %v4099_v19 = vpop.eup %4098  ;;  %2825 = vst [vmem:[%s4675_s22 + $0x190] sm:$0xff] %v4097_v16  ;;  %4124 = vtanh.f32 %v1707_v17 }
 0x147   : > { %v4101_v20 = vpop.eup %4100  ;;  %2953 = vst [vmem:[%s4675_s22 + $0x590] sm:$0xff] %v4099_v19  ;;  %4126 = vtanh.f32 %v2219_v18  ;;  %v3564_v21 = vpop.f32.mrf.mxu0 }
 0x148   : > { %v3692_v22 = vpop.f32.mrf.mxu1  ;;  %v4103_v23 = vpop.eup %4102  ;;  %2823 = vst [vmem:[%s4675_s22 + $0x180] sm:$0xff] %v4101_v20  ;;  %4128 = vtanh.f32 %v3564_v21 }
 0x149   : > { %v4105_v24 = vpop.eup %4104  ;;  %2951 = vst [vmem:[%s4675_s22 + $0x580] sm:$0xff] %v4103_v23  ;;  %4130 = vtanh.f32 %v3692_v22  ;;  %v1720_v25 = vpop.f32.mrf.mxu0 }
 0x14a   : > { %v2232_v26 = vpop.f32.mrf.mxu1  ;;  %v4107_v27 = vpop.eup %4106  ;;  %2826 = vst [vmem:[%s4675_s22 + $0x198] sm:$0xff] %v4105_v24  ;;  %4132 = vtanh.f32 %v1720_v25 }
 0x14b   : > { %v4109_v28 = vpop.eup %4108  ;;  %2954 = vst [vmem:[%s4675_s22 + $0x598] sm:$0xff] %v4107_v27  ;;  %4134 = vtanh.f32 %v2232_v26  ;;  %v3565_v29 = vpop.f32.mrf.mxu0 }
 0x14c   : > { %v3693_v30 = vpop.f32.mrf.mxu1  ;;  %v4111_v31 = vpop.eup %4110  ;;  %2824 = vst [vmem:[%s4675_s22 + $0x188] sm:$0xff] %v4109_v28  ;;  %4136 = vtanh.f32 %v3565_v29 }
 0x14d   : > { %v4113_v32 = vpop.eup %4112  ;;  %2952 = vst [vmem:[%s4675_s22 + $0x588] sm:$0xff] %v4111_v31  ;;  %4138 = vtanh.f32 %v3693_v30  ;;  %v1723_v33 = vpop.f32.mrf.mxu0 }
 0x14e   : > { %v2235_v34 = vpop.f32.mrf.mxu1  ;;  %v4115_v35 = vpop.eup %4114  ;;  %2829 = vst [vmem:[%s4675_s22 + $0x1b0] sm:$0xff] %v4113_v32  ;;  %4140 = vtanh.f32 %v1723_v33 }
 0x14f   : > { %v4117_v36 = vpop.eup %4116  ;;  %2957 = vst [vmem:[%s4675_s22 + $0x5b0] sm:$0xff] %v4115_v35  ;;  %4142 = vtanh.f32 %v2235_v34  ;;  %v3568_v37 = vpop.f32.mrf.mxu0 }
 0x150   : > { %v3696_v38 = vpop.f32.mrf.mxu1  ;;  %v4119_v39 = vpop.eup %4118  ;;  %2827 = vst [vmem:[%s4675_s22 + $0x1a0] sm:$0xff] %v4117_v36  ;;  %4144 = vtanh.f32 %v3568_v37 }
 0x151   : > { %v4121_v40 = vpop.eup %4120  ;;  %2955 = vst [vmem:[%s4675_s22 + $0x5a0] sm:$0xff] %v4119_v39  ;;  %4146 = vtanh.f32 %v3696_v38  ;;  %v1736_v41 = vpop.f32.mrf.mxu0 }
 0x152   : > { %v2248_v42 = vpop.f32.mrf.mxu1  ;;  %v4123_v43 = vpop.eup %4122  ;;  %2830 = vst [vmem:[%s4675_s22 + $0x1b8] sm:$0xff] %v4121_v40  ;;  %4148 = vtanh.f32 %v1736_v41 }
 0x153   : > { %v4125_v44 = vpop.eup %4124  ;;  %2958 = vst [vmem:[%s4675_s22 + $0x5b8] sm:$0xff] %v4123_v43  ;;  %4150 = vtanh.f32 %v2248_v42  ;;  %v3569_v45 = vpop.f32.mrf.mxu0 }
 0x154   : > { %v3697_v46 = vpop.f32.mrf.mxu1  ;;  %v4127_v47 = vpop.eup %4126  ;;  %2828 = vst [vmem:[%s4675_s22 + $0x1a8] sm:$0xff] %v4125_v44  ;;  %4152 = vtanh.f32 %v3569_v45 }
 0x155   : > { %v4129_v48 = vpop.eup %4128  ;;  %2956 = vst [vmem:[%s4675_s22 + $0x5a8] sm:$0xff] %v4127_v47  ;;  %4154 = vtanh.f32 %v3697_v46  ;;  %v1739_v49 = vpop.f32.mrf.mxu0 }
 0x156   : > { %v2251_v50 = vpop.f32.mrf.mxu1  ;;  %v4131_v51 = vpop.eup %4130  ;;  %2833 = vst [vmem:[%s4675_s22 + $0x1d0] sm:$0xff] %v4129_v48  ;;  %4156 = vtanh.f32 %v1739_v49 }
 0x157   : > { %v4133_v52 = vpop.eup %4132  ;;  %2961 = vst [vmem:[%s4675_s22 + $0x5d0] sm:$0xff] %v4131_v51  ;;  %4158 = vtanh.f32 %v2251_v50  ;;  %v3572_v53 = vpop.f32.mrf.mxu0 }
 0x158   : > { %v3700_v54 = vpop.f32.mrf.mxu1  ;;  %v4135_v55 = vpop.eup %4134  ;;  %2831 = vst [vmem:[%s4675_s22 + $0x1c0] sm:$0xff] %v4133_v52  ;;  %4160 = vtanh.f32 %v3572_v53 }
 0x159   : > { %v4137_v56 = vpop.eup %4136  ;;  %2959 = vst [vmem:[%s4675_s22 + $0x5c0] sm:$0xff] %v4135_v55  ;;  %4162 = vtanh.f32 %v3700_v54  ;;  %v1752_v57 = vpop.f32.mrf.mxu0 }
 0x15a   : > { %v2264_v58 = vpop.f32.mrf.mxu1  ;;  %v4139_v59 = vpop.eup %4138  ;;  %2834 = vst [vmem:[%s4675_s22 + $0x1d8] sm:$0xff] %v4137_v56  ;;  %4164 = vtanh.f32 %v1752_v57 }
 0x15b   : > { %v4141_v60 = vpop.eup %4140  ;;  %2962 = vst [vmem:[%s4675_s22 + $0x5d8] sm:$0xff] %v4139_v59  ;;  %4166 = vtanh.f32 %v2264_v58  ;;  %v3573_v61 = vpop.f32.mrf.mxu0 }
 0x15c   : > { %v3701_v62 = vpop.f32.mrf.mxu1  ;;  %v4143_v63 = vpop.eup %4142  ;;  %2832 = vst [vmem:[%s4675_s22 + $0x1c8] sm:$0xff] %v4141_v60  ;;  %4168 = vtanh.f32 %v3573_v61 }
 0x15d   : > { %v4145_v0 = vpop.eup %4144  ;;  %2960 = vst [vmem:[%s4675_s22 + $0x5c8] sm:$0xff] %v4143_v63  ;;  %4170 = vtanh.f32 %v3701_v62  ;;  %v1755_v1 = vpop.f32.mrf.mxu0 }
 0x15e   : > { %v2267_v2 = vpop.f32.mrf.mxu1  ;;  %v4147_v3 = vpop.eup %4146  ;;  %2837 = vst [vmem:[%s4675_s22 + $0x1f0] sm:$0xff] %v4145_v0  ;;  %4172 = vtanh.f32 %v1755_v1 }
 0x15f   : > { %v4149_v4 = vpop.eup %4148  ;;  %2965 = vst [vmem:[%s4675_s22 + $0x5f0] sm:$0xff] %v4147_v3  ;;  %4174 = vtanh.f32 %v2267_v2  ;;  %v3576_v5 = vpop.f32.mrf.mxu0 }
 0x160   : > { %v3704_v6 = vpop.f32.mrf.mxu1  ;;  %v4151_v7 = vpop.eup %4150  ;;  %2835 = vst [vmem:[%s4675_s22 + $0x1e0] sm:$0xff] %v4149_v4  ;;  %4176 = vtanh.f32 %v3576_v5 }
 0x161   : > { %v4153_v8 = vpop.eup %4152  ;;  %2963 = vst [vmem:[%s4675_s22 + $0x5e0] sm:$0xff] %v4151_v7  ;;  %4178 = vtanh.f32 %v3704_v6  ;;  %v1768_v9 = vpop.f32.mrf.mxu0 }
 0x162   : > { %v2280_v10 = vpop.f32.mrf.mxu1  ;;  %v4155_v11 = vpop.eup %4154  ;;  %2838 = vst [vmem:[%s4675_s22 + $0x1f8] sm:$0xff] %v4153_v8  ;;  %4180 = vtanh.f32 %v1768_v9 }
 0x163   : > { %v4157_v12 = vpop.eup %4156  ;;  %2966 = vst [vmem:[%s4675_s22 + $0x5f8] sm:$0xff] %v4155_v11  ;;  %4182 = vtanh.f32 %v2280_v10  ;;  %v3577_v13 = vpop.f32.mrf.mxu0 }
 0x164   : > { %v3705_v14 = vpop.f32.mrf.mxu1  ;;  %v4159_v15 = vpop.eup %4158  ;;  %2836 = vst [vmem:[%s4675_s22 + $0x1e8] sm:$0xff] %v4157_v12  ;;  %4184 = vtanh.f32 %v3577_v13 }
 0x165   : > { %v4161_v16 = vpop.eup %4160  ;;  %2964 = vst [vmem:[%s4675_s22 + $0x5e8] sm:$0xff] %v4159_v15  ;;  %4186 = vtanh.f32 %v3705_v14  ;;  %v1771_v17 = vpop.f32.mrf.mxu0 }
 0x166   : > { %v2283_v18 = vpop.f32.mrf.mxu1  ;;  %v4163_v19 = vpop.eup %4162  ;;  %2841 = vst [vmem:[%s4675_s22 + $0x210] sm:$0xff] %v4161_v16  ;;  %4188 = vtanh.f32 %v1771_v17 }
 0x167   : > { %v4165_v20 = vpop.eup %4164  ;;  %2969 = vst [vmem:[%s4675_s22 + $0x610] sm:$0xff] %v4163_v19  ;;  %4190 = vtanh.f32 %v2283_v18  ;;  %v3580_v21 = vpop.f32.mrf.mxu0 }
 0x168   : > { %v3708_v22 = vpop.f32.mrf.mxu1  ;;  %v4167_v23 = vpop.eup %4166  ;;  %2839 = vst [vmem:[%s4675_s22 + $0x200] sm:$0xff] %v4165_v20  ;;  %4192 = vtanh.f32 %v3580_v21 }
 0x169   : > { %v4169_v24 = vpop.eup %4168  ;;  %2967 = vst [vmem:[%s4675_s22 + $0x600] sm:$0xff] %v4167_v23  ;;  %4194 = vtanh.f32 %v3708_v22  ;;  %v1784_v25 = vpop.f32.mrf.mxu0 }
 0x16a   : > { %v2296_v26 = vpop.f32.mrf.mxu1  ;;  %v4171_v27 = vpop.eup %4170  ;;  %2842 = vst [vmem:[%s4675_s22 + $0x218] sm:$0xff] %v4169_v24  ;;  %4196 = vtanh.f32 %v1784_v25 }
 0x16b   : > { %v4173_v28 = vpop.eup %4172  ;;  %2970 = vst [vmem:[%s4675_s22 + $0x618] sm:$0xff] %v4171_v27  ;;  %4198 = vtanh.f32 %v2296_v26  ;;  %v3581_v29 = vpop.f32.mrf.mxu0 }
 0x16c   : > { %v3709_v30 = vpop.f32.mrf.mxu1  ;;  %v4175_v31 = vpop.eup %4174  ;;  %2840 = vst [vmem:[%s4675_s22 + $0x208] sm:$0xff] %v4173_v28  ;;  %4200 = vtanh.f32 %v3581_v29 }
 0x16d   : > { %v4177_v32 = vpop.eup %4176  ;;  %2968 = vst [vmem:[%s4675_s22 + $0x608] sm:$0xff] %v4175_v31  ;;  %4202 = vtanh.f32 %v3709_v30  ;;  %v1787_v33 = vpop.f32.mrf.mxu0 }
 0x16e   : > { %v2299_v34 = vpop.f32.mrf.mxu1  ;;  %v4179_v35 = vpop.eup %4178  ;;  %2845 = vst [vmem:[%s4675_s22 + $0x230] sm:$0xff] %v4177_v32  ;;  %4204 = vtanh.f32 %v1787_v33 }
 0x16f   : > { %v4181_v36 = vpop.eup %4180  ;;  %2973 = vst [vmem:[%s4675_s22 + $0x630] sm:$0xff] %v4179_v35  ;;  %4206 = vtanh.f32 %v2299_v34  ;;  %v3584_v37 = vpop.f32.mrf.mxu0 }
 0x170   : > { %v3712_v38 = vpop.f32.mrf.mxu1  ;;  %v4183_v39 = vpop.eup %4182  ;;  %2843 = vst [vmem:[%s4675_s22 + $0x220] sm:$0xff] %v4181_v36  ;;  %4208 = vtanh.f32 %v3584_v37 }
 0x171   : > { %v4185_v40 = vpop.eup %4184  ;;  %2971 = vst [vmem:[%s4675_s22 + $0x620] sm:$0xff] %v4183_v39  ;;  %4210 = vtanh.f32 %v3712_v38  ;;  %v1800_v41 = vpop.f32.mrf.mxu0 }
 0x172   : > { %v2312_v42 = vpop.f32.mrf.mxu1  ;;  %v4187_v43 = vpop.eup %4186  ;;  %2846 = vst [vmem:[%s4675_s22 + $0x238] sm:$0xff] %v4185_v40  ;;  %4212 = vtanh.f32 %v1800_v41 }
 0x173   : > { %v4189_v44 = vpop.eup %4188  ;;  %2974 = vst [vmem:[%s4675_s22 + $0x638] sm:$0xff] %v4187_v43  ;;  %4214 = vtanh.f32 %v2312_v42  ;;  %v3585_v45 = vpop.f32.mrf.mxu0 }
 0x174   : > { %v3713_v46 = vpop.f32.mrf.mxu1  ;;  %v4191_v47 = vpop.eup %4190  ;;  %2844 = vst [vmem:[%s4675_s22 + $0x228] sm:$0xff] %v4189_v44  ;;  %4216 = vtanh.f32 %v3585_v45 }
 0x175   : > { %v4193_v48 = vpop.eup %4192  ;;  %2972 = vst [vmem:[%s4675_s22 + $0x628] sm:$0xff] %v4191_v47  ;;  %4218 = vtanh.f32 %v3713_v46  ;;  %v1803_v49 = vpop.f32.mrf.mxu0 }
 0x176   : > { %v2315_v50 = vpop.f32.mrf.mxu1  ;;  %v4195_v51 = vpop.eup %4194  ;;  %2849 = vst [vmem:[%s4675_s22 + $0x250] sm:$0xff] %v4193_v48  ;;  %4220 = vtanh.f32 %v1803_v49 }
 0x177   : > { %v4197_v52 = vpop.eup %4196  ;;  %2977 = vst [vmem:[%s4675_s22 + $0x650] sm:$0xff] %v4195_v51  ;;  %4222 = vtanh.f32 %v2315_v50  ;;  %v3588_v53 = vpop.f32.mrf.mxu0 }
 0x178   : > { %v3716_v54 = vpop.f32.mrf.mxu1  ;;  %v4199_v55 = vpop.eup %4198  ;;  %2847 = vst [vmem:[%s4675_s22 + $0x240] sm:$0xff] %v4197_v52  ;;  %4224 = vtanh.f32 %v3588_v53 }
 0x179   : > { %v4201_v56 = vpop.eup %4200  ;;  %2975 = vst [vmem:[%s4675_s22 + $0x640] sm:$0xff] %v4199_v55  ;;  %4226 = vtanh.f32 %v3716_v54  ;;  %v1816_v57 = vpop.f32.mrf.mxu0 }
 0x17a   : > { %v2328_v58 = vpop.f32.mrf.mxu1  ;;  %v4203_v59 = vpop.eup %4202  ;;  %2850 = vst [vmem:[%s4675_s22 + $0x258] sm:$0xff] %v4201_v56  ;;  %4228 = vtanh.f32 %v1816_v57 }
 0x17b   : > { %v4205_v60 = vpop.eup %4204  ;;  %2978 = vst [vmem:[%s4675_s22 + $0x658] sm:$0xff] %v4203_v59  ;;  %4230 = vtanh.f32 %v2328_v58  ;;  %v3589_v61 = vpop.f32.mrf.mxu0 }
 0x17c   : > { %v3717_v62 = vpop.f32.mrf.mxu1  ;;  %v4207_v63 = vpop.eup %4206  ;;  %2848 = vst [vmem:[%s4675_s22 + $0x248] sm:$0xff] %v4205_v60  ;;  %4232 = vtanh.f32 %v3589_v61 }
 0x17d   : > { %v4209_v0 = vpop.eup %4208  ;;  %2976 = vst [vmem:[%s4675_s22 + $0x648] sm:$0xff] %v4207_v63  ;;  %4234 = vtanh.f32 %v3717_v62  ;;  %v1819_v1 = vpop.f32.mrf.mxu0 }
 0x17e   : > { %v2331_v2 = vpop.f32.mrf.mxu1  ;;  %v4211_v3 = vpop.eup %4210  ;;  %2853 = vst [vmem:[%s4675_s22 + $0x270] sm:$0xff] %v4209_v0  ;;  %4236 = vtanh.f32 %v1819_v1 }
 0x17f   : > { %v4213_v4 = vpop.eup %4212  ;;  %2981 = vst [vmem:[%s4675_s22 + $0x670] sm:$0xff] %v4211_v3  ;;  %4238 = vtanh.f32 %v2331_v2  ;;  %v3592_v5 = vpop.f32.mrf.mxu0 }
 0x180   : > { %v3720_v6 = vpop.f32.mrf.mxu1  ;;  %v4215_v7 = vpop.eup %4214  ;;  %2851 = vst [vmem:[%s4675_s22 + $0x260] sm:$0xff] %v4213_v4  ;;  %4240 = vtanh.f32 %v3592_v5 }
 0x181   : > { %v4217_v8 = vpop.eup %4216  ;;  %2979 = vst [vmem:[%s4675_s22 + $0x660] sm:$0xff] %v4215_v7  ;;  %4242 = vtanh.f32 %v3720_v6  ;;  %v1832_v9 = vpop.f32.mrf.mxu0 }
 0x182   : > { %v2344_v10 = vpop.f32.mrf.mxu1  ;;  %v4219_v11 = vpop.eup %4218  ;;  %2854 = vst [vmem:[%s4675_s22 + $0x278] sm:$0xff] %v4217_v8  ;;  %4244 = vtanh.f32 %v1832_v9 }
 0x183   : > { %v4221_v12 = vpop.eup %4220  ;;  %2982 = vst [vmem:[%s4675_s22 + $0x678] sm:$0xff] %v4219_v11  ;;  %4246 = vtanh.f32 %v2344_v10  ;;  %v3593_v13 = vpop.f32.mrf.mxu0 }
 0x184   : > { %v3721_v14 = vpop.f32.mrf.mxu1  ;;  %v4223_v15 = vpop.eup %4222  ;;  %2852 = vst [vmem:[%s4675_s22 + $0x268] sm:$0xff] %v4221_v12  ;;  %4248 = vtanh.f32 %v3593_v13 }
 0x185   : > { %v4225_v16 = vpop.eup %4224  ;;  %2980 = vst [vmem:[%s4675_s22 + $0x668] sm:$0xff] %v4223_v15  ;;  %4250 = vtanh.f32 %v3721_v14  ;;  %v1835_v17 = vpop.f32.mrf.mxu0 }
 0x186   : > { %v2347_v18 = vpop.f32.mrf.mxu1  ;;  %v4227_v19 = vpop.eup %4226  ;;  %2857 = vst [vmem:[%s4675_s22 + $0x290] sm:$0xff] %v4225_v16  ;;  %4252 = vtanh.f32 %v1835_v17 }
 0x187   : > { %v4229_v20 = vpop.eup %4228  ;;  %2985 = vst [vmem:[%s4675_s22 + $0x690] sm:$0xff] %v4227_v19  ;;  %4254 = vtanh.f32 %v2347_v18  ;;  %v3596_v21 = vpop.f32.mrf.mxu0 }
 0x188   : > { %v3724_v22 = vpop.f32.mrf.mxu1  ;;  %v4231_v23 = vpop.eup %4230  ;;  %2855 = vst [vmem:[%s4675_s22 + $0x280] sm:$0xff] %v4229_v20  ;;  %4256 = vtanh.f32 %v3596_v21 }
 0x189   : > { %v4233_v24 = vpop.eup %4232  ;;  %2983 = vst [vmem:[%s4675_s22 + $0x680] sm:$0xff] %v4231_v23  ;;  %4258 = vtanh.f32 %v3724_v22  ;;  %v1848_v25 = vpop.f32.mrf.mxu0 }
 0x18a   : > { %v2360_v26 = vpop.f32.mrf.mxu1  ;;  %v4235_v27 = vpop.eup %4234  ;;  %2858 = vst [vmem:[%s4675_s22 + $0x298] sm:$0xff] %v4233_v24  ;;  %4260 = vtanh.f32 %v1848_v25 }
 0x18b   : > { %v4237_v28 = vpop.eup %4236  ;;  %2986 = vst [vmem:[%s4675_s22 + $0x698] sm:$0xff] %v4235_v27  ;;  %4262 = vtanh.f32 %v2360_v26  ;;  %v3597_v29 = vpop.f32.mrf.mxu0 }
 0x18c   : > { %v3725_v30 = vpop.f32.mrf.mxu1  ;;  %v4239_v31 = vpop.eup %4238  ;;  %2856 = vst [vmem:[%s4675_s22 + $0x288] sm:$0xff] %v4237_v28  ;;  %4264 = vtanh.f32 %v3597_v29 }
 0x18d   : > { %v4241_v32 = vpop.eup %4240  ;;  %2984 = vst [vmem:[%s4675_s22 + $0x688] sm:$0xff] %v4239_v31  ;;  %4266 = vtanh.f32 %v3725_v30  ;;  %v1851_v33 = vpop.f32.mrf.mxu0 }
 0x18e   : > { %v2363_v34 = vpop.f32.mrf.mxu1  ;;  %v4243_v35 = vpop.eup %4242  ;;  %2861 = vst [vmem:[%s4675_s22 + $0x2b0] sm:$0xff] %v4241_v32  ;;  %4268 = vtanh.f32 %v1851_v33 }
 0x18f   : > { %v4245_v36 = vpop.eup %4244  ;;  %2989 = vst [vmem:[%s4675_s22 + $0x6b0] sm:$0xff] %v4243_v35  ;;  %4270 = vtanh.f32 %v2363_v34  ;;  %v3600_v37 = vpop.f32.mrf.mxu0 }
 0x190   : > { %v3728_v38 = vpop.f32.mrf.mxu1  ;;  %v4247_v39 = vpop.eup %4246  ;;  %2859 = vst [vmem:[%s4675_s22 + $0x2a0] sm:$0xff] %v4245_v36  ;;  %4272 = vtanh.f32 %v3600_v37 }
 0x191   : > { %v4249_v40 = vpop.eup %4248  ;;  %2987 = vst [vmem:[%s4675_s22 + $0x6a0] sm:$0xff] %v4247_v39  ;;  %4274 = vtanh.f32 %v3728_v38  ;;  %v1864_v41 = vpop.f32.mrf.mxu0 }
 0x192   : > { %v2376_v42 = vpop.f32.mrf.mxu1  ;;  %v4251_v43 = vpop.eup %4250  ;;  %2862 = vst [vmem:[%s4675_s22 + $0x2b8] sm:$0xff] %v4249_v40  ;;  %4276 = vtanh.f32 %v1864_v41 }
 0x193   : > { %v4253_v44 = vpop.eup %4252  ;;  %2990 = vst [vmem:[%s4675_s22 + $0x6b8] sm:$0xff] %v4251_v43  ;;  %4278 = vtanh.f32 %v2376_v42  ;;  %v3601_v45 = vpop.f32.mrf.mxu0 }
 0x194   : > { %v3729_v46 = vpop.f32.mrf.mxu1  ;;  %v4255_v47 = vpop.eup %4254  ;;  %2860 = vst [vmem:[%s4675_s22 + $0x2a8] sm:$0xff] %v4253_v44  ;;  %4280 = vtanh.f32 %v3601_v45 }
 0x195   : > { %v4257_v48 = vpop.eup %4256  ;;  %2988 = vst [vmem:[%s4675_s22 + $0x6a8] sm:$0xff] %v4255_v47  ;;  %4282 = vtanh.f32 %v3729_v46  ;;  %v1867_v49 = vpop.f32.mrf.mxu0 }
 0x196   : > { %v2379_v50 = vpop.f32.mrf.mxu1  ;;  %v4259_v51 = vpop.eup %4258  ;;  %2865 = vst [vmem:[%s4675_s22 + $0x2d0] sm:$0xff] %v4257_v48  ;;  %4284 = vtanh.f32 %v1867_v49 }
 0x197   : > { %v4261_v52 = vpop.eup %4260  ;;  %2993 = vst [vmem:[%s4675_s22 + $0x6d0] sm:$0xff] %v4259_v51  ;;  %4286 = vtanh.f32 %v2379_v50  ;;  %v3604_v53 = vpop.f32.mrf.mxu0 }
 0x198   : > { %v3732_v54 = vpop.f32.mrf.mxu1  ;;  %v4263_v55 = vpop.eup %4262  ;;  %2863 = vst [vmem:[%s4675_s22 + $0x2c0] sm:$0xff] %v4261_v52  ;;  %4288 = vtanh.f32 %v3604_v53 }
 0x199   : > { %v4265_v56 = vpop.eup %4264  ;;  %2991 = vst [vmem:[%s4675_s22 + $0x6c0] sm:$0xff] %v4263_v55  ;;  %4290 = vtanh.f32 %v3732_v54  ;;  %v1880_v57 = vpop.f32.mrf.mxu0 }
 0x19a   : > { %v2392_v58 = vpop.f32.mrf.mxu1  ;;  %v4267_v59 = vpop.eup %4266  ;;  %2866 = vst [vmem:[%s4675_s22 + $0x2d8] sm:$0xff] %v4265_v56  ;;  %4292 = vtanh.f32 %v1880_v57 }
 0x19b   : > { %v4269_v60 = vpop.eup %4268  ;;  %2994 = vst [vmem:[%s4675_s22 + $0x6d8] sm:$0xff] %v4267_v59  ;;  %4294 = vtanh.f32 %v2392_v58  ;;  %v3605_v61 = vpop.f32.mrf.mxu0 }
 0x19c   : > { %v3733_v62 = vpop.f32.mrf.mxu1  ;;  %v4271_v63 = vpop.eup %4270  ;;  %2864 = vst [vmem:[%s4675_s22 + $0x2c8] sm:$0xff] %v4269_v60  ;;  %4296 = vtanh.f32 %v3605_v61 }
 0x19d   : > { %v4273_v0 = vpop.eup %4272  ;;  %2992 = vst [vmem:[%s4675_s22 + $0x6c8] sm:$0xff] %v4271_v63  ;;  %4298 = vtanh.f32 %v3733_v62  ;;  %v1883_v1 = vpop.f32.mrf.mxu0 }
 0x19e   : > { %v2395_v2 = vpop.f32.mrf.mxu1  ;;  %v4275_v3 = vpop.eup %4274  ;;  %2869 = vst [vmem:[%s4675_s22 + $0x2f0] sm:$0xff] %v4273_v0  ;;  %4300 = vtanh.f32 %v1883_v1 }
 0x19f   : > { %v4277_v4 = vpop.eup %4276  ;;  %2997 = vst [vmem:[%s4675_s22 + $0x6f0] sm:$0xff] %v4275_v3  ;;  %4302 = vtanh.f32 %v2395_v2  ;;  %v3608_v5 = vpop.f32.mrf.mxu0 }
 0x1a0   : > { %v3736_v6 = vpop.f32.mrf.mxu1  ;;  %v4279_v7 = vpop.eup %4278  ;;  %2867 = vst [vmem:[%s4675_s22 + $0x2e0] sm:$0xff] %v4277_v4  ;;  %4304 = vtanh.f32 %v3608_v5 }
 0x1a1   : > { %v4281_v8 = vpop.eup %4280  ;;  %2995 = vst [vmem:[%s4675_s22 + $0x6e0] sm:$0xff] %v4279_v7  ;;  %4306 = vtanh.f32 %v3736_v6  ;;  %v1896_v9 = vpop.f32.mrf.mxu0 }
 0x1a2   : > { %v2408_v10 = vpop.f32.mrf.mxu1  ;;  %v4283_v11 = vpop.eup %4282  ;;  %2870 = vst [vmem:[%s4675_s22 + $0x2f8] sm:$0xff] %v4281_v8  ;;  %4308 = vtanh.f32 %v1896_v9 }
 0x1a3   : > { %v4285_v12 = vpop.eup %4284  ;;  %2998 = vst [vmem:[%s4675_s22 + $0x6f8] sm:$0xff] %v4283_v11  ;;  %4310 = vtanh.f32 %v2408_v10  ;;  %v3609_v13 = vpop.f32.mrf.mxu0 }
 0x1a4   : > { %v3737_v14 = vpop.f32.mrf.mxu1  ;;  %v4287_v15 = vpop.eup %4286  ;;  %2868 = vst [vmem:[%s4675_s22 + $0x2e8] sm:$0xff] %v4285_v12  ;;  %4312 = vtanh.f32 %v3609_v13 }
 0x1a5   : > { %v4289_v16 = vpop.eup %4288  ;;  %2996 = vst [vmem:[%s4675_s22 + $0x6e8] sm:$0xff] %v4287_v15  ;;  %4314 = vtanh.f32 %v3737_v14  ;;  %v1899_v17 = vpop.f32.mrf.mxu0 }
 0x1a6   : > { %v2411_v18 = vpop.f32.mrf.mxu1  ;;  %v4291_v19 = vpop.eup %4290  ;;  %2873 = vst [vmem:[%s4675_s22 + $0x310] sm:$0xff] %v4289_v16  ;;  %4316 = vtanh.f32 %v1899_v17 }
 0x1a7   : > { %v4293_v20 = vpop.eup %4292  ;;  %3001 = vst [vmem:[%s4675_s22 + $0x710] sm:$0xff] %v4291_v19  ;;  %4318 = vtanh.f32 %v2411_v18  ;;  %v3612_v21 = vpop.f32.mrf.mxu0 }
 0x1a8   : > { %v3740_v22 = vpop.f32.mrf.mxu1  ;;  %v4295_v23 = vpop.eup %4294  ;;  %2871 = vst [vmem:[%s4675_s22 + $0x300] sm:$0xff] %v4293_v20  ;;  %4320 = vtanh.f32 %v3612_v21 }
 0x1a9   : > { %v4297_v24 = vpop.eup %4296  ;;  %2999 = vst [vmem:[%s4675_s22 + $0x700] sm:$0xff] %v4295_v23  ;;  %4322 = vtanh.f32 %v3740_v22  ;;  %v1912_v25 = vpop.f32.mrf.mxu0 }
 0x1aa   : > { %v2424_v26 = vpop.f32.mrf.mxu1  ;;  %v4299_v27 = vpop.eup %4298  ;;  %2874 = vst [vmem:[%s4675_s22 + $0x318] sm:$0xff] %v4297_v24  ;;  %4324 = vtanh.f32 %v1912_v25 }
 0x1ab   : > { %v4301_v28 = vpop.eup %4300  ;;  %3002 = vst [vmem:[%s4675_s22 + $0x718] sm:$0xff] %v4299_v27  ;;  %4326 = vtanh.f32 %v2424_v26  ;;  %v3613_v29 = vpop.f32.mrf.mxu0 }
 0x1ac   : > { %v3741_v30 = vpop.f32.mrf.mxu1  ;;  %v4303_v31 = vpop.eup %4302  ;;  %2872 = vst [vmem:[%s4675_s22 + $0x308] sm:$0xff] %v4301_v28  ;;  %4328 = vtanh.f32 %v3613_v29 }
 0x1ad   : > { %v4305_v32 = vpop.eup %4304  ;;  %3000 = vst [vmem:[%s4675_s22 + $0x708] sm:$0xff] %v4303_v31  ;;  %4330 = vtanh.f32 %v3741_v30  ;;  %v1915_v33 = vpop.f32.mrf.mxu0 }
 0x1ae   : > { %v2427_v34 = vpop.f32.mrf.mxu1  ;;  %v4307_v35 = vpop.eup %4306  ;;  %2877 = vst [vmem:[%s4675_s22 + $0x330] sm:$0xff] %v4305_v32  ;;  %4332 = vtanh.f32 %v1915_v33 }
 0x1af   : > { %v4309_v36 = vpop.eup %4308  ;;  %3005 = vst [vmem:[%s4675_s22 + $0x730] sm:$0xff] %v4307_v35  ;;  %4334 = vtanh.f32 %v2427_v34  ;;  %v3616_v37 = vpop.f32.mrf.mxu0 }
 0x1b0   : > { %v3744_v38 = vpop.f32.mrf.mxu1  ;;  %v4311_v39 = vpop.eup %4310  ;;  %2875 = vst [vmem:[%s4675_s22 + $0x320] sm:$0xff] %v4309_v36  ;;  %4336 = vtanh.f32 %v3616_v37 }
 0x1b1   : > { %v4313_v40 = vpop.eup %4312  ;;  %3003 = vst [vmem:[%s4675_s22 + $0x720] sm:$0xff] %v4311_v39  ;;  %4338 = vtanh.f32 %v3744_v38  ;;  %v1928_v41 = vpop.f32.mrf.mxu0 }
 0x1b2   : > { %v2440_v42 = vpop.f32.mrf.mxu1  ;;  %v4315_v43 = vpop.eup %4314  ;;  %2878 = vst [vmem:[%s4675_s22 + $0x338] sm:$0xff] %v4313_v40  ;;  %4340 = vtanh.f32 %v1928_v41 }
 0x1b3   : > { %v4317_v44 = vpop.eup %4316  ;;  %3006 = vst [vmem:[%s4675_s22 + $0x738] sm:$0xff] %v4315_v43  ;;  %4342 = vtanh.f32 %v2440_v42  ;;  %v3617_v45 = vpop.f32.mrf.mxu0 }
 0x1b4   : > { %v3745_v46 = vpop.f32.mrf.mxu1  ;;  %v4319_v47 = vpop.eup %4318  ;;  %2876 = vst [vmem:[%s4675_s22 + $0x328] sm:$0xff] %v4317_v44  ;;  %4344 = vtanh.f32 %v3617_v45 }
 0x1b5   : > { %v4321_v48 = vpop.eup %4320  ;;  %3004 = vst [vmem:[%s4675_s22 + $0x728] sm:$0xff] %v4319_v47  ;;  %4346 = vtanh.f32 %v3745_v46  ;;  %v1931_v49 = vpop.f32.mrf.mxu0 }
 0x1b6   : > { %v2443_v50 = vpop.f32.mrf.mxu1  ;;  %v4323_v51 = vpop.eup %4322  ;;  %2881 = vst [vmem:[%s4675_s22 + $0x350] sm:$0xff] %v4321_v48  ;;  %4348 = vtanh.f32 %v1931_v49 }
 0x1b7   : > { %v4325_v52 = vpop.eup %4324  ;;  %3009 = vst [vmem:[%s4675_s22 + $0x750] sm:$0xff] %v4323_v51  ;;  %4350 = vtanh.f32 %v2443_v50  ;;  %v3620_v53 = vpop.f32.mrf.mxu0 }
 0x1b8   : > { %v3748_v54 = vpop.f32.mrf.mxu1  ;;  %v4327_v55 = vpop.eup %4326  ;;  %2879 = vst [vmem:[%s4675_s22 + $0x340] sm:$0xff] %v4325_v52  ;;  %4352 = vtanh.f32 %v3620_v53 }
 0x1b9   : > { %v4329_v56 = vpop.eup %4328  ;;  %3007 = vst [vmem:[%s4675_s22 + $0x740] sm:$0xff] %v4327_v55  ;;  %4354 = vtanh.f32 %v3748_v54  ;;  %v1944_v57 = vpop.f32.mrf.mxu0 }
 0x1ba   : > { %v2456_v58 = vpop.f32.mrf.mxu1  ;;  %v4331_v59 = vpop.eup %4330  ;;  %2882 = vst [vmem:[%s4675_s22 + $0x358] sm:$0xff] %v4329_v56  ;;  %4356 = vtanh.f32 %v1944_v57 }
 0x1bb   : > { %v4333_v60 = vpop.eup %4332  ;;  %3010 = vst [vmem:[%s4675_s22 + $0x758] sm:$0xff] %v4331_v59  ;;  %4358 = vtanh.f32 %v2456_v58  ;;  %v3621_v61 = vpop.f32.mrf.mxu0 }
 0x1bc   : > { %v3749_v62 = vpop.f32.mrf.mxu1  ;;  %v4335_v63 = vpop.eup %4334  ;;  %2880 = vst [vmem:[%s4675_s22 + $0x348] sm:$0xff] %v4333_v60  ;;  %4360 = vtanh.f32 %v3621_v61 }
 0x1bd   : > { %v4337_v0 = vpop.eup %4336  ;;  %3008 = vst [vmem:[%s4675_s22 + $0x748] sm:$0xff] %v4335_v63  ;;  %4362 = vtanh.f32 %v3749_v62  ;;  %v1947_v1 = vpop.f32.mrf.mxu0 }
 0x1be   : > { %v2459_v2 = vpop.f32.mrf.mxu1  ;;  %v4339_v3 = vpop.eup %4338  ;;  %2885 = vst [vmem:[%s4675_s22 + $0x370] sm:$0xff] %v4337_v0  ;;  %4364 = vtanh.f32 %v1947_v1 }
 0x1bf   : > { %v4341_v4 = vpop.eup %4340  ;;  %3013 = vst [vmem:[%s4675_s22 + $0x770] sm:$0xff] %v4339_v3  ;;  %4366 = vtanh.f32 %v2459_v2  ;;  %v3624_v5 = vpop.f32.mrf.mxu0 }
 0x1c0   : > { %v3752_v6 = vpop.f32.mrf.mxu1  ;;  %v4343_v7 = vpop.eup %4342  ;;  %2883 = vst [vmem:[%s4675_s22 + $0x360] sm:$0xff] %v4341_v4  ;;  %4368 = vtanh.f32 %v3624_v5 }
 0x1c1   : > { %v4345_v8 = vpop.eup %4344  ;;  %3011 = vst [vmem:[%s4675_s22 + $0x760] sm:$0xff] %v4343_v7  ;;  %4370 = vtanh.f32 %v3752_v6  ;;  %v1960_v9 = vpop.f32.mrf.mxu0 }
 0x1c2   : > { %v2472_v10 = vpop.f32.mrf.mxu1  ;;  %v4347_v11 = vpop.eup %4346  ;;  %2886 = vst [vmem:[%s4675_s22 + $0x378] sm:$0xff] %v4345_v8  ;;  %4372 = vtanh.f32 %v1960_v9 }
 0x1c3   : > { %v4349_v12 = vpop.eup %4348  ;;  %3014 = vst [vmem:[%s4675_s22 + $0x778] sm:$0xff] %v4347_v11  ;;  %4374 = vtanh.f32 %v2472_v10  ;;  %v3625_v13 = vpop.f32.mrf.mxu0 }
 0x1c4   : > { %v3753_v14 = vpop.f32.mrf.mxu1  ;;  %v4351_v15 = vpop.eup %4350  ;;  %2884 = vst [vmem:[%s4675_s22 + $0x368] sm:$0xff] %v4349_v12  ;;  %4376 = vtanh.f32 %v3625_v13 }
 0x1c5   : > { %v4353_v16 = vpop.eup %4352  ;;  %3012 = vst [vmem:[%s4675_s22 + $0x768] sm:$0xff] %v4351_v15  ;;  %4378 = vtanh.f32 %v3753_v14  ;;  %v1963_v17 = vpop.f32.mrf.mxu0 }
 0x1c6   : > { %v2475_v18 = vpop.f32.mrf.mxu1  ;;  %v4355_v19 = vpop.eup %4354  ;;  %2889 = vst [vmem:[%s4675_s22 + $0x390] sm:$0xff] %v4353_v16  ;;  %4380 = vtanh.f32 %v1963_v17 }
 0x1c7   : > { %v4357_v20 = vpop.eup %4356  ;;  %3017 = vst [vmem:[%s4675_s22 + $0x790] sm:$0xff] %v4355_v19  ;;  %4382 = vtanh.f32 %v2475_v18  ;;  %v3628_v21 = vpop.f32.mrf.mxu0 }
 0x1c8   : > { %v3756_v22 = vpop.f32.mrf.mxu1  ;;  %v4359_v23 = vpop.eup %4358  ;;  %2887 = vst [vmem:[%s4675_s22 + $0x380] sm:$0xff] %v4357_v20  ;;  %4384 = vtanh.f32 %v3628_v21 }
 0x1c9   : > { %v4361_v24 = vpop.eup %4360  ;;  %3015 = vst [vmem:[%s4675_s22 + $0x780] sm:$0xff] %v4359_v23  ;;  %4386 = vtanh.f32 %v3756_v22  ;;  %v1976_v25 = vpop.f32.mrf.mxu0 }
 0x1ca   : > { %v2488_v26 = vpop.f32.mrf.mxu1  ;;  %v4363_v27 = vpop.eup %4362  ;;  %2890 = vst [vmem:[%s4675_s22 + $0x398] sm:$0xff] %v4361_v24  ;;  %4388 = vtanh.f32 %v1976_v25 }
 0x1cb   : > { %v4365_v28 = vpop.eup %4364  ;;  %3018 = vst [vmem:[%s4675_s22 + $0x798] sm:$0xff] %v4363_v27  ;;  %4390 = vtanh.f32 %v2488_v26  ;;  %v3629_v29 = vpop.f32.mrf.mxu0 }
 0x1cc   : > { %v3757_v30 = vpop.f32.mrf.mxu1  ;;  %v4367_v31 = vpop.eup %4366  ;;  %2888 = vst [vmem:[%s4675_s22 + $0x388] sm:$0xff] %v4365_v28  ;;  %4392 = vtanh.f32 %v3629_v29 }
 0x1cd   : > { %v4369_v32 = vpop.eup %4368  ;;  %3016 = vst [vmem:[%s4675_s22 + $0x788] sm:$0xff] %v4367_v31  ;;  %4394 = vtanh.f32 %v3757_v30  ;;  %v1979_v33 = vpop.f32.mrf.mxu0 }
 0x1ce   : > { %v2491_v34 = vpop.f32.mrf.mxu1  ;;  %v4371_v35 = vpop.eup %4370  ;;  %2893 = vst [vmem:[%s4675_s22 + $0x3b0] sm:$0xff] %v4369_v32  ;;  %4396 = vtanh.f32 %v1979_v33 }
 0x1cf   : > { %v4373_v36 = vpop.eup %4372  ;;  %3021 = vst [vmem:[%s4675_s22 + $0x7b0] sm:$0xff] %v4371_v35  ;;  %4398 = vtanh.f32 %v2491_v34  ;;  %v3632_v37 = vpop.f32.mrf.mxu0 }
 0x1d0   : > { %v3760_v38 = vpop.f32.mrf.mxu1  ;;  %v4375_v39 = vpop.eup %4374  ;;  %2891 = vst [vmem:[%s4675_s22 + $0x3a0] sm:$0xff] %v4373_v36  ;;  %4400 = vtanh.f32 %v3632_v37 }
 0x1d1   : > { %v4377_v40 = vpop.eup %4376  ;;  %3019 = vst [vmem:[%s4675_s22 + $0x7a0] sm:$0xff] %v4375_v39  ;;  %4402 = vtanh.f32 %v3760_v38  ;;  %v1992_v41 = vpop.f32.mrf.mxu0 }
 0x1d2   : > { %v2504_v42 = vpop.f32.mrf.mxu1  ;;  %v4379_v43 = vpop.eup %4378  ;;  %2894 = vst [vmem:[%s4675_s22 + $0x3b8] sm:$0xff] %v4377_v40  ;;  %4404 = vtanh.f32 %v1992_v41 }
 0x1d3   : > { %v4381_v44 = vpop.eup %4380  ;;  %3022 = vst [vmem:[%s4675_s22 + $0x7b8] sm:$0xff] %v4379_v43  ;;  %4406 = vtanh.f32 %v2504_v42  ;;  %v3633_v45 = vpop.f32.mrf.mxu0 }
 0x1d4   : > { %v3761_v46 = vpop.f32.mrf.mxu1  ;;  %v4383_v47 = vpop.eup %4382  ;;  %2892 = vst [vmem:[%s4675_s22 + $0x3a8] sm:$0xff] %v4381_v44  ;;  %4408 = vtanh.f32 %v3633_v45 }
 0x1d5   : > { %v4385_v48 = vpop.eup %4384  ;;  %3020 = vst [vmem:[%s4675_s22 + $0x7a8] sm:$0xff] %v4383_v47  ;;  %4410 = vtanh.f32 %v3761_v46  ;;  %v1995_v49 = vpop.f32.mrf.mxu0 }
 0x1d6   : > { %v2507_v50 = vpop.f32.mrf.mxu1  ;;  %v4387_v51 = vpop.eup %4386  ;;  %2897 = vst [vmem:[%s4675_s22 + $0x3d0] sm:$0xff] %v4385_v48  ;;  %4412 = vtanh.f32 %v1995_v49 }
 0x1d7   : > { %v4389_v52 = vpop.eup %4388  ;;  %3025 = vst [vmem:[%s4675_s22 + $0x7d0] sm:$0xff] %v4387_v51  ;;  %4414 = vtanh.f32 %v2507_v50 }
 0x1d8   : > { %v4391_v53 = vpop.eup %4390  ;;  %2895 = vst [vmem:[%s4675_s22 + $0x3c0] sm:$0xff] %v4389_v52 }
 0x1d9   : > { %v4393_v54 = vpop.eup %4392  ;;  %3023 = vst [vmem:[%s4675_s22 + $0x7c0] sm:$0xff] %v4391_v53 }
 0x1da   : > { %v4395_v55 = vpop.eup %4394  ;;  %2898 = vst [vmem:[%s4675_s22 + $0x3d8] sm:$0xff] %v4393_v54 }
 0x1db   : > { %v4397_v56 = vpop.eup %4396  ;;  %3026 = vst [vmem:[%s4675_s22 + $0x7d8] sm:$0xff] %v4395_v55 }
 0x1dc   : > { %v4399_v57 = vpop.eup %4398  ;;  %2896 = vst [vmem:[%s4675_s22 + $0x3c8] sm:$0xff] %v4397_v56 }
 0x1dd   : > { %v4401_v58 = vpop.eup %4400  ;;  %3024 = vst [vmem:[%s4675_s22 + $0x7c8] sm:$0xff] %v4399_v57 }
 0x1de   : > { %v4403_v59 = vpop.eup %4402  ;;  %2901 = vst [vmem:[%s4675_s22 + $0x3f0] sm:$0xff] %v4401_v58 }
 0x1df   : > { %v4405_v60 = vpop.eup %4404  ;;  %3029 = vst [vmem:[%s4675_s22 + $0x7f0] sm:$0xff] %v4403_v59 }
 0x1e0   : > { %v4407_v61 = vpop.eup %4406  ;;  %2899 = vst [vmem:[%s4675_s22 + $0x3e0] sm:$0xff] %v4405_v60 }
 0x1e1   : > { %v4409_v62 = vpop.eup %4408  ;;  %3027 = vst [vmem:[%s4675_s22 + $0x7e0] sm:$0xff] %v4407_v61 }
 0x1e2   : > { %v4411_v63 = vpop.eup %4410  ;;  %2902 = vst [vmem:[%s4675_s22 + $0x3f8] sm:$0xff] %v4409_v62 }
 0x1e3   : > { %v4413_v0 = vpop.eup %4412  ;;  %3030 = vst [vmem:[%s4675_s22 + $0x7f8] sm:$0xff] %v4411_v63 }
 0x1e4   : > { %v4415_v1 = vpop.eup %4414  ;;  %2900 = vst [vmem:[%s4675_s22 + $0x3e8] sm:$0xff] %v4413_v0 }
 0x1e5   : > { %3028 = vst [vmem:[%s4675_s22 + $0x7e8] sm:$0xff] %v4415_v1 }
 0x1e6 PF: > { %s12_s9 = sadd.s32 1, %s4422_s9  }
 0x1e7   : > { %p9_p4 = scmp.ge.s32.totalorder %s12_s9, 6  }
 0x1e9   :  { %11 = sbr.rel (!%p9_p4) target bundleno = 1 (0x1), region = 61 }

</bundles_post_ra>
